<compile_context>
chip_gen: v5e
topology: v5e:2x2
jax: 0.10.0
libtpu: 0.0.40
codegen_flags: <defaults>
</compile_context>

<pallas_src>
import jax
import jax.numpy as jnp
from jax.experimental import pallas as pl
from jax.experimental.pallas import tpu as pltpu

# ----------------------------- model config (small, CaiT structure) -----------------------------
IMG = 64
PATCH = 16
IN_CHANS = 3
DIM = 64
HEADS = 4
HEAD_DIM = DIM // HEADS
DEPTH = 2                 # number of talking-heads SA blocks
DEPTH_TOKEN_ONLY = 2      # number of class-attention blocks
MLP_HIDDEN = DIM * 4
EPS = 1e-6                # timm CaiT uses LayerNorm(eps=1e-6)
INIT_VALUES = 1e-1        # LayerScale init (real model uses 1e-5; 1e-1 keeps outputs non-trivial)
N_PATCH = (IMG // PATCH) ** 2
SCALE = HEAD_DIM ** -0.5
VEC_W = max(MLP_HIDDEN, 3 * DIM)   # lane width of the packed small-weight rows (=256)

# Matmul operand dtype. f32 keeps numerical parity with the f32 PyTorch reference.
# At this size the MXU is idle, so bf16 buys nothing (per review); only consider bf16
# for the real 577-token cait_xxs24_384, keeping LN/softmax/GELU stats in f32.
MM_DTYPE = jnp.float32


# ----------------------------- in-kernel math helpers -----------------------------
def _mm(a, b):
    return jnp.dot(a.astype(MM_DTYPE), b.astype(MM_DTYPE),
                   preferred_element_type=jnp.float32)


def _mm_t(a, b):
    # a @ b.T without materializing a transpose: contract the last dim of both.
    return jax.lax.dot_general(a.astype(MM_DTYPE), b.astype(MM_DTYPE),
                               (((1,), (1,)), ((), ())),
                               preferred_element_type=jnp.float32)


def _layernorm(x, g, b):
    mu = jnp.mean(x, axis=-1, keepdims=True)
    xc = x - mu
    var = jnp.mean(xc * xc, axis=-1, keepdims=True)
    return xc * jax.lax.rsqrt(var + EPS) * g + b


def _gelu(x):
    # exact erf-based GELU (nn.GELU default); erf routes to the EUP slot.
    return 0.5 * x * (1.0 + jax.lax.erf(x * 0.7071067811865476))


def _softmax_rows(x):
    m = jnp.max(x, axis=-1, keepdims=True)
    e = jnp.exp(x - m)
    return e * pl.reciprocal(jnp.sum(e, axis=-1, keepdims=True), approx=True)


# ----------------------------- the single fused kernel -----------------------------
def _cait_fused_kernel(patches_ref, pw_ref, misc_ref,
                       sa_qkv_ref, sa_proj_ref, sa_fc1_ref, sa_fc2_ref,
                       sa_vec_ref, sa_tw_ref, sa_tb_ref,
                       hm_sa_ref, hm_ca_ref,
                       ca_qkv_ref, ca_proj_ref, ca_fc1_ref, ca_fc2_ref, ca_vec_ref,
                       feat_ref, cls_ref):
    H, N, D = HEADS, N_PATCH, DIM
    B = patches_ref.shape[0] // N          # static at trace time

    misc = misc_ref[...].astype(jnp.float32)       # (N+4, D): patch_b, pos, cls, norm_g, norm_b
    hm_sa = hm_sa_ref[...]                         # (H*N, D) block-diag head mask
    hm_ca = hm_ca_ref[...]                         # (H,   D) head mask for class-attn

    def unpack_vec(vec):
        # packed rows (10, VEC_W): LN1 g/b, qkv_b, proj_b, gamma1, LN2 g/b, fc1_b, fc2_b, gamma2
        return (vec[0:1, :D], vec[1:2, :D], vec[2:3, :3 * D], vec[3:4, :D], vec[4:5, :D],
                vec[5:6, :D], vec[6:7, :D], vec[7:8, :MLP_HIDDEN], vec[8:9, :D], vec[9:10, :D])

    # ---------------- patch embed (+bias +pos_embed), whole batch at once ----------------
    x = _mm(patches_ref[...], pw_ref[...])                      # (B*N, D)
    pos = misc[1:1 + N, :]                                      # (N, D)
    x = x + misc[0:1, :] + jnp.concatenate([pos] * B, axis=0)   # pos tiled over batch rows

    # ---------------- talking-heads SA blocks (unrolled, all data stays in VMEM) ----------------
    for l in range(DEPTH):
        wqkv = sa_qkv_ref[l]                                    # (D, 3D)
        wproj = sa_proj_ref[l]                                  # (D, D)
        wfc1 = sa_fc1_ref[l]                                    # (D, 4D)
        wfc2 = sa_fc2_ref[l]                                    # (4D, D)
        (n1g, n1b, qkvb, pb, g1, n2g, n2b, f1b, f2b, g2) = unpack_vec(sa_vec_ref[l])
        tw = sa_tw_ref[l]                                       # (2, H*N, H*N) kron(W, I_N)
        tb = sa_tb_ref[l]                                       # (2, H*N, N)   broadcast biases
        kpre, kpost = tw[0], tw[1]
        bpre, bpost = tb[0], tb[1]

        # LN1 + fused QKV projection on the whole (B*N, D) slab
        xn = _layernorm(x, n1g, n1b)
        qkv = _mm(xn, wqkv) + qkvb                              # (B*N, 3D)
        q = qkv[:, 0:D] * SCALE
        k = qkv[:, D:2 * D]
        v = qkv[:, 2 * D:3 * D]

        # per-batch attention with the block-diagonal-Q trick (all heads in one matmul)
        attn_rows = []
        for b in range(B):
            qb = q[b * N:(b + 1) * N]
            kb = k[b * N:(b + 1) * N]
            vb = v[b * N:(b + 1) * N]
            q_blk = jnp.concatenate([qb] * H, axis=0) * hm_sa    # (H*N, D)
            logits = _mm_t(q_blk, kb)                            # (H*N, N)
            mixed = _mm(kpre, logits) + bpre                     # talking-heads pre-softmax mix
            probs = _softmax_rows(mixed)
            pm = _mm(kpost, probs) + bpost                       # talking-heads post-softmax mix
            o_big = _mm(pm, vb) * hm_sa                          # (H*N, D), head h in its own lanes
            ab = o_big[0:N]
            for h in range(1, H):                                # fold heads (static sublane slices)
                ab = ab + o_big[h * N:(h + 1) * N]
            attn_rows.append(ab)
        attn = jnp.concatenate(attn_rows, axis=0)                # (B*N, D)

        # proj + LayerScale + residual, then MLP + LayerScale + residual
        x = x + g1 * (_mm(attn, wproj) + pb)
        xn2 = _layernorm(x, n2g, n2b)
        h1 = _gelu(_mm(xn2, wfc1) + f1b)
        x = x + g2 * (_mm(h1, wfc2) + f2b)

    # ---------------- class-attention blocks (cls attends over [cls, x]) ----------------
    cls = jnp.concatenate([misc[N + 1:N + 2, :]] * B, axis=0)    # (B, D) cls_token per batch

    for l in range(DEPTH_TOKEN_ONLY):
        wqkv = ca_qkv_ref[l]                                     # (D, 3D) = [q | k | v]
        wproj = ca_proj_ref[l]
        wfc1 = ca_fc1_ref[l]
        wfc2 = ca_fc2_ref[l]
        (n1g, n1b, qkvb, pb, g1, n2g, n2b, f1b, f2b, g2) = unpack_vec(ca_vec_ref[l])

        # LN1 on patch rows (whole batch) and cls rows; fused projections
        xn = _layernorm(x, n1g, n1b)                             # (B*N, D)
        x_kv = _mm(xn, wqkv[:, D:]) + qkvb[:, D:]                # (B*N, 2D) = [k | v] of patches
        cn = _layernorm(cls, n1g, n1b)                           # (B, D)
        c_qkv = _mm(cn, wqkv) + qkvb                             # (B, 3D)  = [q | k | v] of cls

        attn_rows = []
        for b in range(B):
            qc = c_qkv[b:b + 1, 0:D] * SCALE                     # (1, D)
            kc = c_qkv[b:b + 1, D:2 * D]
            vc = c_qkv[b:b + 1, 2 * D:3 * D]
            kx = x_kv[b * N:(b + 1) * N, 0:D]                    # (N, D)
            vx = x_kv[b * N:(b + 1) * N, D:2 * D]
            q_blk = jnp.concatenate([qc] * H, axis=0) * hm_ca    # (H, D)
            lx = _mm_t(q_blk, kx)                                # (H, N)  logits vs patch keys
            lc = _mm_t(q_blk, kc)                                # (H, 1)  logit  vs cls key
            # two-term softmax over the [cls ; patches] key set
            m = jnp.maximum(jnp.max(lx, axis=-1, keepdims=True), lc)
            ex = jnp.exp(lx - m)
            ec = jnp.exp(lc - m)
            denom = jnp.sum(ex, axis=-1, keepdims=True) + ec
            num = _mm(ex, vx) + ec * vc                          # (H, D)
            o_big = num * pl.reciprocal(denom, approx=True) * hm_ca
            attn_rows.append(jnp.sum(o_big, axis=0, keepdims=True))   # (1, D)
        attn = jnp.concatenate(attn_rows, axis=0)                # (B, D)

        cls = cls + g1 * (_mm(attn, wproj) + pb)
        cn2 = _layernorm(cls, n2g, n2b)
        h1 = _gelu(_mm(cn2, wfc1) + f1b)
        cls = cls + g2 * (_mm(h1, wfc2) + f2b)

    # ---------------- final LayerNorm (applied per-row to both cls and patch rows) ----------------
    fg = misc[N + 2:N + 3, :]
    fb = misc[N + 3:N + 4, :]
    feat_ref[...] = _layernorm(x, fg, fb).astype(feat_ref.dtype)
    cls_ref[...] = _layernorm(cls, fg, fb).astype(cls_ref.dtype)


# ----------------------------- wrapper -----------------------------
def cait_forward(params, x):
    """x: NCHW (B, 3, IMG, IMG) -> (feat (B, N, D), cls_token (B, D))"""
    B = x.shape[0]
    nh = IMG // PATCH
    # Conv2d(k=16, s=16) == non-overlapping unfold + matmul; the unfold is pure data layout
    # (done here in XLA), the matmul happens inside the fused kernel.
    patches = x.reshape(B, IN_CHANS, nh, PATCH, nh, PATCH)
    patches = patches.transpose(0, 2, 4, 1, 3, 5).reshape(B * N_PATCH, IN_CHANS * PATCH * PATCH)

    ops = (patches, params["patch_w_t"], params["misc_vec"],
           params["sa_qkv_w"], params["sa_proj_w"], params["sa_fc1_w"], params["sa_fc2_w"],
           params["sa_vec"], params["sa_talk_w"], params["sa_talk_b"],
           params["head_mask_sa"], params["head_mask_ca"],
           params["ca_qkv_w"], params["ca_proj_w"], params["ca_fc1_w"], params["ca_fc2_w"],
           params["ca_vec"])

    def whole(a):
        # whole-array block, resident in VMEM for the single grid step
        nd = a.ndim
        return pl.BlockSpec(a.shape, lambda i, _nd=nd: (0,) * _nd)

    feat_flat, cls_flat = pl.pallas_call(
        _cait_fused_kernel,
        grid=(1,),
        in_specs=[whole(a) for a in ops],
        out_specs=(pl.BlockSpec((B * N_PATCH, DIM), lambda i: (0, 0)),
                   pl.BlockSpec((B, DIM), lambda i: (0, 0))),
        out_shape=(jax.ShapeDtypeStruct((B * N_PATCH, DIM), jnp.float32),
                   jax.ShapeDtypeStruct((B, DIM), jnp.float32)),
        compiler_params=pltpu.CompilerParams(dimension_semantics=("arbitrary",)),
    )(*ops)
    # pos_drop / attn_drop / proj_drop / drop_path are identity (drop rates are 0)
    return feat_flat.reshape(B, N_PATCH, DIM), cls_flat


# ----------------------------- deterministic synthetic parameters -----------------------------
def init_params(key):
    counter = [0]

    def nrm(shape, std=0.02):
        counter[0] += 1
        return std * jax.random.normal(jax.random.fold_in(key, counter[0]), shape, jnp.float32)

    def ones(shape):
        return jnp.ones(shape, jnp.float32)

    def zeros(shape):
        return jnp.zeros(shape, jnp.float32)

    # ---- raw (per-block) weights, same deterministic scheme as before ----
    patch_w = nrm((DIM, IN_CHANS, PATCH, PATCH))   # conv weight, PyTorch OIHW
    patch_b = nrm((DIM,))
    pos_embed = nrm((1, N_PATCH, DIM))
    cls_token = nrm((1, 1, DIM))
    norm_g = ones((DIM,))
    norm_b = zeros((DIM,))

    sa_blocks = []
    for _ in range(DEPTH):
        sa_blocks.append(dict(
            norm1_g=ones((DIM,)), norm1_b=zeros((DIM,)),
            qkv_w=nrm((DIM, 3 * DIM)), qkv_b=nrm((3 * DIM,)),
            talk_pre_w=nrm((HEADS, HEADS), std=0.2), talk_pre_b=nrm((HEADS,)),
            talk_post_w=nrm((HEADS, HEADS), std=0.2), talk_post_b=nrm((HEADS,)),
            attn_proj_w=nrm((DIM, DIM)), attn_proj_b=nrm((DIM,)),
            gamma_1=jnp.full((DIM,), INIT_VALUES, jnp.float32),
            norm2_g=ones((DIM,)), norm2_b=zeros((DIM,)),
            fc1_w=nrm((DIM, MLP_HIDDEN)), fc1_b=nrm((MLP_HIDDEN,)),
            fc2_w=nrm((MLP_HIDDEN, DIM)), fc2_b=nrm((DIM,)),
            gamma_2=jnp.full((DIM,), INIT_VALUES, jnp.float32),
        ))

    ca_blocks = []
    for _ in range(DEPTH_TOKEN_ONLY):
        ca_blocks.append(dict(
            norm1_g=ones((DIM,)), norm1_b=zeros((DIM,)),
            q_w=nrm((DIM, DIM)), q_b=nrm((DIM,)),
            k_w=nrm((DIM, DIM)), k_b=nrm((DIM,)),
            v_w=nrm((DIM, DIM)), v_b=nrm((DIM,)),
            attn_proj_w=nrm((DIM, DIM)), attn_proj_b=nrm((DIM,)),
            gamma_1=jnp.full((DIM,), INIT_VALUES, jnp.float32),
            norm2_g=ones((DIM,)), norm2_b=zeros((DIM,)),
            fc1_w=nrm((DIM, MLP_HIDDEN)), fc1_b=nrm((MLP_HIDDEN,)),
            fc2_w=nrm((MLP_HIDDEN, DIM)), fc2_b=nrm((DIM,)),
            gamma_2=jnp.full((DIM,), INIT_VALUES, jnp.float32),
        ))

    # ---- one-time (outside-jit) packing: stacked big weights, packed small vectors,
    #      precomputed kron(W_talk, I_N) mixes and head masks ----
    def row(v):
        return jnp.pad(v, (0, VEC_W - v.shape[0]))[None, :]

    def pack_vec(b, qkv_bias):
        return jnp.concatenate([
            row(b["norm1_g"]), row(b["norm1_b"]), row(qkv_bias),
            row(b["attn_proj_b"]), row(b["gamma_1"]),
            row(b["norm2_g"]), row(b["norm2_b"]), row(b["fc1_b"]),
            row(b["fc2_b"]), row(b["gamma_2"])], axis=0)          # (10, VEC_W)

    eye_n = jnp.eye(N_PATCH, dtype=jnp.float32)

    misc_vec = jnp.concatenate([
        patch_b[None, :], pos_embed[0], cls_token.reshape(1, DIM),
        norm_g[None, :], norm_b[None, :]], axis=0)                # (N_PATCH + 4, DIM)

    sa_talk_w = jnp.stack([jnp.stack([jnp.kron(b["talk_pre_w"], eye_n),
                                      jnp.kron(b["talk_post_w"], eye_n)]) for b in sa_blocks])
    sa_talk_b = jnp.stack([jnp.stack([
        jnp.broadcast_to(jnp.repeat(b["talk_pre_b"], N_PATCH)[:, None],
                         (HEADS * N_PATCH, N_PATCH)),
        jnp.broadcast_to(jnp.repeat(b["talk_post_b"], N_PATCH)[:, None],
                         (HEADS * N_PATCH, N_PATCH))]) for b in sa_blocks])

    row_head = jnp.arange(HEADS * N_PATCH)[:, None] // N_PATCH
    col_head = jnp.arange(DIM)[None, :] // HEAD_DIM
    head_mask_sa = (row_head == col_head).astype(jnp.float32)                 # (H*N, D)
    head_mask_ca = (jnp.arange(HEADS)[:, None] == col_head).astype(jnp.float32)  # (H, D)

    return {
        "patch_w_t": patch_w.reshape(DIM, IN_CHANS * PATCH * PATCH).T,
        "misc_vec": misc_vec,
        "sa_qkv_w": jnp.stack([b["qkv_w"] for b in sa_blocks]),
        "sa_proj_w": jnp.stack([b["attn_proj_w"] for b in sa_blocks]),
        "sa_fc1_w": jnp.stack([b["fc1_w"] for b in sa_blocks]),
        "sa_fc2_w": jnp.stack([b["fc2_w"] for b in sa_blocks]),
        "sa_vec": jnp.stack([pack_vec(b, b["qkv_b"]) for b in sa_blocks]),
        "sa_talk_w": sa_talk_w,
        "sa_talk_b": sa_talk_b,
        "head_mask_sa": head_mask_sa,
        "head_mask_ca": head_mask_ca,
        "ca_qkv_w": jnp.stack([jnp.concatenate([b["q_w"], b["k_w"], b["v_w"]], axis=1)
                               for b in ca_blocks]),
        "ca_proj_w": jnp.stack([b["attn_proj_w"] for b in ca_blocks]),
        "ca_fc1_w": jnp.stack([b["fc1_w"] for b in ca_blocks]),
        "ca_fc2_w": jnp.stack([b["fc2_w"] for b in ca_blocks]),
        "ca_vec": jnp.stack([pack_vec(b, jnp.concatenate([b["q_b"], b["k_b"], b["v_b"]]))
                             for b in ca_blocks]),
    }


# ----------------------------- main -----------------------------
if __name__ == "__main__":
    key = jax.random.PRNGKey(0)
    params = init_params(jax.random.fold_in(key, 1))
    x = jax.random.normal(jax.random.fold_in(key, 2), (2, IN_CHANS, IMG, IMG), jnp.float32)

    fwd = jax.jit(cait_forward)
    feat, cls_token = fwd(params, x)
    jax.block_until_ready((feat, cls_token))

    assert feat.shape == (2, N_PATCH, DIM), feat.shape
    assert cls_token.shape == (2, DIM), cls_token.shape
    assert bool(jnp.all(jnp.isfinite(feat))) and bool(jnp.all(jnp.isfinite(cls_token)))
    print("KERNEL_OK")
</pallas_src>

<mosaic_0001>
module attributes {stable_mosaic.version = 11 : i64} {
  func.func @_cait_fused_kernel(%arg0: i32, %arg1: memref<32x768xf32, #tpu.memory_space<vmem>>, %arg2: memref<768x64xf32, #tpu.memory_space<vmem>>, %arg3: memref<20x64xf32, #tpu.memory_space<vmem>>, %arg4: memref<2x64x192xf32, #tpu.memory_space<vmem>>, %arg5: memref<2x64x64xf32, #tpu.memory_space<vmem>>, %arg6: memref<2x64x256xf32, #tpu.memory_space<vmem>>, %arg7: memref<2x256x64xf32, #tpu.memory_space<vmem>>, %arg8: memref<2x10x256xf32, #tpu.memory_space<vmem>>, %arg9: memref<2x2x64x64xf32, #tpu.memory_space<vmem>>, %arg10: memref<2x2x64x16xf32, #tpu.memory_space<vmem>>, %arg11: memref<64x64xf32, #tpu.memory_space<vmem>>, %arg12: memref<4x64xf32, #tpu.memory_space<vmem>>, %arg13: memref<2x64x192xf32, #tpu.memory_space<vmem>>, %arg14: memref<2x64x64xf32, #tpu.memory_space<vmem>>, %arg15: memref<2x64x256xf32, #tpu.memory_space<vmem>>, %arg16: memref<2x256x64xf32, #tpu.memory_space<vmem>>, %arg17: memref<2x10x256xf32, #tpu.memory_space<vmem>>, %arg18: memref<32x64xf32, #tpu.memory_space<vmem>>, %arg19: memref<2x64xf32, #tpu.memory_space<vmem>>) attributes {dimension_semantics = [#tpu.dimension_semantics<arbitrary>], iteration_bounds = array<i64: 1>, scalar_prefetch = 0 : i64, scratch_operands = 0 : i64, tpu.core_type = #tpu.core_type<tc>, window_params = [{pipeline_mode = #tpu.pipeline_mode<synchronous>, transform_indices = @transform_0, window_bounds = array<i64: 32, 768>}, {pipeline_mode = #tpu.pipeline_mode<synchronous>, transform_indices = @transform_1, window_bounds = array<i64: 768, 64>}, {pipeline_mode = #tpu.pipeline_mode<synchronous>, transform_indices = @transform_2, window_bounds = array<i64: 20, 64>}, {pipeline_mode = #tpu.pipeline_mode<synchronous>, transform_indices = @transform_3, window_bounds = array<i64: 2, 64, 192>}, {pipeline_mode = #tpu.pipeline_mode<synchronous>, transform_indices = @transform_4, window_bounds = array<i64: 2, 64, 64>}, {pipeline_mode = #tpu.pipeline_mode<synchronous>, transform_indices = @transform_5, window_bounds = array<i64: 2, 64, 256>}, {pipeline_mode = #tpu.pipeline_mode<synchronous>, transform_indices = @transform_6, window_bounds = array<i64: 2, 256, 64>}, {pipeline_mode = #tpu.pipeline_mode<synchronous>, transform_indices = @transform_7, window_bounds = array<i64: 2, 10, 256>}, {pipeline_mode = #tpu.pipeline_mode<synchronous>, transform_indices = @transform_8, window_bounds = array<i64: 2, 2, 64, 64>}, {pipeline_mode = #tpu.pipeline_mode<synchronous>, transform_indices = @transform_9, window_bounds = array<i64: 2, 2, 64, 16>}, {pipeline_mode = #tpu.pipeline_mode<synchronous>, transform_indices = @transform_10, window_bounds = array<i64: 64, 64>}, {pipeline_mode = #tpu.pipeline_mode<synchronous>, transform_indices = @transform_11, window_bounds = array<i64: 4, 64>}, {pipeline_mode = #tpu.pipeline_mode<synchronous>, transform_indices = @transform_12, window_bounds = array<i64: 2, 64, 192>}, {pipeline_mode = #tpu.pipeline_mode<synchronous>, transform_indices = @transform_13, window_bounds = array<i64: 2, 64, 64>}, {pipeline_mode = #tpu.pipeline_mode<synchronous>, transform_indices = @transform_14, window_bounds = array<i64: 2, 64, 256>}, {pipeline_mode = #tpu.pipeline_mode<synchronous>, transform_indices = @transform_15, window_bounds = array<i64: 2, 256, 64>}, {pipeline_mode = #tpu.pipeline_mode<synchronous>, transform_indices = @transform_16, window_bounds = array<i64: 2, 10, 256>}, {pipeline_mode = #tpu.pipeline_mode<synchronous>, transform_indices = @transform_17, window_bounds = array<i64: 32, 64>}, {pipeline_mode = #tpu.pipeline_mode<synchronous>, transform_indices = @transform_18, window_bounds = array<i64: 2, 64>}]} {
    %c0 = arith.constant 0 : index
    %c0_0 = arith.constant 0 : index
    %0 = vector.load %arg3[%c0, %c0_0] : memref<20x64xf32, #tpu.memory_space<vmem>>, vector<20x64xf32>
    %c0_1 = arith.constant 0 : index
    %c0_2 = arith.constant 0 : index
    %1 = vector.load %arg11[%c0_1, %c0_2] : memref<64x64xf32, #tpu.memory_space<vmem>>, vector<64x64xf32>
    %c0_3 = arith.constant 0 : index
    %c0_4 = arith.constant 0 : index
    %2 = vector.load %arg12[%c0_3, %c0_4] : memref<4x64xf32, #tpu.memory_space<vmem>>, vector<4x64xf32>
    %c0_5 = arith.constant 0 : index
    %c0_6 = arith.constant 0 : index
    %3 = vector.load %arg1[%c0_5, %c0_6] : memref<32x768xf32, #tpu.memory_space<vmem>>, vector<32x768xf32>
    %c0_7 = arith.constant 0 : index
    %c0_8 = arith.constant 0 : index
    %4 = vector.load %arg2[%c0_7, %c0_8] : memref<768x64xf32, #tpu.memory_space<vmem>>, vector<768x64xf32>
    %cst = arith.constant dense<0.000000e+00> : vector<32x64xf32>
    %5 = tpu.matmul %3, %4, %cst {dimension_numbers = #tpu.dot_dimension_numbers<[1], [0], [0], [1], [0, 0, 1, 1], [], []>} : vector<32x768xf32>, vector<768x64xf32>, vector<32x64xf32> -> vector<32x64xf32>
    %6 = vector.extract_strided_slice %0 {offsets = [1, 0], sizes = [16, 64], strides = [1, 1]} : vector<20x64xf32> to vector<16x64xf32>
    %7 = vector.extract_strided_slice %0 {offsets = [0, 0], sizes = [1, 64], strides = [1, 1]} : vector<20x64xf32> to vector<1x64xf32>
    %8 = vector.broadcast %7 : vector<1x64xf32> to vector<32x64xf32>
    %9 = arith.addf %5, %8 : vector<32x64xf32>
    %10 = tpu.concatenate %6, %6 in 0 : vector<16x64xf32>, vector<16x64xf32> -> vector<32x64xf32>
    %11 = arith.addf %9, %10 : vector<32x64xf32>
    %c0_9 = arith.constant 0 : index
    %c0_10 = arith.constant 0 : index
    %c0_11 = arith.constant 0 : index
    %12 = vector.load %arg4[%c0_9, %c0_10, %c0_11] : memref<2x64x192xf32, #tpu.memory_space<vmem>>, vector<1x64x192xf32>
    %13 = vector.shape_cast %12 : vector<1x64x192xf32> to vector<64x192xf32>
    %c0_12 = arith.constant 0 : index
    %c0_13 = arith.constant 0 : index
    %c0_14 = arith.constant 0 : index
    %14 = vector.load %arg5[%c0_12, %c0_13, %c0_14] : memref<2x64x64xf32, #tpu.memory_space<vmem>>, vector<1x64x64xf32>
    %15 = vector.shape_cast %14 : vector<1x64x64xf32> to vector<64x64xf32>
    %c0_15 = arith.constant 0 : index
    %c0_16 = arith.constant 0 : index
    %c0_17 = arith.constant 0 : index
    %16 = vector.load %arg6[%c0_15, %c0_16, %c0_17] : memref<2x64x256xf32, #tpu.memory_space<vmem>>, vector<1x64x256xf32>
    %17 = vector.shape_cast %16 : vector<1x64x256xf32> to vector<64x256xf32>
    %c0_18 = arith.constant 0 : index
    %c0_19 = arith.constant 0 : index
    %c0_20 = arith.constant 0 : index
    %18 = vector.load %arg7[%c0_18, %c0_19, %c0_20] : memref<2x256x64xf32, #tpu.memory_space<vmem>>, vector<1x256x64xf32>
    %19 = vector.shape_cast %18 : vector<1x256x64xf32> to vector<256x64xf32>
    %c0_21 = arith.constant 0 : index
    %c0_22 = arith.constant 0 : index
    %c0_23 = arith.constant 0 : index
    %20 = vector.load %arg8[%c0_21, %c0_22, %c0_23] : memref<2x10x256xf32, #tpu.memory_space<vmem>>, vector<1x10x256xf32>
    %21 = vector.shape_cast %20 : vector<1x10x256xf32> to vector<10x256xf32>
    %22 = vector.extract_strided_slice %21 {offsets = [0, 0], sizes = [1, 64], strides = [1, 1]} : vector<10x256xf32> to vector<1x64xf32>
    %23 = vector.extract_strided_slice %21 {offsets = [1, 0], sizes = [1, 64], strides = [1, 1]} : vector<10x256xf32> to vector<1x64xf32>
    %24 = vector.extract_strided_slice %21 {offsets = [2, 0], sizes = [1, 192], strides = [1, 1]} : vector<10x256xf32> to vector<1x192xf32>
    %25 = vector.extract_strided_slice %21 {offsets = [3, 0], sizes = [1, 64], strides = [1, 1]} : vector<10x256xf32> to vector<1x64xf32>
    %26 = vector.extract_strided_slice %21 {offsets = [4, 0], sizes = [1, 64], strides = [1, 1]} : vector<10x256xf32> to vector<1x64xf32>
    %27 = vector.extract_strided_slice %21 {offsets = [5, 0], sizes = [1, 64], strides = [1, 1]} : vector<10x256xf32> to vector<1x64xf32>
    %28 = vector.extract_strided_slice %21 {offsets = [6, 0], sizes = [1, 64], strides = [1, 1]} : vector<10x256xf32> to vector<1x64xf32>
    %29 = vector.extract_strided_slice %21 {offsets = [7, 0], sizes = [1, 256], strides = [1, 1]} : vector<10x256xf32> to vector<1x256xf32>
    %30 = vector.extract_strided_slice %21 {offsets = [8, 0], sizes = [1, 64], strides = [1, 1]} : vector<10x256xf32> to vector<1x64xf32>
    %31 = vector.extract_strided_slice %21 {offsets = [9, 0], sizes = [1, 64], strides = [1, 1]} : vector<10x256xf32> to vector<1x64xf32>
    %c0_24 = arith.constant 0 : index
    %c0_25 = arith.constant 0 : index
    %c0_26 = arith.constant 0 : index
    %c0_27 = arith.constant 0 : index
    %32 = vector.load %arg9[%c0_24, %c0_25, %c0_26, %c0_27] : memref<2x2x64x64xf32, #tpu.memory_space<vmem>>, vector<1x2x64x64xf32>
    %33 = vector.shape_cast %32 : vector<1x2x64x64xf32> to vector<2x64x64xf32>
    %c0_28 = arith.constant 0 : index
    %c0_29 = arith.constant 0 : index
    %c0_30 = arith.constant 0 : index
    %c0_31 = arith.constant 0 : index
    %34 = vector.load %arg10[%c0_28, %c0_29, %c0_30, %c0_31] : memref<2x2x64x16xf32, #tpu.memory_space<vmem>>, vector<1x2x64x16xf32>
    %35 = vector.shape_cast %34 : vector<1x2x64x16xf32> to vector<2x64x16xf32>
    %36 = vector.extract_strided_slice %33 {offsets = [0, 0, 0], sizes = [1, 64, 64], strides = [1, 1, 1]} : vector<2x64x64xf32> to vector<1x64x64xf32>
    %37 = vector.shape_cast %36 : vector<1x64x64xf32> to vector<64x64xf32>
    %38 = vector.extract_strided_slice %33 {offsets = [1, 0, 0], sizes = [1, 64, 64], strides = [1, 1, 1]} : vector<2x64x64xf32> to vector<1x64x64xf32>
    %39 = vector.shape_cast %38 : vector<1x64x64xf32> to vector<64x64xf32>
    %40 = vector.extract_strided_slice %35 {offsets = [0, 0, 0], sizes = [1, 64, 16], strides = [1, 1, 1]} : vector<2x64x16xf32> to vector<1x64x16xf32>
    %41 = vector.shape_cast %40 : vector<1x64x16xf32> to vector<64x16xf32>
    %42 = vector.extract_strided_slice %35 {offsets = [1, 0, 0], sizes = [1, 64, 16], strides = [1, 1, 1]} : vector<2x64x16xf32> to vector<1x64x16xf32>
    %43 = vector.shape_cast %42 : vector<1x64x16xf32> to vector<64x16xf32>
    %cst_32 = arith.constant dense<0.000000e+00> : vector<32xf32>
    %44 = vector.multi_reduction <add>, %11, %cst_32 [1] : vector<32x64xf32> to vector<32xf32>
    %45 = vector.shape_cast %44 : vector<32xf32> to vector<32x1xf32>
    %cst_33 = arith.constant 6.400000e+01 : f32
    %46 = vector.broadcast %cst_33 : f32 to vector<32x1xf32>
    %47 = arith.divf %45, %46 : vector<32x1xf32>
    %48 = vector.broadcast %47 : vector<32x1xf32> to vector<32x64xf32>
    %49 = arith.subf %11, %48 : vector<32x64xf32>
    %50 = arith.mulf %49, %49 : vector<32x64xf32>
    %cst_34 = arith.constant dense<0.000000e+00> : vector<32xf32>
    %51 = vector.multi_reduction <add>, %50, %cst_34 [1] : vector<32x64xf32> to vector<32xf32>
    %52 = vector.shape_cast %51 : vector<32xf32> to vector<32x1xf32>
    %cst_35 = arith.constant 6.400000e+01 : f32
    %53 = vector.broadcast %cst_35 : f32 to vector<32x1xf32>
    %54 = arith.divf %52, %53 : vector<32x1xf32>
    %cst_36 = arith.constant 9.99999997E-7 : f32
    %55 = vector.broadcast %cst_36 : f32 to vector<32x1xf32>
    %56 = arith.addf %54, %55 : vector<32x1xf32>
    %57 = math.rsqrt %56 : vector<32x1xf32>
    %58 = vector.broadcast %57 : vector<32x1xf32> to vector<32x64xf32>
    %59 = arith.mulf %49, %58 : vector<32x64xf32>
    %60 = vector.broadcast %22 : vector<1x64xf32> to vector<32x64xf32>
    %61 = arith.mulf %59, %60 : vector<32x64xf32>
    %62 = vector.broadcast %23 : vector<1x64xf32> to vector<32x64xf32>
    %63 = arith.addf %61, %62 : vector<32x64xf32>
    %cst_37 = arith.constant dense<0.000000e+00> : vector<32x192xf32>
    %64 = tpu.matmul %63, %13, %cst_37 {dimension_numbers = #tpu.dot_dimension_numbers<[1], [0], [0], [1], [0, 0, 1, 1], [], []>} : vector<32x64xf32>, vector<64x192xf32>, vector<32x192xf32> -> vector<32x192xf32>
    %65 = vector.broadcast %24 : vector<1x192xf32> to vector<32x192xf32>
    %66 = arith.addf %64, %65 : vector<32x192xf32>
    %67 = vector.extract_strided_slice %66 {offsets = [0, 0], sizes = [32, 64], strides = [1, 1]} : vector<32x192xf32> to vector<32x64xf32>
    %cst_38 = arith.constant 2.500000e-01 : f32
    %68 = vector.broadcast %cst_38 : f32 to vector<32x64xf32>
    %69 = arith.mulf %67, %68 : vector<32x64xf32>
    %70 = vector.extract_strided_slice %66 {offsets = [0, 64], sizes = [32, 64], strides = [1, 1]} : vector<32x192xf32> to vector<32x64xf32>
    %71 = vector.extract_strided_slice %66 {offsets = [0, 128], sizes = [32, 64], strides = [1, 1]} : vector<32x192xf32> to vector<32x64xf32>
    %72 = vector.extract_strided_slice %69 {offsets = [0, 0], sizes = [16, 64], strides = [1, 1]} : vector<32x64xf32> to vector<16x64xf32>
    %73 = vector.extract_strided_slice %70 {offsets = [0, 0], sizes = [16, 64], strides = [1, 1]} : vector<32x64xf32> to vector<16x64xf32>
    %74 = vector.extract_strided_slice %71 {offsets = [0, 0], sizes = [16, 64], strides = [1, 1]} : vector<32x64xf32> to vector<16x64xf32>
    %75 = tpu.concatenate %72, %72, %72, %72 in 0 : vector<16x64xf32>, vector<16x64xf32>, vector<16x64xf32>, vector<16x64xf32> -> vector<64x64xf32>
    %76 = arith.mulf %75, %1 : vector<64x64xf32>
    %cst_39 = arith.constant dense<0.000000e+00> : vector<64x16xf32>
    %77 = tpu.matmul %76, %73, %cst_39 {dimension_numbers = #tpu.dot_dimension_numbers<[1], [1], [0], [0], [0, 0, 1, 0], [], []>} : vector<64x64xf32>, vector<16x64xf32>, vector<64x16xf32> -> vector<64x16xf32>
    %cst_40 = arith.constant dense<0.000000e+00> : vector<64x16xf32>
    %78 = tpu.matmul %37, %77, %cst_40 {dimension_numbers = #tpu.dot_dimension_numbers<[1], [0], [0], [1], [0, 0, 1, 1], [], []>} : vector<64x64xf32>, vector<64x16xf32>, vector<64x16xf32> -> vector<64x16xf32>
    %79 = arith.addf %78, %41 : vector<64x16xf32>
    %cst_41 = arith.constant dense<0xFF800000> : vector<64xf32>
    %80 = vector.multi_reduction <maximumf>, %79, %cst_41 [1] : vector<64x16xf32> to vector<64xf32>
    %81 = vector.shape_cast %80 : vector<64xf32> to vector<64x1xf32>
    %82 = vector.broadcast %81 : vector<64x1xf32> to vector<64x16xf32>
    %83 = arith.subf %79, %82 : vector<64x16xf32>
    %84 = math.exp %83 : vector<64x16xf32>
    %cst_42 = arith.constant dense<0.000000e+00> : vector<64xf32>
    %85 = vector.multi_reduction <add>, %84, %cst_42 [1] : vector<64x16xf32> to vector<64xf32>
    %86 = vector.shape_cast %85 : vector<64xf32> to vector<64x1xf32>
    %87 = tpu.reciprocal %86 {approx = true} : vector<64x1xf32> -> vector<64x1xf32>
    %88 = vector.broadcast %87 : vector<64x1xf32> to vector<64x16xf32>
    %89 = arith.mulf %84, %88 : vector<64x16xf32>
    %cst_43 = arith.constant dense<0.000000e+00> : vector<64x16xf32>
    %90 = tpu.matmul %39, %89, %cst_43 {dimension_numbers = #tpu.dot_dimension_numbers<[1], [0], [0], [1], [0, 0, 1, 1], [], []>} : vector<64x64xf32>, vector<64x16xf32>, vector<64x16xf32> -> vector<64x16xf32>
    %91 = arith.addf %90, %43 : vector<64x16xf32>
    %cst_44 = arith.constant dense<0.000000e+00> : vector<64x64xf32>
    %92 = tpu.matmul %91, %74, %cst_44 {dimension_numbers = #tpu.dot_dimension_numbers<[1], [0], [0], [1], [0, 0, 1, 1], [], []>} : vector<64x16xf32>, vector<16x64xf32>, vector<64x64xf32> -> vector<64x64xf32>
    %93 = arith.mulf %92, %1 : vector<64x64xf32>
    %94 = vector.extract_strided_slice %93 {offsets = [0, 0], sizes = [16, 64], strides = [1, 1]} : vector<64x64xf32> to vector<16x64xf32>
    %95 = vector.extract_strided_slice %93 {offsets = [16, 0], sizes = [16, 64], strides = [1, 1]} : vector<64x64xf32> to vector<16x64xf32>
    %96 = arith.addf %94, %95 : vector<16x64xf32>
    %97 = vector.extract_strided_slice %93 {offsets = [32, 0], sizes = [16, 64], strides = [1, 1]} : vector<64x64xf32> to vector<16x64xf32>
    %98 = arith.addf %96, %97 : vector<16x64xf32>
    %99 = vector.extract_strided_slice %93 {offsets = [48, 0], sizes = [16, 64], strides = [1, 1]} : vector<64x64xf32> to vector<16x64xf32>
    %100 = arith.addf %98, %99 : vector<16x64xf32>
    %101 = vector.extract_strided_slice %69 {offsets = [16, 0], sizes = [16, 64], strides = [1, 1]} : vector<32x64xf32> to vector<16x64xf32>
    %102 = vector.extract_strided_slice %70 {offsets = [16, 0], sizes = [16, 64], strides = [1, 1]} : vector<32x64xf32> to vector<16x64xf32>
    %103 = vector.extract_strided_slice %71 {offsets = [16, 0], sizes = [16, 64], strides = [1, 1]} : vector<32x64xf32> to vector<16x64xf32>
    %104 = tpu.concatenate %101, %101, %101, %101 in 0 : vector<16x64xf32>, vector<16x64xf32>, vector<16x64xf32>, vector<16x64xf32> -> vector<64x64xf32>
    %105 = arith.mulf %104, %1 : vector<64x64xf32>
    %cst_45 = arith.constant dense<0.000000e+00> : vector<64x16xf32>
    %106 = tpu.matmul %105, %102, %cst_45 {dimension_numbers = #tpu.dot_dimension_numbers<[1], [1], [0], [0], [0, 0, 1, 0], [], []>} : vector<64x64xf32>, vector<16x64xf32>, vector<64x16xf32> -> vector<64x16xf32>
    %cst_46 = arith.constant dense<0.000000e+00> : vector<64x16xf32>
    %107 = tpu.matmul %37, %106, %cst_46 {dimension_numbers = #tpu.dot_dimension_numbers<[1], [0], [0], [1], [0, 0, 1, 1], [], []>} : vector<64x64xf32>, vector<64x16xf32>, vector<64x16xf32> -> vector<64x16xf32>
    %108 = arith.addf %107, %41 : vector<64x16xf32>
    %cst_47 = arith.constant dense<0xFF800000> : vector<64xf32>
    %109 = vector.multi_reduction <maximumf>, %108, %cst_47 [1] : vector<64x16xf32> to vector<64xf32>
    %110 = vector.shape_cast %109 : vector<64xf32> to vector<64x1xf32>
    %111 = vector.broadcast %110 : vector<64x1xf32> to vector<64x16xf32>
    %112 = arith.subf %108, %111 : vector<64x16xf32>
    %113 = math.exp %112 : vector<64x16xf32>
    %cst_48 = arith.constant dense<0.000000e+00> : vector<64xf32>
    %114 = vector.multi_reduction <add>, %113, %cst_48 [1] : vector<64x16xf32> to vector<64xf32>
    %115 = vector.shape_cast %114 : vector<64xf32> to vector<64x1xf32>
    %116 = tpu.reciprocal %115 {approx = true} : vector<64x1xf32> -> vector<64x1xf32>
    %117 = vector.broadcast %116 : vector<64x1xf32> to vector<64x16xf32>
    %118 = arith.mulf %113, %117 : vector<64x16xf32>
    %cst_49 = arith.constant dense<0.000000e+00> : vector<64x16xf32>
    %119 = tpu.matmul %39, %118, %cst_49 {dimension_numbers = #tpu.dot_dimension_numbers<[1], [0], [0], [1], [0, 0, 1, 1], [], []>} : vector<64x64xf32>, vector<64x16xf32>, vector<64x16xf32> -> vector<64x16xf32>
    %120 = arith.addf %119, %43 : vector<64x16xf32>
    %cst_50 = arith.constant dense<0.000000e+00> : vector<64x64xf32>
    %121 = tpu.matmul %120, %103, %cst_50 {dimension_numbers = #tpu.dot_dimension_numbers<[1], [0], [0], [1], [0, 0, 1, 1], [], []>} : vector<64x16xf32>, vector<16x64xf32>, vector<64x64xf32> -> vector<64x64xf32>
    %122 = arith.mulf %121, %1 : vector<64x64xf32>
    %123 = vector.extract_strided_slice %122 {offsets = [0, 0], sizes = [16, 64], strides = [1, 1]} : vector<64x64xf32> to vector<16x64xf32>
    %124 = vector.extract_strided_slice %122 {offsets = [16, 0], sizes = [16, 64], strides = [1, 1]} : vector<64x64xf32> to vector<16x64xf32>
    %125 = arith.addf %123, %124 : vector<16x64xf32>
    %126 = vector.extract_strided_slice %122 {offsets = [32, 0], sizes = [16, 64], strides = [1, 1]} : vector<64x64xf32> to vector<16x64xf32>
    %127 = arith.addf %125, %126 : vector<16x64xf32>
    %128 = vector.extract_strided_slice %122 {offsets = [48, 0], sizes = [16, 64], strides = [1, 1]} : vector<64x64xf32> to vector<16x64xf32>
    %129 = arith.addf %127, %128 : vector<16x64xf32>
    %130 = tpu.concatenate %100, %129 in 0 : vector<16x64xf32>, vector<16x64xf32> -> vector<32x64xf32>
    %cst_51 = arith.constant dense<0.000000e+00> : vector<32x64xf32>
    %131 = tpu.matmul %130, %15, %cst_51 {dimension_numbers = #tpu.dot_dimension_numbers<[1], [0], [0], [1], [0, 0, 1, 1], [], []>} : vector<32x64xf32>, vector<64x64xf32>, vector<32x64xf32> -> vector<32x64xf32>
    %132 = vector.broadcast %25 : vector<1x64xf32> to vector<32x64xf32>
    %133 = arith.addf %131, %132 : vector<32x64xf32>
    %134 = vector.broadcast %26 : vector<1x64xf32> to vector<32x64xf32>
    %135 = arith.mulf %134, %133 : vector<32x64xf32>
    %136 = arith.addf %11, %135 : vector<32x64xf32>
    %cst_52 = arith.constant dense<0.000000e+00> : vector<32xf32>
    %137 = vector.multi_reduction <add>, %136, %cst_52 [1] : vector<32x64xf32> to vector<32xf32>
    %138 = vector.shape_cast %137 : vector<32xf32> to vector<32x1xf32>
    %cst_53 = arith.constant 6.400000e+01 : f32
    %139 = vector.broadcast %cst_53 : f32 to vector<32x1xf32>
    %140 = arith.divf %138, %139 : vector<32x1xf32>
    %141 = vector.broadcast %140 : vector<32x1xf32> to vector<32x64xf32>
    %142 = arith.subf %136, %141 : vector<32x64xf32>
    %143 = arith.mulf %142, %142 : vector<32x64xf32>
    %cst_54 = arith.constant dense<0.000000e+00> : vector<32xf32>
    %144 = vector.multi_reduction <add>, %143, %cst_54 [1] : vector<32x64xf32> to vector<32xf32>
    %145 = vector.shape_cast %144 : vector<32xf32> to vector<32x1xf32>
    %cst_55 = arith.constant 6.400000e+01 : f32
    %146 = vector.broadcast %cst_55 : f32 to vector<32x1xf32>
    %147 = arith.divf %145, %146 : vector<32x1xf32>
    %cst_56 = arith.constant 9.99999997E-7 : f32
    %148 = vector.broadcast %cst_56 : f32 to vector<32x1xf32>
    %149 = arith.addf %147, %148 : vector<32x1xf32>
    %150 = math.rsqrt %149 : vector<32x1xf32>
    %151 = vector.broadcast %150 : vector<32x1xf32> to vector<32x64xf32>
    %152 = arith.mulf %142, %151 : vector<32x64xf32>
    %153 = vector.broadcast %27 : vector<1x64xf32> to vector<32x64xf32>
    %154 = arith.mulf %152, %153 : vector<32x64xf32>
    %155 = vector.broadcast %28 : vector<1x64xf32> to vector<32x64xf32>
    %156 = arith.addf %154, %155 : vector<32x64xf32>
    %cst_57 = arith.constant dense<0.000000e+00> : vector<32x256xf32>
    %157 = tpu.matmul %156, %17, %cst_57 {dimension_numbers = #tpu.dot_dimension_numbers<[1], [0], [0], [1], [0, 0, 1, 1], [], []>} : vector<32x64xf32>, vector<64x256xf32>, vector<32x256xf32> -> vector<32x256xf32>
    %158 = vector.broadcast %29 : vector<1x256xf32> to vector<32x256xf32>
    %159 = arith.addf %157, %158 : vector<32x256xf32>
    %cst_58 = arith.constant 5.000000e-01 : f32
    %160 = vector.broadcast %cst_58 : f32 to vector<32x256xf32>
    %161 = arith.mulf %160, %159 : vector<32x256xf32>
    %cst_59 = arith.constant 0.707106769 : f32
    %162 = vector.broadcast %cst_59 : f32 to vector<32x256xf32>
    %163 = arith.mulf %159, %162 : vector<32x256xf32>
    %164 = math.erf %163 : vector<32x256xf32>
    %cst_60 = arith.constant 1.000000e+00 : f32
    %165 = vector.broadcast %cst_60 : f32 to vector<32x256xf32>
    %166 = arith.addf %165, %164 : vector<32x256xf32>
    %167 = arith.mulf %161, %166 : vector<32x256xf32>
    %cst_61 = arith.constant dense<0.000000e+00> : vector<32x64xf32>
    %168 = tpu.matmul %167, %19, %cst_61 {dimension_numbers = #tpu.dot_dimension_numbers<[1], [0], [0], [1], [0, 0, 1, 1], [], []>} : vector<32x256xf32>, vector<256x64xf32>, vector<32x64xf32> -> vector<32x64xf32>
    %169 = vector.broadcast %30 : vector<1x64xf32> to vector<32x64xf32>
    %170 = arith.addf %168, %169 : vector<32x64xf32>
    %171 = vector.broadcast %31 : vector<1x64xf32> to vector<32x64xf32>
    %172 = arith.mulf %171, %170 : vector<32x64xf32>
    %173 = arith.addf %136, %172 : vector<32x64xf32>
    %c1 = arith.constant 1 : index
    %c0_62 = arith.constant 0 : index
    %c0_63 = arith.constant 0 : index
    %174 = vector.load %arg4[%c1, %c0_62, %c0_63] : memref<2x64x192xf32, #tpu.memory_space<vmem>>, vector<1x64x192xf32>
    %175 = vector.shape_cast %174 : vector<1x64x192xf32> to vector<64x192xf32>
    %c1_64 = arith.constant 1 : index
    %c0_65 = arith.constant 0 : index
    %c0_66 = arith.constant 0 : index
    %176 = vector.load %arg5[%c1_64, %c0_65, %c0_66] : memref<2x64x64xf32, #tpu.memory_space<vmem>>, vector<1x64x64xf32>
    %177 = vector.shape_cast %176 : vector<1x64x64xf32> to vector<64x64xf32>
    %c1_67 = arith.constant 1 : index
    %c0_68 = arith.constant 0 : index
    %c0_69 = arith.constant 0 : index
    %178 = vector.load %arg6[%c1_67, %c0_68, %c0_69] : memref<2x64x256xf32, #tpu.memory_space<vmem>>, vector<1x64x256xf32>
    %179 = vector.shape_cast %178 : vector<1x64x256xf32> to vector<64x256xf32>
    %c1_70 = arith.constant 1 : index
    %c0_71 = arith.constant 0 : index
    %c0_72 = arith.constant 0 : index
    %180 = vector.load %arg7[%c1_70, %c0_71, %c0_72] : memref<2x256x64xf32, #tpu.memory_space<vmem>>, vector<1x256x64xf32>
    %181 = vector.shape_cast %180 : vector<1x256x64xf32> to vector<256x64xf32>
    %c1_73 = arith.constant 1 : index
    %c0_74 = arith.constant 0 : index
    %c0_75 = arith.constant 0 : index
    %182 = vector.load %arg8[%c1_73, %c0_74, %c0_75] : memref<2x10x256xf32, #tpu.memory_space<vmem>>, vector<1x10x256xf32>
    %183 = vector.shape_cast %182 : vector<1x10x256xf32> to vector<10x256xf32>
    %184 = vector.extract_strided_slice %183 {offsets = [0, 0], sizes = [1, 64], strides = [1, 1]} : vector<10x256xf32> to vector<1x64xf32>
    %185 = vector.extract_strided_slice %183 {offsets = [1, 0], sizes = [1, 64], strides = [1, 1]} : vector<10x256xf32> to vector<1x64xf32>
    %186 = vector.extract_strided_slice %183 {offsets = [2, 0], sizes = [1, 192], strides = [1, 1]} : vector<10x256xf32> to vector<1x192xf32>
    %187 = vector.extract_strided_slice %183 {offsets = [3, 0], sizes = [1, 64], strides = [1, 1]} : vector<10x256xf32> to vector<1x64xf32>
    %188 = vector.extract_strided_slice %183 {offsets = [4, 0], sizes = [1, 64], strides = [1, 1]} : vector<10x256xf32> to vector<1x64xf32>
    %189 = vector.extract_strided_slice %183 {offsets = [5, 0], sizes = [1, 64], strides = [1, 1]} : vector<10x256xf32> to vector<1x64xf32>
    %190 = vector.extract_strided_slice %183 {offsets = [6, 0], sizes = [1, 64], strides = [1, 1]} : vector<10x256xf32> to vector<1x64xf32>
    %191 = vector.extract_strided_slice %183 {offsets = [7, 0], sizes = [1, 256], strides = [1, 1]} : vector<10x256xf32> to vector<1x256xf32>
    %192 = vector.extract_strided_slice %183 {offsets = [8, 0], sizes = [1, 64], strides = [1, 1]} : vector<10x256xf32> to vector<1x64xf32>
    %193 = vector.extract_strided_slice %183 {offsets = [9, 0], sizes = [1, 64], strides = [1, 1]} : vector<10x256xf32> to vector<1x64xf32>
    %c1_76 = arith.constant 1 : index
    %c0_77 = arith.constant 0 : index
    %c0_78 = arith.constant 0 : index
    %c0_79 = arith.constant 0 : index
    %194 = vector.load %arg9[%c1_76, %c0_77, %c0_78, %c0_79] : memref<2x2x64x64xf32, #tpu.memory_space<vmem>>, vector<1x2x64x64xf32>
    %195 = vector.shape_cast %194 : vector<1x2x64x64xf32> to vector<2x64x64xf32>
    %c1_80 = arith.constant 1 : index
    %c0_81 = arith.constant 0 : index
    %c0_82 = arith.constant 0 : index
    %c0_83 = arith.constant 0 : index
    %196 = vector.load %arg10[%c1_80, %c0_81, %c0_82, %c0_83] : memref<2x2x64x16xf32, #tpu.memory_space<vmem>>, vector<1x2x64x16xf32>
    %197 = vector.shape_cast %196 : vector<1x2x64x16xf32> to vector<2x64x16xf32>
    %198 = vector.extract_strided_slice %195 {offsets = [0, 0, 0], sizes = [1, 64, 64], strides = [1, 1, 1]} : vector<2x64x64xf32> to vector<1x64x64xf32>
    %199 = vector.shape_cast %198 : vector<1x64x64xf32> to vector<64x64xf32>
    %200 = vector.extract_strided_slice %195 {offsets = [1, 0, 0], sizes = [1, 64, 64], strides = [1, 1, 1]} : vector<2x64x64xf32> to vector<1x64x64xf32>
    %201 = vector.shape_cast %200 : vector<1x64x64xf32> to vector<64x64xf32>
    %202 = vector.extract_strided_slice %197 {offsets = [0, 0, 0], sizes = [1, 64, 16], strides = [1, 1, 1]} : vector<2x64x16xf32> to vector<1x64x16xf32>
    %203 = vector.shape_cast %202 : vector<1x64x16xf32> to vector<64x16xf32>
    %204 = vector.extract_strided_slice %197 {offsets = [1, 0, 0], sizes = [1, 64, 16], strides = [1, 1, 1]} : vector<2x64x16xf32> to vector<1x64x16xf32>
    %205 = vector.shape_cast %204 : vector<1x64x16xf32> to vector<64x16xf32>
    %cst_84 = arith.constant dense<0.000000e+00> : vector<32xf32>
    %206 = vector.multi_reduction <add>, %173, %cst_84 [1] : vector<32x64xf32> to vector<32xf32>
    %207 = vector.shape_cast %206 : vector<32xf32> to vector<32x1xf32>
    %cst_85 = arith.constant 6.400000e+01 : f32
    %208 = vector.broadcast %cst_85 : f32 to vector<32x1xf32>
    %209 = arith.divf %207, %208 : vector<32x1xf32>
    %210 = vector.broadcast %209 : vector<32x1xf32> to vector<32x64xf32>
    %211 = arith.subf %173, %210 : vector<32x64xf32>
    %212 = arith.mulf %211, %211 : vector<32x64xf32>
    %cst_86 = arith.constant dense<0.000000e+00> : vector<32xf32>
    %213 = vector.multi_reduction <add>, %212, %cst_86 [1] : vector<32x64xf32> to vector<32xf32>
    %214 = vector.shape_cast %213 : vector<32xf32> to vector<32x1xf32>
    %cst_87 = arith.constant 6.400000e+01 : f32
    %215 = vector.broadcast %cst_87 : f32 to vector<32x1xf32>
    %216 = arith.divf %214, %215 : vector<32x1xf32>
    %cst_88 = arith.constant 9.99999997E-7 : f32
    %217 = vector.broadcast %cst_88 : f32 to vector<32x1xf32>
    %218 = arith.addf %216, %217 : vector<32x1xf32>
    %219 = math.rsqrt %218 : vector<32x1xf32>
    %220 = vector.broadcast %219 : vector<32x1xf32> to vector<32x64xf32>
    %221 = arith.mulf %211, %220 : vector<32x64xf32>
    %222 = vector.broadcast %184 : vector<1x64xf32> to vector<32x64xf32>
    %223 = arith.mulf %221, %222 : vector<32x64xf32>
    %224 = vector.broadcast %185 : vector<1x64xf32> to vector<32x64xf32>
    %225 = arith.addf %223, %224 : vector<32x64xf32>
    %cst_89 = arith.constant dense<0.000000e+00> : vector<32x192xf32>
    %226 = tpu.matmul %225, %175, %cst_89 {dimension_numbers = #tpu.dot_dimension_numbers<[1], [0], [0], [1], [0, 0, 1, 1], [], []>} : vector<32x64xf32>, vector<64x192xf32>, vector<32x192xf32> -> vector<32x192xf32>
    %227 = vector.broadcast %186 : vector<1x192xf32> to vector<32x192xf32>
    %228 = arith.addf %226, %227 : vector<32x192xf32>
    %229 = vector.extract_strided_slice %228 {offsets = [0, 0], sizes = [32, 64], strides = [1, 1]} : vector<32x192xf32> to vector<32x64xf32>
    %cst_90 = arith.constant 2.500000e-01 : f32
    %230 = vector.broadcast %cst_90 : f32 to vector<32x64xf32>
    %231 = arith.mulf %229, %230 : vector<32x64xf32>
    %232 = vector.extract_strided_slice %228 {offsets = [0, 64], sizes = [32, 64], strides = [1, 1]} : vector<32x192xf32> to vector<32x64xf32>
    %233 = vector.extract_strided_slice %228 {offsets = [0, 128], sizes = [32, 64], strides = [1, 1]} : vector<32x192xf32> to vector<32x64xf32>
    %234 = vector.extract_strided_slice %231 {offsets = [0, 0], sizes = [16, 64], strides = [1, 1]} : vector<32x64xf32> to vector<16x64xf32>
    %235 = vector.extract_strided_slice %232 {offsets = [0, 0], sizes = [16, 64], strides = [1, 1]} : vector<32x64xf32> to vector<16x64xf32>
    %236 = vector.extract_strided_slice %233 {offsets = [0, 0], sizes = [16, 64], strides = [1, 1]} : vector<32x64xf32> to vector<16x64xf32>
    %237 = tpu.concatenate %234, %234, %234, %234 in 0 : vector<16x64xf32>, vector<16x64xf32>, vector<16x64xf32>, vector<16x64xf32> -> vector<64x64xf32>
    %238 = arith.mulf %237, %1 : vector<64x64xf32>
    %cst_91 = arith.constant dense<0.000000e+00> : vector<64x16xf32>
    %239 = tpu.matmul %238, %235, %cst_91 {dimension_numbers = #tpu.dot_dimension_numbers<[1], [1], [0], [0], [0, 0, 1, 0], [], []>} : vector<64x64xf32>, vector<16x64xf32>, vector<64x16xf32> -> vector<64x16xf32>
    %cst_92 = arith.constant dense<0.000000e+00> : vector<64x16xf32>
    %240 = tpu.matmul %199, %239, %cst_92 {dimension_numbers = #tpu.dot_dimension_numbers<[1], [0], [0], [1], [0, 0, 1, 1], [], []>} : vector<64x64xf32>, vector<64x16xf32>, vector<64x16xf32> -> vector<64x16xf32>
    %241 = arith.addf %240, %203 : vector<64x16xf32>
    %cst_93 = arith.constant dense<0xFF800000> : vector<64xf32>
    %242 = vector.multi_reduction <maximumf>, %241, %cst_93 [1] : vector<64x16xf32> to vector<64xf32>
    %243 = vector.shape_cast %242 : vector<64xf32> to vector<64x1xf32>
    %244 = vector.broadcast %243 : vector<64x1xf32> to vector<64x16xf32>
    %245 = arith.subf %241, %244 : vector<64x16xf32>
    %246 = math.exp %245 : vector<64x16xf32>
    %cst_94 = arith.constant dense<0.000000e+00> : vector<64xf32>
    %247 = vector.multi_reduction <add>, %246, %cst_94 [1] : vector<64x16xf32> to vector<64xf32>
    %248 = vector.shape_cast %247 : vector<64xf32> to vector<64x1xf32>
    %249 = tpu.reciprocal %248 {approx = true} : vector<64x1xf32> -> vector<64x1xf32>
    %250 = vector.broadcast %249 : vector<64x1xf32> to vector<64x16xf32>
    %251 = arith.mulf %246, %250 : vector<64x16xf32>
    %cst_95 = arith.constant dense<0.000000e+00> : vector<64x16xf32>
    %252 = tpu.matmul %201, %251, %cst_95 {dimension_numbers = #tpu.dot_dimension_numbers<[1], [0], [0], [1], [0, 0, 1, 1], [], []>} : vector<64x64xf32>, vector<64x16xf32>, vector<64x16xf32> -> vector<64x16xf32>
    %253 = arith.addf %252, %205 : vector<64x16xf32>
    %cst_96 = arith.constant dense<0.000000e+00> : vector<64x64xf32>
    %254 = tpu.matmul %253, %236, %cst_96 {dimension_numbers = #tpu.dot_dimension_numbers<[1], [0], [0], [1], [0, 0, 1, 1], [], []>} : vector<64x16xf32>, vector<16x64xf32>, vector<64x64xf32> -> vector<64x64xf32>
    %255 = arith.mulf %254, %1 : vector<64x64xf32>
    %256 = vector.extract_strided_slice %255 {offsets = [0, 0], sizes = [16, 64], strides = [1, 1]} : vector<64x64xf32> to vector<16x64xf32>
    %257 = vector.extract_strided_slice %255 {offsets = [16, 0], sizes = [16, 64], strides = [1, 1]} : vector<64x64xf32> to vector<16x64xf32>
    %258 = arith.addf %256, %257 : vector<16x64xf32>
    %259 = vector.extract_strided_slice %255 {offsets = [32, 0], sizes = [16, 64], strides = [1, 1]} : vector<64x64xf32> to vector<16x64xf32>
    %260 = arith.addf %258, %259 : vector<16x64xf32>
    %261 = vector.extract_strided_slice %255 {offsets = [48, 0], sizes = [16, 64], strides = [1, 1]} : vector<64x64xf32> to vector<16x64xf32>
    %262 = arith.addf %260, %261 : vector<16x64xf32>
    %263 = vector.extract_strided_slice %231 {offsets = [16, 0], sizes = [16, 64], strides = [1, 1]} : vector<32x64xf32> to vector<16x64xf32>
    %264 = vector.extract_strided_slice %232 {offsets = [16, 0], sizes = [16, 64], strides = [1, 1]} : vector<32x64xf32> to vector<16x64xf32>
    %265 = vector.extract_strided_slice %233 {offsets = [16, 0], sizes = [16, 64], strides = [1, 1]} : vector<32x64xf32> to vector<16x64xf32>
    %266 = tpu.concatenate %263, %263, %263, %263 in 0 : vector<16x64xf32>, vector<16x64xf32>, vector<16x64xf32>, vector<16x64xf32> -> vector<64x64xf32>
    %267 = arith.mulf %266, %1 : vector<64x64xf32>
    %cst_97 = arith.constant dense<0.000000e+00> : vector<64x16xf32>
    %268 = tpu.matmul %267, %264, %cst_97 {dimension_numbers = #tpu.dot_dimension_numbers<[1], [1], [0], [0], [0, 0, 1, 0], [], []>} : vector<64x64xf32>, vector<16x64xf32>, vector<64x16xf32> -> vector<64x16xf32>
    %cst_98 = arith.constant dense<0.000000e+00> : vector<64x16xf32>
    %269 = tpu.matmul %199, %268, %cst_98 {dimension_numbers = #tpu.dot_dimension_numbers<[1], [0], [0], [1], [0, 0, 1, 1], [], []>} : vector<64x64xf32>, vector<64x16xf32>, vector<64x16xf32> -> vector<64x16xf32>
    %270 = arith.addf %269, %203 : vector<64x16xf32>
    %cst_99 = arith.constant dense<0xFF800000> : vector<64xf32>
    %271 = vector.multi_reduction <maximumf>, %270, %cst_99 [1] : vector<64x16xf32> to vector<64xf32>
    %272 = vector.shape_cast %271 : vector<64xf32> to vector<64x1xf32>
    %273 = vector.broadcast %272 : vector<64x1xf32> to vector<64x16xf32>
    %274 = arith.subf %270, %273 : vector<64x16xf32>
    %275 = math.exp %274 : vector<64x16xf32>
    %cst_100 = arith.constant dense<0.000000e+00> : vector<64xf32>
    %276 = vector.multi_reduction <add>, %275, %cst_100 [1] : vector<64x16xf32> to vector<64xf32>
    %277 = vector.shape_cast %276 : vector<64xf32> to vector<64x1xf32>
    %278 = tpu.reciprocal %277 {approx = true} : vector<64x1xf32> -> vector<64x1xf32>
    %279 = vector.broadcast %278 : vector<64x1xf32> to vector<64x16xf32>
    %280 = arith.mulf %275, %279 : vector<64x16xf32>
    %cst_101 = arith.constant dense<0.000000e+00> : vector<64x16xf32>
    %281 = tpu.matmul %201, %280, %cst_101 {dimension_numbers = #tpu.dot_dimension_numbers<[1], [0], [0], [1], [0, 0, 1, 1], [], []>} : vector<64x64xf32>, vector<64x16xf32>, vector<64x16xf32> -> vector<64x16xf32>
    %282 = arith.addf %281, %205 : vector<64x16xf32>
    %cst_102 = arith.constant dense<0.000000e+00> : vector<64x64xf32>
    %283 = tpu.matmul %282, %265, %cst_102 {dimension_numbers = #tpu.dot_dimension_numbers<[1], [0], [0], [1], [0, 0, 1, 1], [], []>} : vector<64x16xf32>, vector<16x64xf32>, vector<64x64xf32> -> vector<64x64xf32>
    %284 = arith.mulf %283, %1 : vector<64x64xf32>
    %285 = vector.extract_strided_slice %284 {offsets = [0, 0], sizes = [16, 64], strides = [1, 1]} : vector<64x64xf32> to vector<16x64xf32>
    %286 = vector.extract_strided_slice %284 {offsets = [16, 0], sizes = [16, 64], strides = [1, 1]} : vector<64x64xf32> to vector<16x64xf32>
    %287 = arith.addf %285, %286 : vector<16x64xf32>
    %288 = vector.extract_strided_slice %284 {offsets = [32, 0], sizes = [16, 64], strides = [1, 1]} : vector<64x64xf32> to vector<16x64xf32>
    %289 = arith.addf %287, %288 : vector<16x64xf32>
    %290 = vector.extract_strided_slice %284 {offsets = [48, 0], sizes = [16, 64], strides = [1, 1]} : vector<64x64xf32> to vector<16x64xf32>
    %291 = arith.addf %289, %290 : vector<16x64xf32>
    %292 = tpu.concatenate %262, %291 in 0 : vector<16x64xf32>, vector<16x64xf32> -> vector<32x64xf32>
    %cst_103 = arith.constant dense<0.000000e+00> : vector<32x64xf32>
    %293 = tpu.matmul %292, %177, %cst_103 {dimension_numbers = #tpu.dot_dimension_numbers<[1], [0], [0], [1], [0, 0, 1, 1], [], []>} : vector<32x64xf32>, vector<64x64xf32>, vector<32x64xf32> -> vector<32x64xf32>
    %294 = vector.broadcast %187 : vector<1x64xf32> to vector<32x64xf32>
    %295 = arith.addf %293, %294 : vector<32x64xf32>
    %296 = vector.broadcast %188 : vector<1x64xf32> to vector<32x64xf32>
    %297 = arith.mulf %296, %295 : vector<32x64xf32>
    %298 = arith.addf %173, %297 : vector<32x64xf32>
    %cst_104 = arith.constant dense<0.000000e+00> : vector<32xf32>
    %299 = vector.multi_reduction <add>, %298, %cst_104 [1] : vector<32x64xf32> to vector<32xf32>
    %300 = vector.shape_cast %299 : vector<32xf32> to vector<32x1xf32>
    %cst_105 = arith.constant 6.400000e+01 : f32
    %301 = vector.broadcast %cst_105 : f32 to vector<32x1xf32>
    %302 = arith.divf %300, %301 : vector<32x1xf32>
    %303 = vector.broadcast %302 : vector<32x1xf32> to vector<32x64xf32>
    %304 = arith.subf %298, %303 : vector<32x64xf32>
    %305 = arith.mulf %304, %304 : vector<32x64xf32>
    %cst_106 = arith.constant dense<0.000000e+00> : vector<32xf32>
    %306 = vector.multi_reduction <add>, %305, %cst_106 [1] : vector<32x64xf32> to vector<32xf32>
    %307 = vector.shape_cast %306 : vector<32xf32> to vector<32x1xf32>
    %cst_107 = arith.constant 6.400000e+01 : f32
    %308 = vector.broadcast %cst_107 : f32 to vector<32x1xf32>
    %309 = arith.divf %307, %308 : vector<32x1xf32>
    %cst_108 = arith.constant 9.99999997E-7 : f32
    %310 = vector.broadcast %cst_108 : f32 to vector<32x1xf32>
    %311 = arith.addf %309, %310 : vector<32x1xf32>
    %312 = math.rsqrt %311 : vector<32x1xf32>
    %313 = vector.broadcast %312 : vector<32x1xf32> to vector<32x64xf32>
    %314 = arith.mulf %304, %313 : vector<32x64xf32>
    %315 = vector.broadcast %189 : vector<1x64xf32> to vector<32x64xf32>
    %316 = arith.mulf %314, %315 : vector<32x64xf32>
    %317 = vector.broadcast %190 : vector<1x64xf32> to vector<32x64xf32>
    %318 = arith.addf %316, %317 : vector<32x64xf32>
    %cst_109 = arith.constant dense<0.000000e+00> : vector<32x256xf32>
    %319 = tpu.matmul %318, %179, %cst_109 {dimension_numbers = #tpu.dot_dimension_numbers<[1], [0], [0], [1], [0, 0, 1, 1], [], []>} : vector<32x64xf32>, vector<64x256xf32>, vector<32x256xf32> -> vector<32x256xf32>
    %320 = vector.broadcast %191 : vector<1x256xf32> to vector<32x256xf32>
    %321 = arith.addf %319, %320 : vector<32x256xf32>
    %cst_110 = arith.constant 5.000000e-01 : f32
    %322 = vector.broadcast %cst_110 : f32 to vector<32x256xf32>
    %323 = arith.mulf %322, %321 : vector<32x256xf32>
    %cst_111 = arith.constant 0.707106769 : f32
    %324 = vector.broadcast %cst_111 : f32 to vector<32x256xf32>
    %325 = arith.mulf %321, %324 : vector<32x256xf32>
    %326 = math.erf %325 : vector<32x256xf32>
    %cst_112 = arith.constant 1.000000e+00 : f32
    %327 = vector.broadcast %cst_112 : f32 to vector<32x256xf32>
    %328 = arith.addf %327, %326 : vector<32x256xf32>
    %329 = arith.mulf %323, %328 : vector<32x256xf32>
    %cst_113 = arith.constant dense<0.000000e+00> : vector<32x64xf32>
    %330 = tpu.matmul %329, %181, %cst_113 {dimension_numbers = #tpu.dot_dimension_numbers<[1], [0], [0], [1], [0, 0, 1, 1], [], []>} : vector<32x256xf32>, vector<256x64xf32>, vector<32x64xf32> -> vector<32x64xf32>
    %331 = vector.broadcast %192 : vector<1x64xf32> to vector<32x64xf32>
    %332 = arith.addf %330, %331 : vector<32x64xf32>
    %333 = vector.broadcast %193 : vector<1x64xf32> to vector<32x64xf32>
    %334 = arith.mulf %333, %332 : vector<32x64xf32>
    %335 = arith.addf %298, %334 : vector<32x64xf32>
    %336 = vector.extract_strided_slice %0 {offsets = [17, 0], sizes = [1, 64], strides = [1, 1]} : vector<20x64xf32> to vector<1x64xf32>
    %337 = tpu.concatenate %336, %336 in 0 : vector<1x64xf32>, vector<1x64xf32> -> vector<2x64xf32>
    %c0_114 = arith.constant 0 : index
    %c0_115 = arith.constant 0 : index
    %c0_116 = arith.constant 0 : index
    %338 = vector.load %arg13[%c0_114, %c0_115, %c0_116] : memref<2x64x192xf32, #tpu.memory_space<vmem>>, vector<1x64x192xf32>
    %339 = vector.shape_cast %338 : vector<1x64x192xf32> to vector<64x192xf32>
    %c0_117 = arith.constant 0 : index
    %c0_118 = arith.constant 0 : index
    %c0_119 = arith.constant 0 : index
    %340 = vector.load %arg14[%c0_117, %c0_118, %c0_119] : memref<2x64x64xf32, #tpu.memory_space<vmem>>, vector<1x64x64xf32>
    %341 = vector.shape_cast %340 : vector<1x64x64xf32> to vector<64x64xf32>
    %c0_120 = arith.constant 0 : index
    %c0_121 = arith.constant 0 : index
    %c0_122 = arith.constant 0 : index
    %342 = vector.load %arg15[%c0_120, %c0_121, %c0_122] : memref<2x64x256xf32, #tpu.memory_space<vmem>>, vector<1x64x256xf32>
    %343 = vector.shape_cast %342 : vector<1x64x256xf32> to vector<64x256xf32>
    %c0_123 = arith.constant 0 : index
    %c0_124 = arith.constant 0 : index
    %c0_125 = arith.constant 0 : index
    %344 = vector.load %arg16[%c0_123, %c0_124, %c0_125] : memref<2x256x64xf32, #tpu.memory_space<vmem>>, vector<1x256x64xf32>
    %345 = vector.shape_cast %344 : vector<1x256x64xf32> to vector<256x64xf32>
    %c0_126 = arith.constant 0 : index
    %c0_127 = arith.constant 0 : index
    %c0_128 = arith.constant 0 : index
    %346 = vector.load %arg17[%c0_126, %c0_127, %c0_128] : memref<2x10x256xf32, #tpu.memory_space<vmem>>, vector<1x10x256xf32>
    %347 = vector.shape_cast %346 : vector<1x10x256xf32> to vector<10x256xf32>
    %348 = vector.extract_strided_slice %347 {offsets = [0, 0], sizes = [1, 64], strides = [1, 1]} : vector<10x256xf32> to vector<1x64xf32>
    %349 = vector.extract_strided_slice %347 {offsets = [1, 0], sizes = [1, 64], strides = [1, 1]} : vector<10x256xf32> to vector<1x64xf32>
    %350 = vector.extract_strided_slice %347 {offsets = [2, 0], sizes = [1, 192], strides = [1, 1]} : vector<10x256xf32> to vector<1x192xf32>
    %351 = vector.extract_strided_slice %347 {offsets = [3, 0], sizes = [1, 64], strides = [1, 1]} : vector<10x256xf32> to vector<1x64xf32>
    %352 = vector.extract_strided_slice %347 {offsets = [4, 0], sizes = [1, 64], strides = [1, 1]} : vector<10x256xf32> to vector<1x64xf32>
    %353 = vector.extract_strided_slice %347 {offsets = [5, 0], sizes = [1, 64], strides = [1, 1]} : vector<10x256xf32> to vector<1x64xf32>
    %354 = vector.extract_strided_slice %347 {offsets = [6, 0], sizes = [1, 64], strides = [1, 1]} : vector<10x256xf32> to vector<1x64xf32>
    %355 = vector.extract_strided_slice %347 {offsets = [7, 0], sizes = [1, 256], strides = [1, 1]} : vector<10x256xf32> to vector<1x256xf32>
    %356 = vector.extract_strided_slice %347 {offsets = [8, 0], sizes = [1, 64], strides = [1, 1]} : vector<10x256xf32> to vector<1x64xf32>
    %357 = vector.extract_strided_slice %347 {offsets = [9, 0], sizes = [1, 64], strides = [1, 1]} : vector<10x256xf32> to vector<1x64xf32>
    %cst_129 = arith.constant dense<0.000000e+00> : vector<32xf32>
    %358 = vector.multi_reduction <add>, %335, %cst_129 [1] : vector<32x64xf32> to vector<32xf32>
    %359 = vector.shape_cast %358 : vector<32xf32> to vector<32x1xf32>
    %cst_130 = arith.constant 6.400000e+01 : f32
    %360 = vector.broadcast %cst_130 : f32 to vector<32x1xf32>
    %361 = arith.divf %359, %360 : vector<32x1xf32>
    %362 = vector.broadcast %361 : vector<32x1xf32> to vector<32x64xf32>
    %363 = arith.subf %335, %362 : vector<32x64xf32>
    %364 = arith.mulf %363, %363 : vector<32x64xf32>
    %cst_131 = arith.constant dense<0.000000e+00> : vector<32xf32>
    %365 = vector.multi_reduction <add>, %364, %cst_131 [1] : vector<32x64xf32> to vector<32xf32>
    %366 = vector.shape_cast %365 : vector<32xf32> to vector<32x1xf32>
    %cst_132 = arith.constant 6.400000e+01 : f32
    %367 = vector.broadcast %cst_132 : f32 to vector<32x1xf32>
    %368 = arith.divf %366, %367 : vector<32x1xf32>
    %cst_133 = arith.constant 9.99999997E-7 : f32
    %369 = vector.broadcast %cst_133 : f32 to vector<32x1xf32>
    %370 = arith.addf %368, %369 : vector<32x1xf32>
    %371 = math.rsqrt %370 : vector<32x1xf32>
    %372 = vector.broadcast %371 : vector<32x1xf32> to vector<32x64xf32>
    %373 = arith.mulf %363, %372 : vector<32x64xf32>
    %374 = vector.broadcast %348 : vector<1x64xf32> to vector<32x64xf32>
    %375 = arith.mulf %373, %374 : vector<32x64xf32>
    %376 = vector.broadcast %349 : vector<1x64xf32> to vector<32x64xf32>
    %377 = arith.addf %375, %376 : vector<32x64xf32>
    %378 = vector.extract_strided_slice %339 {offsets = [0, 64], sizes = [64, 128], strides = [1, 1]} : vector<64x192xf32> to vector<64x128xf32>
    %cst_134 = arith.constant dense<0.000000e+00> : vector<32x128xf32>
    %379 = tpu.matmul %377, %378, %cst_134 {dimension_numbers = #tpu.dot_dimension_numbers<[1], [0], [0], [1], [0, 0, 1, 1], [], []>} : vector<32x64xf32>, vector<64x128xf32>, vector<32x128xf32> -> vector<32x128xf32>
    %380 = vector.extract_strided_slice %350 {offsets = [0, 64], sizes = [1, 128], strides = [1, 1]} : vector<1x192xf32> to vector<1x128xf32>
    %381 = vector.broadcast %380 : vector<1x128xf32> to vector<32x128xf32>
    %382 = arith.addf %379, %381 : vector<32x128xf32>
    %cst_135 = arith.constant dense<0.000000e+00> : vector<2xf32>
    %383 = vector.multi_reduction <add>, %337, %cst_135 [1] : vector<2x64xf32> to vector<2xf32>
    %384 = vector.shape_cast %383 : vector<2xf32> to vector<2x1xf32>
    %cst_136 = arith.constant 6.400000e+01 : f32
    %385 = vector.broadcast %cst_136 : f32 to vector<2x1xf32>
    %386 = arith.divf %384, %385 : vector<2x1xf32>
    %387 = vector.broadcast %386 : vector<2x1xf32> to vector<2x64xf32>
    %388 = arith.subf %337, %387 : vector<2x64xf32>
    %389 = arith.mulf %388, %388 : vector<2x64xf32>
    %cst_137 = arith.constant dense<0.000000e+00> : vector<2xf32>
    %390 = vector.multi_reduction <add>, %389, %cst_137 [1] : vector<2x64xf32> to vector<2xf32>
    %391 = vector.shape_cast %390 : vector<2xf32> to vector<2x1xf32>
    %cst_138 = arith.constant 6.400000e+01 : f32
    %392 = vector.broadcast %cst_138 : f32 to vector<2x1xf32>
    %393 = arith.divf %391, %392 : vector<2x1xf32>
    %cst_139 = arith.constant 9.99999997E-7 : f32
    %394 = vector.broadcast %cst_139 : f32 to vector<2x1xf32>
    %395 = arith.addf %393, %394 : vector<2x1xf32>
    %396 = math.rsqrt %395 : vector<2x1xf32>
    %397 = vector.broadcast %396 : vector<2x1xf32> to vector<2x64xf32>
    %398 = arith.mulf %388, %397 : vector<2x64xf32>
    %399 = vector.broadcast %348 : vector<1x64xf32> to vector<2x64xf32>
    %400 = arith.mulf %398, %399 : vector<2x64xf32>
    %401 = vector.broadcast %349 : vector<1x64xf32> to vector<2x64xf32>
    %402 = arith.addf %400, %401 : vector<2x64xf32>
    %cst_140 = arith.constant dense<0.000000e+00> : vector<2x192xf32>
    %403 = tpu.matmul %402, %339, %cst_140 {dimension_numbers = #tpu.dot_dimension_numbers<[1], [0], [0], [1], [0, 0, 1, 1], [], []>} : vector<2x64xf32>, vector<64x192xf32>, vector<2x192xf32> -> vector<2x192xf32>
    %404 = vector.broadcast %350 : vector<1x192xf32> to vector<2x192xf32>
    %405 = arith.addf %403, %404 : vector<2x192xf32>
    %406 = vector.extract_strided_slice %405 {offsets = [0, 0], sizes = [1, 64], strides = [1, 1]} : vector<2x192xf32> to vector<1x64xf32>
    %cst_141 = arith.constant 2.500000e-01 : f32
    %407 = vector.broadcast %cst_141 : f32 to vector<1x64xf32>
    %408 = arith.mulf %406, %407 : vector<1x64xf32>
    %409 = vector.extract_strided_slice %405 {offsets = [0, 64], sizes = [1, 64], strides = [1, 1]} : vector<2x192xf32> to vector<1x64xf32>
    %410 = vector.extract_strided_slice %405 {offsets = [0, 128], sizes = [1, 64], strides = [1, 1]} : vector<2x192xf32> to vector<1x64xf32>
    %411 = vector.extract_strided_slice %382 {offsets = [0, 0], sizes = [16, 64], strides = [1, 1]} : vector<32x128xf32> to vector<16x64xf32>
    %412 = vector.extract_strided_slice %382 {offsets = [0, 64], sizes = [16, 64], strides = [1, 1]} : vector<32x128xf32> to vector<16x64xf32>
    %413 = tpu.concatenate %408, %408, %408, %408 in 0 : vector<1x64xf32>, vector<1x64xf32>, vector<1x64xf32>, vector<1x64xf32> -> vector<4x64xf32>
    %414 = arith.mulf %413, %2 : vector<4x64xf32>
    %cst_142 = arith.constant dense<0.000000e+00> : vector<4x16xf32>
    %415 = tpu.matmul %414, %411, %cst_142 {dimension_numbers = #tpu.dot_dimension_numbers<[1], [1], [0], [0], [0, 0, 1, 0], [], []>} : vector<4x64xf32>, vector<16x64xf32>, vector<4x16xf32> -> vector<4x16xf32>
    %cst_143 = arith.constant dense<0.000000e+00> : vector<4x1xf32>
    %416 = tpu.matmul %414, %409, %cst_143 {dimension_numbers = #tpu.dot_dimension_numbers<[1], [1], [0], [0], [0, 0, 1, 0], [], []>} : vector<4x64xf32>, vector<1x64xf32>, vector<4x1xf32> -> vector<4x1xf32>
    %cst_144 = arith.constant dense<0xFF800000> : vector<4xf32>
    %417 = vector.multi_reduction <maximumf>, %415, %cst_144 [1] : vector<4x16xf32> to vector<4xf32>
    %418 = vector.shape_cast %417 : vector<4xf32> to vector<4x1xf32>
    %419 = arith.maximumf %418, %416 : vector<4x1xf32>
    %420 = vector.broadcast %419 : vector<4x1xf32> to vector<4x16xf32>
    %421 = arith.subf %415, %420 : vector<4x16xf32>
    %422 = math.exp %421 : vector<4x16xf32>
    %423 = arith.subf %416, %419 : vector<4x1xf32>
    %424 = math.exp %423 : vector<4x1xf32>
    %cst_145 = arith.constant dense<0.000000e+00> : vector<4xf32>
    %425 = vector.multi_reduction <add>, %422, %cst_145 [1] : vector<4x16xf32> to vector<4xf32>
    %426 = vector.shape_cast %425 : vector<4xf32> to vector<4x1xf32>
    %427 = arith.addf %426, %424 : vector<4x1xf32>
    %cst_146 = arith.constant dense<0.000000e+00> : vector<4x64xf32>
    %428 = tpu.matmul %422, %412, %cst_146 {dimension_numbers = #tpu.dot_dimension_numbers<[1], [0], [0], [1], [0, 0, 1, 1], [], []>} : vector<4x16xf32>, vector<16x64xf32>, vector<4x64xf32> -> vector<4x64xf32>
    %429 = vector.broadcast %424 : vector<4x1xf32> to vector<4x64xf32>
    %430 = vector.broadcast %410 : vector<1x64xf32> to vector<4x64xf32>
    %431 = arith.mulf %429, %430 : vector<4x64xf32>
    %432 = arith.addf %428, %431 : vector<4x64xf32>
    %433 = tpu.reciprocal %427 {approx = true} : vector<4x1xf32> -> vector<4x1xf32>
    %434 = vector.broadcast %433 : vector<4x1xf32> to vector<4x64xf32>
    %435 = arith.mulf %432, %434 : vector<4x64xf32>
    %436 = arith.mulf %435, %2 : vector<4x64xf32>
    %cst_147 = arith.constant dense<0.000000e+00> : vector<64xf32>
    %437 = vector.multi_reduction <add>, %436, %cst_147 [0] : vector<4x64xf32> to vector<64xf32>
    %438 = vector.shape_cast %437 : vector<64xf32> to vector<1x64xf32>
    %439 = vector.extract_strided_slice %405 {offsets = [1, 0], sizes = [1, 64], strides = [1, 1]} : vector<2x192xf32> to vector<1x64xf32>
    %cst_148 = arith.constant 2.500000e-01 : f32
    %440 = vector.broadcast %cst_148 : f32 to vector<1x64xf32>
    %441 = arith.mulf %439, %440 : vector<1x64xf32>
    %442 = vector.extract_strided_slice %405 {offsets = [1, 64], sizes = [1, 64], strides = [1, 1]} : vector<2x192xf32> to vector<1x64xf32>
    %443 = vector.extract_strided_slice %405 {offsets = [1, 128], sizes = [1, 64], strides = [1, 1]} : vector<2x192xf32> to vector<1x64xf32>
    %444 = vector.extract_strided_slice %382 {offsets = [16, 0], sizes = [16, 64], strides = [1, 1]} : vector<32x128xf32> to vector<16x64xf32>
    %445 = vector.extract_strided_slice %382 {offsets = [16, 64], sizes = [16, 64], strides = [1, 1]} : vector<32x128xf32> to vector<16x64xf32>
    %446 = tpu.concatenate %441, %441, %441, %441 in 0 : vector<1x64xf32>, vector<1x64xf32>, vector<1x64xf32>, vector<1x64xf32> -> vector<4x64xf32>
    %447 = arith.mulf %446, %2 : vector<4x64xf32>
    %cst_149 = arith.constant dense<0.000000e+00> : vector<4x16xf32>
    %448 = tpu.matmul %447, %444, %cst_149 {dimension_numbers = #tpu.dot_dimension_numbers<[1], [1], [0], [0], [0, 0, 1, 0], [], []>} : vector<4x64xf32>, vector<16x64xf32>, vector<4x16xf32> -> vector<4x16xf32>
    %cst_150 = arith.constant dense<0.000000e+00> : vector<4x1xf32>
    %449 = tpu.matmul %447, %442, %cst_150 {dimension_numbers = #tpu.dot_dimension_numbers<[1], [1], [0], [0], [0, 0, 1, 0], [], []>} : vector<4x64xf32>, vector<1x64xf32>, vector<4x1xf32> -> vector<4x1xf32>
    %cst_151 = arith.constant dense<0xFF800000> : vector<4xf32>
    %450 = vector.multi_reduction <maximumf>, %448, %cst_151 [1] : vector<4x16xf32> to vector<4xf32>
    %451 = vector.shape_cast %450 : vector<4xf32> to vector<4x1xf32>
    %452 = arith.maximumf %451, %449 : vector<4x1xf32>
    %453 = vector.broadcast %452 : vector<4x1xf32> to vector<4x16xf32>
    %454 = arith.subf %448, %453 : vector<4x16xf32>
    %455 = math.exp %454 : vector<4x16xf32>
    %456 = arith.subf %449, %452 : vector<4x1xf32>
    %457 = math.exp %456 : vector<4x1xf32>
    %cst_152 = arith.constant dense<0.000000e+00> : vector<4xf32>
    %458 = vector.multi_reduction <add>, %455, %cst_152 [1] : vector<4x16xf32> to vector<4xf32>
    %459 = vector.shape_cast %458 : vector<4xf32> to vector<4x1xf32>
    %460 = arith.addf %459, %457 : vector<4x1xf32>
    %cst_153 = arith.constant dense<0.000000e+00> : vector<4x64xf32>
    %461 = tpu.matmul %455, %445, %cst_153 {dimension_numbers = #tpu.dot_dimension_numbers<[1], [0], [0], [1], [0, 0, 1, 1], [], []>} : vector<4x16xf32>, vector<16x64xf32>, vector<4x64xf32> -> vector<4x64xf32>
    %462 = vector.broadcast %457 : vector<4x1xf32> to vector<4x64xf32>
    %463 = vector.broadcast %443 : vector<1x64xf32> to vector<4x64xf32>
    %464 = arith.mulf %462, %463 : vector<4x64xf32>
    %465 = arith.addf %461, %464 : vector<4x64xf32>
    %466 = tpu.reciprocal %460 {approx = true} : vector<4x1xf32> -> vector<4x1xf32>
    %467 = vector.broadcast %466 : vector<4x1xf32> to vector<4x64xf32>
    %468 = arith.mulf %465, %467 : vector<4x64xf32>
    %469 = arith.mulf %468, %2 : vector<4x64xf32>
    %cst_154 = arith.constant dense<0.000000e+00> : vector<64xf32>
    %470 = vector.multi_reduction <add>, %469, %cst_154 [0] : vector<4x64xf32> to vector<64xf32>
    %471 = vector.shape_cast %470 : vector<64xf32> to vector<1x64xf32>
    %472 = tpu.concatenate %438, %471 in 0 : vector<1x64xf32>, vector<1x64xf32> -> vector<2x64xf32>
    %cst_155 = arith.constant dense<0.000000e+00> : vector<2x64xf32>
    %473 = tpu.matmul %472, %341, %cst_155 {dimension_numbers = #tpu.dot_dimension_numbers<[1], [0], [0], [1], [0, 0, 1, 1], [], []>} : vector<2x64xf32>, vector<64x64xf32>, vector<2x64xf32> -> vector<2x64xf32>
    %474 = vector.broadcast %351 : vector<1x64xf32> to vector<2x64xf32>
    %475 = arith.addf %473, %474 : vector<2x64xf32>
    %476 = vector.broadcast %352 : vector<1x64xf32> to vector<2x64xf32>
    %477 = arith.mulf %476, %475 : vector<2x64xf32>
    %478 = arith.addf %337, %477 : vector<2x64xf32>
    %cst_156 = arith.constant dense<0.000000e+00> : vector<2xf32>
    %479 = vector.multi_reduction <add>, %478, %cst_156 [1] : vector<2x64xf32> to vector<2xf32>
    %480 = vector.shape_cast %479 : vector<2xf32> to vector<2x1xf32>
    %cst_157 = arith.constant 6.400000e+01 : f32
    %481 = vector.broadcast %cst_157 : f32 to vector<2x1xf32>
    %482 = arith.divf %480, %481 : vector<2x1xf32>
    %483 = vector.broadcast %482 : vector<2x1xf32> to vector<2x64xf32>
    %484 = arith.subf %478, %483 : vector<2x64xf32>
    %485 = arith.mulf %484, %484 : vector<2x64xf32>
    %cst_158 = arith.constant dense<0.000000e+00> : vector<2xf32>
    %486 = vector.multi_reduction <add>, %485, %cst_158 [1] : vector<2x64xf32> to vector<2xf32>
    %487 = vector.shape_cast %486 : vector<2xf32> to vector<2x1xf32>
    %cst_159 = arith.constant 6.400000e+01 : f32
    %488 = vector.broadcast %cst_159 : f32 to vector<2x1xf32>
    %489 = arith.divf %487, %488 : vector<2x1xf32>
    %cst_160 = arith.constant 9.99999997E-7 : f32
    %490 = vector.broadcast %cst_160 : f32 to vector<2x1xf32>
    %491 = arith.addf %489, %490 : vector<2x1xf32>
    %492 = math.rsqrt %491 : vector<2x1xf32>
    %493 = vector.broadcast %492 : vector<2x1xf32> to vector<2x64xf32>
    %494 = arith.mulf %484, %493 : vector<2x64xf32>
    %495 = vector.broadcast %353 : vector<1x64xf32> to vector<2x64xf32>
    %496 = arith.mulf %494, %495 : vector<2x64xf32>
    %497 = vector.broadcast %354 : vector<1x64xf32> to vector<2x64xf32>
    %498 = arith.addf %496, %497 : vector<2x64xf32>
    %cst_161 = arith.constant dense<0.000000e+00> : vector<2x256xf32>
    %499 = tpu.matmul %498, %343, %cst_161 {dimension_numbers = #tpu.dot_dimension_numbers<[1], [0], [0], [1], [0, 0, 1, 1], [], []>} : vector<2x64xf32>, vector<64x256xf32>, vector<2x256xf32> -> vector<2x256xf32>
    %500 = vector.broadcast %355 : vector<1x256xf32> to vector<2x256xf32>
    %501 = arith.addf %499, %500 : vector<2x256xf32>
    %cst_162 = arith.constant 5.000000e-01 : f32
    %502 = vector.broadcast %cst_162 : f32 to vector<2x256xf32>
    %503 = arith.mulf %502, %501 : vector<2x256xf32>
    %cst_163 = arith.constant 0.707106769 : f32
    %504 = vector.broadcast %cst_163 : f32 to vector<2x256xf32>
    %505 = arith.mulf %501, %504 : vector<2x256xf32>
    %506 = math.erf %505 : vector<2x256xf32>
    %cst_164 = arith.constant 1.000000e+00 : f32
    %507 = vector.broadcast %cst_164 : f32 to vector<2x256xf32>
    %508 = arith.addf %507, %506 : vector<2x256xf32>
    %509 = arith.mulf %503, %508 : vector<2x256xf32>
    %cst_165 = arith.constant dense<0.000000e+00> : vector<2x64xf32>
    %510 = tpu.matmul %509, %345, %cst_165 {dimension_numbers = #tpu.dot_dimension_numbers<[1], [0], [0], [1], [0, 0, 1, 1], [], []>} : vector<2x256xf32>, vector<256x64xf32>, vector<2x64xf32> -> vector<2x64xf32>
    %511 = vector.broadcast %356 : vector<1x64xf32> to vector<2x64xf32>
    %512 = arith.addf %510, %511 : vector<2x64xf32>
    %513 = vector.broadcast %357 : vector<1x64xf32> to vector<2x64xf32>
    %514 = arith.mulf %513, %512 : vector<2x64xf32>
    %515 = arith.addf %478, %514 : vector<2x64xf32>
    %c1_166 = arith.constant 1 : index
    %c0_167 = arith.constant 0 : index
    %c0_168 = arith.constant 0 : index
    %516 = vector.load %arg13[%c1_166, %c0_167, %c0_168] : memref<2x64x192xf32, #tpu.memory_space<vmem>>, vector<1x64x192xf32>
    %517 = vector.shape_cast %516 : vector<1x64x192xf32> to vector<64x192xf32>
    %c1_169 = arith.constant 1 : index
    %c0_170 = arith.constant 0 : index
    %c0_171 = arith.constant 0 : index
    %518 = vector.load %arg14[%c1_169, %c0_170, %c0_171] : memref<2x64x64xf32, #tpu.memory_space<vmem>>, vector<1x64x64xf32>
    %519 = vector.shape_cast %518 : vector<1x64x64xf32> to vector<64x64xf32>
    %c1_172 = arith.constant 1 : index
    %c0_173 = arith.constant 0 : index
    %c0_174 = arith.constant 0 : index
    %520 = vector.load %arg15[%c1_172, %c0_173, %c0_174] : memref<2x64x256xf32, #tpu.memory_space<vmem>>, vector<1x64x256xf32>
    %521 = vector.shape_cast %520 : vector<1x64x256xf32> to vector<64x256xf32>
    %c1_175 = arith.constant 1 : index
    %c0_176 = arith.constant 0 : index
    %c0_177 = arith.constant 0 : index
    %522 = vector.load %arg16[%c1_175, %c0_176, %c0_177] : memref<2x256x64xf32, #tpu.memory_space<vmem>>, vector<1x256x64xf32>
    %523 = vector.shape_cast %522 : vector<1x256x64xf32> to vector<256x64xf32>
    %c1_178 = arith.constant 1 : index
    %c0_179 = arith.constant 0 : index
    %c0_180 = arith.constant 0 : index
    %524 = vector.load %arg17[%c1_178, %c0_179, %c0_180] : memref<2x10x256xf32, #tpu.memory_space<vmem>>, vector<1x10x256xf32>
    %525 = vector.shape_cast %524 : vector<1x10x256xf32> to vector<10x256xf32>
    %526 = vector.extract_strided_slice %525 {offsets = [0, 0], sizes = [1, 64], strides = [1, 1]} : vector<10x256xf32> to vector<1x64xf32>
    %527 = vector.extract_strided_slice %525 {offsets = [1, 0], sizes = [1, 64], strides = [1, 1]} : vector<10x256xf32> to vector<1x64xf32>
    %528 = vector.extract_strided_slice %525 {offsets = [2, 0], sizes = [1, 192], strides = [1, 1]} : vector<10x256xf32> to vector<1x192xf32>
    %529 = vector.extract_strided_slice %525 {offsets = [3, 0], sizes = [1, 64], strides = [1, 1]} : vector<10x256xf32> to vector<1x64xf32>
    %530 = vector.extract_strided_slice %525 {offsets = [4, 0], sizes = [1, 64], strides = [1, 1]} : vector<10x256xf32> to vector<1x64xf32>
    %531 = vector.extract_strided_slice %525 {offsets = [5, 0], sizes = [1, 64], strides = [1, 1]} : vector<10x256xf32> to vector<1x64xf32>
    %532 = vector.extract_strided_slice %525 {offsets = [6, 0], sizes = [1, 64], strides = [1, 1]} : vector<10x256xf32> to vector<1x64xf32>
    %533 = vector.extract_strided_slice %525 {offsets = [7, 0], sizes = [1, 256], strides = [1, 1]} : vector<10x256xf32> to vector<1x256xf32>
    %534 = vector.extract_strided_slice %525 {offsets = [8, 0], sizes = [1, 64], strides = [1, 1]} : vector<10x256xf32> to vector<1x64xf32>
    %535 = vector.extract_strided_slice %525 {offsets = [9, 0], sizes = [1, 64], strides = [1, 1]} : vector<10x256xf32> to vector<1x64xf32>
    %cst_181 = arith.constant dense<0.000000e+00> : vector<32xf32>
    %536 = vector.multi_reduction <add>, %335, %cst_181 [1] : vector<32x64xf32> to vector<32xf32>
    %537 = vector.shape_cast %536 : vector<32xf32> to vector<32x1xf32>
    %cst_182 = arith.constant 6.400000e+01 : f32
    %538 = vector.broadcast %cst_182 : f32 to vector<32x1xf32>
    %539 = arith.divf %537, %538 : vector<32x1xf32>
    %540 = vector.broadcast %539 : vector<32x1xf32> to vector<32x64xf32>
    %541 = arith.subf %335, %540 : vector<32x64xf32>
    %542 = arith.mulf %541, %541 : vector<32x64xf32>
    %cst_183 = arith.constant dense<0.000000e+00> : vector<32xf32>
    %543 = vector.multi_reduction <add>, %542, %cst_183 [1] : vector<32x64xf32> to vector<32xf32>
    %544 = vector.shape_cast %543 : vector<32xf32> to vector<32x1xf32>
    %cst_184 = arith.constant 6.400000e+01 : f32
    %545 = vector.broadcast %cst_184 : f32 to vector<32x1xf32>
    %546 = arith.divf %544, %545 : vector<32x1xf32>
    %cst_185 = arith.constant 9.99999997E-7 : f32
    %547 = vector.broadcast %cst_185 : f32 to vector<32x1xf32>
    %548 = arith.addf %546, %547 : vector<32x1xf32>
    %549 = math.rsqrt %548 : vector<32x1xf32>
    %550 = vector.broadcast %549 : vector<32x1xf32> to vector<32x64xf32>
    %551 = arith.mulf %541, %550 : vector<32x64xf32>
    %552 = vector.broadcast %526 : vector<1x64xf32> to vector<32x64xf32>
    %553 = arith.mulf %551, %552 : vector<32x64xf32>
    %554 = vector.broadcast %527 : vector<1x64xf32> to vector<32x64xf32>
    %555 = arith.addf %553, %554 : vector<32x64xf32>
    %556 = vector.extract_strided_slice %517 {offsets = [0, 64], sizes = [64, 128], strides = [1, 1]} : vector<64x192xf32> to vector<64x128xf32>
    %cst_186 = arith.constant dense<0.000000e+00> : vector<32x128xf32>
    %557 = tpu.matmul %555, %556, %cst_186 {dimension_numbers = #tpu.dot_dimension_numbers<[1], [0], [0], [1], [0, 0, 1, 1], [], []>} : vector<32x64xf32>, vector<64x128xf32>, vector<32x128xf32> -> vector<32x128xf32>
    %558 = vector.extract_strided_slice %528 {offsets = [0, 64], sizes = [1, 128], strides = [1, 1]} : vector<1x192xf32> to vector<1x128xf32>
    %559 = vector.broadcast %558 : vector<1x128xf32> to vector<32x128xf32>
    %560 = arith.addf %557, %559 : vector<32x128xf32>
    %cst_187 = arith.constant dense<0.000000e+00> : vector<2xf32>
    %561 = vector.multi_reduction <add>, %515, %cst_187 [1] : vector<2x64xf32> to vector<2xf32>
    %562 = vector.shape_cast %561 : vector<2xf32> to vector<2x1xf32>
    %cst_188 = arith.constant 6.400000e+01 : f32
    %563 = vector.broadcast %cst_188 : f32 to vector<2x1xf32>
    %564 = arith.divf %562, %563 : vector<2x1xf32>
    %565 = vector.broadcast %564 : vector<2x1xf32> to vector<2x64xf32>
    %566 = arith.subf %515, %565 : vector<2x64xf32>
    %567 = arith.mulf %566, %566 : vector<2x64xf32>
    %cst_189 = arith.constant dense<0.000000e+00> : vector<2xf32>
    %568 = vector.multi_reduction <add>, %567, %cst_189 [1] : vector<2x64xf32> to vector<2xf32>
    %569 = vector.shape_cast %568 : vector<2xf32> to vector<2x1xf32>
    %cst_190 = arith.constant 6.400000e+01 : f32
    %570 = vector.broadcast %cst_190 : f32 to vector<2x1xf32>
    %571 = arith.divf %569, %570 : vector<2x1xf32>
    %cst_191 = arith.constant 9.99999997E-7 : f32
    %572 = vector.broadcast %cst_191 : f32 to vector<2x1xf32>
    %573 = arith.addf %571, %572 : vector<2x1xf32>
    %574 = math.rsqrt %573 : vector<2x1xf32>
    %575 = vector.broadcast %574 : vector<2x1xf32> to vector<2x64xf32>
    %576 = arith.mulf %566, %575 : vector<2x64xf32>
    %577 = vector.broadcast %526 : vector<1x64xf32> to vector<2x64xf32>
    %578 = arith.mulf %576, %577 : vector<2x64xf32>
    %579 = vector.broadcast %527 : vector<1x64xf32> to vector<2x64xf32>
    %580 = arith.addf %578, %579 : vector<2x64xf32>
    %cst_192 = arith.constant dense<0.000000e+00> : vector<2x192xf32>
    %581 = tpu.matmul %580, %517, %cst_192 {dimension_numbers = #tpu.dot_dimension_numbers<[1], [0], [0], [1], [0, 0, 1, 1], [], []>} : vector<2x64xf32>, vector<64x192xf32>, vector<2x192xf32> -> vector<2x192xf32>
    %582 = vector.broadcast %528 : vector<1x192xf32> to vector<2x192xf32>
    %583 = arith.addf %581, %582 : vector<2x192xf32>
    %584 = vector.extract_strided_slice %583 {offsets = [0, 0], sizes = [1, 64], strides = [1, 1]} : vector<2x192xf32> to vector<1x64xf32>
    %cst_193 = arith.constant 2.500000e-01 : f32
    %585 = vector.broadcast %cst_193 : f32 to vector<1x64xf32>
    %586 = arith.mulf %584, %585 : vector<1x64xf32>
    %587 = vector.extract_strided_slice %583 {offsets = [0, 64], sizes = [1, 64], strides = [1, 1]} : vector<2x192xf32> to vector<1x64xf32>
    %588 = vector.extract_strided_slice %583 {offsets = [0, 128], sizes = [1, 64], strides = [1, 1]} : vector<2x192xf32> to vector<1x64xf32>
    %589 = vector.extract_strided_slice %560 {offsets = [0, 0], sizes = [16, 64], strides = [1, 1]} : vector<32x128xf32> to vector<16x64xf32>
    %590 = vector.extract_strided_slice %560 {offsets = [0, 64], sizes = [16, 64], strides = [1, 1]} : vector<32x128xf32> to vector<16x64xf32>
    %591 = tpu.concatenate %586, %586, %586, %586 in 0 : vector<1x64xf32>, vector<1x64xf32>, vector<1x64xf32>, vector<1x64xf32> -> vector<4x64xf32>
    %592 = arith.mulf %591, %2 : vector<4x64xf32>
    %cst_194 = arith.constant dense<0.000000e+00> : vector<4x16xf32>
    %593 = tpu.matmul %592, %589, %cst_194 {dimension_numbers = #tpu.dot_dimension_numbers<[1], [1], [0], [0], [0, 0, 1, 0], [], []>} : vector<4x64xf32>, vector<16x64xf32>, vector<4x16xf32> -> vector<4x16xf32>
    %cst_195 = arith.constant dense<0.000000e+00> : vector<4x1xf32>
    %594 = tpu.matmul %592, %587, %cst_195 {dimension_numbers = #tpu.dot_dimension_numbers<[1], [1], [0], [0], [0, 0, 1, 0], [], []>} : vector<4x64xf32>, vector<1x64xf32>, vector<4x1xf32> -> vector<4x1xf32>
    %cst_196 = arith.constant dense<0xFF800000> : vector<4xf32>
    %595 = vector.multi_reduction <maximumf>, %593, %cst_196 [1] : vector<4x16xf32> to vector<4xf32>
    %596 = vector.shape_cast %595 : vector<4xf32> to vector<4x1xf32>
    %597 = arith.maximumf %596, %594 : vector<4x1xf32>
    %598 = vector.broadcast %597 : vector<4x1xf32> to vector<4x16xf32>
    %599 = arith.subf %593, %598 : vector<4x16xf32>
    %600 = math.exp %599 : vector<4x16xf32>
    %601 = arith.subf %594, %597 : vector<4x1xf32>
    %602 = math.exp %601 : vector<4x1xf32>
    %cst_197 = arith.constant dense<0.000000e+00> : vector<4xf32>
    %603 = vector.multi_reduction <add>, %600, %cst_197 [1] : vector<4x16xf32> to vector<4xf32>
    %604 = vector.shape_cast %603 : vector<4xf32> to vector<4x1xf32>
    %605 = arith.addf %604, %602 : vector<4x1xf32>
    %cst_198 = arith.constant dense<0.000000e+00> : vector<4x64xf32>
    %606 = tpu.matmul %600, %590, %cst_198 {dimension_numbers = #tpu.dot_dimension_numbers<[1], [0], [0], [1], [0, 0, 1, 1], [], []>} : vector<4x16xf32>, vector<16x64xf32>, vector<4x64xf32> -> vector<4x64xf32>
    %607 = vector.broadcast %602 : vector<4x1xf32> to vector<4x64xf32>
    %608 = vector.broadcast %588 : vector<1x64xf32> to vector<4x64xf32>
    %609 = arith.mulf %607, %608 : vector<4x64xf32>
    %610 = arith.addf %606, %609 : vector<4x64xf32>
    %611 = tpu.reciprocal %605 {approx = true} : vector<4x1xf32> -> vector<4x1xf32>
    %612 = vector.broadcast %611 : vector<4x1xf32> to vector<4x64xf32>
    %613 = arith.mulf %610, %612 : vector<4x64xf32>
    %614 = arith.mulf %613, %2 : vector<4x64xf32>
    %cst_199 = arith.constant dense<0.000000e+00> : vector<64xf32>
    %615 = vector.multi_reduction <add>, %614, %cst_199 [0] : vector<4x64xf32> to vector<64xf32>
    %616 = vector.shape_cast %615 : vector<64xf32> to vector<1x64xf32>
    %617 = vector.extract_strided_slice %583 {offsets = [1, 0], sizes = [1, 64], strides = [1, 1]} : vector<2x192xf32> to vector<1x64xf32>
    %cst_200 = arith.constant 2.500000e-01 : f32
    %618 = vector.broadcast %cst_200 : f32 to vector<1x64xf32>
    %619 = arith.mulf %617, %618 : vector<1x64xf32>
    %620 = vector.extract_strided_slice %583 {offsets = [1, 64], sizes = [1, 64], strides = [1, 1]} : vector<2x192xf32> to vector<1x64xf32>
    %621 = vector.extract_strided_slice %583 {offsets = [1, 128], sizes = [1, 64], strides = [1, 1]} : vector<2x192xf32> to vector<1x64xf32>
    %622 = vector.extract_strided_slice %560 {offsets = [16, 0], sizes = [16, 64], strides = [1, 1]} : vector<32x128xf32> to vector<16x64xf32>
    %623 = vector.extract_strided_slice %560 {offsets = [16, 64], sizes = [16, 64], strides = [1, 1]} : vector<32x128xf32> to vector<16x64xf32>
    %624 = tpu.concatenate %619, %619, %619, %619 in 0 : vector<1x64xf32>, vector<1x64xf32>, vector<1x64xf32>, vector<1x64xf32> -> vector<4x64xf32>
    %625 = arith.mulf %624, %2 : vector<4x64xf32>
    %cst_201 = arith.constant dense<0.000000e+00> : vector<4x16xf32>
    %626 = tpu.matmul %625, %622, %cst_201 {dimension_numbers = #tpu.dot_dimension_numbers<[1], [1], [0], [0], [0, 0, 1, 0], [], []>} : vector<4x64xf32>, vector<16x64xf32>, vector<4x16xf32> -> vector<4x16xf32>
    %cst_202 = arith.constant dense<0.000000e+00> : vector<4x1xf32>
    %627 = tpu.matmul %625, %620, %cst_202 {dimension_numbers = #tpu.dot_dimension_numbers<[1], [1], [0], [0], [0, 0, 1, 0], [], []>} : vector<4x64xf32>, vector<1x64xf32>, vector<4x1xf32> -> vector<4x1xf32>
    %cst_203 = arith.constant dense<0xFF800000> : vector<4xf32>
    %628 = vector.multi_reduction <maximumf>, %626, %cst_203 [1] : vector<4x16xf32> to vector<4xf32>
    %629 = vector.shape_cast %628 : vector<4xf32> to vector<4x1xf32>
    %630 = arith.maximumf %629, %627 : vector<4x1xf32>
    %631 = vector.broadcast %630 : vector<4x1xf32> to vector<4x16xf32>
    %632 = arith.subf %626, %631 : vector<4x16xf32>
    %633 = math.exp %632 : vector<4x16xf32>
    %634 = arith.subf %627, %630 : vector<4x1xf32>
    %635 = math.exp %634 : vector<4x1xf32>
    %cst_204 = arith.constant dense<0.000000e+00> : vector<4xf32>
    %636 = vector.multi_reduction <add>, %633, %cst_204 [1] : vector<4x16xf32> to vector<4xf32>
    %637 = vector.shape_cast %636 : vector<4xf32> to vector<4x1xf32>
    %638 = arith.addf %637, %635 : vector<4x1xf32>
    %cst_205 = arith.constant dense<0.000000e+00> : vector<4x64xf32>
    %639 = tpu.matmul %633, %623, %cst_205 {dimension_numbers = #tpu.dot_dimension_numbers<[1], [0], [0], [1], [0, 0, 1, 1], [], []>} : vector<4x16xf32>, vector<16x64xf32>, vector<4x64xf32> -> vector<4x64xf32>
    %640 = vector.broadcast %635 : vector<4x1xf32> to vector<4x64xf32>
    %641 = vector.broadcast %621 : vector<1x64xf32> to vector<4x64xf32>
    %642 = arith.mulf %640, %641 : vector<4x64xf32>
    %643 = arith.addf %639, %642 : vector<4x64xf32>
    %644 = tpu.reciprocal %638 {approx = true} : vector<4x1xf32> -> vector<4x1xf32>
    %645 = vector.broadcast %644 : vector<4x1xf32> to vector<4x64xf32>
    %646 = arith.mulf %643, %645 : vector<4x64xf32>
    %647 = arith.mulf %646, %2 : vector<4x64xf32>
    %cst_206 = arith.constant dense<0.000000e+00> : vector<64xf32>
    %648 = vector.multi_reduction <add>, %647, %cst_206 [0] : vector<4x64xf32> to vector<64xf32>
    %649 = vector.shape_cast %648 : vector<64xf32> to vector<1x64xf32>
    %650 = tpu.concatenate %616, %649 in 0 : vector<1x64xf32>, vector<1x64xf32> -> vector<2x64xf32>
    %cst_207 = arith.constant dense<0.000000e+00> : vector<2x64xf32>
    %651 = tpu.matmul %650, %519, %cst_207 {dimension_numbers = #tpu.dot_dimension_numbers<[1], [0], [0], [1], [0, 0, 1, 1], [], []>} : vector<2x64xf32>, vector<64x64xf32>, vector<2x64xf32> -> vector<2x64xf32>
    %652 = vector.broadcast %529 : vector<1x64xf32> to vector<2x64xf32>
    %653 = arith.addf %651, %652 : vector<2x64xf32>
    %654 = vector.broadcast %530 : vector<1x64xf32> to vector<2x64xf32>
    %655 = arith.mulf %654, %653 : vector<2x64xf32>
    %656 = arith.addf %515, %655 : vector<2x64xf32>
    %cst_208 = arith.constant dense<0.000000e+00> : vector<2xf32>
    %657 = vector.multi_reduction <add>, %656, %cst_208 [1] : vector<2x64xf32> to vector<2xf32>
    %658 = vector.shape_cast %657 : vector<2xf32> to vector<2x1xf32>
    %cst_209 = arith.constant 6.400000e+01 : f32
    %659 = vector.broadcast %cst_209 : f32 to vector<2x1xf32>
    %660 = arith.divf %658, %659 : vector<2x1xf32>
    %661 = vector.broadcast %660 : vector<2x1xf32> to vector<2x64xf32>
    %662 = arith.subf %656, %661 : vector<2x64xf32>
    %663 = arith.mulf %662, %662 : vector<2x64xf32>
    %cst_210 = arith.constant dense<0.000000e+00> : vector<2xf32>
    %664 = vector.multi_reduction <add>, %663, %cst_210 [1] : vector<2x64xf32> to vector<2xf32>
    %665 = vector.shape_cast %664 : vector<2xf32> to vector<2x1xf32>
    %cst_211 = arith.constant 6.400000e+01 : f32
    %666 = vector.broadcast %cst_211 : f32 to vector<2x1xf32>
    %667 = arith.divf %665, %666 : vector<2x1xf32>
    %cst_212 = arith.constant 9.99999997E-7 : f32
    %668 = vector.broadcast %cst_212 : f32 to vector<2x1xf32>
    %669 = arith.addf %667, %668 : vector<2x1xf32>
    %670 = math.rsqrt %669 : vector<2x1xf32>
    %671 = vector.broadcast %670 : vector<2x1xf32> to vector<2x64xf32>
    %672 = arith.mulf %662, %671 : vector<2x64xf32>
    %673 = vector.broadcast %531 : vector<1x64xf32> to vector<2x64xf32>
    %674 = arith.mulf %672, %673 : vector<2x64xf32>
    %675 = vector.broadcast %532 : vector<1x64xf32> to vector<2x64xf32>
    %676 = arith.addf %674, %675 : vector<2x64xf32>
    %cst_213 = arith.constant dense<0.000000e+00> : vector<2x256xf32>
    %677 = tpu.matmul %676, %521, %cst_213 {dimension_numbers = #tpu.dot_dimension_numbers<[1], [0], [0], [1], [0, 0, 1, 1], [], []>} : vector<2x64xf32>, vector<64x256xf32>, vector<2x256xf32> -> vector<2x256xf32>
    %678 = vector.broadcast %533 : vector<1x256xf32> to vector<2x256xf32>
    %679 = arith.addf %677, %678 : vector<2x256xf32>
    %cst_214 = arith.constant 5.000000e-01 : f32
    %680 = vector.broadcast %cst_214 : f32 to vector<2x256xf32>
    %681 = arith.mulf %680, %679 : vector<2x256xf32>
    %cst_215 = arith.constant 0.707106769 : f32
    %682 = vector.broadcast %cst_215 : f32 to vector<2x256xf32>
    %683 = arith.mulf %679, %682 : vector<2x256xf32>
    %684 = math.erf %683 : vector<2x256xf32>
    %cst_216 = arith.constant 1.000000e+00 : f32
    %685 = vector.broadcast %cst_216 : f32 to vector<2x256xf32>
    %686 = arith.addf %685, %684 : vector<2x256xf32>
    %687 = arith.mulf %681, %686 : vector<2x256xf32>
    %cst_217 = arith.constant dense<0.000000e+00> : vector<2x64xf32>
    %688 = tpu.matmul %687, %523, %cst_217 {dimension_numbers = #tpu.dot_dimension_numbers<[1], [0], [0], [1], [0, 0, 1, 1], [], []>} : vector<2x256xf32>, vector<256x64xf32>, vector<2x64xf32> -> vector<2x64xf32>
    %689 = vector.broadcast %534 : vector<1x64xf32> to vector<2x64xf32>
    %690 = arith.addf %688, %689 : vector<2x64xf32>
    %691 = vector.broadcast %535 : vector<1x64xf32> to vector<2x64xf32>
    %692 = arith.mulf %691, %690 : vector<2x64xf32>
    %693 = arith.addf %656, %692 : vector<2x64xf32>
    %694 = vector.extract_strided_slice %0 {offsets = [18, 0], sizes = [1, 64], strides = [1, 1]} : vector<20x64xf32> to vector<1x64xf32>
    %695 = vector.extract_strided_slice %0 {offsets = [19, 0], sizes = [1, 64], strides = [1, 1]} : vector<20x64xf32> to vector<1x64xf32>
    %cst_218 = arith.constant dense<0.000000e+00> : vector<32xf32>
    %696 = vector.multi_reduction <add>, %335, %cst_218 [1] : vector<32x64xf32> to vector<32xf32>
    %697 = vector.shape_cast %696 : vector<32xf32> to vector<32x1xf32>
    %cst_219 = arith.constant 6.400000e+01 : f32
    %698 = vector.broadcast %cst_219 : f32 to vector<32x1xf32>
    %699 = arith.divf %697, %698 : vector<32x1xf32>
    %700 = vector.broadcast %699 : vector<32x1xf32> to vector<32x64xf32>
    %701 = arith.subf %335, %700 : vector<32x64xf32>
    %702 = arith.mulf %701, %701 : vector<32x64xf32>
    %cst_220 = arith.constant dense<0.000000e+00> : vector<32xf32>
    %703 = vector.multi_reduction <add>, %702, %cst_220 [1] : vector<32x64xf32> to vector<32xf32>
    %704 = vector.shape_cast %703 : vector<32xf32> to vector<32x1xf32>
    %cst_221 = arith.constant 6.400000e+01 : f32
    %705 = vector.broadcast %cst_221 : f32 to vector<32x1xf32>
    %706 = arith.divf %704, %705 : vector<32x1xf32>
    %cst_222 = arith.constant 9.99999997E-7 : f32
    %707 = vector.broadcast %cst_222 : f32 to vector<32x1xf32>
    %708 = arith.addf %706, %707 : vector<32x1xf32>
    %709 = math.rsqrt %708 : vector<32x1xf32>
    %710 = vector.broadcast %709 : vector<32x1xf32> to vector<32x64xf32>
    %711 = arith.mulf %701, %710 : vector<32x64xf32>
    %712 = vector.broadcast %694 : vector<1x64xf32> to vector<32x64xf32>
    %713 = arith.mulf %711, %712 : vector<32x64xf32>
    %714 = vector.broadcast %695 : vector<1x64xf32> to vector<32x64xf32>
    %715 = arith.addf %713, %714 : vector<32x64xf32>
    %c0_223 = arith.constant 0 : index
    %c0_224 = arith.constant 0 : index
    %716 = vector.load %arg18[%c0_223, %c0_224] : memref<32x64xf32, #tpu.memory_space<vmem>>, vector<32x64xf32>
    tpu.vector_store %arg18[%c0_223, %c0_224], %715 {strides = array<i32>} : memref<32x64xf32, #tpu.memory_space<vmem>>, vector<32x64xf32>,
    %cst_225 = arith.constant dense<0.000000e+00> : vector<2xf32>
    %717 = vector.multi_reduction <add>, %693, %cst_225 [1] : vector<2x64xf32> to vector<2xf32>
    %718 = vector.shape_cast %717 : vector<2xf32> to vector<2x1xf32>
    %cst_226 = arith.constant 6.400000e+01 : f32
    %719 = vector.broadcast %cst_226 : f32 to vector<2x1xf32>
    %720 = arith.divf %718, %719 : vector<2x1xf32>
    %721 = vector.broadcast %720 : vector<2x1xf32> to vector<2x64xf32>
    %722 = arith.subf %693, %721 : vector<2x64xf32>
    %723 = arith.mulf %722, %722 : vector<2x64xf32>
    %cst_227 = arith.constant dense<0.000000e+00> : vector<2xf32>
    %724 = vector.multi_reduction <add>, %723, %cst_227 [1] : vector<2x64xf32> to vector<2xf32>
    %725 = vector.shape_cast %724 : vector<2xf32> to vector<2x1xf32>
    %cst_228 = arith.constant 6.400000e+01 : f32
    %726 = vector.broadcast %cst_228 : f32 to vector<2x1xf32>
    %727 = arith.divf %725, %726 : vector<2x1xf32>
    %cst_229 = arith.constant 9.99999997E-7 : f32
    %728 = vector.broadcast %cst_229 : f32 to vector<2x1xf32>
    %729 = arith.addf %727, %728 : vector<2x1xf32>
    %730 = math.rsqrt %729 : vector<2x1xf32>
    %731 = vector.broadcast %730 : vector<2x1xf32> to vector<2x64xf32>
    %732 = arith.mulf %722, %731 : vector<2x64xf32>
    %733 = vector.broadcast %694 : vector<1x64xf32> to vector<2x64xf32>
    %734 = arith.mulf %732, %733 : vector<2x64xf32>
    %735 = vector.broadcast %695 : vector<1x64xf32> to vector<2x64xf32>
    %736 = arith.addf %734, %735 : vector<2x64xf32>
    %c0_230 = arith.constant 0 : index
    %c0_231 = arith.constant 0 : index
    %737 = vector.load %arg19[%c0_230, %c0_231] : memref<2x64xf32, #tpu.memory_space<vmem>>, vector<2x64xf32>
    tpu.vector_store %arg19[%c0_230, %c0_231], %736 {strides = array<i32>} : memref<2x64xf32, #tpu.memory_space<vmem>>, vector<2x64xf32>,
    return
  }
  func.func @transform_0(%arg0: i32) -> (i32, i32) {
    %c0_i32 = arith.constant 0 : i32
    %c0_i32_0 = arith.constant 0 : i32
    %c0_i32_1 = arith.constant 0 : i32
    return %c0_i32, %c0_i32_0 : i32, i32
  }
  func.func @transform_1(%arg0: i32) -> (i32, i32) {
    %c0_i32 = arith.constant 0 : i32
    %c0_i32_0 = arith.constant 0 : i32
    %c0_i32_1 = arith.constant 0 : i32
    return %c0_i32, %c0_i32_0 : i32, i32
  }
  func.func @transform_2(%arg0: i32) -> (i32, i32) {
    %c0_i32 = arith.constant 0 : i32
    %c0_i32_0 = arith.constant 0 : i32
    %c0_i32_1 = arith.constant 0 : i32
    return %c0_i32, %c0_i32_0 : i32, i32
  }
  func.func @transform_3(%arg0: i32) -> (i32, i32, i32) {
    %c0_i32 = arith.constant 0 : i32
    %c0_i32_0 = arith.constant 0 : i32
    %c0_i32_1 = arith.constant 0 : i32
    %c0_i32_2 = arith.constant 0 : i32
    return %c0_i32, %c0_i32_0, %c0_i32_1 : i32, i32, i32
  }
  func.func @transform_4(%arg0: i32) -> (i32, i32, i32) {
    %c0_i32 = arith.constant 0 : i32
    %c0_i32_0 = arith.constant 0 : i32
    %c0_i32_1 = arith.constant 0 : i32
    %c0_i32_2 = arith.constant 0 : i32
    return %c0_i32, %c0_i32_0, %c0_i32_1 : i32, i32, i32
  }
  func.func @transform_5(%arg0: i32) -> (i32, i32, i32) {
    %c0_i32 = arith.constant 0 : i32
    %c0_i32_0 = arith.constant 0 : i32
    %c0_i32_1 = arith.constant 0 : i32
    %c0_i32_2 = arith.constant 0 : i32
    return %c0_i32, %c0_i32_0, %c0_i32_1 : i32, i32, i32
  }
  func.func @transform_6(%arg0: i32) -> (i32, i32, i32) {
    %c0_i32 = arith.constant 0 : i32
    %c0_i32_0 = arith.constant 0 : i32
    %c0_i32_1 = arith.constant 0 : i32
    %c0_i32_2 = arith.constant 0 : i32
    return %c0_i32, %c0_i32_0, %c0_i32_1 : i32, i32, i32
  }
  func.func @transform_7(%arg0: i32) -> (i32, i32, i32) {
    %c0_i32 = arith.constant 0 : i32
    %c0_i32_0 = arith.constant 0 : i32
    %c0_i32_1 = arith.constant 0 : i32
    %c0_i32_2 = arith.constant 0 : i32
    return %c0_i32, %c0_i32_0, %c0_i32_1 : i32, i32, i32
  }
  func.func @transform_8(%arg0: i32) -> (i32, i32, i32, i32) {
    %c0_i32 = arith.constant 0 : i32
    %c0_i32_0 = arith.constant 0 : i32
    %c0_i32_1 = arith.constant 0 : i32
    %c0_i32_2 = arith.constant 0 : i32
    %c0_i32_3 = arith.constant 0 : i32
    return %c0_i32, %c0_i32_0, %c0_i32_1, %c0_i32_2 : i32, i32, i32, i32
  }
  func.func @transform_9(%arg0: i32) -> (i32, i32, i32, i32) {
    %c0_i32 = arith.constant 0 : i32
    %c0_i32_0 = arith.constant 0 : i32
    %c0_i32_1 = arith.constant 0 : i32
    %c0_i32_2 = arith.constant 0 : i32
    %c0_i32_3 = arith.constant 0 : i32
    return %c0_i32, %c0_i32_0, %c0_i32_1, %c0_i32_2 : i32, i32, i32, i32
  }
  func.func @transform_10(%arg0: i32) -> (i32, i32) {
    %c0_i32 = arith.constant 0 : i32
    %c0_i32_0 = arith.constant 0 : i32
    %c0_i32_1 = arith.constant 0 : i32
    return %c0_i32, %c0_i32_0 : i32, i32
  }
  func.func @transform_11(%arg0: i32) -> (i32, i32) {
    %c0_i32 = arith.constant 0 : i32
    %c0_i32_0 = arith.constant 0 : i32
    %c0_i32_1 = arith.constant 0 : i32
    return %c0_i32, %c0_i32_0 : i32, i32
  }
  func.func @transform_12(%arg0: i32) -> (i32, i32, i32) {
    %c0_i32 = arith.constant 0 : i32
    %c0_i32_0 = arith.constant 0 : i32
    %c0_i32_1 = arith.constant 0 : i32
    %c0_i32_2 = arith.constant 0 : i32
    return %c0_i32, %c0_i32_0, %c0_i32_1 : i32, i32, i32
  }
  func.func @transform_13(%arg0: i32) -> (i32, i32, i32) {
    %c0_i32 = arith.constant 0 : i32
    %c0_i32_0 = arith.constant 0 : i32
    %c0_i32_1 = arith.constant 0 : i32
    %c0_i32_2 = arith.constant 0 : i32
    return %c0_i32, %c0_i32_0, %c0_i32_1 : i32, i32, i32
  }
  func.func @transform_14(%arg0: i32) -> (i32, i32, i32) {
    %c0_i32 = arith.constant 0 : i32
    %c0_i32_0 = arith.constant 0 : i32
    %c0_i32_1 = arith.constant 0 : i32
    %c0_i32_2 = arith.constant 0 : i32
    return %c0_i32, %c0_i32_0, %c0_i32_1 : i32, i32, i32
  }
  func.func @transform_15(%arg0: i32) -> (i32, i32, i32) {
    %c0_i32 = arith.constant 0 : i32
    %c0_i32_0 = arith.constant 0 : i32
    %c0_i32_1 = arith.constant 0 : i32
    %c0_i32_2 = arith.constant 0 : i32
    return %c0_i32, %c0_i32_0, %c0_i32_1 : i32, i32, i32
  }
  func.func @transform_16(%arg0: i32) -> (i32, i32, i32) {
    %c0_i32 = arith.constant 0 : i32
    %c0_i32_0 = arith.constant 0 : i32
    %c0_i32_1 = arith.constant 0 : i32
    %c0_i32_2 = arith.constant 0 : i32
    return %c0_i32, %c0_i32_0, %c0_i32_1 : i32, i32, i32
  }
  func.func @transform_17(%arg0: i32) -> (i32, i32) {
    %c0_i32 = arith.constant 0 : i32
    %c0_i32_0 = arith.constant 0 : i32
    %c0_i32_1 = arith.constant 0 : i32
    return %c0_i32, %c0_i32_0 : i32, i32
  }
  func.func @transform_18(%arg0: i32) -> (i32, i32) {
    %c0_i32 = arith.constant 0 : i32
    %c0_i32_0 = arith.constant 0 : i32
    %c0_i32_1 = arith.constant 0 : i32
    return %c0_i32, %c0_i32_0 : i32, i32
  }
}

</mosaic_0001>

<bundles_post_ra>
// kernel: cait_forward.1
= control target key start
LH: loop header
LB: loop body
LE: loop exit
PB: predicated region body
PF: predicated region fallthrough
CT: control target
= control target key end

     0   :  { %s9568_s0 = inlined_call_operand.vmem [shape: f32[32,768], index: 0, kind: input, shape index: {}]   ;;  %s9569_s1 = inlined_call_operand.vmem [shape: f32[768,64], index: 1, kind: input, shape index: {}]   ;;  %s9570_s2 = inlined_call_operand.vmem [shape: f32[20,64], index: 2, kind: input, shape index: {}]   ;;  %s9571_s3 = inlined_call_operand.vmem [shape: f32[2,64,192], index: 3, kind: input, shape index: {}]   ;;  %s9572_s4 = inlined_call_operand.vmem [shape: f32[2,64,64], index: 4, kind: input, shape index: {}]   ;;  %s9573_s5 = inlined_call_operand.vmem [shape: f32[2,64,256], index: 5, kind: input, shape index: {}]   ;;  %s9574_s6 = inlined_call_operand.vmem [shape: f32[2,256,64], index: 6, kind: input, shape index: {}]   ;;  %s9575_s7 = inlined_call_operand.vmem [shape: f32[2,10,256], index: 7, kind: input, shape index: {}]   ;;  %s9576_s8 = inlined_call_operand.vmem [shape: f32[2,2,64,64], index: 8, kind: input, shape index: {}]   ;;  %s9577_s9 = inlined_call_operand.vmem [shape: f32[2,2,64,16], index: 9, kind: input, shape index: {}]   ;;  %s9578_s10 = inlined_call_operand.vmem [shape: f32[64,64], index: 10, kind: input, shape index: {}]   ;;  %s9579_s11 = inlined_call_operand.vmem [shape: f32[4,64], index: 11, kind: input, shape index: {}]   ;;  %s9580_s12 = inlined_call_operand.vmem [shape: f32[2,64,192], index: 12, kind: input, shape index: {}]   ;;  %s9581_s13 = inlined_call_operand.vmem [shape: f32[2,64,64], index: 13, kind: input, shape index: {}]   ;;  %s9582_s14 = inlined_call_operand.vmem [shape: f32[2,64,256], index: 14, kind: input, shape index: {}]   ;;  %s9583_s15 = inlined_call_operand.vmem [shape: f32[2,256,64], index: 15, kind: input, shape index: {}]   ;;  %s9584_s16 = inlined_call_operand.vmem [shape: f32[2,10,256], index: 16, kind: input, shape index: {}]   ;;  %s9585_s17 = inlined_call_operand.hbm [shape: f32[32,64], index: 17, kind: output, shape index: {0}]   ;;  %s9586_s18 = inlined_call_operand.hbm [shape: f32[2,64], index: 18, kind: output, shape index: {1}]  }
   0x1   :  { %9590 = sst [smem:[#allocation8_spill]] %s9568_s0 }
   0x2   :  { %9591 = sst [smem:[#allocation9_spill]] %s9569_s1 }
   0x3   :  { %9592 = sst [smem:[#allocation10_spill]] %s9570_s2 }
   0x4   :  { %24 = vsyncpa [#allocation3], 0  ;;  %s9593_s29 = sld [smem:[#allocation9_spill]] }
   0x5   :  { %s9594_s27 = sld [smem:[#allocation8_spill]] }
   0xa   :  { %v111_v0 = vld [vmem:[%s9593_s29 + $0x78] sm:$0xff]  ;;  %v110_v2 = vld [vmem:[%s9593_s29 + $0x70] sm:$0xff]  ;;  %v109_v6 = vld [vmem:[%s9593_s29 + $0x68] sm:$0xff] }
   0xb   :  { %v143_v1 = vld [vmem:[%s9593_s29 + $0x178] sm:$0xff]  ;;  %193 = vmatpush.msra.mxu0 %v111_v0  ;;  %v142_v4 = vld [vmem:[%s9593_s29 + $0x170] sm:$0xff]  ;;  %v141_v8 = vld [vmem:[%s9593_s29 + $0x168] sm:$0xff] }
   0xc   :  { %251 = vmatpush.msra.mxu2 %v143_v1  ;;  %v127_v3 = vld [vmem:[%s9593_s29 + $0xf8] sm:$0xff]  ;;  %v126_v7 = vld [vmem:[%s9593_s29 + $0xf0] sm:$0xff]  ;;  %v125_v10 = vld [vmem:[%s9593_s29 + $0xe8] sm:$0xff] }
   0xd   :  { %v159_v5 = vld [vmem:[%s9593_s29 + $0x1f8] sm:$0xff]  ;;  %222 = vmatpush.msra.mxu1 %v127_v3  ;;  %194 = vmatpush.msra.mxu0 %v110_v2  ;;  %v158_v9 = vld [vmem:[%s9593_s29 + $0x1f0] sm:$0xff]  ;;  %v108_v11 = vld [vmem:[%s9593_s29 + $0x60] sm:$0xff] }
   0xe   :  { %280 = vmatpush.msra.mxu3 %v159_v5  ;;  %252 = vmatpush.msra.mxu2 %v142_v4  ;;  %v140_v12 = vld [vmem:[%s9593_s29 + $0x160] sm:$0xff]  ;;  %v157_v13 = vld [vmem:[%s9593_s29 + $0x1e8] sm:$0xff]  ;;  %v107_v16 = vld [vmem:[%s9593_s29 + $0x58] sm:$0xff] }
   0xf   :  { %223 = vmatpush.msra.mxu1 %v126_v7  ;;  %195 = vmatpush.msra.mxu0 %v109_v6  ;;  %v124_v14 = vld [vmem:[%s9593_s29 + $0xe0] sm:$0xff]  ;;  %v139_v17 = vld [vmem:[%s9593_s29 + $0x158] sm:$0xff]  ;;  %v106_v20 = vld [vmem:[%s9593_s29 + $0x50] sm:$0xff] }
  0x10   :  { %281 = vmatpush.msra.mxu3 %v158_v9  ;;  %253 = vmatpush.msra.mxu2 %v141_v8  ;;  %v156_v15 = vld [vmem:[%s9593_s29 + $0x1e0] sm:$0xff]  ;;  %v123_v18 = vld [vmem:[%s9593_s29 + $0xd8] sm:$0xff]  ;;  %v138_v21 = vld [vmem:[%s9593_s29 + $0x150] sm:$0xff] }
  0x11   :  { %224 = vmatpush.msra.mxu1 %v125_v10  ;;  %196 = vmatpush.msra.mxu0 %v108_v11  ;;  %v155_v19 = vld [vmem:[%s9593_s29 + $0x1d8] sm:$0xff]  ;;  %v122_v22 = vld [vmem:[%s9593_s29 + $0xd0] sm:$0xff]  ;;  %v105_v24 = vld [vmem:[%s9593_s29 + $0x48] sm:$0xff] }
  0x12   :  { %282 = vmatpush.msra.mxu3 %v157_v13  ;;  %254 = vmatpush.msra.mxu2 %v140_v12  ;;  %v154_v23 = vld [vmem:[%s9593_s29 + $0x1d0] sm:$0xff]  ;;  %v137_v25 = vld [vmem:[%s9593_s29 + $0x148] sm:$0xff]  ;;  %v104_v28 = vld [vmem:[%s9593_s29 + $0x40] sm:$0xff] }
  0x13   :  { %225 = vmatpush.msra.mxu1 %v124_v14  ;;  %197 = vmatpush.msra.mxu0 %v107_v16  ;;  %v121_v26 = vld [vmem:[%s9593_s29 + $0xc8] sm:$0xff]  ;;  %v136_v29 = vld [vmem:[%s9593_s29 + $0x140] sm:$0xff]  ;;  %v103_v32 = vld [vmem:[%s9593_s29 + $0x38] sm:$0xff] }
  0x14   :  { %283 = vmatpush.msra.mxu3 %v156_v15  ;;  %255 = vmatpush.msra.mxu2 %v139_v17  ;;  %v153_v27 = vld [vmem:[%s9593_s29 + $0x1c8] sm:$0xff]  ;;  %v120_v30 = vld [vmem:[%s9593_s29 + $0xc0] sm:$0xff]  ;;  %v135_v33 = vld [vmem:[%s9593_s29 + $0x138] sm:$0xff] }
  0x15   :  { %226 = vmatpush.msra.mxu1 %v123_v18  ;;  %198 = vmatpush.msra.mxu0 %v106_v20  ;;  %v152_v31 = vld [vmem:[%s9593_s29 + $0x1c0] sm:$0xff]  ;;  %v119_v34 = vld [vmem:[%s9593_s29 + $0xb8] sm:$0xff]  ;;  %v102_v36 = vld [vmem:[%s9593_s29 + $0x30] sm:$0xff] }
  0x16   :  { %284 = vmatpush.msra.mxu3 %v155_v19  ;;  %256 = vmatpush.msra.mxu2 %v138_v21  ;;  %v151_v35 = vld [vmem:[%s9593_s29 + $0x1b8] sm:$0xff]  ;;  %v134_v37 = vld [vmem:[%s9593_s29 + $0x130] sm:$0xff]  ;;  %v101_v40 = vld [vmem:[%s9593_s29 + $0x28] sm:$0xff] }
  0x17   :  { %227 = vmatpush.msra.mxu1 %v122_v22  ;;  %199 = vmatpush.msra.mxu0 %v105_v24  ;;  %v118_v38 = vld [vmem:[%s9593_s29 + $0xb0] sm:$0xff]  ;;  %v133_v41 = vld [vmem:[%s9593_s29 + $0x128] sm:$0xff]  ;;  %v100_v44 = vld [vmem:[%s9593_s29 + $0x20] sm:$0xff] }
  0x18   :  { %285 = vmatpush.msra.mxu3 %v154_v23  ;;  %257 = vmatpush.msra.mxu2 %v137_v25  ;;  %v150_v39 = vld [vmem:[%s9593_s29 + $0x1b0] sm:$0xff]  ;;  %v117_v42 = vld [vmem:[%s9593_s29 + $0xa8] sm:$0xff]  ;;  %v132_v45 = vld [vmem:[%s9593_s29 + $0x120] sm:$0xff] }
  0x19   :  { %228 = vmatpush.msra.mxu1 %v121_v26  ;;  %200 = vmatpush.msra.mxu0 %v104_v28  ;;  %v149_v43 = vld [vmem:[%s9593_s29 + $0x1a8] sm:$0xff]  ;;  %v116_v46 = vld [vmem:[%s9593_s29 + $0xa0] sm:$0xff]  ;;  %v99_v48 = vld [vmem:[%s9593_s29 + $0x18] sm:$0xff] }
  0x1a   :  { %286 = vmatpush.msra.mxu3 %v153_v27  ;;  %258 = vmatpush.msra.mxu2 %v136_v29  ;;  %v148_v47 = vld [vmem:[%s9593_s29 + $0x1a0] sm:$0xff]  ;;  %v131_v49 = vld [vmem:[%s9593_s29 + $0x118] sm:$0xff]  ;;  %v98_v52 = vld [vmem:[%s9593_s29 + $0x10] sm:$0xff] }
  0x1b   :  { %229 = vmatpush.msra.mxu1 %v120_v30  ;;  %201 = vmatpush.msra.mxu0 %v103_v32  ;;  %v115_v50 = vld [vmem:[%s9593_s29 + $0x98] sm:$0xff]  ;;  %v130_v53 = vld [vmem:[%s9593_s29 + $0x110] sm:$0xff]  ;;  %v97_v56 = vld [vmem:[%s9593_s29 + $0x8] sm:$0xff] }
  0x1c   :  { %287 = vmatpush.msra.mxu3 %v152_v31  ;;  %259 = vmatpush.msra.mxu2 %v135_v33  ;;  %v147_v51 = vld [vmem:[%s9593_s29 + $0x198] sm:$0xff]  ;;  %v114_v54 = vld [vmem:[%s9593_s29 + $0x90] sm:$0xff]  ;;  %v129_v57 = vld [vmem:[%s9593_s29 + $0x108] sm:$0xff] }
  0x1d   :  { %230 = vmatpush.msra.mxu1 %v119_v34  ;;  %202 = vmatpush.msra.mxu0 %v102_v36  ;;  %v146_v55 = vld [vmem:[%s9593_s29 + $0x190] sm:$0xff]  ;;  %v113_v58 = vld [vmem:[%s9593_s29 + $0x88] sm:$0xff]  ;;  %v96_v60 = vld [vmem:[%s9593_s29] sm:$0xff] }
  0x1e   :  { %288 = vmatpush.msra.mxu3 %v151_v35  ;;  %260 = vmatpush.msra.mxu2 %v134_v37  ;;  %v145_v59 = vld [vmem:[%s9593_s29 + $0x188] sm:$0xff]  ;;  %v128_v61 = vld [vmem:[%s9593_s29 + $0x100] sm:$0xff]  ;;  %v74_v63 = vld [vmem:[%s9594_s27 + $0x10] sm:$0xff] }
  0x1f   :  { %231 = vmatpush.msra.mxu1 %v118_v38  ;;  %203 = vmatpush.msra.mxu0 %v101_v40  ;;  %v72_v62 = vld [vmem:[%s9594_s27] sm:$0xff]  ;;  %v175_v2 = vld [vmem:[%s9593_s29 + $0x278] sm:$0xff]  ;;  %v73_v3 = vld [vmem:[%s9594_s27 + $0x8] sm:$0xff] }
  0x20   :  { %289 = vmatpush.msra.mxu3 %v150_v39  ;;  %261 = vmatpush.msra.mxu2 %v133_v41  ;;  %v112_v0 = vld [vmem:[%s9593_s29 + $0x80] sm:$0xff]  ;;  %v75_v4 = vld [vmem:[%s9594_s27 + $0x18] sm:$0xff]  ;;  %v174_v6 = vld [vmem:[%s9593_s29 + $0x270] sm:$0xff] }
  0x21   :  { %232 = vmatpush.msra.mxu1 %v117_v42  ;;  %204 = vmatpush.msra.mxu0 %v100_v44  ;;  %v144_v1 = vld [vmem:[%s9593_s29 + $0x180] sm:$0xff]  ;;  %v191_v5 = vld [vmem:[%s9593_s29 + $0x2f8] sm:$0xff]  ;;  %v190_v7 = vld [vmem:[%s9593_s29 + $0x2f0] sm:$0xff] }
  0x22   :  { %290 = vmatpush.msra.mxu3 %v149_v43  ;;  %262 = vmatpush.msra.mxu2 %v132_v45  ;;  %v173_v8 = vld [vmem:[%s9593_s29 + $0x268] sm:$0xff]  ;;  %v172_v10 = vld [vmem:[%s9593_s29 + $0x260] sm:$0xff]  ;;  %v78_v12 = vld [vmem:[%s9594_s27 + $0x30] sm:$0xff] }
  0x23   :  { %233 = vmatpush.msra.mxu1 %v116_v46  ;;  %205 = vmatpush.msra.mxu0 %v99_v48  ;;  %v189_v9 = vld [vmem:[%s9593_s29 + $0x2e8] sm:$0xff]  ;;  %v80_v11 = vld [vmem:[%s9594_s27 + $0x40] sm:$0xff] }
  0x24   :  { %291 = vmatpush.msra.mxu3 %v148_v47  ;;  %263 = vmatpush.msra.mxu2 %v131_v49  ;;  %v188_v13 = vld [vmem:[%s9593_s29 + $0x2e0] sm:$0xff] }
  0x25   :  { %234 = vmatpush.msra.mxu1 %v115_v50  ;;  %206 = vmatpush.msra.mxu0 %v98_v52 }
  0x26   :  { %292 = vmatpush.msra.mxu3 %v147_v51  ;;  %264 = vmatpush.msra.mxu2 %v130_v53 }
  0x27   :  { %235 = vmatpush.msra.mxu1 %v114_v54  ;;  %207 = vmatpush.msra.mxu0 %v97_v56 }
  0x28   :  { %293 = vmatpush.msra.mxu3 %v146_v55  ;;  %265 = vmatpush.msra.mxu2 %v129_v57 }
  0x29   :  { %236 = vmatpush.msra.mxu1 %v113_v58  ;;  %208 = vmatpush.msra.mxu0 %v96_v60 }
  0x2a   :  { %294 = vmatpush.msra.mxu3 %v145_v59  ;;  %266 = vmatpush.msra.mxu2 %v128_v61 }
  0x2b   :  { %209 = vmatmul.f32.vlgmr.msra.gmra.mxu0 %v72_v62  ;;  %267 = vmatmul.f32.vlgmr.msra.gmra.mxu2 %v74_v63 }
  0x2c   :  { %237 = vmatpush.msra.mxu1 %v112_v0  ;;  %295 = vmatpush.msra.mxu3 %v144_v1 }
  0x2d   :  { %309 = vmatpush.msrb.mxu0 %v175_v2  ;;  %238 = vmatmul.f32.vlgmr.msra.gmra.mxu1 %v73_v3 }
  0x2e   :  { %296 = vmatmul.f32.vlgmr.msra.gmra.mxu3 %v75_v4  ;;  %338 = vmatpush.msrb.mxu1 %v191_v5 }
  0x2f   :  { %310 = vmatpush.msrb.mxu0 %v174_v6  ;;  %5656 = vmatpush.msrb.mxu2 %v191_v5 }
  0x30   :  { %339 = vmatpush.msrb.mxu1 %v190_v7 }
  0x31   :  { %311 = vmatpush.msrb.mxu0 %v173_v8  ;;  %5657 = vmatpush.msrb.mxu2 %v190_v7 }
  0x32   :  { %25 = vsyncpa [#allocation5], 0  ;;  %340 = vmatpush.msrb.mxu1 %v189_v9  ;;  %v171_v14 = vld [vmem:[%s9593_s29 + $0x258] sm:$0xff]  ;;  %v81_v16 = vld [vmem:[%s9594_s27 + $0x48] sm:$0xff]  ;;  %s9595_s25 = sld [smem:[#allocation10_spill]]  ;;  %vm370_vm0 = vcmask 1046528  }
  0x33   :  { %v79_v15 = vld [vmem:[%s9594_s27 + $0x38] sm:$0xff]  ;;  %312 = vmatpush.msrb.mxu0 %v172_v10  ;;  %270 = vmatmul.f32.gmra.mxu2 %v80_v11  ;;  %v170_v18 = vld [vmem:[%s9593_s29 + $0x250] sm:$0xff]  ;;  %v169_v20 = vld [vmem:[%s9593_s29 + $0x248] sm:$0xff]  ;;  %vm489_vm1 = vcmask 523264   ;;  %s6094_s22 = smov 64   ;;  %vm819_vm15 = vcmask 130048  }
  0x34   :  { %v187_v17 = vld [vmem:[%s9593_s29 + $0x2d8] sm:$0xff]  ;;  %212 = vmatmul.f32.gmra.mxu0 %v78_v12  ;;  %341 = vmatpush.msrb.mxu1 %v188_v13  ;;  %v186_v19 = vld [vmem:[%s9593_s29 + $0x2d0] sm:$0xff]  ;;  %v185_v21 = vld [vmem:[%s9593_s29 + $0x2c8] sm:$0xff]  ;;  %s6095_s26 = smov [#allocation2]   ;;  %s6096_s28 = smov 128  }
  0x35   :  { %313 = vmatpush.msrb.mxu0 %v171_v14  ;;  %241 = vmatmul.f32.gmra.mxu1 %v79_v15  ;;  %v168_v22 = vld [vmem:[%s9593_s29 + $0x240] sm:$0xff]  ;;  %v86_v23 = vld [vmem:[%s9594_s27 + $0x70] sm:$0xff]  ;;  %v167_v26 = vld [vmem:[%s9593_s29 + $0x238] sm:$0xff]  ;;  %s6097_s30 = smov 8   ;;  %s5230_s1 = sshll.u32 %s9586_s18, 4  ;;  %s5231_s1 = int_to_ptr.hbm [resolvable:$true] %s5230_s1 }
  0x36   :  { %299 = vmatmul.f32.gmra.mxu3 %v81_v16  ;;  %342 = vmatpush.msrb.mxu1 %v187_v17  ;;  %v84_v24 = vld [vmem:[%s9594_s27 + $0x60] sm:$0xff]  ;;  %v85_v27 = vld [vmem:[%s9594_s27 + $0x68] sm:$0xff]  ;;  %v87_v28 = vld [vmem:[%s9594_s27 + $0x78] sm:$0xff] }
  0x37   :  { %314 = vmatpush.msrb.mxu0 %v170_v18  ;;  %5658 = vmatpush.msrb.mxu2 %v189_v9  ;;  %v184_v25 = vld [vmem:[%s9593_s29 + $0x2c0] sm:$0xff]  ;;  %v183_v29 = vld [vmem:[%s9593_s29 + $0x2b8] sm:$0xff]  ;;  %v166_v30 = vld [vmem:[%s9593_s29 + $0x230] sm:$0xff] }
  0x38   :  { %343 = vmatpush.msrb.mxu1 %v186_v19  ;;  %v182_v31 = vld [vmem:[%s9593_s29 + $0x2b0] sm:$0xff]  ;;  %v165_v32 = vld [vmem:[%s9593_s29 + $0x228] sm:$0xff]  ;;  %v164_v34 = vld [vmem:[%s9593_s29 + $0x220] sm:$0xff] }
  0x39   :  { %315 = vmatpush.msrb.mxu0 %v169_v20  ;;  %5659 = vmatpush.msrb.mxu2 %v188_v13  ;;  %v181_v33 = vld [vmem:[%s9593_s29 + $0x2a8] sm:$0xff]  ;;  %v92_v35 = vld [vmem:[%s9594_s27 + $0xa0] sm:$0xff]  ;;  %v90_v36 = vld [vmem:[%s9594_s27 + $0x90] sm:$0xff] }
  0x3a   :  { %344 = vmatpush.msrb.mxu1 %v185_v21  ;;  %v163_v37 = vld [vmem:[%s9593_s29 + $0x218] sm:$0xff]  ;;  %v180_v38 = vld [vmem:[%s9593_s29 + $0x2a0] sm:$0xff]  ;;  %v93_v40 = vld [vmem:[%s9594_s27 + $0xa8] sm:$0xff] }
  0x3b   :  { %316 = vmatpush.msrb.mxu0 %v168_v22  ;;  %273 = vmatmul.f32.gmra.mxu2 %v86_v23  ;;  %v91_v39 = vld [vmem:[%s9594_s27 + $0x98] sm:$0xff]  ;;  %v162_v41 = vld [vmem:[%s9593_s29 + $0x210] sm:$0xff]  ;;  %v161_v43 = vld [vmem:[%s9593_s29 + $0x208] sm:$0xff] }
  0x3c   :  { %215 = vmatmul.f32.gmra.mxu0 %v84_v24  ;;  %345 = vmatpush.msrb.mxu1 %v184_v25  ;;  %v179_v42 = vld [vmem:[%s9593_s29 + $0x298] sm:$0xff]  ;;  %v178_v44 = vld [vmem:[%s9593_s29 + $0x290] sm:$0xff]  ;;  %v160_v45 = vld [vmem:[%s9593_s29 + $0x200] sm:$0xff] }
  0x3d   :  { %317 = vmatpush.msrb.mxu0 %v167_v26  ;;  %244 = vmatmul.f32.gmra.mxu1 %v85_v27  ;;  %v177_v46 = vld [vmem:[%s9593_s29 + $0x288] sm:$0xff]  ;;  %v76_v47 = vld [vmem:[%s9594_s27 + $0x20] sm:$0xff]  ;;  %v82_v50 = vld [vmem:[%s9594_s27 + $0x50] sm:$0xff] }
  0x3e   :  { %302 = vmatmul.f32.gmra.mxu3 %v87_v28  ;;  %346 = vmatpush.msrb.mxu1 %v183_v29  ;;  %v176_v48 = vld [vmem:[%s9593_s29 + $0x280] sm:$0xff]  ;;  %v77_v49 = vld [vmem:[%s9594_s27 + $0x28] sm:$0xff]  ;;  %v83_v51 = vld [vmem:[%s9594_s27 + $0x58] sm:$0xff] }
  0x3f   :  { %318 = vmatpush.msrb.mxu0 %v166_v30  ;;  %5660 = vmatpush.msrb.mxu2 %v187_v17  ;;  %v89_v52 = vld [vmem:[%s9594_s27 + $0x88] sm:$0xff]  ;;  %v88_v53 = vld [vmem:[%s9594_s27 + $0x80] sm:$0xff]  ;;  %v95_v54 = vld [vmem:[%s9594_s27 + $0xb8] sm:$0xff] }
  0x40   :  { %347 = vmatpush.msrb.mxu1 %v182_v31  ;;  %v94_v55 = vld [vmem:[%s9594_s27 + $0xb0] sm:$0xff]  ;;  %v60_v61 = vld [vmem:[%s9595_s25] sm:$0xff]  ;;  %v61_v8 = vld [vmem:[%s9595_s25 + $0x8] sm:$0xff] }
  0x41   :  { %319 = vmatpush.msrb.mxu0 %v165_v32  ;;  %5661 = vmatpush.msrb.mxu2 %v186_v19  ;;  %v192_v63 = vperm.slane %v60_v61, 0  ;;  %v371_v12 = vrot.slane %v60_v61, 1  ;;  %v372_v13 = vrot.slane %v61_v8, 1  ;;  %v6564_v22 = vld [vmem:[%s9595_s25 + $0x10] sm:$0xf] }
  0x42   :  { %348 = vmatpush.msrb.mxu1 %v181_v33  ;;  %v374_v26 = vrot.slane %v6564_v22, 1 }
  0x43   :  { %320 = vmatpush.msrb.mxu0 %v164_v34  ;;  %276 = vmatmul.f32.gmra.mxu2 %v92_v35  ;;  %v373_v20 = vsel %vm370_vm0, %v371_v12, %v372_v13 }
  0x44   :  { %218 = vmatmul.f32.gmra.mxu0 %v90_v36  ;;  %5662 = vmatpush.msrb.mxu2 %v185_v21  ;;  %v375_v35 = vsel %vm370_vm0, %v372_v13, %v374_v26 }
  0x45   :  { %321 = vmatpush.msrb.mxu0 %v163_v37  ;;  %349 = vmatpush.msrb.mxu1 %v180_v38 }
  0x46   :  { %247 = vmatmul.f32.gmra.mxu1 %v91_v39  ;;  %305 = vmatmul.f32.gmra.mxu3 %v93_v40 }
  0x47   :  { %322 = vmatpush.msrb.mxu0 %v162_v41  ;;  %5663 = vmatpush.msrb.mxu2 %v184_v25 }
  0x48   :  { %350 = vmatpush.msrb.mxu1 %v179_v42 }
  0x49   :  { %323 = vmatpush.msrb.mxu0 %v161_v43  ;;  %5664 = vmatpush.msrb.mxu2 %v183_v29 }
  0x4a   :  { %351 = vmatpush.msrb.mxu1 %v178_v44 }
  0x4b   :  { %324 = vmatpush.msrb.mxu0 %v160_v45  ;;  %5665 = vmatpush.msrb.mxu2 %v182_v31 }
  0x4c   :  { %352 = vmatpush.msrb.mxu1 %v177_v46  ;;  %325 = vmatmul.f32.vlgmr.msrb.gmra.mxu0 %v76_v47 }
  0x4d   :  { %5666 = vmatpush.msrb.mxu2 %v181_v33 }
  0x4e   :  { %353 = vmatpush.msrb.mxu1 %v176_v48 }
  0x4f   :  { %354 = vmatmul.f32.vlgmr.msrb.gmra.mxu1 %v77_v49  ;;  %5667 = vmatpush.msrb.mxu2 %v180_v38 }
  0x51   :  { %5668 = vmatpush.msrb.mxu2 %v179_v42 }
  0x53   :  { %5669 = vmatpush.msrb.mxu2 %v178_v44 }
  0x54   :  { %328 = vmatmul.f32.gmra.mxu0 %v82_v50 }
  0x55   :  { %5670 = vmatpush.msrb.mxu2 %v177_v46 }
  0x57   :  { %357 = vmatmul.f32.gmra.mxu1 %v83_v51  ;;  %5671 = vmatpush.msrb.mxu2 %v176_v48 }
  0x58   :  { %360 = vmatmul.f32.vlgmr.msrb.gmra.mxu2 %v89_v52 }
  0x5c   :  { %331 = vmatmul.f32.gmra.mxu0 %v88_v53 }
  0x60   :  { %363 = vmatmul.f32.gmra.mxu2 %v95_v54 }
  0x64   :  { %334 = vmatmul.f32.gmra.mxu0 %v94_v55 }
  0xa8   :  { %v210_v56 = vpop.f32.mrf.mxu0 }
  0xa9   :  { %v211_v1 = vadd.f32 %v210_v56, %v192_v63 }
  0xaa   :  { %v239_v57 = vpop.f32.mrf.mxu1 }
  0xab   :  { %v240_v5 = vadd.f32 %v239_v57, %v211_v1  ;;  %v6093_v57 = vmov 64.0  }
  0xac   :  { %5780 = vrcp.f32 %v6093_v57 }
  0xae   :  { %v268_v60 = vpop.f32.mrf.mxu2 }
  0xaf   :  { %v269_v7 = vadd.f32 %v268_v60, %v240_v5 }
  0xb1   :  { %v213_v58 = vpop.f32.mrf.mxu0  ;;  %v297_v2 = vpop.f32.mrf.mxu3 }
  0xb2   :  { %v242_v59 = vpop.f32.mrf.mxu1  ;;  %v214_v9 = vadd.f32 %v213_v58, %v192_v63  ;;  %v298_v10 = vadd.f32 %v297_v2, %v269_v7  ;;  %v5781_v58 = vpop.eup %5780 }
  0xb3   :  { %vm507_vm2 = vweird.f32 %v5781_v58 }
  0xb4   :  { %v243_v16 = vadd.f32 %v242_v59, %v214_v9  ;;  %v503_v59 = vmul.f32 64.0, %v5781_v58 }
  0xb6   :  { %v271_v3 = vpop.f32.mrf.mxu2  ;;  %v504_v60 = vsub.f32 1.0, %v503_v59 }
  0xb7   :  { %v272_v18 = vadd.f32 %v271_v3, %v243_v16 }
  0xb8   :  { %v505_v61 = vmul.f32 %v5781_v58, %v504_v60 }
  0xb9   :  { %v216_v62 = vpop.f32.mrf.mxu0  ;;  %v300_v11 = vpop.f32.mrf.mxu3 }
  0xba   :  { %v245_v0 = vpop.f32.mrf.mxu1  ;;  %v217_v23 = vadd.f32 %v216_v62, %v192_v63  ;;  %v301_v25 = vadd.f32 %v300_v11, %v272_v18  ;;  %v506_v62 = vadd.f32 %v5781_v58, %v505_v61 }
  0xbc   :  { %v246_v29 = vadd.f32 %v245_v0, %v217_v23  ;;  %v394_v23 = vld [vmem:[%s9571_s3 + $0x60] sm:$0xff] }
  0xbe   :  { %v274_v14 = vpop.f32.mrf.mxu2 }
  0xbf   :  { %v275_v33 = vadd.f32 %v274_v14, %v246_v29  ;;  %v390_v29 = vld [vmem:[%s9571_s3 + $0x40] sm:$0xff] }
  0xc1   :  { %v219_v4 = vpop.f32.mrf.mxu0  ;;  %v303_v31 = vpop.f32.mrf.mxu3 }
  0xc2   :  { %v220_v37 = vadd.f32 %v219_v4, %v192_v63  ;;  %v304_v39 = vadd.f32 %v303_v31, %v275_v33  ;;  %v6586_v63 = vsel %vm507_vm2, %v5781_v58, %v506_v62  ;;  %v388_v31 = vld [vmem:[%s9571_s3 + $0x30] sm:$0xff]  ;;  %v386_v33 = vld [vmem:[%s9571_s3 + $0x20] sm:$0xff] }
  0xc3   :  { %v248_v6 = vpop.f32.mrf.mxu1 }
  0xc4   :  { %v249_v42 = vadd.f32 %v248_v6, %v220_v37  ;;  %v382_v37 = vld [vmem:[%s9571_s3] sm:$0xff] }
  0xc6   :  { %v277_v32 = vpop.f32.mrf.mxu2 }
  0xc7   :  { %v278_v45 = vadd.f32 %v277_v32, %v249_v42  ;;  %v389_v32 = vld [vmem:[%s9571_s3 + $0x38] sm:$0xff] }
  0xc9   :  { %v326_v15 = vpop.f32.mrf.mxu0  ;;  %v306_v47 = vpop.f32.mrf.mxu3 }
  0xca   :  { %v327_v17 = vadd.f32 %v326_v15, %v298_v10  ;;  %v307_v49 = vadd.f32 %v306_v47, %v278_v45 }
  0xcc   :  { %v355_v19 = vpop.f32.mrf.mxu1 }
  0xcd   :  { %v356_v21 = vadd.f32 %v355_v19, %v327_v17 }
  0xcf   :  { %v6566_v24 = vadd.f32 %v373_v20, %v356_v21  ;;  %v397_v21 = vld [vmem:[%s9571_s3 + $0x78] sm:$0xff] }
  0xd0   :  { %646 = vmatpush.msrb.mxu3 %v397_v21 }
  0xd1   :  { %v329_v27 = vpop.f32.mrf.mxu0  ;;  %v490_v28 = vsel %vm489_vm1, %v6566_v24, 0.0 }
  0xd2   :  { %v330_v30 = vadd.f32 %v329_v27, %v301_v25  ;;  %491 = vadd.xlane.f32.xlu0 %v490_v28  ;;  %v395_v25 = vld [vmem:[%s9571_s3 + $0x68] sm:$0xff]  ;;  %v392_v27 = vld [vmem:[%s9571_s3 + $0x50] sm:$0xff]  ;;  %v393_v28 = vld [vmem:[%s9571_s3 + $0x58] sm:$0xff] }
  0xd3   :  { %647 = vmatpush.msrb.mxu3 %v395_v25 }
  0xd4   :  { %v358_v34 = vpop.f32.mrf.mxu1 }
  0xd5   :  { %v359_v36 = vadd.f32 %v358_v34, %v330_v30  ;;  %648 = vmatpush.msrb.mxu3 %v393_v28  ;;  %v391_v30 = vld [vmem:[%s9571_s3 + $0x48] sm:$0xff] }
  0xd6   :  { %v387_v34 = vld [vmem:[%s9571_s3 + $0x28] sm:$0xff] }
  0xd7   :  { %v6574_v38 = vadd.f32 %v375_v35, %v359_v36  ;;  %649 = vmatpush.msrb.mxu3 %v391_v30  ;;  %v385_v36 = vld [vmem:[%s9571_s3 + $0x18] sm:$0xff] }
  0xd9   :  { %v332_v40 = vpop.f32.mrf.mxu0  ;;  %v493_v41 = vsel %vm489_vm1, %v6574_v38, 0.0  ;;  %650 = vmatpush.msrb.mxu3 %v389_v32 }
  0xda   :  { %v333_v43 = vadd.f32 %v332_v40, %v304_v39  ;;  %494 = vadd.xlane.f32.xlu0 %v493_v41  ;;  %v383_v39 = vld [vmem:[%s9571_s3 + $0x8] sm:$0xff] }
  0xdb   :  { %v361_v44 = vpop.f32.mrf.mxu2  ;;  %651 = vmatpush.msrb.mxu3 %v387_v34 }
  0xdc   :  { %v362_v46 = vadd.f32 %v361_v44, %v333_v43 }
  0xdd   :  { %652 = vmatpush.msrb.mxu3 %v385_v36 }
  0xde   :  { %v6578_v48 = vadd.f32 %v373_v20, %v362_v46  ;;  %v396_v20 = vld [vmem:[%s9571_s3 + $0x70] sm:$0xff] }
  0xdf   :  { %617 = vmatpush.msra.mxu2 %v396_v20  ;;  %653 = vmatpush.msrb.mxu3 %v383_v39 }
  0xe0   :  { %v496_v50 = vsel %vm489_vm1, %v6578_v48, 0.0 }
  0xe1   :  { %v335_v51 = vpop.f32.mrf.mxu0  ;;  %497 = vadd.xlane.f32.xlu2 %v496_v50  ;;  %618 = vmatpush.msra.mxu2 %v394_v23 }
  0xe2   :  { %v336_v52 = vadd.f32 %v335_v51, %v307_v49 }
  0xe3   :  { %v364_v53 = vpop.f32.mrf.mxu2  ;;  %619 = vmatpush.msra.mxu2 %v392_v27 }
  0xe4   :  { %v365_v54 = vadd.f32 %v364_v53, %v336_v52  ;;  %v6670_v53 = vld [vmem:[%s9575_s7] sm:$0xff] }
  0xe5   :  { %620 = vmatpush.msra.mxu2 %v390_v29  ;;  %v585_v60 = vperm.slane %v6670_v53, 0 }
  0xe6   :  { %v6582_v55 = vadd.f32 %v375_v35, %v365_v54  ;;  %v384_v35 = vld [vmem:[%s9571_s3 + $0x10] sm:$0xff] }
  0xe7   :  { %621 = vmatpush.msra.mxu2 %v388_v31 }
  0xe8   :  { %v499_v56 = vsel %vm489_vm1, %v6582_v55, 0.0 }
  0xe9   :  { %500 = vadd.xlane.f32.xlu2 %v499_v56  ;;  %622 = vmatpush.msra.mxu2 %v386_v33 }
  0xeb   :  { %623 = vmatpush.msra.mxu2 %v384_v35 }
  0xed   :  { %624 = vmatpush.msra.mxu2 %v382_v37 }
 0x145   :  { %v492_v0 = vpop.xlane.xlu0 %491 }
 0x146   :  { %v509_v1 = vmul.f32 %v6586_v63, %v492_v0 }
 0x148   :  { %v6590_v2 = vsub.f32 %v6566_v24, %v509_v1 }
 0x14a   :  { %v517_v3 = vmul.f32 %v6590_v2, %v6590_v2 }
 0x14c   :  { %v521_v4 = vsel %vm489_vm1, %v517_v3, 0.0  ;;  %v590_v3 = vperm.slane %v6670_v53, 1 }
 0x14d   :  { %522 = vadd.xlane.f32.xlu1 %v521_v4  ;;  %v495_v5 = vpop.xlane.xlu0 %494 }
 0x14e   :  { %v510_v6 = vmul.f32 %v6586_v63, %v495_v5 }
 0x150   :  { %v6597_v7 = vsub.f32 %v6574_v38, %v510_v6 }
 0x152   :  { %v518_v8 = vmul.f32 %v6597_v7, %v6597_v7 }
 0x154   :  { %v498_v9 = vpop.xlane.xlu2 %497  ;;  %v524_v10 = vsel %vm489_vm1, %v518_v8, 0.0 }
 0x155   :  { %v511_v11 = vmul.f32 %v6586_v63, %v498_v9  ;;  %525 = vadd.xlane.f32.xlu1 %v524_v10 }
 0x157   :  { %v6604_v12 = vsub.f32 %v6578_v48, %v511_v11 }
 0x159   :  { %v519_v13 = vmul.f32 %v6604_v12, %v6604_v12 }
 0x15b   :  { %v527_v14 = vsel %vm489_vm1, %v519_v13, 0.0 }
 0x15c   :  { %v501_v15 = vpop.xlane.xlu2 %500  ;;  %528 = vadd.xlane.f32.xlu0 %v527_v14 }
 0x15d   :  { %v512_v16 = vmul.f32 %v6586_v63, %v501_v15 }
 0x15f   :  { %v6611_v17 = vsub.f32 %v6582_v55, %v512_v16 }
 0x161   :  { %v520_v18 = vmul.f32 %v6611_v17, %v6611_v17 }
 0x163   :  { %v530_v19 = vsel %vm489_vm1, %v520_v18, 0.0 }
 0x164   :  { %531 = vadd.xlane.f32.xlu1 %v530_v19 }
 0x1c0   :  { %v523_v40 = vpop.xlane.xlu1 %522 }
 0x1c1   :  { %v533_v41 = vmul.f32 %v523_v40, %v6586_v63 }
 0x1c3   :  { %v537_v42 = vadd.f32 1e-06, %v533_v41 }
 0x1c5   :  { %5782 = vrsqrt.f32 %v537_v42  ;;  %vm547_vm4 = vweird.f32 %v537_v42 }
 0x1c8   :  { %v526_v43 = vpop.xlane.xlu1 %525 }
 0x1c9   :  { %v534_v44 = vmul.f32 %v526_v43, %v6586_v63 }
 0x1cb   :  { %v5783_v45 = vpop.eup %5782  ;;  %v538_v46 = vadd.f32 1e-06, %v534_v44 }
 0x1cc   :  { %v542_v47 = vmul.f32 %v5783_v45, %v537_v42  ;;  %vm548_vm3 = vweird.f32 %v5783_v45 }
 0x1cd   :  { %5784 = vrsqrt.f32 %v538_v46  ;;  %vm549_vm5 = vmor %vm547_vm4, %vm548_vm3  ;;  %vm557_vm7 = vweird.f32 %v538_v46 }
 0x1ce   :  { %v543_v49 = vmul.f32 %v5783_v45, %v542_v47 }
 0x1cf   :  { %v529_v50 = vpop.xlane.xlu0 %528 }
 0x1d0   :  { %v544_v51 = vmul.f32 0.5, %v543_v49  ;;  %v535_v52 = vmul.f32 %v529_v50, %v6586_v63 }
 0x1d2   :  { %v545_v54 = vsub.f32 1.5, %v544_v51  ;;  %v539_v56 = vadd.f32 1e-06, %v535_v52  ;;  %v455_v52 = vld [vmem:[%s9575_s7 + $0x8] sm:$0xff] }
 0x1d3   :  { %v5785_v57 = vpop.eup %5784 }
 0x1d4   :  { %v546_v58 = vmul.f32 %v5783_v45, %v545_v54  ;;  %v552_v59 = vmul.f32 %v5785_v57, %v538_v46  ;;  %5786 = vrsqrt.f32 %v539_v56  ;;  %vm558_vm6 = vweird.f32 %v5785_v57 }
 0x1d5   :  { %vm559_vm8 = vmor %vm557_vm7, %vm558_vm6  ;;  %vm567_vm10 = vweird.f32 %v539_v56  ;;  %v596_v54 = vperm.slane %v455_v52, 2  ;;  %v462_v52 = vld [vmem:[%s9576_s8 + $0x28] sm:$0xff] }
 0x1d6   :  { %v550_v61 = vsel %vm549_vm5, %v5783_v45, %v546_v58  ;;  %v553_v62 = vmul.f32 %v5785_v57, %v552_v59  ;;  %v6705_v58 = vld [vmem:[%s9578_s10 + $0x38] sm:$0xff] }
 0x1d7   :  { %v581_v0 = vmul.f32 %v550_v61, %v6590_v2  ;;  %v532_v1 = vpop.xlane.xlu1 %531 }
 0x1d8   :  { %v554_v4 = vmul.f32 0.5, %v553_v62  ;;  %v536_v5 = vmul.f32 %v532_v1, %v6586_v63 }
 0x1d9   :  { %v586_v6 = vmul.f32 %v585_v60, %v581_v0 }
 0x1da   :  { %v5787_v8 = vpop.eup %5786  ;;  %v555_v9 = vsub.f32 1.5, %v554_v4  ;;  %v540_v10 = vadd.f32 1e-06, %v536_v5  ;;  %v6716_v5 = vld [vmem:[%s9578_s10 + $0x8] sm:$0xff] }
 0x1db   :  { %v562_v11 = vmul.f32 %v5787_v8, %v539_v56  ;;  %v591_v13 = vadd.f32 %v590_v3, %v586_v6  ;;  %vm568_vm9 = vweird.f32 %v5787_v8 }
 0x1dc   :  { %v556_v14 = vmul.f32 %v5785_v57, %v555_v9  ;;  %5788 = vrsqrt.f32 %v540_v10  ;;  %vm569_vm11 = vmor %vm567_vm10, %vm568_vm9  ;;  %vm577_vm13 = vweird.f32 %v540_v10 }
 0x1dd   :  { %v563_v15 = vmul.f32 %v5787_v8, %v562_v11  ;;  %5244 = vmatmul.msk.f32.vlgmr.msra.gmra.mxu2 %vm489_vm1, %v591_v13  ;;  %5248 = vmatmul.msk.f32.vlgmr.msrb.gmra.mxu3 %vm489_vm1, %v591_v13 }
 0x1de   :  { %v560_v2 = vsel %vm559_vm8, %v5785_v57, %v556_v14  ;;  %v6700_v57 = vld [vmem:[%s9578_s10] sm:$0xff] }
 0x1df   :  { %v564_v16 = vmul.f32 0.5, %v563_v15  ;;  %v582_v18 = vmul.f32 %v560_v2, %v6597_v7  ;;  %v6739_v15 = vld [vmem:[%s9578_s10 + $0x20] sm:$0xff] }
 0x1e1   :  { %v565_v19 = vsub.f32 1.5, %v564_v16  ;;  %v587_v20 = vmul.f32 %v585_v60, %v582_v18  ;;  %v6746_v16 = vld [vmem:[%s9578_s10 + $0x28] sm:$0xff] }
 0x1e2   :  { %v5789_v21 = vpop.eup %5788 }
 0x1e3   :  { %v566_v23 = vmul.f32 %v5787_v8, %v565_v19  ;;  %v572_v25 = vmul.f32 %v5789_v21, %v540_v10  ;;  %v592_v27 = vadd.f32 %v590_v3, %v587_v20  ;;  %vm578_vm12 = vweird.f32 %v5789_v21  ;;  %v6730_v10 = vld [vmem:[%s9578_s10 + $0x18] sm:$0xff]  ;;  %v6753_v19 = vld [vmem:[%s9578_s10 + $0x30] sm:$0xff] }
 0x1e4   :  { %vm579_vm14 = vmor %vm577_vm13, %vm578_vm12 }
 0x1e5   :  { %v573_v28 = vmul.f32 %v5789_v21, %v572_v25  ;;  %5245 = vmatmul.msk.f32.gmra.mxu2 %vm489_vm1, %v592_v27  ;;  %5249 = vmatmul.msk.f32.gmra.mxu3 %vm489_vm1, %v592_v27  ;;  %v570_v29 = vsel %vm569_vm11, %v5787_v8, %v566_v23  ;;  %v6723_v8 = vld [vmem:[%s9578_s10 + $0x10] sm:$0xff] }
 0x1e6   :  { %v583_v30 = vmul.f32 %v570_v29, %v6604_v12  ;;  %v595_v12 = vperm.slane %v6670_v53, 2 }
 0x1e7   :  { %v574_v31 = vmul.f32 0.5, %v573_v28 }
 0x1e8   :  { %v588_v32 = vmul.f32 %v585_v60, %v583_v30 }
 0x1e9   :  { %v575_v7 = vsub.f32 1.5, %v574_v31 }
 0x1ea   :  { %v593_v33 = vadd.f32 %v590_v3, %v588_v32 }
 0x1eb   :  { %v576_v34 = vmul.f32 %v5789_v21, %v575_v7 }
 0x1ed   :  { %v580_v35 = vsel %vm579_vm14, %v5789_v21, %v576_v34  ;;  %5246 = vmatmul.msk.f32.gmra.mxu2 %vm489_vm1, %v593_v33  ;;  %5250 = vmatmul.msk.f32.gmra.mxu3 %vm489_vm1, %v593_v33 }
 0x1ee   :  { %v584_v36 = vmul.f32 %v580_v35, %v6611_v17 }
 0x1f0   :  { %v589_v37 = vmul.f32 %v585_v60, %v584_v36 }
 0x1f2   :  { %v594_v39 = vadd.f32 %v590_v3, %v589_v37 }
 0x1f5   :  { %5247 = vmatmul.msk.f32.gmra.mxu2 %vm489_vm1, %v594_v39  ;;  %5251 = vmatmul.msk.f32.gmra.mxu3 %vm489_vm1, %v594_v39 }
 0x260   :  { %v626_v40 = vpop.f32.mrf.mxu2  ;;  %v655_v47 = vpop.f32.mrf.mxu3 }
 0x261   :  { %v627_v41 = vadd.f32 %v626_v40, %v595_v12  ;;  %v656_v1 = vadd.f32 %v655_v47, %v596_v54  ;;  %v460_v47 = vld [vmem:[%s9576_s8 + $0x18] sm:$0xff] }
 0x263   :  { %681 = vrot.lane.b32.xlu0 %v627_v41, %s6094_s22  ;;  %v667_v53 = vmul.f32 0.25, %v627_v41 }
 0x265   :  { %v671_v62 = vmul.f32 %v667_v53, %v6700_v57  ;;  %v673_v9 = vmul.f32 %v667_v53, %v6723_v8  ;;  %v675_v2 = vmul.f32 %v667_v53, %v6739_v15  ;;  %v677_v20 = vmul.f32 %v667_v53, %v6753_v19 }
 0x268   :  { %v629_v42 = vpop.f32.mrf.mxu2  ;;  %v658_v49 = vpop.f32.mrf.mxu3 }
 0x269   :  { %v630_v43 = vadd.f32 %v629_v42, %v595_v12  ;;  %v659_v59 = vadd.f32 %v658_v49, %v596_v54  ;;  %v457_v42 = vld [vmem:[%s9576_s8] sm:$0xff] }
 0x26b   :  { %683 = vrot.lane.b32.xlu2 %v630_v43, %s6094_s22  ;;  %v668_v56 = vmul.f32 0.25, %v630_v43 }
 0x26d   :  { %v678_v0 = vmul.f32 %v668_v56, %v6705_v58  ;;  %v672_v6 = vmul.f32 %v668_v56, %v6716_v5  ;;  %v674_v13 = vmul.f32 %v668_v56, %v6730_v10  ;;  %v676_v18 = vmul.f32 %v668_v56, %v6746_v16 }
 0x270   :  { %v632_v44 = vpop.f32.mrf.mxu2  ;;  %v661_v51 = vpop.f32.mrf.mxu3 }
 0x271   :  { %v633_v45 = vadd.f32 %v632_v44, %v595_v12  ;;  %v662_v4 = vadd.f32 %v661_v51, %v596_v54  ;;  %v458_v44 = vld [vmem:[%s9576_s8 + $0x8] sm:$0xff] }
 0x273   :  { %1062 = vrot.lane.b32.xlu2 %v633_v45, %s6094_s22  ;;  %v669_v21 = vmul.f32 0.25, %v633_v45 }
 0x275   :  { %v1052_v23 = vmul.f32 %v669_v21, %v6700_v57  ;;  %v1054_v28 = vmul.f32 %v669_v21, %v6723_v8  ;;  %v1056_v30 = vmul.f32 %v669_v21, %v6739_v15  ;;  %v1058_v32 = vmul.f32 %v669_v21, %v6753_v19 }
 0x278   :  { %v635_v17 = vpop.f32.mrf.mxu2  ;;  %v664_v61 = vpop.f32.mrf.mxu3 }
 0x279   :  { %v636_v46 = vadd.f32 %v635_v17, %v595_v12  ;;  %v665_v3 = vadd.f32 %v664_v61, %v596_v54  ;;  %v459_v17 = vld [vmem:[%s9576_s8 + $0x10] sm:$0xff] }
 0x27a   :  { %v463_v54 = vld [vmem:[%s9576_s8 + $0x30] sm:$0xff] }
 0x27b   :  { %1064 = vrot.lane.b32.xlu1 %v636_v46, %s6094_s22  ;;  %v670_v25 = vmul.f32 0.25, %v636_v46 }
 0x27d   :  { %v1053_v27 = vmul.f32 %v670_v25, %v6716_v5  ;;  %v1055_v29 = vmul.f32 %v670_v25, %v6730_v10  ;;  %v1057_v31 = vmul.f32 %v670_v25, %v6746_v16  ;;  %v1059_v7 = vmul.f32 %v670_v25, %v6705_v58  ;;  %v6842_v25 = vld [vmem:[%s9577_s9 + $0x38] sm:$0xff] }
 0x2c5   :  { %v684_v50 = vpop.permute.xlu2 %683 }
 0x2c6   :  { %5252 = vmatpush.xpose.msk.msra.mxu0 %vm489_vm1, %v684_v50  ;;  %5672 = vmatpush.xpose.msk.msra.mxu3 %vm489_vm1, %v684_v50  ;;  %v461_v50 = vld [vmem:[%s9576_s8 + $0x20] sm:$0xff] }
 0x2cd   :  { %v1063_v14 = vpop.permute.xlu2 %1062 }
 0x2d5   :  { %v682_v60 = vpop.permute.xlu0 %681 }
 0x2d6   :  { %5253 = vmatpush.xpose.msk.msra.mxu0 %vm489_vm1, %v682_v60  ;;  %5673 = vmatpush.xpose.msk.msra.mxu3 %vm489_vm1, %v682_v60 }
 0x2d9   :  { %5254 = vmatmul.msk.f32.vlgmr.msra.gmra.mxu0 %vm489_vm1, %v671_v62  ;;  %5261 = vmatmul.msk.f32.vlgmr.msra.gmra.mxu3 %vm489_vm1, %v678_v0 }
 0x2da   :  { %1011 = vmatpush.msrb.mxu3 %v659_v59  ;;  %v464_v59 = vld [vmem:[%s9576_s8 + $0x38] sm:$0xff] }
 0x2dc   :  { %1012 = vmatpush.msrb.mxu3 %v656_v1 }
 0x2de   :  { %1343 = vmatpush.msra.mxu3 %v665_v3  ;;  %v6816_v3 = vld [vmem:[%s9577_s9 + $0x28] sm:$0xff] }
 0x2e0   :  { %1344 = vmatpush.msra.mxu3 %v662_v4 }
 0x2e1   :  { %5255 = vmatmul.msk.f32.gmra.mxu0 %vm489_vm1, %v672_v6 }
 0x2e9   :  { %5256 = vmatmul.msk.f32.gmra.mxu0 %vm489_vm1, %v673_v9 }
 0x2ed   :  { %v1065_v11 = vpop.permute.xlu1 %1064 }
 0x2ee   :  { %5286 = vmatpush.xpose.msk.msrb.mxu0 %vm489_vm1, %v1065_v11  ;;  %v6823_v11 = vld [vmem:[%s9577_s9 + $0x10] sm:$0xff] }
 0x2f1   :  { %5257 = vmatmul.msk.f32.gmra.mxu0 %vm489_vm1, %v674_v13  ;;  %v6828_v13 = vld [vmem:[%s9577_s9 + $0x30] sm:$0xff] }
 0x2f2   :  { %5287 = vmatpush.xpose.msk.msrb.mxu0 %vm489_vm1, %v1063_v14 }
 0x2f9   :  { %5258 = vmatmul.msk.f32.gmra.mxu0 %vm489_vm1, %v675_v2 }
 0x301   :  { %5259 = vmatmul.msk.f32.gmra.mxu0 %vm489_vm1, %v676_v18 }
 0x309   :  { %5260 = vmatmul.msk.f32.gmra.mxu0 %vm489_vm1, %v677_v20 }
 0x311   :  { %5288 = vmatmul.msk.f32.vlgmr.msrb.gmra.mxu0 %vm489_vm1, %v1052_v23  ;;  %v6837_v23 = vld [vmem:[%s9577_s9 + $0x18] sm:$0xff] }
 0x319   :  { %5289 = vmatmul.msk.f32.gmra.mxu0 %vm489_vm1, %v1053_v27 }
 0x321   :  { %5290 = vmatmul.msk.f32.gmra.mxu0 %vm489_vm1, %v1054_v28 }
 0x329   :  { %5291 = vmatmul.msk.f32.gmra.mxu0 %vm489_vm1, %v1055_v29 }
 0x331   :  { %5292 = vmatmul.msk.f32.gmra.mxu0 %vm489_vm1, %v1056_v30 }
 0x339   :  { %5293 = vmatmul.msk.f32.gmra.mxu0 %vm489_vm1, %v1057_v31 }
 0x341   :  { %5294 = vmatmul.msk.f32.gmra.mxu0 %vm489_vm1, %v1058_v32  ;;  %v6851_v32 = vld [vmem:[%s9577_s9] sm:$0xff] }
 0x349   :  { %5295 = vmatmul.msk.f32.gmra.mxu0 %vm489_vm1, %v1059_v7  ;;  %v6856_v7 = vld [vmem:[%s9577_s9 + $0x20] sm:$0xff] }
 0x356   :  { %v730_v33 = vpop.f32.mrf.mxu0 }
 0x35c   :  { %v751_v34 = vpop.f32.mrf.mxu3 }
 0x35d   :  { %786 = vmatpush.msra.mxu1 %v751_v34 }
 0x35e   :  { %v733_v35 = vpop.f32.mrf.mxu0 }
 0x366   :  { %v736_v36 = vpop.f32.mrf.mxu0 }
 0x36e   :  { %v739_v37 = vpop.f32.mrf.mxu0 }
 0x376   :  { %v742_v39 = vpop.f32.mrf.mxu0 }
 0x37e   :  { %v745_v12 = vpop.f32.mrf.mxu0 }
 0x386   :  { %v748_v40 = vpop.f32.mrf.mxu0 }
 0x387   :  { %787 = vmatpush.msra.mxu1 %v748_v40 }
 0x389   :  { %788 = vmatpush.msra.mxu1 %v745_v12 }
 0x38b   :  { %789 = vmatpush.msra.mxu1 %v742_v39 }
 0x38d   :  { %790 = vmatpush.msra.mxu1 %v739_v37  ;;  %v6865_v37 = vld [vmem:[%s9577_s9 + $0x8] sm:$0xff] }
 0x38e   :  { %v1111_v41 = vpop.f32.mrf.mxu0 }
 0x38f   :  { %791 = vmatpush.msra.mxu1 %v736_v36 }
 0x391   :  { %792 = vmatpush.msra.mxu1 %v733_v35 }
 0x393   :  { %793 = vmatpush.msra.mxu1 %v730_v33 }
 0x394   :  { %5262 = vmatmul.msk.f32.vlgmr.msra.gmra.mxu1 %vm489_vm1, %v457_v42 }
 0x396   :  { %v1114_v43 = vpop.f32.mrf.mxu0 }
 0x39c   :  { %5263 = vmatmul.msk.f32.gmra.mxu1 %vm489_vm1, %v458_v44 }
 0x39e   :  { %v1117_v45 = vpop.f32.mrf.mxu0 }
 0x3a4   :  { %5264 = vmatmul.msk.f32.gmra.mxu1 %vm489_vm1, %v459_v17 }
 0x3a6   :  { %v1120_v46 = vpop.f32.mrf.mxu0 }
 0x3ac   :  { %5265 = vmatmul.msk.f32.gmra.mxu1 %vm489_vm1, %v460_v47 }
 0x3ae   :  { %v1123_v49 = vpop.f32.mrf.mxu0 }
 0x3b4   :  { %5266 = vmatmul.msk.f32.gmra.mxu1 %vm489_vm1, %v461_v50 }
 0x3b6   :  { %v1126_v51 = vpop.f32.mrf.mxu0 }
 0x3bc   :  { %5267 = vmatmul.msk.f32.gmra.mxu1 %vm489_vm1, %v462_v52 }
 0x3be   :  { %v1129_v53 = vpop.f32.mrf.mxu0 }
 0x3c4   :  { %5268 = vmatmul.msk.f32.gmra.mxu1 %vm489_vm1, %v463_v54 }
 0x3c6   :  { %v1132_v56 = vpop.f32.mrf.mxu0 }
 0x3c7   :  { %1143 = vmatpush.msrb.mxu1 %v1132_v56 }
 0x3c9   :  { %1144 = vmatpush.msrb.mxu1 %v1129_v53 }
 0x3cb   :  { %1145 = vmatpush.msrb.mxu1 %v1126_v51 }
 0x3cc   :  { %5269 = vmatmul.msk.f32.gmra.mxu1 %vm489_vm1, %v464_v59 }
 0x3cd   :  { %1146 = vmatpush.msrb.mxu1 %v1123_v49 }
 0x3cf   :  { %1147 = vmatpush.msrb.mxu1 %v1120_v46 }
 0x3d1   :  { %1148 = vmatpush.msrb.mxu1 %v1117_v45 }
 0x3d3   :  { %1149 = vmatpush.msrb.mxu1 %v1114_v43 }
 0x3d5   :  { %1150 = vmatpush.msrb.mxu1 %v1111_v41 }
 0x3d6   :  { %5296 = vmatmul.msk.f32.vlgmr.msrb.gmra.mxu1 %vm489_vm1, %v457_v42 }
 0x3de   :  { %5297 = vmatmul.msk.f32.gmra.mxu1 %vm489_vm1, %v458_v44 }
 0x3e6   :  { %5298 = vmatmul.msk.f32.gmra.mxu1 %vm489_vm1, %v459_v17 }
 0x3ee   :  { %5299 = vmatmul.msk.f32.gmra.mxu1 %vm489_vm1, %v460_v47 }
 0x3f6   :  { %5300 = vmatmul.msk.f32.gmra.mxu1 %vm489_vm1, %v461_v50 }
 0x3fe   :  { %5301 = vmatmul.msk.f32.gmra.mxu1 %vm489_vm1, %v462_v52 }
 0x406   :  { %5302 = vmatmul.msk.f32.gmra.mxu1 %vm489_vm1, %v463_v54 }
 0x40e   :  { %5303 = vmatmul.msk.f32.gmra.mxu1 %vm489_vm1, %v464_v59 }
 0x411   :  { %v795_v60 = vpop.f32.mrf.mxu1 }
 0x412   :  { %v796_v33 = vadd.f32 %v795_v60, %v6851_v32 }
 0x414   :  { %v820_v36 = vsel %vm819_vm15, %v796_v33, -inf }
 0x419   :  { %v798_v61 = vpop.f32.mrf.mxu1 }
 0x41a   :  { %v799_v39 = vadd.f32 %v798_v61, %v6865_v37 }
 0x41c   :  { %v823_v12 = vsel %vm819_vm15, %v799_v39, -inf }
 0x421   :  { %v801_v62 = vpop.f32.mrf.mxu1 }
 0x422   :  { %v802_v14 = vadd.f32 %v801_v62, %v6823_v11 }
 0x424   :  { %v826_v21 = vsel %vm819_vm15, %v802_v14, -inf }
 0x429   :  { %v804_v0 = vpop.f32.mrf.mxu1 }
 0x42a   :  { %v805_v27 = vadd.f32 %v804_v0, %v6837_v23 }
 0x42c   :  { %v829_v31 = vsel %vm819_vm15, %v805_v27, -inf }
 0x431   :  { %v807_v1 = vpop.f32.mrf.mxu1 }
 0x432   :  { %v808_v34 = vadd.f32 %v807_v1, %v6856_v7 }
 0x434   :  { %v832_v35 = vsel %vm819_vm15, %v808_v34, -inf }
 0x439   :  { %v810_v4 = vpop.f32.mrf.mxu1 }
 0x43a   :  { %v811_v6 = vadd.f32 %v810_v4, %v6816_v3 }
 0x43c   :  { %v835_v9 = vsel %vm819_vm15, %v811_v6, -inf }
 0x43d   :  { %836 = vmax.xlane.f32.xlu1 %v835_v9 }
 0x441   :  { %v813_v2 = vpop.f32.mrf.mxu1 }
 0x442   :  { %v814_v18 = vadd.f32 %v813_v2, %v6828_v13 }
 0x444   :  { %v838_v20 = vsel %vm819_vm15, %v814_v18, -inf }
 0x445   :  { %839 = vmax.xlane.f32.xlu2 %v838_v20  ;;  %827 = vmax.xlane.f32.xlu1 %v826_v21 }
 0x449   :  { %v816_v28 = vpop.f32.mrf.mxu1 }
 0x44a   :  { %v817_v29 = vadd.f32 %v816_v28, %v6842_v25 }
 0x44c   :  { %v841_v30 = vsel %vm819_vm15, %v817_v29, -inf }
 0x44d   :  { %842 = vmax.xlane.f32.xlu0 %v841_v30  ;;  %830 = vmax.xlane.f32.xlu2 %v829_v31 }
 0x453   :  { %v6869_v40 = vpop.f32.mrf.mxu1 }
 0x455   :  { %833 = vmax.xlane.f32.xlu0 %v832_v35  ;;  %821 = vmax.xlane.f32.xlu2 %v820_v36 }
 0x45b   :  { %v6871_v41 = vpop.f32.mrf.mxu1 }
 0x45d   :  { %824 = vmax.xlane.f32.xlu0 %v823_v12 }
 0x463   :  { %v6873_v42 = vpop.f32.mrf.mxu1 }
 0x46b   :  { %v6875_v43 = vpop.f32.mrf.mxu1 }
 0x473   :  { %v1164_v45 = vpop.f32.mrf.mxu1 }
 0x47b   :  { %v1167_v51 = vpop.f32.mrf.mxu1 }
 0x483   :  { %v1170_v2 = vpop.f32.mrf.mxu1 }
 0x4b0   :  { %v837_v44 = vpop.xlane.xlu1 %836 }
 0x4b1   :  { %v849_v50 = vsub.f32 %v811_v6, %v837_v44  ;;  %v1173_v44 = vpop.f32.mrf.mxu1 }
 0x4b3   :  { %v862_v52 = vmul.f32 1.442695, %v849_v50 }
 0x4b8   :  { %v840_v17 = vpop.xlane.xlu2 %839  ;;  %v828_v46 = vpop.xlane.xlu1 %827 }
 0x4b9   :  { %v846_v47 = vsub.f32 %v802_v14, %v828_v46  ;;  %v850_v61 = vsub.f32 %v814_v18, %v840_v17 }
 0x4bb   :  { %v856_v49 = vmul.f32 1.442695, %v846_v47  ;;  %v864_v0 = vmul.f32 1.442695, %v850_v61 }
 0x4bd   :  { %5790 = vpow2.f32 %v856_v49  ;;  %v1174_v49 = vadd.f32 %v1173_v44, %v6842_v25  ;;  %v1168_v25 = vadd.f32 %v1167_v51, %v6816_v3  ;;  %v6931_v51 = vadd.f32 %v6875_v43, %v6837_v23 }
 0x4be   :  { %5792 = vpow2.f32 %v862_v52 }
 0x4bf   :  { %v1197_v52 = vsel %vm819_vm15, %v1174_v49, -inf }
 0x4c0   :  { %v843_v53 = vpop.xlane.xlu0 %842  ;;  %v831_v54 = vpop.xlane.xlu2 %830 }
 0x4c1   :  { %v847_v56 = vsub.f32 %v805_v27, %v831_v54  ;;  %v851_v20 = vsub.f32 %v817_v29, %v843_v53 }
 0x4c3   :  { %v858_v59 = vmul.f32 1.442695, %v847_v56  ;;  %v6877_v60 = vpop.eup %5790  ;;  %v866_v31 = vmul.f32 1.442695, %v851_v20 }
 0x4c4   :  { %v874_v62 = vsel %vm819_vm15, %v6877_v60, 0.0  ;;  %v6881_v14 = vpop.eup %5792 }
 0x4c5   :  { %5794 = vpow2.f32 %v858_v59  ;;  %875 = vadd.xlane.f32.xlu2 %v874_v62  ;;  %v883_v30 = vsel %vm819_vm15, %v6881_v14, 0.0  ;;  %v6910_v59 = vadd.f32 %v6871_v41, %v6865_v37  ;;  %v6919_v62 = vadd.f32 %v1170_v2, %v6828_v13 }
 0x4c6   :  { %5796 = vpow2.f32 %v864_v0  ;;  %v6923_v37 = vadd.f32 %v6873_v42, %v6823_v11  ;;  %v1185_v13 = vsel %vm819_vm15, %v6931_v51, -inf  ;;  %v6937_v11 = vadd.f32 %v6869_v40, %v6851_v32 }
 0x4c7   :  { %v1179_v61 = vsel %vm819_vm15, %v6910_v59, -inf  ;;  %v1194_v3 = vsel %vm819_vm15, %v6919_v62, -inf }
 0x4c8   :  { %v834_v1 = vpop.xlane.xlu0 %833  ;;  %v822_v4 = vpop.xlane.xlu2 %821  ;;  %v1182_v41 = vsel %vm819_vm15, %v6923_v37, -inf  ;;  %v1176_v42 = vsel %vm819_vm15, %v6937_v11, -inf }
 0x4c9   :  { %v848_v6 = vsub.f32 %v808_v34, %v834_v1  ;;  %v844_v9 = vsub.f32 %v796_v33, %v822_v4 }
 0x4cb   :  { %v860_v21 = vmul.f32 1.442695, %v848_v6  ;;  %v852_v27 = vmul.f32 1.442695, %v844_v9  ;;  %v6883_v28 = vpop.eup %5794 }
 0x4cc   :  { %v877_v18 = vsel %vm819_vm15, %v6883_v28, 0.0  ;;  %v6889_v34 = vpop.eup %5796 }
 0x4cd   :  { %5798 = vpow2.f32 %v860_v21  ;;  %878 = vadd.xlane.f32.xlu0 %v877_v18  ;;  %884 = vadd.xlane.f32.xlu2 %v883_v30  ;;  %v886_v17 = vsel %vm819_vm15, %v6889_v34, 0.0 }
 0x4ce   :  { %5800 = vpow2.f32 %v852_v27 }
 0x4cf   :  { %5802 = vpow2.f32 %v866_v31 }
 0x4d0   :  { %v825_v33 = vpop.xlane.xlu0 %824 }
 0x4d1   :  { %v845_v35 = vsub.f32 %v799_v39, %v825_v33  ;;  %v1165_v39 = vadd.f32 %v1164_v45, %v6856_v7  ;;  %v1191_v45 = vsel %vm819_vm15, %v1168_v25, -inf }
 0x4d3   :  { %v6891_v29 = vpop.eup %5798  ;;  %v854_v47 = vmul.f32 1.442695, %v845_v35  ;;  %v1188_v54 = vsel %vm819_vm15, %v1165_v39, -inf }
 0x4d4   :  { %v6893_v36 = vpop.eup %5800  ;;  %v880_v12 = vsel %vm819_vm15, %v6891_v29, 0.0 }
 0x4d5   :  { %881 = vadd.xlane.f32.xlu1 %v880_v12  ;;  %v868_v46 = vsel %vm819_vm15, %v6893_v36, 0.0  ;;  %887 = vadd.xlane.f32.xlu0 %v886_v17  ;;  %v5803_v50 = vpop.eup %5802  ;;  %5804 = vpow2.f32 %v854_v47 }
 0x4d6   :  { %869 = vadd.xlane.f32.xlu2 %v868_v46  ;;  %v889_v53 = vsel %vm819_vm15, %v5803_v50, 0.0 }
 0x4db   :  { %v6906_v56 = vpop.eup %5804 }
 0x4dc   :  { %v871_v7 = vsel %vm819_vm15, %v6906_v56, 0.0 }
 0x4dd   :  { %890 = vadd.xlane.f32.xlu1 %v889_v53  ;;  %1198 = vmax.xlane.f32.xlu0 %v1197_v52 }
 0x4de   :  { %1189 = vmax.xlane.f32.xlu2 %v1188_v54 }
 0x4e5   :  { %872 = vadd.xlane.f32.xlu1 %v871_v7  ;;  %1192 = vmax.xlane.f32.xlu0 %v1191_v45 }
 0x4e6   :  { %1180 = vmax.xlane.f32.xlu2 %v1179_v61 }
 0x4ed   :  { %1195 = vmax.xlane.f32.xlu1 %v1194_v3  ;;  %1183 = vmax.xlane.f32.xlu0 %v1182_v41 }
 0x4f5   :  { %1186 = vmax.xlane.f32.xlu1 %v1185_v13 }
 0x4fd   :  { %1177 = vmax.xlane.f32.xlu1 %v1176_v42 }
 0x538   :  { %v876_v0 = vpop.xlane.xlu2 %875 }
 0x540   :  { %v879_v1 = vpop.xlane.xlu0 %878  ;;  %v885_v4 = vpop.xlane.xlu2 %884 }
 0x548   :  { %v882_v6 = vpop.xlane.xlu1 %881  ;;  %v888_v9 = vpop.xlane.xlu0 %887 }
 0x549   :  { %v870_v2 = vpop.xlane.xlu2 %869  ;;  %5806 = vrcp.f32 %v888_v9 }
 0x54f   :  { %v5807_v40 = vpop.eup %5806 }
 0x550   :  { %v891_v23 = vpop.xlane.xlu1 %890  ;;  %v1199_v43 = vpop.xlane.xlu0 %1198  ;;  %v906_v46 = vmul.f32 %v5807_v40, %v6889_v34 }
 0x551   :  { %5808 = vrcp.f32 %v891_v23  ;;  %v1190_v20 = vpop.xlane.xlu2 %1189  ;;  %v1207_v21 = vsub.f32 %v1174_v49, %v1199_v43 }
 0x552   :  { %5810 = vrcp.f32 %v885_v4  ;;  %v1204_v27 = vsub.f32 %v1165_v39, %v1190_v20 }
 0x553   :  { %v1222_v32 = vmul.f32 1.442695, %v1207_v21  ;;  %5812 = vrcp.f32 %v882_v6 }
 0x554   :  { %v1216_v30 = vmul.f32 1.442695, %v1204_v27  ;;  %v6983_v27 = vld [vmem:[%s9576_s8 + $0x48] sm:$0xff] }
 0x555   :  { %5814 = vpow2.f32 %v1222_v32 }
 0x556   :  { %5816 = vrcp.f32 %v879_v1 }
 0x557   :  { %v5809_v18 = vpop.eup %5808  ;;  %5818 = vrcp.f32 %v876_v0 }
 0x558   :  { %v873_v31 = vpop.xlane.xlu1 %872  ;;  %v907_v33 = vmul.f32 %v5809_v18, %v5803_v50  ;;  %v5811_v35 = vpop.eup %5810  ;;  %5820 = vpow2.f32 %v1216_v30 }
 0x559   :  { %v1193_v12 = vpop.xlane.xlu0 %1192  ;;  %v1181_v44 = vpop.xlane.xlu2 %1180  ;;  %5822 = vrcp.f32 %v873_v31  ;;  %v905_v53 = vmul.f32 %v5811_v35, %v6881_v14 }
 0x55a   :  { %v1205_v17 = vsub.f32 %v1168_v25, %v1193_v12  ;;  %940 = vmatpush.msrb.mxu2 %v907_v33  ;;  %v5813_v47 = vpop.eup %5812  ;;  %v1201_v52 = vsub.f32 %v6910_v59, %v1181_v44  ;;  %5824 = vrcp.f32 %v870_v2  ;;  %v6992_v33 = vld [vmem:[%s9576_s8 + $0x50] sm:$0xff]  ;;  %v7000_v12 = vld [vmem:[%s9576_s8 + $0x58] sm:$0xff]  ;;  %v7007_v44 = vld [vmem:[%s9576_s8 + $0x60] sm:$0xff] }
 0x55b   :  { %v6942_v49 = vpop.eup %5814  ;;  %v904_v34 = vmul.f32 %v5813_v47, %v6891_v29  ;;  %v7028_v47 = vld [vmem:[%s9576_s8 + $0x78] sm:$0xff] }
 0x55c   :  { %v1218_v39 = vmul.f32 1.442695, %v1205_v17  ;;  %941 = vmatpush.msrb.mxu2 %v906_v46  ;;  %v5817_v50 = vpop.eup %5816  ;;  %v1245_v54 = vsel %vm819_vm15, %v6942_v49, 0.0  ;;  %v1210_v7 = vmul.f32 1.442695, %v1201_v52  ;;  %v7014_v17 = vld [vmem:[%s9576_s8 + $0x68] sm:$0xff] }
 0x55d   :  { %1246 = vadd.xlane.f32.xlu0 %v1245_v54  ;;  %v5819_v25 = vpop.eup %5818  ;;  %v903_v61 = vmul.f32 %v5817_v50, %v6883_v28  ;;  %v7021_v46 = vld [vmem:[%s9576_s8 + $0x70] sm:$0xff] }
 0x55e   :  { %5826 = vpow2.f32 %v1218_v39  ;;  %942 = vmatpush.msrb.mxu2 %v905_v53  ;;  %v6950_v59 = vpop.eup %5820  ;;  %v902_v42 = vmul.f32 %v5819_v25, %v6877_v60 }
 0x55f   :  { %v5823_v41 = vpop.eup %5822  ;;  %5828 = vpow2.f32 %v1210_v7 }
 0x560   :  { %v1196_v45 = vpop.xlane.xlu1 %1195  ;;  %943 = vmatpush.msrb.mxu2 %v904_v34  ;;  %v5825_v0 = vpop.eup %5824  ;;  %v901_v6 = vmul.f32 %v5823_v41, %v6906_v56 }
 0x561   :  { %v1206_v14 = vsub.f32 %v6919_v62, %v1196_v45  ;;  %v1184_v3 = vpop.xlane.xlu0 %1183  ;;  %v1236_v62 = vsel %vm819_vm15, %v6950_v59, 0.0  ;;  %v900_v60 = vmul.f32 %v5825_v0, %v6893_v36 }
 0x562   :  { %v1202_v13 = vsub.f32 %v6923_v37, %v1184_v3  ;;  %944 = vmatpush.msrb.mxu2 %v903_v61  ;;  %v6966_v37 = vld [vmem:[%s9576_s8 + $0x40] sm:$0xff] }
 0x563   :  { %v1220_v1 = vmul.f32 1.442695, %v1206_v14 }
 0x564   :  { %v6955_v29 = vpop.eup %5826  ;;  %v1212_v4 = vmul.f32 1.442695, %v1202_v13  ;;  %945 = vmatpush.msrb.mxu2 %v902_v42 }
 0x565   :  { %5830 = vpow2.f32 %v1220_v1  ;;  %v1239_v28 = vsel %vm819_vm15, %v6955_v29, 0.0  ;;  %1237 = vadd.xlane.f32.xlu0 %v1236_v62  ;;  %v6969_v23 = vpop.eup %5828 }
 0x566   :  { %5832 = vpow2.f32 %v1212_v4  ;;  %1240 = vadd.xlane.f32.xlu1 %v1239_v28  ;;  %946 = vmatpush.msrb.mxu2 %v901_v6 }
 0x568   :  { %v1187_v9 = vpop.xlane.xlu1 %1186  ;;  %947 = vmatpush.msrb.mxu2 %v900_v60 }
 0x569   :  { %v1203_v2 = vsub.f32 %v6931_v51, %v1187_v9  ;;  %5270 = vmatmul.msk.f32.vlgmr.msrb.gmra.mxu2 %vm489_vm1, %v6966_v37  ;;  %v1227_v51 = vsel %vm819_vm15, %v6969_v23, 0.0  ;;  %v7046_v9 = vld [vmem:[%s9577_s9 + $0x48] sm:$0xff] }
 0x56b   :  { %v5831_v56 = vpop.eup %5830  ;;  %v1214_v43 = vmul.f32 1.442695, %v1203_v2 }
 0x56c   :  { %v6973_v20 = vpop.eup %5832  ;;  %v1242_v36 = vsel %vm819_vm15, %v5831_v56, 0.0 }
 0x56d   :  { %5834 = vpow2.f32 %v1214_v43  ;;  %v1230_v21 = vsel %vm819_vm15, %v6973_v20, 0.0  ;;  %1243 = vadd.xlane.f32.xlu2 %v1242_v36  ;;  %1228 = vadd.xlane.f32.xlu0 %v1227_v51 }
 0x56e   :  { %1231 = vadd.xlane.f32.xlu1 %v1230_v21 }
 0x570   :  { %v1178_v32 = vpop.xlane.xlu1 %1177 }
 0x571   :  { %v1200_v40 = vsub.f32 %v6937_v11, %v1178_v32  ;;  %5271 = vmatmul.msk.f32.gmra.mxu2 %vm489_vm1, %v6983_v27 }
 0x573   :  { %v5835_v18 = vpop.eup %5834  ;;  %v1208_v30 = vmul.f32 1.442695, %v1200_v40 }
 0x574   :  { %v1233_v31 = vsel %vm819_vm15, %v5835_v18, 0.0 }
 0x575   :  { %5836 = vpow2.f32 %v1208_v30  ;;  %1234 = vadd.xlane.f32.xlu2 %v1233_v31 }
 0x579   :  { %5272 = vmatmul.msk.f32.gmra.mxu2 %vm489_vm1, %v6992_v33 }
 0x57b   :  { %v5837_v35 = vpop.eup %5836 }
 0x57c   :  { %v1224_v11 = vsel %vm819_vm15, %v5837_v35, 0.0 }
 0x57d   :  { %1225 = vadd.xlane.f32.xlu2 %v1224_v11 }
 0x581   :  { %5273 = vmatmul.msk.f32.gmra.mxu2 %vm489_vm1, %v7000_v12 }
 0x589   :  { %5274 = vmatmul.msk.f32.gmra.mxu2 %vm489_vm1, %v7007_v44 }
 0x591   :  { %5275 = vmatmul.msk.f32.gmra.mxu2 %vm489_vm1, %v7014_v17 }
 0x599   :  { %5276 = vmatmul.msk.f32.gmra.mxu2 %vm489_vm1, %v7021_v46 }
 0x5a1   :  { %5277 = vmatmul.msk.f32.gmra.mxu2 %vm489_vm1, %v7028_v47 }
 0x5d0   :  { %v1247_v39 = vpop.xlane.xlu0 %1246 }
 0x5d1   :  { %5838 = vrcp.f32 %v1247_v39  ;;  %v7092_v39 = vld [vmem:[%s9577_s9 + $0x78] sm:$0xff] }
 0x5d7   :  { %v5839_v52 = vpop.eup %5838 }
 0x5d8   :  { %v1263_v53 = vmul.f32 %v5839_v52, %v6942_v49  ;;  %v1238_v54 = vpop.xlane.xlu0 %1237  ;;  %v7037_v49 = vld [vmem:[%s9577_s9 + $0x40] sm:$0xff] }
 0x5d9   :  { %v1241_v50 = vpop.xlane.xlu1 %1240 }
 0x5da   :  { %1272 = vmatpush.msra.mxu2 %v1263_v53  ;;  %5840 = vrcp.f32 %v1241_v50 }
 0x5e0   :  { %v1244_v34 = vpop.xlane.xlu2 %1243  ;;  %v5841_v7 = vpop.eup %5840 }
 0x5e1   :  { %5842 = vrcp.f32 %v1244_v34  ;;  %v1232_v25 = vpop.xlane.xlu1 %1231  ;;  %v1229_v61 = vpop.xlane.xlu0 %1228  ;;  %v1261_v13 = vmul.f32 %v5841_v7, %v6955_v29  ;;  %v403_v34 = vld [vmem:[%s9572_s4 + $0x28] sm:$0xff]  ;;  %v401_v7 = vld [vmem:[%s9572_s4 + $0x18] sm:$0xff] }
 0x5e2   :  { %5844 = vrcp.f32 %v1238_v54  ;;  %v404_v54 = vld [vmem:[%s9572_s4 + $0x30] sm:$0xff] }
 0x5e3   :  { %5846 = vrcp.f32 %v1232_v25  ;;  %v402_v25 = vld [vmem:[%s9572_s4 + $0x20] sm:$0xff] }
 0x5e7   :  { %v5843_v45 = vpop.eup %5842 }
 0x5e8   :  { %v1235_v14 = vpop.xlane.xlu2 %1234  ;;  %v1262_v3 = vmul.f32 %v5843_v45, %v5831_v56  ;;  %v5845_v41 = vpop.eup %5844 }
 0x5e9   :  { %5848 = vrcp.f32 %v1235_v14  ;;  %v1260_v42 = vmul.f32 %v5845_v41, %v6950_v59  ;;  %v5847_v1 = vpop.eup %5846  ;;  %v399_v14 = vld [vmem:[%s9572_s4 + $0x8] sm:$0xff] }
 0x5ea   :  { %1273 = vmatpush.msra.mxu2 %v1262_v3  ;;  %5850 = vrcp.f32 %v1229_v61  ;;  %v1258_v60 = vmul.f32 %v5847_v1, %v6973_v20  ;;  %v483_v20 = vld [vmem:[%s9577_s9 + $0x50] sm:$0xff] }
 0x5eb   :  { %v400_v61 = vld [vmem:[%s9572_s4 + $0x10] sm:$0xff] }
 0x5ec   :  { %1274 = vmatpush.msra.mxu2 %v1261_v13  ;;  %v949_v0 = vpop.f32.mrf.mxu2  ;;  %v398_v13 = vld [vmem:[%s9572_s4] sm:$0xff] }
 0x5ed   :  { %v950_v4 = vadd.f32 %v949_v0, %v7037_v49 }
 0x5ee   :  { %1275 = vmatpush.msra.mxu2 %v1260_v42 }
 0x5ef   :  { %v5849_v28 = vpop.eup %5848  ;;  %5278 = vmatmul.msk.f32.vlgmr.msrb.gmra.mxu3 %vm819_vm15, %v950_v4 }
 0x5f0   :  { %v1226_v62 = vpop.xlane.xlu2 %1225  ;;  %v1259_v6 = vmul.f32 %v5849_v28, %v5835_v18  ;;  %v5851_v29 = vpop.eup %5850 }
 0x5f1   :  { %5852 = vrcp.f32 %v1226_v62  ;;  %v1257_v59 = vmul.f32 %v5851_v29, %v6969_v23  ;;  %v484_v23 = vld [vmem:[%s9577_s9 + $0x58] sm:$0xff] }
 0x5f2   :  { %1276 = vmatpush.msra.mxu2 %v1259_v6 }
 0x5f4   :  { %1277 = vmatpush.msra.mxu2 %v1258_v60  ;;  %v952_v2 = vpop.f32.mrf.mxu2 }
 0x5f5   :  { %v953_v56 = vadd.f32 %v952_v2, %v7046_v9 }
 0x5f6   :  { %1278 = vmatpush.msra.mxu2 %v1257_v59 }
 0x5f7   :  { %v5853_v43 = vpop.eup %5852  ;;  %5279 = vmatmul.msk.f32.gmra.mxu3 %vm819_vm15, %v953_v56 }
 0x5f8   :  { %v1256_v36 = vmul.f32 %v5853_v43, %v5837_v35 }
 0x5fa   :  { %1279 = vmatpush.msra.mxu2 %v1256_v36 }
 0x5fb   :  { %5304 = vmatmul.msk.f32.vlgmr.msra.gmra.mxu2 %vm489_vm1, %v6966_v37  ;;  %v485_v37 = vld [vmem:[%s9577_s9 + $0x60] sm:$0xff] }
 0x5fc   :  { %v955_v21 = vpop.f32.mrf.mxu2 }
 0x5fd   :  { %v956_v51 = vadd.f32 %v955_v21, %v483_v20 }
 0x5ff   :  { %5280 = vmatmul.msk.f32.gmra.mxu3 %vm819_vm15, %v956_v51 }
 0x603   :  { %5305 = vmatmul.msk.f32.gmra.mxu2 %vm489_vm1, %v6983_v27  ;;  %v7074_v27 = vld [vmem:[%s9577_s9 + $0x68] sm:$0xff] }
 0x604   :  { %v958_v32 = vpop.f32.mrf.mxu2 }
 0x605   :  { %v959_v40 = vadd.f32 %v958_v32, %v484_v23 }
 0x607   :  { %5281 = vmatmul.msk.f32.gmra.mxu3 %vm819_vm15, %v959_v40 }
 0x60b   :  { %5306 = vmatmul.msk.f32.gmra.mxu2 %vm489_vm1, %v6992_v33  ;;  %v7083_v33 = vld [vmem:[%s9577_s9 + $0x70] sm:$0xff] }
 0x60c   :  { %v961_v18 = vpop.f32.mrf.mxu2 }
 0x60d   :  { %v962_v30 = vadd.f32 %v961_v18, %v485_v37 }
 0x60f   :  { %5282 = vmatmul.msk.f32.gmra.mxu3 %vm819_vm15, %v962_v30 }
 0x613   :  { %5307 = vmatmul.msk.f32.gmra.mxu2 %vm489_vm1, %v7000_v12 }
 0x614   :  { %v964_v31 = vpop.f32.mrf.mxu2 }
 0x615   :  { %v965_v35 = vadd.f32 %v964_v31, %v7074_v27 }
 0x617   :  { %5283 = vmatmul.msk.f32.gmra.mxu3 %vm819_vm15, %v965_v35 }
 0x61b   :  { %5308 = vmatmul.msk.f32.gmra.mxu2 %vm489_vm1, %v7007_v44 }
 0x61c   :  { %v967_v11 = vpop.f32.mrf.mxu2 }
 0x61d   :  { %v968_v12 = vadd.f32 %v967_v11, %v7083_v33 }
 0x61f   :  { %5284 = vmatmul.msk.f32.gmra.mxu3 %vm819_vm15, %v968_v12 }
 0x623   :  { %5309 = vmatmul.msk.f32.gmra.mxu2 %vm489_vm1, %v7014_v17  ;;  %v405_v17 = vld [vmem:[%s9572_s4 + $0x38] sm:$0xff] }
 0x624   :  { %v970_v52 = vpop.f32.mrf.mxu2  ;;  %1405 = vmatpush.msra.mxu0 %v405_v17 }
 0x625   :  { %v971_v44 = vadd.f32 %v970_v52, %v7092_v39 }
 0x626   :  { %1406 = vmatpush.msra.mxu0 %v404_v54 }
 0x627   :  { %5285 = vmatmul.msk.f32.gmra.mxu3 %vm819_vm15, %v971_v44 }
 0x628   :  { %1407 = vmatpush.msra.mxu0 %v403_v34 }
 0x62a   :  { %1408 = vmatpush.msra.mxu0 %v402_v25 }
 0x62b   :  { %5310 = vmatmul.msk.f32.gmra.mxu2 %vm489_vm1, %v7021_v46 }
 0x62c   :  { %1409 = vmatpush.msra.mxu0 %v401_v7 }
 0x62e   :  { %1410 = vmatpush.msra.mxu0 %v400_v61 }
 0x630   :  { %1411 = vmatpush.msra.mxu0 %v399_v14 }
 0x632   :  { %1412 = vmatpush.msra.mxu0 %v398_v13 }
 0x633   :  { %5311 = vmatmul.msk.f32.gmra.mxu2 %vm489_vm1, %v7028_v47 }
 0x672   :  { %v1014_v53 = vpop.f32.mrf.mxu3 }
 0x67a   :  { %v1017_v50 = vpop.f32.mrf.mxu3 }
 0x67b   :  { %v1039_v32 = vmul.f32 %v1017_v50, %v6716_v5 }
 0x67e   :  { %v1281_v46 = vpop.f32.mrf.mxu2 }
 0x67f   :  { %v1282_v47 = vadd.f32 %v1281_v46, %v7037_v49 }
 0x681   :  { %5312 = vmatmul.msk.f32.vlgmr.msra.gmra.mxu3 %vm819_vm15, %v1282_v47 }
 0x682   :  { %v1020_v45 = vpop.f32.mrf.mxu3 }
 0x683   :  { %v1040_v6 = vmul.f32 %v1020_v45, %v6723_v8 }
 0x686   :  { %v1284_v3 = vpop.f32.mrf.mxu2 }
 0x687   :  { %v1285_v41 = vadd.f32 %v1284_v3, %v7046_v9  ;;  %v1038_v9 = vmul.f32 %v1014_v53, %v6700_v57 }
 0x689   :  { %5313 = vmatmul.msk.f32.gmra.mxu3 %vm819_vm15, %v1285_v41  ;;  %v1046_v2 = vadd.f32 %v1040_v6, %v1038_v9  ;;  %v6025_v41 = vld [vmem:[%s9578_s10] sm:$0xff]  ;;  %v6026_v9 = vld [vmem:[%s9578_s10 + $0x38] sm:$0xff] }
 0x68a   :  { %v1023_v49 = vpop.f32.mrf.mxu3 }
 0x68e   :  { %v1287_v42 = vpop.f32.mrf.mxu2 }
 0x68f   :  { %v1288_v0 = vadd.f32 %v1287_v42, %v483_v20  ;;  %v1041_v20 = vmul.f32 %v1023_v49, %v6730_v10 }
 0x691   :  { %5314 = vmatmul.msk.f32.gmra.mxu3 %vm819_vm15, %v1288_v0  ;;  %v1047_v57 = vadd.f32 %v1041_v20, %v1039_v32 }
 0x692   :  { %v1026_v1 = vpop.f32.mrf.mxu3 }
 0x693   :  { %v1042_v59 = vmul.f32 %v1026_v1, %v6739_v15 }
 0x695   :  { %v1048_v43 = vadd.f32 %v1046_v2, %v1042_v59 }
 0x696   :  { %v1290_v4 = vpop.f32.mrf.mxu2 }
 0x697   :  { %v1291_v28 = vadd.f32 %v1290_v4, %v484_v23 }
 0x699   :  { %5315 = vmatmul.msk.f32.gmra.mxu3 %vm819_vm15, %v1291_v28 }
 0x69a   :  { %v1029_v62 = vpop.f32.mrf.mxu3 }
 0x69b   :  { %v1043_v40 = vmul.f32 %v1029_v62, %v6746_v16 }
 0x69d   :  { %v1049_v18 = vadd.f32 %v1047_v57, %v1043_v40 }
 0x69e   :  { %v1293_v29 = vpop.f32.mrf.mxu2 }
 0x69f   :  { %v1294_v60 = vadd.f32 %v1293_v29, %v485_v37 }
 0x6a1   :  { %5316 = vmatmul.msk.f32.gmra.mxu3 %vm819_vm15, %v1294_v60 }
 0x6a2   :  { %v1032_v56 = vpop.f32.mrf.mxu3 }
 0x6a3   :  { %v1044_v36 = vmul.f32 %v1032_v56, %v6753_v19 }
 0x6a5   :  { %v1050_v21 = vadd.f32 %v1048_v43, %v1044_v36 }
 0x6a6   :  { %v1296_v51 = vpop.f32.mrf.mxu2 }
 0x6a7   :  { %v1297_v23 = vadd.f32 %v1296_v51, %v7074_v27  ;;  %5320 = vmatmul.msk.f32.vlgmr.msra.gmra.mxu0 %vm489_vm1, %v1050_v21 }
 0x6a9   :  { %5317 = vmatmul.msk.f32.gmra.mxu3 %vm819_vm15, %v1297_v23 }
 0x6aa   :  { %v1035_v37 = vpop.f32.mrf.mxu3 }
 0x6ab   :  { %v1045_v30 = vmul.f32 %v1035_v37, %v6705_v58  ;;  %v7150_v58 = vld [vmem:[%s9575_s7] sm:$0xff] }
 0x6ac   :  { %v1426_v54 = vperm.slane %v7150_v58, 4 }
 0x6ad   :  { %v1051_v31 = vadd.f32 %v1049_v18, %v1045_v30 }
 0x6ae   :  { %v1299_v35 = vpop.f32.mrf.mxu2 }
 0x6af   :  { %v1300_v11 = vadd.f32 %v1299_v35, %v7083_v33  ;;  %5321 = vmatmul.msk.f32.gmra.mxu0 %vm489_vm1, %v1051_v31  ;;  %v1384_v33 = vperm.slane %v7150_v58, 3 }
 0x6b1   :  { %5318 = vmatmul.msk.f32.gmra.mxu3 %vm819_vm15, %v1300_v11 }
 0x6b6   :  { %v1302_v27 = vpop.f32.mrf.mxu2 }
 0x6b7   :  { %v1303_v12 = vadd.f32 %v1302_v27, %v7092_v39  ;;  %v420_v27 = vld [vmem:[%s9573_s5 + $0x70] sm:$0xff] }
 0x6b8   :  { %1555 = vmatpush.msra.mxu1 %v420_v27 }
 0x6b9   :  { %5319 = vmatmul.msk.f32.gmra.mxu3 %vm819_vm15, %v1303_v12  ;;  %v418_v12 = vld [vmem:[%s9573_s5 + $0x60] sm:$0xff] }
 0x6ba   :  { %1556 = vmatpush.msra.mxu1 %v418_v12  ;;  %v7287_v12 = vperm.slane %v7150_v58, 7 }
 0x704   :  { %v1346_v52 = vpop.f32.mrf.mxu3 }
 0x705   :  { %v1370_v13 = vmul.f32 %v6025_v41, %v1346_v52  ;;  %v416_v52 = vld [vmem:[%s9573_s5 + $0x50] sm:$0xff] }
 0x706   :  { %1557 = vmatpush.msra.mxu1 %v416_v52 }
 0x70c   :  { %v1349_v44 = vpop.f32.mrf.mxu3 }
 0x70d   :  { %v1371_v6 = vmul.f32 %v1349_v44, %v6716_v5  ;;  %v417_v44 = vld [vmem:[%s9573_s5 + $0x58] sm:$0xff] }
 0x714   :  { %v1352_v53 = vpop.f32.mrf.mxu3 }
 0x715   :  { %v1372_v14 = vmul.f32 %v1352_v53, %v6723_v8  ;;  %v414_v53 = vld [vmem:[%s9573_s5 + $0x40] sm:$0xff] }
 0x716   :  { %1558 = vmatpush.msra.mxu1 %v414_v53 }
 0x717   :  { %v1378_v42 = vadd.f32 %v1372_v14, %v1370_v13 }
 0x71c   :  { %v1355_v17 = vpop.f32.mrf.mxu3 }
 0x71d   :  { %v1373_v28 = vmul.f32 %v1355_v17, %v6730_v10  ;;  %v415_v17 = vld [vmem:[%s9573_s5 + $0x48] sm:$0xff] }
 0x724   :  { %v1358_v50 = vpop.f32.mrf.mxu3  ;;  %v1414_v34 = vpop.f32.mrf.mxu0 }
 0x725   :  { %v1415_v46 = vadd.f32 %v1414_v34, %v1384_v33  ;;  %v1374_v49 = vmul.f32 %v1358_v50, %v6739_v15  ;;  %v413_v50 = vld [vmem:[%s9573_s5 + $0x38] sm:$0xff]  ;;  %v411_v34 = vld [vmem:[%s9573_s5 + $0x28] sm:$0xff] }
 0x727   :  { %v1427_v47 = vmul.f32 %v1426_v54, %v1415_v46  ;;  %v1380_v4 = vadd.f32 %v1378_v42, %v1374_v49  ;;  %v408_v46 = vld [vmem:[%s9573_s5 + $0x10] sm:$0xff] }
 0x729   :  { %v7155_v39 = vadd.f32 %v1427_v47, %v6566_v24  ;;  %v409_v47 = vld [vmem:[%s9573_s5 + $0x18] sm:$0xff] }
 0x72b   :  { %v1435_v25 = vsel %vm489_vm1, %v7155_v39, 0.0 }
 0x72c   :  { %v1361_v7 = vpop.f32.mrf.mxu3  ;;  %1436 = vadd.xlane.f32.xlu1 %v1435_v25  ;;  %v1417_v45 = vpop.f32.mrf.mxu0  ;;  %v406_v25 = vld [vmem:[%s9573_s5] sm:$0xff] }
 0x72d   :  { %v1418_v61 = vadd.f32 %v1417_v45, %v1384_v33  ;;  %v1375_v29 = vmul.f32 %v1361_v7, %v6746_v16  ;;  %v407_v7 = vld [vmem:[%s9573_s5 + $0x8] sm:$0xff] }
 0x72f   :  { %v1428_v3 = vmul.f32 %v1426_v54, %v1418_v61 }
 0x731   :  { %v7165_v24 = vadd.f32 %v1428_v3, %v6574_v38  ;;  %v1379_v38 = vadd.f32 %v1373_v28, %v1371_v6  ;;  %v7253_v6 = vperm.slane %v7150_v58, 5 }
 0x733   :  { %v1438_v0 = vsel %vm489_vm1, %v7165_v24, 0.0  ;;  %v1381_v60 = vadd.f32 %v1379_v38, %v1375_v29 }
 0x734   :  { %v1364_v1 = vpop.f32.mrf.mxu3  ;;  %1439 = vadd.xlane.f32.xlu0 %v1438_v0 }
 0x735   :  { %v1376_v8 = vmul.f32 %v1364_v1, %v6753_v19 }
 0x737   :  { %v1382_v62 = vadd.f32 %v1380_v4, %v1376_v8 }
 0x739   :  { %5322 = vmatmul.msk.f32.gmra.mxu0 %vm489_vm1, %v1382_v62 }
 0x73c   :  { %v1367_v15 = vpop.f32.mrf.mxu3 }
 0x73d   :  { %v1377_v59 = vmul.f32 %v6026_v9, %v1367_v15 }
 0x73f   :  { %v1383_v2 = vadd.f32 %v1381_v60, %v1377_v59  ;;  %v7258_v59 = vperm.slane %v7150_v58, 6  ;;  %v434_v58 = vld [vmem:[%s9574_s6 + $0x60] sm:$0xff] }
 0x741   :  { %5323 = vmatmul.msk.f32.gmra.mxu0 %vm489_vm1, %v1383_v2 }
 0x79f   :  { %v1437_v19 = vpop.xlane.xlu1 %1436 }
 0x7a0   :  { %v1447_v10 = vmul.f32 %v1437_v19, %v6586_v63 }
 0x7a2   :  { %v7180_v5 = vsub.f32 %v7155_v39, %v1447_v10 }
 0x7a4   :  { %v1455_v16 = vmul.f32 %v7180_v5, %v7180_v5 }
 0x7a6   :  { %v1459_v56 = vsel %vm489_vm1, %v1455_v16, 0.0 }
 0x7a7   :  { %1460 = vadd.xlane.f32.xlu2 %v1459_v56  ;;  %v1440_v43 = vpop.xlane.xlu0 %1439 }
 0x7a8   :  { %v1448_v36 = vmul.f32 %v1440_v43, %v6586_v63 }
 0x7aa   :  { %v7187_v20 = vsub.f32 %v7165_v24, %v1448_v36 }
 0x7ac   :  { %v1456_v21 = vmul.f32 %v7187_v20, %v7187_v20 }
 0x7ae   :  { %v1462_v51 = vsel %vm489_vm1, %v1456_v21, 0.0 }
 0x7af   :  { %1463 = vadd.xlane.f32.xlu1 %v1462_v51 }
 0x7b6   :  { %v1420_v23 = vpop.f32.mrf.mxu0 }
 0x7b7   :  { %v1421_v32 = vadd.f32 %v1420_v23, %v1384_v33 }
 0x7b9   :  { %v1429_v40 = vmul.f32 %v1426_v54, %v1421_v32 }
 0x7bb   :  { %v7193_v57 = vadd.f32 %v1429_v40, %v6578_v48  ;;  %v421_v48 = vld [vmem:[%s9573_s5 + $0x78] sm:$0xff] }
 0x7bc   :  { %1584 = vmatpush.msrb.mxu2 %v421_v48  ;;  %v437_v48 = vld [vmem:[%s9574_s6 + $0x78] sm:$0xff] }
 0x7bd   :  { %v1441_v37 = vsel %vm489_vm1, %v7193_v57, 0.0  ;;  %1958 = vmatpush.msrb.mxu3 %v437_v48 }
 0x7be   :  { %1442 = vadd.xlane.f32.xlu0 %v1441_v37  ;;  %v1423_v18 = vpop.f32.mrf.mxu0 }
 0x7bf   :  { %v1424_v30 = vadd.f32 %v1423_v18, %v1384_v33  ;;  %v412_v33 = vld [vmem:[%s9573_s5 + $0x30] sm:$0xff] }
 0x7c0   :  { %1559 = vmatpush.msra.mxu1 %v412_v33 }
 0x7c1   :  { %v1430_v31 = vmul.f32 %v1426_v54, %v1424_v30  ;;  %v410_v54 = vld [vmem:[%s9573_s5 + $0x20] sm:$0xff] }
 0x7c2   :  { %1560 = vmatpush.msra.mxu1 %v410_v54 }
 0x7c3   :  { %v7198_v35 = vadd.f32 %v1430_v31, %v6582_v55  ;;  %v419_v55 = vld [vmem:[%s9573_s5 + $0x68] sm:$0xff] }
 0x7c4   :  { %1585 = vmatpush.msrb.mxu2 %v419_v55  ;;  %1561 = vmatpush.msra.mxu1 %v408_v46  ;;  %v436_v55 = vld [vmem:[%s9574_s6 + $0x70] sm:$0xff] }
 0x7c5   :  { %v1444_v11 = vsel %vm489_vm1, %v7198_v35, 0.0  ;;  %1959 = vmatpush.msrb.mxu3 %v436_v55 }
 0x7c6   :  { %1445 = vadd.xlane.f32.xlu2 %v1444_v11  ;;  %1586 = vmatpush.msrb.mxu2 %v417_v44  ;;  %v435_v44 = vld [vmem:[%s9574_s6 + $0x68] sm:$0xff] }
 0x7c7   :  { %1562 = vmatpush.msra.mxu1 %v406_v25  ;;  %1960 = vmatpush.msrb.mxu3 %v435_v44  ;;  %v6027_v25 = vld [vmem:[%s9575_s7 + $0x8] sm:$0xff] }
 0x7c8   :  { %1587 = vmatpush.msrb.mxu2 %v415_v17 }
 0x7c9   :  { %1961 = vmatpush.msrb.mxu3 %v434_v58  ;;  %v427_v58 = vld [vmem:[%s9574_s6 + $0x28] sm:$0xff] }
 0x7ca   :  { %1588 = vmatpush.msrb.mxu2 %v413_v50  ;;  %v453_v50 = vld [vmem:[%s9574_s6 + $0xf8] sm:$0xff] }
 0x7cb   :  { %1987 = vmatpush.msrb.mxu0 %v453_v50 }
 0x7cc   :  { %1589 = vmatpush.msrb.mxu2 %v411_v34 }
 0x7ce   :  { %1590 = vmatpush.msrb.mxu2 %v409_v47 }
 0x7d0   :  { %1591 = vmatpush.msrb.mxu2 %v407_v7  ;;  %v7313_v7 = vperm.slane %v6027_v25, 7  ;;  %v446_v25 = vld [vmem:[%s9574_s6 + $0xc0] sm:$0xff] }
 0x81a   :  { %v1461_v45 = vpop.xlane.xlu2 %1460 }
 0x81b   :  { %v1471_v61 = vmul.f32 %v1461_v45, %v6586_v63  ;;  %v433_v45 = vld [vmem:[%s9574_s6 + $0x58] sm:$0xff] }
 0x81c   :  { %1962 = vmatpush.msrb.mxu3 %v433_v45 }
 0x81d   :  { %v1475_v14 = vadd.f32 1e-06, %v1471_v61  ;;  %v452_v61 = vld [vmem:[%s9574_s6 + $0xf0] sm:$0xff] }
 0x81e   :  { %1988 = vmatpush.msrb.mxu0 %v452_v61 }
 0x81f   :  { %5854 = vrsqrt.f32 %v1475_v14  ;;  %vm1485_vm2 = vweird.f32 %v1475_v14 }
 0x822   :  { %v1464_v3 = vpop.xlane.xlu1 %1463 }
 0x823   :  { %v1472_v41 = vmul.f32 %v1464_v3, %v6586_v63 }
 0x825   :  { %v5855_v13 = vpop.eup %5854  ;;  %v1476_v49 = vadd.f32 1e-06, %v1472_v41  ;;  %v432_v41 = vld [vmem:[%s9574_s6 + $0x50] sm:$0xff] }
 0x826   :  { %v1480_v42 = vmul.f32 %v5855_v13, %v1475_v14  ;;  %vm1486_vm0 = vweird.f32 %v5855_v13  ;;  %1963 = vmatpush.msrb.mxu3 %v432_v41 }
 0x827   :  { %5856 = vrsqrt.f32 %v1476_v49  ;;  %vm1487_vm3 = vmor %vm1485_vm2, %vm1486_vm0  ;;  %vm1495_vm5 = vweird.f32 %v1476_v49 }
 0x828   :  { %v1481_v0 = vmul.f32 %v5855_v13, %v1480_v42 }
 0x82a   :  { %v1482_v1 = vmul.f32 0.5, %v1481_v0 }
 0x82c   :  { %v1483_v4 = vsub.f32 1.5, %v1482_v1 }
 0x82d   :  { %v5857_v8 = vpop.eup %5856 }
 0x82e   :  { %v1484_v28 = vmul.f32 %v5855_v13, %v1483_v4  ;;  %v1490_v62 = vmul.f32 %v5857_v8, %v1476_v49  ;;  %vm1496_vm4 = vweird.f32 %v5857_v8  ;;  %v431_v4 = vld [vmem:[%s9574_s6 + $0x48] sm:$0xff] }
 0x82f   :  { %vm1497_vm6 = vmor %vm1495_vm5, %vm1496_vm4  ;;  %1964 = vmatpush.msrb.mxu3 %v431_v4 }
 0x830   :  { %v1488_v29 = vsel %vm1487_vm3, %v5855_v13, %v1484_v28  ;;  %v1491_v38 = vmul.f32 %v5857_v8, %v1490_v62  ;;  %v451_v13 = vld [vmem:[%s9574_s6 + $0xe8] sm:$0xff] }
 0x831   :  { %v1443_v15 = vpop.xlane.xlu0 %1442  ;;  %v1519_v60 = vmul.f32 %v1488_v29, %v7180_v5  ;;  %1989 = vmatpush.msrb.mxu0 %v451_v13 }
 0x832   :  { %v1449_v9 = vmul.f32 %v1443_v15, %v6586_v63  ;;  %v1492_v2 = vmul.f32 0.5, %v1491_v38 }
 0x833   :  { %v1524_v19 = vmul.f32 %v7253_v6, %v1519_v60 }
 0x834   :  { %v7262_v10 = vsub.f32 %v7193_v57, %v1449_v9  ;;  %v1493_v16 = vsub.f32 1.5, %v1492_v2  ;;  %v430_v2 = vld [vmem:[%s9574_s6 + $0x40] sm:$0xff] }
 0x835   :  { %v1529_v56 = vadd.f32 %v7258_v59, %v1524_v19  ;;  %v449_v19 = vld [vmem:[%s9574_s6 + $0xd8] sm:$0xff]  ;;  %1965 = vmatpush.msrb.mxu3 %v430_v2 }
 0x836   :  { %v1457_v43 = vmul.f32 %v7262_v10, %v7262_v10  ;;  %v1494_v36 = vmul.f32 %v5857_v8, %v1493_v16  ;;  %v425_v2 = vld [vmem:[%s9574_s6 + $0x18] sm:$0xff] }
 0x837   :  { %5324 = vmatmul.msk.f32.vlgmr.msra.gmra.mxu1 %vm489_vm1, %v1529_v56  ;;  %5328 = vmatmul.msk.f32.vlgmr.msrb.gmra.mxu2 %vm489_vm1, %v1529_v56 }
 0x838   :  { %v1465_v5 = vsel %vm489_vm1, %v1457_v43, 0.0  ;;  %v1498_v21 = vsel %vm1497_vm6, %v5857_v8, %v1494_v36  ;;  %v450_v8 = vld [vmem:[%s9574_s6 + $0xe0] sm:$0xff] }
 0x839   :  { %1466 = vadd.xlane.f32.xlu1 %v1465_v5  ;;  %v1446_v51 = vpop.xlane.xlu2 %1445  ;;  %v1520_v32 = vmul.f32 %v1498_v21, %v7187_v20  ;;  %1990 = vmatpush.msrb.mxu0 %v450_v8  ;;  %v429_v5 = vld [vmem:[%s9574_s6 + $0x38] sm:$0xff]  ;;  %v448_v21 = vld [vmem:[%s9574_s6 + $0xd0] sm:$0xff] }
 0x83a   :  { %v1450_v23 = vmul.f32 %v1446_v51, %v6586_v63  ;;  %1966 = vmatpush.msrb.mxu3 %v429_v5 }
 0x83b   :  { %v1525_v37 = vmul.f32 %v7253_v6, %v1520_v32  ;;  %1991 = vmatpush.msrb.mxu0 %v449_v19  ;;  %v444_v19 = vld [vmem:[%s9574_s6 + $0xb0] sm:$0xff] }
 0x83c   :  { %v7273_v40 = vsub.f32 %v7198_v35, %v1450_v23 }
 0x83d   :  { %v1530_v18 = vadd.f32 %v7258_v59, %v1525_v37  ;;  %1992 = vmatpush.msrb.mxu0 %v448_v21 }
 0x83e   :  { %v1458_v30 = vmul.f32 %v7273_v40, %v7273_v40 }
 0x83f   :  { %5325 = vmatmul.msk.f32.gmra.mxu1 %vm489_vm1, %v1530_v18  ;;  %5329 = vmatmul.msk.f32.gmra.mxu2 %vm489_vm1, %v1530_v18 }
 0x840   :  { %v1468_v31 = vsel %vm489_vm1, %v1458_v30, 0.0 }
 0x841   :  { %1469 = vadd.xlane.f32.xlu0 %v1468_v31  ;;  %v428_v31 = vld [vmem:[%s9574_s6 + $0x30] sm:$0xff] }
 0x842   :  { %1967 = vmatpush.msrb.mxu3 %v428_v31  ;;  %v423_v31 = vld [vmem:[%s9574_s6 + $0x8] sm:$0xff] }
 0x844   :  { %1968 = vmatpush.msrb.mxu3 %v427_v58 }
 0x8ac   :  { %v1467_v11 = vpop.xlane.xlu1 %1466 }
 0x8ad   :  { %v1473_v20 = vmul.f32 %v1467_v11, %v6586_v63  ;;  %v447_v11 = vld [vmem:[%s9574_s6 + $0xc8] sm:$0xff] }
 0x8ae   :  { %1993 = vmatpush.msrb.mxu0 %v447_v11 }
 0x8af   :  { %v1477_v27 = vadd.f32 1e-06, %v1473_v20 }
 0x8b0   :  { %1994 = vmatpush.msrb.mxu0 %v446_v25 }
 0x8b1   :  { %5858 = vrsqrt.f32 %v1477_v27  ;;  %vm1505_vm8 = vweird.f32 %v1477_v27 }
 0x8b4   :  { %v1470_v52 = vpop.xlane.xlu0 %1469  ;;  %v1564_v53 = vpop.f32.mrf.mxu1 }
 0x8b5   :  { %v1474_v17 = vmul.f32 %v1470_v52, %v6586_v63  ;;  %v7297_v33 = vadd.f32 %v1564_v53, %v7287_v12 }
 0x8b7   :  { %v5859_v54 = vpop.eup %5858  ;;  %v7305_v34 = vadd.f32 1e-06, %v1474_v17  ;;  %v7308_v47 = vmul.f32 0.70710677, %v7297_v33 }
 0x8b8   :  { %v1500_v46 = vmul.f32 %v5859_v54, %v1477_v27  ;;  %vm1506_vm7 = vweird.f32 %v5859_v54 }
 0x8b9   :  { %5860 = vrsqrt.f32 %v7305_v34  ;;  %v1621_v3 = vmul.f32 %v7308_v47, %v7308_v47  ;;  %vm1507_vm9 = vmor %vm1505_vm8, %vm1506_vm7  ;;  %vm1515_vm11 = vweird.f32 %v7305_v34 }
 0x8ba   :  { %v1501_v14 = vmul.f32 %v5859_v54, %v1500_v46  ;;  %v1593_v49 = vpop.f32.mrf.mxu2 }
 0x8bb   :  { %v7330_v0 = vmin.f32 %v1621_v3, 16.0  ;;  %v7333_v1 = vadd.f32 %v1593_v49, %v7313_v7  ;;  %v426_v3 = vld [vmem:[%s9574_s6 + $0x20] sm:$0xff] }
 0x8bc   :  { %v1502_v42 = vmul.f32 0.5, %v1501_v14  ;;  %v1567_v28 = vpop.f32.mrf.mxu1  ;;  %1969 = vmatpush.msrb.mxu3 %v426_v3 }
 0x8bd   :  { %v1623_v29 = vmul.f32 2.1237322e-06, %v7330_v0  ;;  %v1634_v38 = vmul.f32 3.8918573e-05, %v7330_v0  ;;  %v7346_v60 = vmul.f32 0.70710677, %v7333_v1  ;;  %v7349_v9 = vadd.f32 %v1567_v28, %v7287_v12 }
 0x8be   :  { %v1503_v62 = vsub.f32 1.5, %v1502_v42  ;;  %v445_v42 = vld [vmem:[%s9574_s6 + $0xb8] sm:$0xff]  ;;  %1970 = vmatpush.msrb.mxu3 %v425_v2 }
 0x8bf   :  { %v7343_v15 = vpop.eup %5860  ;;  %v1624_v56 = vadd.f32 0.00028619796, %v1623_v29  ;;  %v1635_v43 = vadd.f32 0.001143296, %v1634_v38  ;;  %v1661_v51 = vmul.f32 %v7346_v60, %v7346_v60  ;;  %v7369_v23 = vmul.f32 0.70710677, %v7349_v9  ;;  %1995 = vmatpush.msrb.mxu0 %v445_v42 }
 0x8c0   :  { %v1504_v16 = vmul.f32 %v5859_v54, %v1503_v62  ;;  %v1510_v36 = vmul.f32 %v7343_v15, %v7305_v34  ;;  %vm1516_vm10 = vweird.f32 %v7343_v15  ;;  %v439_v42 = vld [vmem:[%s9574_s6 + $0x88] sm:$0xff] }
 0x8c1   :  { %v1625_v37 = vmul.f32 %v1624_v56, %v7330_v0  ;;  %v1636_v18 = vmul.f32 %v1635_v43, %v7330_v0  ;;  %v7381_v27 = vmin.f32 %v1661_v51, 16.0  ;;  %v1701_v48 = vmul.f32 %v7369_v23, %v7369_v23  ;;  %vm1517_vm12 = vmor %vm1515_vm11, %vm1516_vm10  ;;  %1996 = vmatpush.msrb.mxu0 %v444_v19 }
 0x8c2   :  { %v1508_v32 = vsel %vm1507_vm9, %v5859_v54, %v1504_v16  ;;  %v1511_v30 = vmul.f32 %v7343_v15, %v1510_v36  ;;  %v1596_v55 = vpop.f32.mrf.mxu2  ;;  %v424_v36 = vld [vmem:[%s9574_s6 + $0x10] sm:$0xff] }
 0x8c3   :  { %v1521_v20 = vmul.f32 %v1508_v32, %v7262_v10  ;;  %v1626_v52 = vadd.f32 0.0036580483, %v1625_v37  ;;  %v1637_v44 = vadd.f32 0.014752088, %v1636_v18  ;;  %v7386_v17 = vadd.f32 %v1596_v55, %v7313_v7  ;;  %v443_v37 = vld [vmem:[%s9574_s6 + $0xa8] sm:$0xff]  ;;  %1971 = vmatpush.msrb.mxu3 %v424_v36 }
 0x8c4   :  { %v1512_v53 = vmul.f32 0.5, %v1511_v30  ;;  %v1663_v10 = vmul.f32 2.1237322e-06, %v7381_v27  ;;  %v1674_v50 = vmul.f32 3.8918573e-05, %v7381_v27  ;;  %v7393_v54 = vmin.f32 %v1701_v48, 16.0  ;;  %1997 = vmatpush.msrb.mxu0 %v443_v37 }
 0x8c5   :  { %v1526_v46 = vmul.f32 %v7253_v6, %v1521_v20  ;;  %v1627_v45 = vmul.f32 %v1626_v52, %v7330_v0  ;;  %v1638_v61 = vmul.f32 %v1637_v44, %v7330_v0  ;;  %v7413_v62 = vmul.f32 0.70710677, %v7386_v17  ;;  %v442_v20 = vld [vmem:[%s9574_s6 + $0xa0] sm:$0xff]  ;;  %1972 = vmatpush.msrb.mxu3 %v423_v31 }
 0x8c6   :  { %v1513_v14 = vsub.f32 1.5, %v1512_v53  ;;  %v1664_v41 = vadd.f32 0.00028619796, %v1663_v10  ;;  %v1675_v13 = vadd.f32 0.001143296, %v1674_v50  ;;  %v441_v50 = vld [vmem:[%s9574_s6 + $0x98] sm:$0xff]  ;;  %1998 = vmatpush.msrb.mxu0 %v442_v20 }
 0x8c7   :  { %v1531_v49 = vadd.f32 %v7258_v59, %v1526_v46  ;;  %v1639_v4 = vadd.f32 0.112945676, %v1638_v61  ;;  %v1703_v28 = vmul.f32 2.1237322e-06, %v7393_v54  ;;  %v1628_v29 = vadd.f32 0.05243302, %v1627_v45 }
 0x8c8   :  { %v1514_v8 = vmul.f32 %v7343_v15, %v1513_v14  ;;  %v1665_v34 = vmul.f32 %v1664_v41, %v7381_v27  ;;  %v1676_v38 = vmul.f32 %v1675_v13, %v7381_v27  ;;  %v1741_v43 = vmul.f32 %v7413_v62, %v7413_v62  ;;  %1999 = vmatpush.msrb.mxu0 %v441_v50 }
 0x8c9   :  { %5326 = vmatmul.msk.f32.gmra.mxu1 %vm489_vm1, %v1531_v49  ;;  %5330 = vmatmul.msk.f32.gmra.mxu2 %vm489_vm1, %v1531_v49  ;;  %v1640_v16 = vmul.f32 %v1639_v4, %v7330_v0  ;;  %v1714_v5 = vmul.f32 3.8918573e-05, %v7393_v54  ;;  %v1704_v18 = vadd.f32 0.00028619796, %v1703_v28  ;;  %v1629_v48 = vmul.f32 %v1628_v29, %v7330_v0 }
 0x8ca   :  { %v1518_v56 = vsel %vm1517_vm12, %v7343_v15, %v1514_v8  ;;  %v1666_v51 = vadd.f32 0.0036580483, %v1665_v34  ;;  %v1677_v32 = vadd.f32 0.014752088, %v1676_v38  ;;  %v7439_v30 = vmin.f32 %v1741_v43, 16.0  ;;  %v438_v38 = vld [vmem:[%s9574_s6 + $0x80] sm:$0xff] }
 0x8cb   :  { %v1522_v21 = vmul.f32 %v1518_v56, %v7273_v40  ;;  %v1641_v15 = vadd.f32 0.4994258, %v1640_v16  ;;  %v1715_v44 = vadd.f32 0.001143296, %v1714_v5  ;;  %v1705_v25 = vmul.f32 %v1704_v18, %v7393_v54 }
 0x8cc   :  { %v1678_v11 = vmul.f32 %v1677_v32, %v7381_v27  ;;  %v1743_v52 = vmul.f32 2.1237322e-06, %v7439_v30  ;;  %v1667_v53 = vmul.f32 %v1666_v51, %v7381_v27  ;;  %v1754_v3 = vmul.f32 3.8918573e-05, %v7439_v30 }
 0x8cd   :  { %v1527_v40 = vmul.f32 %v7253_v6, %v1522_v21  ;;  %v1642_v55 = vmul.f32 %v1641_v15, %v7330_v0  ;;  %v422_v6 = vld [vmem:[%s9574_s6] sm:$0xff]  ;;  %v1716_v61 = vmul.f32 %v1715_v44, %v7393_v54  ;;  %v1630_v41 = vadd.f32 0.18741608, %v1629_v48 }
 0x8ce   :  { %v1679_v58 = vadd.f32 0.112945676, %v1678_v11  ;;  %v1744_v45 = vadd.f32 0.00028619796, %v1743_v52  ;;  %1973 = vmatpush.msrb.mxu3 %v422_v6  ;;  %v1668_v13 = vadd.f32 0.05243302, %v1667_v53 }
 0x8cf   :  { %v1532_v10 = vadd.f32 %v7258_v59, %v1527_v40  ;;  %v1643_v46 = vadd.f32 1.0, %v1642_v55  ;;  %v440_v59 = vld [vmem:[%s9574_s6 + $0x90] sm:$0xff]  ;;  %v1706_v4 = vadd.f32 0.0036580483, %v1705_v25  ;;  %v1717_v28 = vadd.f32 0.014752088, %v1716_v61 }
 0x8d0   :  { %v1680_v14 = vmul.f32 %v1679_v58, %v7381_v27  ;;  %v1745_v8 = vmul.f32 %v1744_v45, %v7439_v30  ;;  %2000 = vmatpush.msrb.mxu0 %v440_v59  ;;  %v1755_v29 = vadd.f32 0.001143296, %v1754_v3  ;;  %v1631_v2 = vmul.f32 %v1630_v41, %v7330_v0 }
 0x8d1   :  { %5327 = vmatmul.msk.f32.gmra.mxu1 %vm489_vm1, %v1532_v10  ;;  %5331 = vmatmul.msk.f32.gmra.mxu2 %vm489_vm1, %v1532_v10  ;;  %5862 = vrcp.f32 %v1643_v46  ;;  %v1718_v19 = vmul.f32 %v1717_v28, %v7393_v54  ;;  %v1669_v56 = vmul.f32 %v1668_v13, %v7381_v27  ;;  %v1707_v5 = vmul.f32 %v1706_v4, %v7393_v54 }
 0x8d2   :  { %v1681_v49 = vadd.f32 0.4994258, %v1680_v14  ;;  %2001 = vmatpush.msrb.mxu0 %v439_v42  ;;  %v1756_v16 = vmul.f32 %v1755_v29, %v7439_v30  ;;  %v1746_v21 = vadd.f32 0.0036580483, %v1745_v8  ;;  %v1632_v15 = vadd.f32 1.1283791, %v1631_v2 }
 0x8d3   :  { %v1719_v51 = vadd.f32 0.112945676, %v1718_v19  ;;  %v1670_v0 = vadd.f32 0.18741608, %v1669_v56  ;;  %v1653_v40 = vand.u32 2147483647, %v1643_v46  ;;  %vm1649_vm14 = vweird.f32 %v1643_v46 }
 0x8d4   :  { %v1682_v34 = vmul.f32 %v1681_v49, %v7381_v27  ;;  %2002 = vmatpush.msrb.mxu0 %v438_v38  ;;  %v1757_v32 = vadd.f32 0.014752088, %v1756_v16  ;;  %v1655_v20 = vand.u32 2147483648, %v1643_v46  ;;  %v1708_v48 = vadd.f32 0.05243302, %v1707_v5 }
 0x8d5   :  { %v1720_v31 = vmul.f32 %v1719_v51, %v7393_v54  ;;  %v1747_v55 = vmul.f32 %v1746_v21, %v7439_v30  ;;  %v1633_v58 = vmul.f32 %v1632_v15, %v7308_v47  ;;  %v1671_v50 = vmul.f32 %v1670_v0, %v7381_v27 }
 0x8d6   :  { %v1683_v43 = vadd.f32 1.0, %v1682_v34  ;;  %v1758_v11 = vmul.f32 %v1757_v32, %v7439_v30  ;;  %vm1654_vm2 = vcmp.eq.f32.partialorder %v1653_v40, 8.507059e+37  ;;  %v1656_v61 = vor.u32 1.1754944e-38, %v1655_v20 }
 0x8d7   :  { %v5863_v36 = vpop.eup %5862  ;;  %v1721_v44 = vadd.f32 0.4994258, %v1720_v31  ;;  %v1709_v59 = vmul.f32 %v1708_v48, %v7393_v54  ;;  %v1748_v41 = vadd.f32 0.05243302, %v1747_v55  ;;  %v1672_v4 = vadd.f32 1.1283791, %v1671_v50 }
 0x8d8   :  { %v1645_v37 = vmul.f32 %v5863_v36, %v1643_v46  ;;  %5864 = vrcp.f32 %v1683_v43  ;;  %vm1650_vm13 = vweird.f32 %v5863_v36  ;;  %v1759_v53 = vadd.f32 0.112945676, %v1758_v11 }
 0x8d9   :  { %v1722_v25 = vmul.f32 %v1721_v44, %v7393_v54  ;;  %vm1651_vm0 = vmor %vm1649_vm14, %vm1650_vm13  ;;  %v1695_v8 = vand.u32 2147483648, %v1683_v43  ;;  %v1693_v28 = vand.u32 2147483647, %v1683_v43  ;;  %v1710_v38 = vadd.f32 0.18741608, %v1709_v59 }
 0x8da   :  { %v1646_v18 = vsub.f32 1.0, %v1645_v37  ;;  %v1760_v45 = vmul.f32 %v1759_v53, %v7439_v30  ;;  %v1749_v2 = vmul.f32 %v1748_v41, %v7439_v30  ;;  %vm1689_vm4 = vweird.f32 %v1683_v43 }
 0x8db   :  { %v1723_v13 = vadd.f32 1.0, %v1722_v25  ;;  %v1605_v56 = vmul.f32 0.5, %v7297_v33  ;;  %v1696_v5 = vor.u32 1.1754944e-38, %v1695_v8  ;;  %v1673_v21 = vmul.f32 %v1672_v4, %v7346_v60 }
 0x8dc   :  { %v1647_v52 = vmul.f32 %v5863_v36, %v1646_v18  ;;  %v1761_v49 = vadd.f32 0.4994258, %v1760_v45  ;;  %vm1694_vm6 = vcmp.eq.f32.partialorder %v1693_v28, 8.507059e+37  ;;  %v1711_v18 = vmul.f32 %v1710_v38, %v7393_v54 }
 0x8dd   :  { %5866 = vrcp.f32 %v1723_v13  ;;  %v1750_v0 = vadd.f32 0.18741608, %v1749_v2  ;;  %v1606_v33 = vmul.f32 0.5, %v7333_v1  ;;  %v1735_v60 = vand.u32 2147483648, %v1723_v13 }
 0x8de   :  { %v5865_v10 = vpop.eup %5864  ;;  %v1648_v6 = vadd.f32 %v5863_v36, %v1647_v52  ;;  %v1762_v29 = vmul.f32 %v1761_v49, %v7439_v30  ;;  %v1712_v20 = vadd.f32 1.1283791, %v1711_v18  ;;  %v1733_v53 = vand.u32 2147483647, %v1723_v13 }
 0x8df   :  { %v1685_v14 = vmul.f32 %v5865_v10, %v1683_v43  ;;  %vm1690_vm3 = vweird.f32 %v5865_v10  ;;  %v1751_v48 = vmul.f32 %v1750_v0, %v7439_v30  ;;  %vm1729_vm8 = vweird.f32 %v1723_v13 }
 0x8e0   :  { %v1652_v3 = vsel %vm1651_vm0, %v5863_v36, %v1648_v6  ;;  %v1763_v16 = vadd.f32 1.0, %v1762_v29  ;;  %vm1691_vm5 = vmor %vm1689_vm4, %vm1690_vm3  ;;  %v1713_v6 = vmul.f32 %v1712_v20, %v7369_v23  ;;  %v1736_v50 = vor.u32 1.1754944e-38, %v1735_v60 }
 0x8e1   :  { %v1657_v47 = vsel %vm1654_vm2, %v1656_v61, %v1652_v3  ;;  %v1686_v46 = vsub.f32 1.0, %v1685_v14  ;;  %v1752_v45 = vadd.f32 1.1283791, %v1751_v48  ;;  %vm1734_vm10 = vcmp.eq.f32.partialorder %v1733_v53, 8.507059e+37 }
 0x8e2   :  { %v1658_v42 = vmul.f32 %v1657_v47, %v1633_v58  ;;  %5868 = vrcp.f32 %v1763_v16  ;;  %v1775_v30 = vand.u32 2147483648, %v1763_v16  ;;  %v1773_v59 = vand.u32 2147483647, %v1763_v16 }
 0x8e3   :  { %v1687_v27 = vmul.f32 %v5865_v10, %v1686_v46  ;;  %v5867_v32 = vpop.eup %5866  ;;  %vm1769_vm12 = vweird.f32 %v1763_v16  ;;  %v1753_v23 = vmul.f32 %v1752_v45, %v7413_v62  ;;  %v1607_v46 = vmul.f32 0.5, %v7349_v9 }
 0x8e4   :  { %v5332_v34 = vclamps-f32 %v1658_v42, 1.0  ;;  %v1725_v11 = vmul.f32 %v5867_v32, %v1723_v13  ;;  %vm1730_vm7 = vweird.f32 %v5867_v32  ;;  %v1776_v13 = vor.u32 1.1754944e-38, %v1775_v30 }
 0x8e5   :  { %v1688_v19 = vadd.f32 %v5865_v10, %v1687_v27  ;;  %vm1731_vm9 = vmor %vm1729_vm8, %vm1730_vm7  ;;  %vm1774_vm14 = vcmp.eq.f32.partialorder %v1773_v59, 8.507059e+37  ;;  %v1608_v29 = vmul.f32 0.5, %v7386_v17 }
 0x8e6   :  { %v1941_v36 = vadd.f32 1.0, %v5332_v34  ;;  %v1726_v40 = vsub.f32 1.0, %v1725_v11 }
 0x8e7   :  { %v1692_v51 = vsel %vm1691_vm5, %v5865_v10, %v1688_v19 }
 0x8e8   :  { %v1949_v37 = vmul.f32 %v1941_v36, %v1605_v56  ;;  %v1697_v15 = vsel %vm1694_vm6, %v1696_v5, %v1692_v51  ;;  %v5869_v55 = vpop.eup %5868  ;;  %v1727_v44 = vmul.f32 %v5867_v32, %v1726_v40 }
 0x8e9   :  { %v1698_v31 = vmul.f32 %v1697_v15, %v1673_v21  ;;  %v1765_v58 = vmul.f32 %v5869_v55, %v1763_v16  ;;  %vm1770_vm11 = vweird.f32 %v5869_v55 }
 0x8ea   :  { %1974 = vmatmul.f32.vlgmr.msrb.gmra.mxu3 %v1949_v37  ;;  %v1728_v54 = vadd.f32 %v5867_v32, %v1727_v44  ;;  %vm1771_vm13 = vmor %vm1769_vm12, %vm1770_vm11 }
 0x8eb   :  { %v5333_v43 = vclamps-f32 %v1698_v31, 1.0  ;;  %v1766_v25 = vsub.f32 1.0, %v1765_v58 }
 0x8ec   :  { %v1732_v1 = vsel %vm1731_vm9, %v5867_v32, %v1728_v54 }
 0x8ed   :  { %v1942_v52 = vadd.f32 1.0, %v5333_v43  ;;  %v1737_v61 = vsel %vm1734_vm10, %v1736_v50, %v1732_v1  ;;  %v1767_v14 = vmul.f32 %v5869_v55, %v1766_v25 }
 0x8ee   :  { %v1738_v3 = vmul.f32 %v1737_v61, %v1713_v6 }
 0x8ef   :  { %v1950_v10 = vmul.f32 %v1942_v52, %v1606_v33  ;;  %v1768_v41 = vadd.f32 %v5869_v55, %v1767_v14 }
 0x8f0   :  { %v5334_v49 = vclamps-f32 %v1738_v3, 1.0 }
 0x8f1   :  { %2003 = vmatmul.f32.vlgmr.msrb.gmra.mxu0 %v1950_v10  ;;  %v1772_v47 = vsel %vm1771_vm13, %v5869_v55, %v1768_v41 }
 0x8f2   :  { %v1943_v42 = vadd.f32 1.0, %v5334_v49  ;;  %v1777_v4 = vsel %vm1774_vm14, %v1776_v13, %v1772_v47 }
 0x8f3   :  { %v1778_v8 = vmul.f32 %v1777_v4, %v1753_v23 }
 0x8f4   :  { %v1951_v27 = vmul.f32 %v1943_v42, %v1607_v46 }
 0x8f5   :  { %v5335_v28 = vclamps-f32 %v1778_v8, 1.0 }
 0x8f6   :  { %1977 = vmatmul.f32.gmra.mxu3 %v1951_v27 }
 0x8f7   :  { %v1944_v34 = vadd.f32 1.0, %v5335_v28 }
 0x8f9   :  { %v1952_v38 = vmul.f32 %v1944_v34, %v1608_v29 }
 0x8fb   :  { %2006 = vmatmul.f32.gmra.mxu0 %v1952_v38 }
 0x946   :  { %v1570_v2 = vpop.f32.mrf.mxu1 }
 0x947   :  { %v7502_v19 = vadd.f32 %v1570_v2, %v7287_v12 }
 0x949   :  { %v7505_v62 = vmul.f32 0.70710677, %v7502_v19 }
 0x94b   :  { %v1781_v9 = vmul.f32 %v7505_v62, %v7505_v62 }
 0x94c   :  { %v1599_v16 = vpop.f32.mrf.mxu2 }
 0x94d   :  { %v7509_v56 = vmin.f32 %v1781_v9, 16.0  ;;  %v7512_v36 = vadd.f32 %v1599_v16, %v7313_v7 }
 0x94e   :  { %v1573_v17 = vpop.f32.mrf.mxu1 }
 0x94f   :  { %v1783_v5 = vmul.f32 2.1237322e-06, %v7509_v56  ;;  %v7516_v21 = vmul.f32 0.70710677, %v7512_v36  ;;  %v7519_v51 = vadd.f32 %v1573_v17, %v7287_v12  ;;  %v1794_v32 = vmul.f32 3.8918573e-05, %v7509_v56 }
 0x951   :  { %v1784_v37 = vadd.f32 0.00028619796, %v1783_v5  ;;  %v1821_v15 = vmul.f32 %v7516_v21, %v7516_v21  ;;  %v7525_v18 = vmul.f32 0.70710677, %v7519_v51  ;;  %v1795_v0 = vadd.f32 0.001143296, %v1794_v32 }
 0x953   :  { %v1785_v31 = vmul.f32 %v1784_v37, %v7509_v56  ;;  %v7528_v11 = vmin.f32 %v1821_v15, 16.0  ;;  %v1861_v43 = vmul.f32 %v7525_v18, %v7525_v18  ;;  %v1796_v12 = vmul.f32 %v1795_v0, %v7509_v56 }
 0x954   :  { %v1602_v40 = vpop.f32.mrf.mxu2 }
 0x955   :  { %v1786_v33 = vadd.f32 0.0036580483, %v1785_v31  ;;  %v1823_v20 = vmul.f32 2.1237322e-06, %v7528_v11  ;;  %v7534_v48 = vmin.f32 %v1861_v43, 16.0  ;;  %v7537_v60 = vadd.f32 %v1602_v40, %v7313_v7 }
 0x956   :  { %v1797_v55 = vadd.f32 0.014752088, %v1796_v12  ;;  %v1834_v52 = vmul.f32 3.8918573e-05, %v7528_v11 }
 0x957   :  { %v1787_v44 = vmul.f32 %v1786_v33, %v7509_v56  ;;  %v1824_v53 = vadd.f32 0.00028619796, %v1823_v20  ;;  %v1863_v58 = vmul.f32 2.1237322e-06, %v7534_v48  ;;  %v7543_v10 = vmul.f32 0.70710677, %v7537_v60 }
 0x958   :  { %v1798_v54 = vmul.f32 %v1797_v55, %v7509_v56  ;;  %v1835_v6 = vadd.f32 0.001143296, %v1834_v52  ;;  %v1874_v50 = vmul.f32 3.8918573e-05, %v7534_v48 }
 0x959   :  { %v1825_v25 = vmul.f32 %v1824_v53, %v7528_v11  ;;  %v1864_v7 = vadd.f32 0.00028619796, %v1863_v58  ;;  %v1901_v45 = vmul.f32 %v7543_v10, %v7543_v10  ;;  %v1788_v14 = vadd.f32 0.05243302, %v1787_v44  ;;  %v456_v58 = vld [vmem:[%s9575_s7 + $0x10] sm:$0x3] }
 0x95a   :  { %v1799_v1 = vadd.f32 0.112945676, %v1798_v54  ;;  %v1836_v30 = vmul.f32 %v1835_v6, %v7528_v11  ;;  %v1875_v61 = vadd.f32 0.001143296, %v1874_v50 }
 0x95b   :  { %v1826_v59 = vadd.f32 0.0036580483, %v1825_v25  ;;  %v1865_v3 = vmul.f32 %v1864_v7, %v7534_v48  ;;  %v7552_v41 = vmin.f32 %v1901_v45, 16.0  ;;  %v1789_v28 = vmul.f32 %v1788_v14, %v7509_v56 }
 0x95c   :  { %v1800_v49 = vmul.f32 %v1799_v1, %v7509_v56  ;;  %v1837_v13 = vadd.f32 0.014752088, %v1836_v30  ;;  %v1876_v23 = vmul.f32 %v1875_v61, %v7534_v48  ;;  %v7579_v61 = vperm.slane %v456_v58, 0 }
 0x95d   :  { %v1827_v47 = vmul.f32 %v1826_v59, %v7528_v11  ;;  %v1866_v46 = vadd.f32 0.0036580483, %v1865_v3  ;;  %v1903_v42 = vmul.f32 2.1237322e-06, %v7552_v41  ;;  %v1914_v29 = vmul.f32 3.8918573e-05, %v7552_v41 }
 0x95e   :  { %v1801_v4 = vadd.f32 0.4994258, %v1800_v49  ;;  %v1838_v8 = vmul.f32 %v1837_v13, %v7528_v11  ;;  %v1877_v27 = vadd.f32 0.014752088, %v1876_v23  ;;  %v1790_v31 = vadd.f32 0.18741608, %v1789_v28 }
 0x95f   :  { %v1904_v34 = vadd.f32 0.00028619796, %v1903_v42  ;;  %v1828_v16 = vadd.f32 0.05243302, %v1827_v47  ;;  %v1915_v17 = vadd.f32 0.001143296, %v1914_v29  ;;  %v1867_v5 = vmul.f32 %v1866_v46, %v7534_v48 }
 0x960   :  { %v1802_v38 = vmul.f32 %v1801_v4, %v7509_v56  ;;  %v1839_v2 = vadd.f32 0.112945676, %v1838_v8  ;;  %v1878_v9 = vmul.f32 %v1877_v27, %v7534_v48  ;;  %v1791_v44 = vmul.f32 %v1790_v31, %v7509_v56 }
 0x961   :  { %v1916_v0 = vmul.f32 %v1915_v17, %v7552_v41  ;;  %v1905_v43 = vmul.f32 %v1904_v34, %v7552_v41  ;;  %v1829_v12 = vmul.f32 %v1828_v16, %v7528_v11  ;;  %v1868_v33 = vadd.f32 0.05243302, %v1867_v5 }
 0x962   :  { %v1803_v32 = vadd.f32 1.0, %v1802_v38  ;;  %v1840_v37 = vmul.f32 %v1839_v2, %v7528_v11  ;;  %v1879_v15 = vadd.f32 0.112945676, %v1878_v9  ;;  %v1792_v14 = vadd.f32 1.1283791, %v1791_v44 }
 0x963   :  { %v1917_v55 = vadd.f32 0.014752088, %v1916_v0  ;;  %v1906_v53 = vadd.f32 0.0036580483, %v1905_v43  ;;  %v1830_v7 = vadd.f32 0.18741608, %v1829_v12  ;;  %v1869_v45 = vmul.f32 %v1868_v33, %v7534_v48 }
 0x964   :  { %5870 = vrcp.f32 %v1803_v32  ;;  %v1841_v40 = vadd.f32 0.4994258, %v1840_v37  ;;  %v1880_v20 = vmul.f32 %v1879_v15, %v7534_v48  ;;  %v7583_v3 = vperm.slane %v456_v58, 1 }
 0x965   :  { %v1918_v6 = vmul.f32 %v1917_v55, %v7552_v41  ;;  %v1907_v59 = vmul.f32 %v1906_v53, %v7552_v41  ;;  %v1831_v47 = vmul.f32 %v1830_v7, %v7528_v11  ;;  %v1870_v46 = vadd.f32 0.18741608, %v1869_v45 }
 0x966   :  { %v1842_v52 = vmul.f32 %v1841_v40, %v7528_v11  ;;  %v1881_v54 = vadd.f32 0.4994258, %v1880_v20  ;;  %v1813_v4 = vand.u32 2147483647, %v1803_v32  ;;  %v1815_v8 = vand.u32 2147483648, %v1803_v32 }
 0x967   :  { %v1919_v30 = vadd.f32 0.112945676, %v1918_v6  ;;  %v1609_v29 = vmul.f32 0.5, %v7502_v19  ;;  %v1793_v34 = vmul.f32 %v1792_v14, %v7505_v62  ;;  %v1908_v38 = vadd.f32 0.05243302, %v1907_v59 }
 0x968   :  { %v7575_v50 = vadd.f32 1.0, %v1842_v52  ;;  %v1882_v1 = vmul.f32 %v1881_v54, %v7534_v48  ;;  %vm1809_vm2 = vweird.f32 %v1803_v32  ;;  %v1832_v5 = vadd.f32 1.1283791, %v1831_v47 }
 0x969   :  { %v1920_v23 = vmul.f32 %v1919_v30, %v7552_v41  ;;  %vm1814_vm4 = vcmp.eq.f32.partialorder %v1813_v4, 8.507059e+37  ;;  %v1816_v37 = vor.u32 1.1754944e-38, %v1815_v8  ;;  %v1871_v0 = vmul.f32 %v1870_v46, %v7534_v48 }
 0x96a   :  { %v5871_v25 = vpop.eup %5870  ;;  %5872 = vrcp.f32 %v7575_v50  ;;  %v7585_v13 = vadd.f32 1.0, %v1882_v1  ;;  %v1909_v43 = vmul.f32 %v1908_v38, %v7552_v41  ;;  %v1855_v52 = vand.u32 2147483648, %v7575_v50 }
 0x96b   :  { %v1805_v56 = vmul.f32 %v5871_v25, %v1803_v32  ;;  %vm1810_vm0 = vweird.f32 %v5871_v25  ;;  %v1921_v11 = vadd.f32 0.4994258, %v1920_v23  ;;  %v1853_v32 = vand.u32 2147483647, %v7575_v50 }
 0x96c   :  { %5874 = vrcp.f32 %v7585_v13  ;;  %vm1811_vm3 = vmor %vm1809_vm2, %vm1810_vm0  ;;  %v1833_v48 = vmul.f32 %v1832_v5, %v7516_v21  ;;  %v1872_v54 = vadd.f32 1.1283791, %v1871_v0  ;;  %vm1849_vm6 = vweird.f32 %v7575_v50 }
 0x96d   :  { %v1806_v49 = vsub.f32 1.0, %v1805_v56  ;;  %v1975_v42 = vpop.f32.mrf.mxu3  ;;  %v1922_v62 = vmul.f32 %v1921_v11, %v7552_v41  ;;  %vm1854_vm8 = vcmp.eq.f32.partialorder %v1853_v32, 8.507059e+37  ;;  %v1856_v21 = vor.u32 1.1754944e-38, %v1855_v52 }
 0x96e   :  { %v1976_v27 = vadd.f32 %v1975_v42, %v7579_v61  ;;  %v2004_v2 = vpop.f32.mrf.mxu0  ;;  %v1895_v30 = vand.u32 2147483648, %v7585_v13  ;;  %v1893_v59 = vand.u32 2147483647, %v7585_v13  ;;  %vm1889_vm10 = vweird.f32 %v7585_v13 }
 0x96f   :  { %v1807_v28 = vmul.f32 %v5871_v25, %v1806_v49  ;;  %v7603_v44 = vadd.f32 1.0, %v1922_v62 }
 0x970   :  { %v5873_v9 = vpop.eup %5872  ;;  %v2005_v16 = vadd.f32 %v2004_v2, %v1976_v27  ;;  %v1896_v8 = vor.u32 1.1754944e-38, %v1895_v30  ;;  %vm1894_vm12 = vcmp.eq.f32.partialorder %v1893_v59, 8.507059e+37 }
 0x971   :  { %v1808_v17 = vadd.f32 %v5871_v25, %v1807_v28  ;;  %v1845_v15 = vmul.f32 %v5873_v9, %v7575_v50  ;;  %vm1850_vm5 = vweird.f32 %v5873_v9  ;;  %5876 = vrcp.f32 %v7603_v44 }
 0x972   :  { %v2017_v31 = vmul.f32 %v7583_v3, %v2005_v16  ;;  %v5875_v33 = vpop.eup %5874  ;;  %vm1851_vm7 = vmor %vm1849_vm6, %vm1850_vm5  ;;  %v1873_v50 = vmul.f32 %v1872_v54, %v7525_v18  ;;  %v1935_v5 = vand.u32 2147483648, %v7603_v44  ;;  %vm1929_vm14 = vweird.f32 %v7603_v44 }
 0x973   :  { %v1812_v19 = vsel %vm1811_vm3, %v5871_v25, %v1808_v17  ;;  %v1846_v12 = vsub.f32 1.0, %v1845_v15  ;;  %v1885_v58 = vmul.f32 %v5875_v33, %v7585_v13  ;;  %vm1890_vm9 = vweird.f32 %v5875_v33 }
 0x974   :  { %v1817_v40 = vsel %vm1814_vm4, %v1816_v37, %v1812_v19  ;;  %v7600_v20 = vadd.f32 %v2017_v31, %v7155_v39  ;;  %v1910_v39 = vadd.f32 0.18741608, %v1909_v43  ;;  %vm1891_vm11 = vmor %vm1889_vm10, %vm1890_vm9 }
 0x975   :  { %v1818_v55 = vmul.f32 %v1817_v40, %v1793_v34  ;;  %v1847_v53 = vmul.f32 %v5873_v9, %v1846_v12  ;;  %v1886_v45 = vsub.f32 1.0, %v1885_v58  ;;  %v1936_v12 = vor.u32 1.1754944e-38, %v1935_v5  ;;  %v5342_v5 = vld [vmem:[%s9571_s3 + $0x90] sm:$0xff] }
 0x976   :  { %v2139_v6 = vsel %vm489_vm1, %v7600_v20, 0.0  ;;  %v1911_v4 = vmul.f32 %v1910_v39, %v7552_v41  ;;  %v1933_v41 = vand.u32 2147483647, %v7603_v44 }
 0x977   :  { %v5336_v25 = vclamps-f32 %v1818_v55, 1.0  ;;  %2140 = vadd.xlane.f32.xlu2 %v2139_v6  ;;  %v1848_v7 = vadd.f32 %v5873_v9, %v1847_v53  ;;  %v1887_v14 = vmul.f32 %v5875_v33, %v1886_v45  ;;  %v5877_v42 = vpop.eup %5876 }
 0x978   :  { %v1925_v34 = vmul.f32 %v5877_v42, %v7603_v44  ;;  %v1912_v18 = vadd.f32 1.1283791, %v1911_v4  ;;  %v2007_v11 = vpop.f32.mrf.mxu0  ;;  %vm1930_vm13 = vweird.f32 %v5877_v42  ;;  %vm1934_vm2 = vcmp.eq.f32.partialorder %v1933_v41, 8.507059e+37 }
 0x979   :  { %v1945_v1 = vadd.f32 1.0, %v5336_v25  ;;  %v1852_v56 = vsel %vm1851_vm7, %v5873_v9, %v1848_v7  ;;  %v1888_v46 = vadd.f32 %v5875_v33, %v1887_v14  ;;  %v1978_v38 = vpop.f32.mrf.mxu3  ;;  %vm1931_vm0 = vmor %vm1929_vm14, %vm1930_vm13  ;;  %v1612_v44 = vmul.f32 0.5, %v7537_v60 }
 0x97a   :  { %v1857_v23 = vsel %vm1854_vm8, %v1856_v21, %v1852_v56  ;;  %v1979_v9 = vadd.f32 %v1978_v38, %v7579_v61  ;;  %v1926_v17 = vsub.f32 1.0, %v1925_v34  ;;  %v1913_v40 = vmul.f32 %v1912_v18, %v7543_v10  ;;  %v5355_v34 = vld [vmem:[%s9571_s3 + $0xf8] sm:$0xff]  ;;  %v5348_v38 = vld [vmem:[%s9571_s3 + $0xc0] sm:$0xff] }
 0x97b   :  { %v1953_v49 = vmul.f32 %v1945_v1, %v1609_v29  ;;  %v1858_v47 = vmul.f32 %v1857_v23, %v1833_v48  ;;  %v1892_v28 = vsel %vm1891_vm11, %v5875_v33, %v1888_v46  ;;  %v1610_v29 = vmul.f32 0.5, %v7512_v36  ;;  %2288 = vmatpush.msra.mxu2 %v5355_v34  ;;  %v5344_v18 = vld [vmem:[%s9571_s3 + $0xa0] sm:$0xff] }
 0x97c   :  { %v1897_v2 = vsel %vm1894_vm12, %v1896_v8, %v1892_v28  ;;  %v2008_v37 = vadd.f32 %v2007_v11, %v1979_v9  ;;  %v1927_v31 = vmul.f32 %v5877_v42, %v1926_v17  ;;  %v1611_v36 = vmul.f32 0.5, %v7519_v51  ;;  %v5346_v9 = vld [vmem:[%s9571_s3 + $0xb0] sm:$0xff]  ;;  %v5345_v11 = vld [vmem:[%s9571_s3 + $0xa8] sm:$0xff] }
 0x97d   :  { %1980 = vmatmul.f32.gmra.mxu3 %v1953_v49  ;;  %v5337_v27 = vclamps-f32 %v1858_v47, 1.0  ;;  %v1898_v16 = vmul.f32 %v1897_v2, %v1873_v50  ;;  %v5349_v2 = vld [vmem:[%s9571_s3 + $0xc8] sm:$0xff] }
 0x97e   :  { %v2018_v19 = vmul.f32 %v7583_v3, %v2008_v37  ;;  %v1928_v43 = vadd.f32 %v5877_v42, %v1927_v31  ;;  %v5343_v37 = vld [vmem:[%s9571_s3 + $0x98] sm:$0xff] }
 0x97f   :  { %v1946_v13 = vadd.f32 1.0, %v5337_v27  ;;  %v5338_v0 = vclamps-f32 %v1898_v16, 1.0 }
 0x980   :  { %v7626_v32 = vadd.f32 %v2018_v19, %v7165_v24  ;;  %v1932_v55 = vsel %vm1931_vm0, %v5877_v42, %v1928_v43 }
 0x981   :  { %v1954_v15 = vmul.f32 %v1946_v13, %v1610_v29  ;;  %v1947_v62 = vadd.f32 1.0, %v5338_v0  ;;  %v1937_v52 = vsel %vm1934_vm2, %v1936_v12, %v1932_v55  ;;  %v5351_v29 = vld [vmem:[%s9571_s3 + $0xd8] sm:$0xff]  ;;  %v5341_v0 = vld [vmem:[%s9571_s3 + $0x88] sm:$0xff] }
 0x982   :  { %v2142_v51 = vsel %vm489_vm1, %v7626_v32, 0.0  ;;  %v1938_v48 = vmul.f32 %v1937_v52, %v1913_v40  ;;  %v5347_v13 = vld [vmem:[%s9571_s3 + $0xb8] sm:$0xff]  ;;  %v5412_v40 = vld [vmem:[%s9575_s7 + $0x20] sm:$0xff] }
 0x983   :  { %2009 = vmatmul.f32.gmra.mxu0 %v1954_v15  ;;  %v1955_v33 = vmul.f32 %v1947_v62, %v1611_v36  ;;  %2143 = vadd.xlane.f32.xlu1 %v2142_v51  ;;  %v5340_v15 = vld [vmem:[%s9571_s3 + $0x80] sm:$0xff]  ;;  %v7712_v51 = vperm.slane %v5412_v40, 0 }
 0x984   :  { %v5339_v53 = vclamps-f32 %v1938_v48, 1.0 }
 0x985   :  { %1983 = vmatmul.f32.gmra.mxu3 %v1955_v33 }
 0x986   :  { %v1948_v58 = vadd.f32 1.0, %v5339_v53  ;;  %v7714_v53 = vperm.slane %v5412_v40, 1 }
 0x988   :  { %v1956_v10 = vmul.f32 %v1948_v58, %v1612_v44 }
 0x98b   :  { %2012 = vmatmul.f32.gmra.mxu0 %v1956_v10 }
 0x9ea   :  { %v2141_v54 = vpop.xlane.xlu2 %2140 }
 0x9eb   :  { %v2151_v24 = vmul.f32 %v2141_v54, %v6586_v63 }
 0x9ed   :  { %v7633_v6 = vsub.f32 %v7600_v20, %v2151_v24 }
 0x9ef   :  { %v2159_v25 = vmul.f32 %v7633_v6, %v7633_v6 }
 0x9f1   :  { %v2163_v39 = vsel %vm489_vm1, %v2159_v25, 0.0 }
 0x9f2   :  { %2164 = vadd.xlane.f32.xlu0 %v2163_v39 }
 0x9f6   :  { %v2144_v7 = vpop.xlane.xlu1 %2143 }
 0x9f7   :  { %v2152_v45 = vmul.f32 %v2144_v7, %v6586_v63 }
 0x9f9   :  { %v7640_v60 = vsub.f32 %v7626_v32, %v2152_v45 }
 0x9fb   :  { %v2160_v21 = vmul.f32 %v7640_v60, %v7640_v60 }
 0x9fd   :  { %v2166_v14 = vsel %vm489_vm1, %v2160_v21, 0.0 }
 0x9fe   :  { %2167 = vadd.xlane.f32.xlu2 %v2166_v14 }
 0xa00   :  { %v1981_v1 = vpop.f32.mrf.mxu3  ;;  %v2010_v56 = vpop.f32.mrf.mxu0 }
 0xa01   :  { %v1982_v30 = vadd.f32 %v1981_v1, %v7579_v61 }
 0xa03   :  { %v2011_v59 = vadd.f32 %v2010_v56, %v1982_v30 }
 0xa05   :  { %v2019_v49 = vmul.f32 %v7583_v3, %v2011_v59 }
 0xa07   :  { %v7648_v23 = vadd.f32 %v2019_v49, %v7193_v57  ;;  %v5354_v57 = vld [vmem:[%s9571_s3 + $0xf0] sm:$0xff] }
 0xa08   :  { %v1984_v46 = vpop.f32.mrf.mxu3  ;;  %v2013_v50 = vpop.f32.mrf.mxu0  ;;  %2259 = vmatpush.msrb.mxu1 %v5354_v57 }
 0xa09   :  { %v2145_v47 = vsel %vm489_vm1, %v7648_v23, 0.0  ;;  %v1985_v42 = vadd.f32 %v1984_v46, %v7579_v61  ;;  %v5352_v61 = vld [vmem:[%s9571_s3 + $0xe0] sm:$0xff] }
 0xa0a   :  { %2146 = vadd.xlane.f32.xlu1 %v2145_v47  ;;  %2260 = vmatpush.msrb.mxu1 %v5352_v61  ;;  %v7733_v61 = vperm.slane %v5412_v40, 2 }
 0xa0b   :  { %v2014_v4 = vadd.f32 %v2013_v50, %v1985_v42 }
 0xa0d   :  { %v2020_v8 = vmul.f32 %v7583_v3, %v2014_v4  ;;  %v5350_v3 = vld [vmem:[%s9571_s3 + $0xd0] sm:$0xff] }
 0xa0e   :  { %2261 = vmatpush.msrb.mxu1 %v5350_v3 }
 0xa0f   :  { %v7655_v27 = vadd.f32 %v2020_v8, %v7198_v35  ;;  %v5353_v35 = vld [vmem:[%s9571_s3 + $0xe8] sm:$0xff] }
 0xa10   :  { %2289 = vmatpush.msra.mxu2 %v5353_v35  ;;  %2262 = vmatpush.msrb.mxu1 %v5348_v38 }
 0xa11   :  { %v2148_v28 = vsel %vm489_vm1, %v7655_v27, 0.0 }
 0xa12   :  { %2149 = vadd.xlane.f32.xlu0 %v2148_v28  ;;  %2290 = vmatpush.msra.mxu2 %v5351_v29 }
 0xa13   :  { %2263 = vmatpush.msrb.mxu1 %v5346_v9 }
 0xa14   :  { %2291 = vmatpush.msra.mxu2 %v5349_v2 }
 0xa15   :  { %2264 = vmatpush.msrb.mxu1 %v5344_v18 }
 0xa16   :  { %2292 = vmatpush.msra.mxu2 %v5347_v13 }
 0xa17   :  { %2265 = vmatpush.msrb.mxu1 %v5342_v5 }
 0xa18   :  { %2293 = vmatpush.msra.mxu2 %v5345_v11 }
 0xa19   :  { %2266 = vmatpush.msrb.mxu1 %v5340_v15 }
 0xa1a   :  { %2294 = vmatpush.msra.mxu2 %v5343_v37 }
 0xa1c   :  { %2295 = vmatpush.msra.mxu2 %v5341_v0 }
 0xa65   :  { %v2165_v16 = vpop.xlane.xlu0 %2164 }
 0xa66   :  { %v2175_v17 = vmul.f32 %v2165_v16, %v6586_v63 }
 0xa68   :  { %v2179_v41 = vadd.f32 1e-06, %v2175_v17 }
 0xa6a   :  { %5878 = vrsqrt.f32 %v2179_v41  ;;  %vm2189_vm4 = vweird.f32 %v2179_v41 }
 0xa70   :  { %v5879_v31 = vpop.eup %5878 }
 0xa71   :  { %v2184_v36 = vmul.f32 %v5879_v31, %v2179_v41  ;;  %v2168_v43 = vpop.xlane.xlu2 %2167  ;;  %vm2190_vm3 = vweird.f32 %v5879_v31 }
 0xa72   :  { %v2176_v33 = vmul.f32 %v2168_v43, %v6586_v63  ;;  %vm2191_vm5 = vmor %vm2189_vm4, %vm2190_vm3  ;;  %v5413_v43 = vld [vmem:[%s9575_s7 + $0x28] sm:$0xff] }
 0xa73   :  { %v2185_v19 = vmul.f32 %v5879_v31, %v2184_v36 }
 0xa74   :  { %v2180_v52 = vadd.f32 1e-06, %v2176_v33  ;;  %v2238_v33 = vperm.slane %v5413_v43, 2 }
 0xa75   :  { %v2186_v62 = vmul.f32 0.5, %v2185_v19 }
 0xa76   :  { %5880 = vrsqrt.f32 %v2180_v52  ;;  %vm2199_vm7 = vweird.f32 %v2180_v52 }
 0xa77   :  { %v2187_v12 = vsub.f32 1.5, %v2186_v62 }
 0xa79   :  { %v2188_v55 = vmul.f32 %v5879_v31, %v2187_v12 }
 0xa7b   :  { %v2192_v48 = vsel %vm2191_vm5, %v5879_v31, %v2188_v55 }
 0xa7c   :  { %v2223_v44 = vmul.f32 %v2192_v48, %v7633_v6  ;;  %v5881_v39 = vpop.eup %5880 }
 0xa7d   :  { %v2147_v58 = vpop.xlane.xlu1 %2146  ;;  %v2194_v45 = vmul.f32 %v5881_v39, %v2180_v52  ;;  %vm2200_vm6 = vweird.f32 %v5881_v39 }
 0xa7e   :  { %v2153_v10 = vmul.f32 %v2147_v58, %v6586_v63  ;;  %v2228_v54 = vmul.f32 %v7712_v51, %v2223_v44  ;;  %vm2201_vm8 = vmor %vm2199_vm7, %vm2200_vm6 }
 0xa7f   :  { %v2195_v21 = vmul.f32 %v5881_v39, %v2194_v45  ;;  %v7756_v45 = vld [vmem:[%s9578_s10] sm:$0xff] }
 0xa80   :  { %v2157_v24 = vsub.f32 %v7648_v23, %v2153_v10  ;;  %v2233_v25 = vadd.f32 %v7714_v53, %v2228_v54 }
 0xa81   :  { %v2196_v6 = vmul.f32 0.5, %v2195_v21 }
 0xa82   :  { %v2161_v7 = vmul.f32 %v2157_v24, %v2157_v24  ;;  %5447 = vmatmul.msk.f32.vlgmr.msrb.gmra.mxu1 %vm489_vm1, %v2233_v25  ;;  %5451 = vmatmul.msk.f32.vlgmr.msra.gmra.mxu2 %vm489_vm1, %v2233_v25 }
 0xa83   :  { %v2197_v56 = vsub.f32 1.5, %v2196_v6  ;;  %v7764_v6 = vld [vmem:[%s9578_s10 + $0x8] sm:$0xff] }
 0xa84   :  { %v2169_v1 = vsel %vm489_vm1, %v2161_v7, 0.0 }
 0xa85   :  { %2170 = vadd.xlane.f32.xlu2 %v2169_v1  ;;  %v2150_v30 = vpop.xlane.xlu0 %2149  ;;  %v2198_v59 = vmul.f32 %v5881_v39, %v2197_v56 }
 0xa86   :  { %v2154_v14 = vmul.f32 %v2150_v30, %v6586_v63 }
 0xa87   :  { %v2202_v47 = vsel %vm2201_vm8, %v5881_v39, %v2198_v59 }
 0xa88   :  { %v2158_v49 = vsub.f32 %v7655_v27, %v2154_v14  ;;  %v2224_v42 = vmul.f32 %v2202_v47, %v7640_v60  ;;  %v7772_v14 = vld [vmem:[%s9578_s10 + $0x10] sm:$0xff] }
 0xa8a   :  { %v2162_v46 = vmul.f32 %v2158_v49, %v2158_v49  ;;  %v2229_v4 = vmul.f32 %v7712_v51, %v2224_v42  ;;  %v7781_v42 = vld [vmem:[%s9578_s10 + $0x18] sm:$0xff] }
 0xa8c   :  { %v2172_v50 = vsel %vm489_vm1, %v2162_v46, 0.0  ;;  %v2234_v8 = vadd.f32 %v7714_v53, %v2229_v4 }
 0xa8d   :  { %2173 = vadd.xlane.f32.xlu1 %v2172_v50 }
 0xa8e   :  { %5448 = vmatmul.msk.f32.gmra.mxu1 %vm489_vm1, %v2234_v8  ;;  %5452 = vmatmul.msk.f32.gmra.mxu2 %vm489_vm1, %v2234_v8 }
 0xaf8   :  { %v2171_v28 = vpop.xlane.xlu2 %2170 }
 0xaf9   :  { %v2177_v57 = vmul.f32 %v2171_v28, %v6586_v63  ;;  %v7788_v28 = vld [vmem:[%s9578_s10 + $0x20] sm:$0xff] }
 0xafb   :  { %v2181_v34 = vadd.f32 1e-06, %v2177_v57 }
 0xafd   :  { %5882 = vrsqrt.f32 %v2181_v34  ;;  %vm2209_vm10 = vweird.f32 %v2181_v34 }
 0xaff   :  { %v2268_v35 = vpop.f32.mrf.mxu1 }
 0xb00   :  { %v2269_v60 = vadd.f32 %v2268_v35, %v7733_v61  ;;  %v2174_v29 = vpop.xlane.xlu1 %2173  ;;  %v7802_v35 = vld [vmem:[%s9578_s10 + $0x30] sm:$0xff] }
 0xb01   :  { %v2178_v2 = vmul.f32 %v2174_v29, %v6586_v63 }
 0xb02   :  { %2323 = vrot.lane.b32.xlu2 %v2269_v60, %s6094_s22  ;;  %v2309_v39 = vmul.f32 0.25, %v2269_v60 }
 0xb03   :  { %v5883_v3 = vpop.eup %5882  ;;  %v2182_v13 = vadd.f32 1e-06, %v2178_v2 }
 0xb04   :  { %v2204_v38 = vmul.f32 %v5883_v3, %v2181_v34  ;;  %vm2210_vm9 = vweird.f32 %v5883_v3  ;;  %v2315_v59 = vmul.f32 %v7772_v14, %v2309_v39  ;;  %v2317_v57 = vmul.f32 %v7788_v28, %v2309_v39  ;;  %v7795_v34 = vld [vmem:[%s9578_s10 + $0x28] sm:$0xff] }
 0xb05   :  { %5884 = vrsqrt.f32 %v2182_v13  ;;  %vm2211_vm11 = vmor %vm2209_vm10, %vm2210_vm9  ;;  %v2297_v11 = vpop.f32.mrf.mxu2  ;;  %vm2219_vm13 = vweird.f32 %v2182_v13  ;;  %v2319_v60 = vmul.f32 %v7802_v35, %v2309_v39 }
 0xb06   :  { %v2205_v9 = vmul.f32 %v5883_v3, %v2204_v38  ;;  %v2298_v10 = vadd.f32 %v2297_v11, %v2238_v33 }
 0xb08   :  { %v2206_v16 = vmul.f32 0.5, %v2205_v9 }
 0xb0a   :  { %v2207_v17 = vsub.f32 1.5, %v2206_v16 }
 0xb0b   :  { %v5885_v41 = vpop.eup %5884  ;;  %v2271_v31 = vpop.f32.mrf.mxu1 }
 0xb0c   :  { %v2208_v18 = vmul.f32 %v5883_v3, %v2207_v17  ;;  %v2214_v15 = vmul.f32 %v5885_v41, %v2182_v13  ;;  %v2272_v19 = vadd.f32 %v2271_v31, %v7733_v61  ;;  %vm2220_vm12 = vweird.f32 %v5885_v41 }
 0xb0d   :  { %vm2221_vm14 = vmor %vm2219_vm13, %vm2220_vm12 }
 0xb0e   :  { %v2212_v5 = vsel %vm2211_vm11, %v5883_v3, %v2208_v18  ;;  %v2215_v0 = vmul.f32 %v5885_v41, %v2214_v15  ;;  %2325 = vrot.lane.b32.xlu0 %v2272_v19, %s6094_s22  ;;  %v7809_v3 = vld [vmem:[%s9578_s10 + $0x38] sm:$0xff] }
 0xb0f   :  { %v2225_v37 = vmul.f32 %v2212_v5, %v2157_v24 }
 0xb10   :  { %v2216_v62 = vmul.f32 0.5, %v2215_v0 }
 0xb11   :  { %v2230_v36 = vmul.f32 %v7712_v51, %v2225_v37  ;;  %v2300_v52 = vpop.f32.mrf.mxu2 }
 0xb12   :  { %v2217_v12 = vsub.f32 1.5, %v2216_v62  ;;  %v2301_v48 = vadd.f32 %v2300_v52, %v2238_v33  ;;  %v5417_v52 = vld [vmem:[%s9576_s8 + $0x90] sm:$0xff] }
 0xb13   :  { %v2235_v40 = vadd.f32 %v7714_v53, %v2230_v36 }
 0xb14   :  { %v2218_v55 = vmul.f32 %v5885_v41, %v2217_v12  ;;  %2652 = vmatpush.msrb.mxu2 %v2301_v48  ;;  %v5418_v48 = vld [vmem:[%s9576_s8 + $0x98] sm:$0xff] }
 0xb15   :  { %5449 = vmatmul.msk.f32.gmra.mxu1 %vm489_vm1, %v2235_v40  ;;  %5453 = vmatmul.msk.f32.gmra.mxu2 %vm489_vm1, %v2235_v40 }
 0xb16   :  { %v2222_v44 = vsel %vm2221_vm14, %v5885_v41, %v2218_v55  ;;  %2653 = vmatpush.msrb.mxu2 %v2298_v10  ;;  %v5416_v55 = vld [vmem:[%s9576_s8 + $0x88] sm:$0xff]  ;;  %v5421_v10 = vld [vmem:[%s9576_s8 + $0xb0] sm:$0xff] }
 0xb17   :  { %v2226_v58 = vmul.f32 %v2222_v44, %v2158_v49  ;;  %v5419_v44 = vld [vmem:[%s9576_s8 + $0xa0] sm:$0xff] }
 0xb19   :  { %v2231_v54 = vmul.f32 %v7712_v51, %v2226_v58  ;;  %v2313_v51 = vmul.f32 %v7756_v45, %v2309_v39  ;;  %v5420_v58 = vld [vmem:[%s9576_s8 + $0xa8] sm:$0xff] }
 0xb1b   :  { %v2236_v24 = vadd.f32 %v7714_v53, %v2231_v54  ;;  %v2310_v53 = vmul.f32 0.25, %v2272_v19  ;;  %v7862_v54 = vld [vmem:[%s9576_s8 + $0xb8] sm:$0xff] }
 0xb1d   :  { %5450 = vmatmul.msk.f32.gmra.mxu1 %vm489_vm1, %v2236_v24  ;;  %5454 = vmatmul.msk.f32.gmra.mxu2 %vm489_vm1, %v2236_v24  ;;  %v2314_v30 = vmul.f32 %v7764_v6, %v2310_v53  ;;  %v2316_v50 = vmul.f32 %v7781_v42, %v2310_v53  ;;  %v2320_v29 = vmul.f32 %v7809_v3, %v2310_v53 }
 0xb5c   :  { %v2324_v7 = vpop.permute.xlu2 %2323 }
 0xb80   :  { %v2326_v25 = vpop.permute.xlu0 %2325 }
 0xb81   :  { %5455 = vmatpush.xpose.msk.msra.mxu3 %vm489_vm1, %v2326_v25 }
 0xb85   :  { %5456 = vmatpush.xpose.msk.msra.mxu3 %vm489_vm1, %v2324_v7 }
 0xb88   :  { %5457 = vmatmul.msk.f32.vlgmr.msra.gmra.mxu3 %vm489_vm1, %v2313_v51 }
 0xb90   :  { %5458 = vmatmul.msk.f32.gmra.mxu3 %vm489_vm1, %v2314_v30 }
 0xb92   :  { %v2274_v1 = vpop.f32.mrf.mxu1 }
 0xb93   :  { %v2275_v21 = vadd.f32 %v2274_v1, %v7733_v61 }
 0xb95   :  { %2703 = vrot.lane.b32.xlu0 %v2275_v21, %s6094_s22  ;;  %v2311_v9 = vmul.f32 0.25, %v2275_v21 }
 0xb97   :  { %v2693_v16 = vmul.f32 %v7756_v45, %v2311_v9  ;;  %v2695_v5 = vmul.f32 %v7772_v14, %v2311_v9  ;;  %v2697_v31 = vmul.f32 %v7788_v28, %v2311_v9  ;;  %v2699_v43 = vmul.f32 %v7802_v35, %v2311_v9 }
 0xb98   :  { %v2303_v56 = vpop.f32.mrf.mxu2  ;;  %5459 = vmatmul.msk.f32.gmra.mxu3 %vm489_vm1, %v2315_v59 }
 0xb99   :  { %v2304_v8 = vadd.f32 %v2303_v56, %v2238_v33 }
 0xb9a   :  { %v2277_v49 = vpop.f32.mrf.mxu1 }
 0xb9b   :  { %v2278_v47 = vadd.f32 %v2277_v49, %v7733_v61  ;;  %v2318_v61 = vmul.f32 %v7795_v34, %v2310_v53 }
 0xb9d   :  { %2705 = vrot.lane.b32.xlu1 %v2278_v47, %s6094_s22  ;;  %v2312_v18 = vmul.f32 0.25, %v2278_v47 }
 0xb9f   :  { %v2694_v11 = vmul.f32 %v7764_v6, %v2312_v18  ;;  %v2696_v15 = vmul.f32 %v7781_v42, %v2312_v18  ;;  %v2698_v19 = vmul.f32 %v7795_v34, %v2312_v18  ;;  %v2700_v12 = vmul.f32 %v7809_v3, %v2312_v18 }
 0xba0   :  { %v2306_v46 = vpop.f32.mrf.mxu2  ;;  %5460 = vmatmul.msk.f32.gmra.mxu3 %vm489_vm1, %v2316_v50 }
 0xba1   :  { %v2307_v4 = vadd.f32 %v2306_v46, %v2238_v33  ;;  %v5415_v33 = vld [vmem:[%s9576_s8 + $0x80] sm:$0xff]  ;;  %v7872_v46 = vld [vmem:[%s9577_s9 + $0xa8] sm:$0xff] }
 0xba3   :  { %2984 = vmatpush.msra.mxu2 %v2307_v4 }
 0xba5   :  { %2985 = vmatpush.msra.mxu2 %v2304_v8 }
 0xba8   :  { %5461 = vmatmul.msk.f32.gmra.mxu3 %vm489_vm1, %v2317_v57  ;;  %v7880_v57 = vld [vmem:[%s9577_s9 + $0x90] sm:$0xff] }
 0xbb0   :  { %5462 = vmatmul.msk.f32.gmra.mxu3 %vm489_vm1, %v2318_v61  ;;  %v7885_v61 = vld [vmem:[%s9577_s9 + $0xb0] sm:$0xff] }
 0xbb8   :  { %5463 = vmatmul.msk.f32.gmra.mxu3 %vm489_vm1, %v2319_v60 }
 0xbc0   :  { %5464 = vmatmul.msk.f32.gmra.mxu3 %vm489_vm1, %v2320_v29 }
 0xc07   :  { %v2704_v13 = vpop.permute.xlu0 %2703 }
 0xc0b   :  { %v2372_v38 = vpop.f32.mrf.mxu3 }
 0xc0f   :  { %v2706_v2 = vpop.permute.xlu1 %2705 }
 0xc10   :  { %5489 = vmatpush.xpose.msk.msrb.mxu3 %vm489_vm1, %v2706_v2 }
 0xc13   :  { %v2375_v17 = vpop.f32.mrf.mxu3 }
 0xc14   :  { %5490 = vmatpush.xpose.msk.msrb.mxu3 %vm489_vm1, %v2704_v13  ;;  %v7895_v13 = vld [vmem:[%s9577_s9 + $0x98] sm:$0xff] }
 0xc17   :  { %5491 = vmatmul.msk.f32.vlgmr.msrb.gmra.mxu3 %vm489_vm1, %v2693_v16  ;;  %v7900_v16 = vld [vmem:[%s9577_s9 + $0xb8] sm:$0xff] }
 0xc1b   :  { %v2378_v41 = vpop.f32.mrf.mxu3 }
 0xc1f   :  { %5492 = vmatmul.msk.f32.gmra.mxu3 %vm489_vm1, %v2694_v11 }
 0xc23   :  { %v2381_v37 = vpop.f32.mrf.mxu3 }
 0xc27   :  { %5493 = vmatmul.msk.f32.gmra.mxu3 %vm489_vm1, %v2695_v5 }
 0xc2b   :  { %v2384_v0 = vpop.f32.mrf.mxu3 }
 0xc2f   :  { %5494 = vmatmul.msk.f32.gmra.mxu3 %vm489_vm1, %v2696_v15  ;;  %v7915_v15 = vld [vmem:[%s9577_s9 + $0xa0] sm:$0xff] }
 0xc33   :  { %v2387_v36 = vpop.f32.mrf.mxu3 }
 0xc37   :  { %5495 = vmatmul.msk.f32.gmra.mxu3 %vm489_vm1, %v2697_v31 }
 0xc3b   :  { %v2390_v62 = vpop.f32.mrf.mxu3 }
 0xc3f   :  { %5496 = vmatmul.msk.f32.gmra.mxu3 %vm489_vm1, %v2698_v19 }
 0xc43   :  { %v2393_v40 = vpop.f32.mrf.mxu3 }
 0xc44   :  { %2428 = vmatpush.msra.mxu0 %v2393_v40 }
 0xc46   :  { %2429 = vmatpush.msra.mxu0 %v2390_v62  ;;  %v7925_v62 = vld [vmem:[%s9577_s9 + $0x88] sm:$0xff] }
 0xc47   :  { %5497 = vmatmul.msk.f32.gmra.mxu3 %vm489_vm1, %v2699_v43 }
 0xc48   :  { %2430 = vmatpush.msra.mxu0 %v2387_v36 }
 0xc4a   :  { %2431 = vmatpush.msra.mxu0 %v2384_v0 }
 0xc4c   :  { %2432 = vmatpush.msra.mxu0 %v2381_v37  ;;  %v7910_v37 = vld [vmem:[%s9577_s9 + $0x80] sm:$0xff] }
 0xc4e   :  { %2433 = vmatpush.msra.mxu0 %v2378_v41 }
 0xc4f   :  { %5498 = vmatmul.msk.f32.gmra.mxu3 %vm489_vm1, %v2700_v12 }
 0xc50   :  { %2434 = vmatpush.msra.mxu0 %v2375_v17 }
 0xc52   :  { %2435 = vmatpush.msra.mxu0 %v2372_v38 }
 0xc53   :  { %5465 = vmatmul.msk.f32.vlgmr.msra.gmra.mxu0 %vm489_vm1, %v5415_v33 }
 0xc5b   :  { %5466 = vmatmul.msk.f32.gmra.mxu0 %vm489_vm1, %v5416_v55 }
 0xc63   :  { %5467 = vmatmul.msk.f32.gmra.mxu0 %vm489_vm1, %v5417_v52 }
 0xc6b   :  { %5468 = vmatmul.msk.f32.gmra.mxu0 %vm489_vm1, %v5418_v48 }
 0xc73   :  { %5469 = vmatmul.msk.f32.gmra.mxu0 %vm489_vm1, %v5419_v44 }
 0xc7b   :  { %5470 = vmatmul.msk.f32.gmra.mxu0 %vm489_vm1, %v5420_v58 }
 0xc83   :  { %5471 = vmatmul.msk.f32.gmra.mxu0 %vm489_vm1, %v5421_v10 }
 0xc8b   :  { %5472 = vmatmul.msk.f32.gmra.mxu0 %vm489_vm1, %v7862_v54 }
 0xc9a   :  { %v2752_v24 = vpop.f32.mrf.mxu3 }
 0xca2   :  { %v2755_v25 = vpop.f32.mrf.mxu3 }
 0xcaa   :  { %v2758_v39 = vpop.f32.mrf.mxu3 }
 0xcb2   :  { %v2761_v7 = vpop.f32.mrf.mxu3 }
 0xcba   :  { %v2764_v51 = vpop.f32.mrf.mxu3 }
 0xcc2   :  { %v2767_v53 = vpop.f32.mrf.mxu3 }
 0xcca   :  { %v2770_v1 = vpop.f32.mrf.mxu3 }
 0xcd0   :  { %v2437_v30 = vpop.f32.mrf.mxu0 }
 0xcd1   :  { %v2438_v0 = vadd.f32 %v7910_v37, %v2437_v30 }
 0xcd2   :  { %v2773_v21 = vpop.f32.mrf.mxu3 }
 0xcd3   :  { %2784 = vmatpush.msrb.mxu0 %v2773_v21  ;;  %v2461_v19 = vsel %vm819_vm15, %v2438_v0, -inf }
 0xcd5   :  { %2785 = vmatpush.msrb.mxu0 %v2770_v1 }
 0xcd7   :  { %2786 = vmatpush.msrb.mxu0 %v2767_v53 }
 0xcd8   :  { %v2440_v56 = vpop.f32.mrf.mxu0 }
 0xcd9   :  { %2787 = vmatpush.msrb.mxu0 %v2764_v51  ;;  %v2441_v43 = vadd.f32 %v7925_v62, %v2440_v56 }
 0xcdb   :  { %2788 = vmatpush.msrb.mxu0 %v2761_v7  ;;  %v2464_v40 = vsel %vm819_vm15, %v2441_v43, -inf }
 0xcdd   :  { %2789 = vmatpush.msrb.mxu0 %v2758_v39 }
 0xcdf   :  { %2790 = vmatpush.msrb.mxu0 %v2755_v25 }
 0xce0   :  { %v2443_v59 = vpop.f32.mrf.mxu0 }
 0xce1   :  { %2791 = vmatpush.msrb.mxu0 %v2752_v24  ;;  %v2444_v60 = vadd.f32 %v7880_v57, %v2443_v59 }
 0xce2   :  { %5499 = vmatmul.msk.f32.vlgmr.msrb.gmra.mxu0 %vm489_vm1, %v5415_v33 }
 0xce3   :  { %v2467_v9 = vsel %vm819_vm15, %v2444_v60, -inf }
 0xce8   :  { %v2446_v49 = vpop.f32.mrf.mxu0 }
 0xce9   :  { %v2447_v17 = vadd.f32 %v7895_v13, %v2446_v49 }
 0xcea   :  { %5500 = vmatmul.msk.f32.gmra.mxu0 %vm489_vm1, %v5416_v55 }
 0xceb   :  { %v2470_v5 = vsel %vm819_vm15, %v2447_v17, -inf }
 0xcf0   :  { %v2449_v47 = vpop.f32.mrf.mxu0 }
 0xcf1   :  { %v2450_v31 = vadd.f32 %v7915_v15, %v2449_v47 }
 0xcf2   :  { %5501 = vmatmul.msk.f32.gmra.mxu0 %vm489_vm1, %v5417_v52 }
 0xcf3   :  { %v2473_v36 = vsel %vm819_vm15, %v2450_v31, -inf }
 0xcf8   :  { %v2452_v50 = vpop.f32.mrf.mxu0 }
 0xcf9   :  { %v2453_v4 = vadd.f32 %v7872_v46, %v2452_v50 }
 0xcfa   :  { %5502 = vmatmul.msk.f32.gmra.mxu0 %vm489_vm1, %v5418_v48 }
 0xcfb   :  { %v2476_v8 = vsel %vm819_vm15, %v2453_v4, -inf }
 0xcfc   :  { %2477 = vmax.xlane.f32.xlu1 %v2476_v8 }
 0xd00   :  { %v2455_v29 = vpop.f32.mrf.mxu0 }
 0xd01   :  { %v2456_v38 = vadd.f32 %v7885_v61, %v2455_v29 }
 0xd02   :  { %5503 = vmatmul.msk.f32.gmra.mxu0 %vm489_vm1, %v5419_v44 }
 0xd03   :  { %v2479_v2 = vsel %vm819_vm15, %v2456_v38, -inf }
 0xd04   :  { %2480 = vmax.xlane.f32.xlu0 %v2479_v2  ;;  %2468 = vmax.xlane.f32.xlu1 %v2467_v9 }
 0xd08   :  { %v2458_v18 = vpop.f32.mrf.mxu0 }
 0xd09   :  { %v2459_v11 = vadd.f32 %v7900_v16, %v2458_v18 }
 0xd0a   :  { %5504 = vmatmul.msk.f32.gmra.mxu0 %vm489_vm1, %v5420_v58 }
 0xd0b   :  { %v2482_v41 = vsel %vm819_vm15, %v2459_v11, -inf }
 0xd0c   :  { %2483 = vmax.xlane.f32.xlu2 %v2482_v41  ;;  %2471 = vmax.xlane.f32.xlu0 %v2470_v5 }
 0xd12   :  { %5505 = vmatmul.msk.f32.gmra.mxu0 %vm489_vm1, %v5421_v10 }
 0xd14   :  { %2474 = vmax.xlane.f32.xlu2 %v2473_v36  ;;  %2462 = vmax.xlane.f32.xlu0 %v2461_v19 }
 0xd1a   :  { %5506 = vmatmul.msk.f32.gmra.mxu0 %vm489_vm1, %v7862_v54 }
 0xd1c   :  { %2465 = vmax.xlane.f32.xlu2 %v2464_v40 }
 0xd5f   :  { %v7931_v12 = vpop.f32.mrf.mxu0 }
 0xd67   :  { %v7933_v33 = vpop.f32.mrf.mxu0 }
 0xd6f   :  { %v7935_v55 = vpop.f32.mrf.mxu0  ;;  %v2478_v52 = vpop.xlane.xlu1 %2477 }
 0xd70   :  { %v2490_v25 = vsub.f32 %v2453_v4, %v2478_v52 }
 0xd72   :  { %v2503_v54 = vmul.f32 1.442695, %v2490_v25 }
 0xd77   :  { %v7937_v48 = vpop.f32.mrf.mxu0  ;;  %v2481_v44 = vpop.xlane.xlu0 %2480 }
 0xd78   :  { %v2469_v58 = vpop.xlane.xlu1 %2468  ;;  %v2491_v30 = vsub.f32 %v2456_v38, %v2481_v44 }
 0xd79   :  { %v2487_v10 = vsub.f32 %v2444_v60, %v2469_v58 }
 0xd7a   :  { %v2505_v49 = vmul.f32 1.442695, %v2491_v30 }
 0xd7b   :  { %v2497_v24 = vmul.f32 1.442695, %v2487_v10 }
 0xd7d   :  { %5886 = vpow2.f32 %v2497_v24 }
 0xd7e   :  { %5888 = vpow2.f32 %v2503_v54 }
 0xd7f   :  { %v2805_v39 = vpop.f32.mrf.mxu0  ;;  %v2484_v7 = vpop.xlane.xlu2 %2483 }
 0xd80   :  { %v2472_v51 = vpop.xlane.xlu0 %2471  ;;  %v2492_v29 = vsub.f32 %v2459_v11, %v2484_v7 }
 0xd81   :  { %v2488_v53 = vsub.f32 %v2447_v17, %v2472_v51 }
 0xd82   :  { %v2507_v5 = vmul.f32 1.442695, %v2492_v29 }
 0xd83   :  { %v2499_v1 = vmul.f32 1.442695, %v2488_v53  ;;  %v7939_v21 = vpop.eup %5886 }
 0xd84   :  { %v2515_v56 = vsel %vm819_vm15, %v7939_v21, 0.0  ;;  %v7943_v60 = vpop.eup %5888 }
 0xd85   :  { %5890 = vpow2.f32 %v2499_v1  ;;  %2516 = vadd.xlane.f32.xlu0 %v2515_v56  ;;  %v2524_v18 = vsel %vm819_vm15, %v7943_v60, 0.0  ;;  %v7972_v1 = vadd.f32 %v7925_v62, %v7933_v33  ;;  %v7985_v62 = vadd.f32 %v7880_v57, %v7935_v55 }
 0xd86   :  { %5892 = vpow2.f32 %v2505_v49  ;;  %v7999_v57 = vadd.f32 %v7910_v37, %v7931_v12 }
 0xd87   :  { %v2808_v59 = vpop.f32.mrf.mxu0  ;;  %v2475_v47 = vpop.xlane.xlu2 %2474  ;;  %v2823_v33 = vsel %vm819_vm15, %v7985_v62, -inf }
 0xd88   :  { %v2463_v50 = vpop.xlane.xlu0 %2462  ;;  %v2489_v4 = vsub.f32 %v2450_v31, %v2475_v47  ;;  %v2817_v55 = vsel %vm819_vm15, %v7999_v57, -inf }
 0xd89   :  { %v2485_v8 = vsub.f32 %v2438_v0, %v2463_v50 }
 0xd8a   :  { %v2501_v2 = vmul.f32 1.442695, %v2489_v4 }
 0xd8b   :  { %v2493_v9 = vmul.f32 1.442695, %v2485_v8  ;;  %v7945_v17 = vpop.eup %5890 }
 0xd8c   :  { %5894 = vpow2.f32 %v2501_v2  ;;  %v2518_v38 = vsel %vm819_vm15, %v7945_v17, 0.0  ;;  %v7951_v31 = vpop.eup %5892 }
 0xd8d   :  { %5896 = vpow2.f32 %v2493_v9  ;;  %2519 = vadd.xlane.f32.xlu2 %v2518_v38  ;;  %2525 = vadd.xlane.f32.xlu0 %v2524_v18  ;;  %v2527_v52 = vsel %vm819_vm15, %v7951_v31, 0.0 }
 0xd8e   :  { %5898 = vpow2.f32 %v2507_v5 }
 0xd8f   :  { %v2811_v41 = vpop.f32.mrf.mxu0  ;;  %v2466_v0 = vpop.xlane.xlu2 %2465 }
 0xd90   :  { %v2486_v36 = vsub.f32 %v2441_v43, %v2466_v0  ;;  %v2806_v43 = vadd.f32 %v7915_v15, %v2805_v39  ;;  %v2820_v39 = vsel %vm819_vm15, %v7972_v1, -inf  ;;  %v7981_v56 = vadd.f32 %v7885_v61, %v2811_v41 }
 0xd92   :  { %v7953_v11 = vpop.eup %5894  ;;  %v2495_v10 = vmul.f32 1.442695, %v2486_v36  ;;  %v2829_v51 = vsel %vm819_vm15, %v2806_v43, -inf }
 0xd93   :  { %v7955_v19 = vpop.eup %5896  ;;  %v2521_v40 = vsel %vm819_vm15, %v7953_v11, 0.0 }
 0xd94   :  { %2522 = vadd.xlane.f32.xlu1 %v2521_v40  ;;  %v2509_v44 = vsel %vm819_vm15, %v7955_v19, 0.0  ;;  %v5899_v25 = vpop.eup %5898  ;;  %5900 = vpow2.f32 %v2495_v10 }
 0xd95   :  { %2528 = vadd.xlane.f32.xlu2 %v2527_v52  ;;  %2510 = vadd.xlane.f32.xlu0 %v2509_v44  ;;  %v2530_v7 = vsel %vm819_vm15, %v5899_v25, 0.0 }
 0xd97   :  { %v2814_v58 = vpop.f32.mrf.mxu0 }
 0xd98   :  { %v2815_v24 = vadd.f32 %v7900_v16, %v2814_v58  ;;  %v2809_v16 = vadd.f32 %v7872_v46, %v2808_v59  ;;  %v2835_v46 = vsel %vm819_vm15, %v7981_v56, -inf  ;;  %v7993_v59 = vadd.f32 %v7895_v13, %v7937_v48 }
 0xd9a   :  { %v2838_v54 = vsel %vm819_vm15, %v2815_v24, -inf  ;;  %v7968_v53 = vpop.eup %5900  ;;  %v2832_v30 = vsel %vm819_vm15, %v2809_v16, -inf  ;;  %v2826_v61 = vsel %vm819_vm15, %v7993_v59, -inf }
 0xd9b   :  { %v2512_v15 = vsel %vm819_vm15, %v7968_v53, 0.0 }
 0xd9c   :  { %2531 = vadd.xlane.f32.xlu1 %v2530_v7 }
 0xd9d   :  { %2830 = vmax.xlane.f32.xlu0 %v2829_v51  ;;  %2839 = vmax.xlane.f32.xlu2 %v2838_v54 }
 0xda4   :  { %2513 = vadd.xlane.f32.xlu1 %v2512_v15 }
 0xda5   :  { %2821 = vmax.xlane.f32.xlu0 %v2820_v39  ;;  %2833 = vmax.xlane.f32.xlu2 %v2832_v30 }
 0xdac   :  { %2836 = vmax.xlane.f32.xlu1 %v2835_v46 }
 0xdad   :  { %2824 = vmax.xlane.f32.xlu2 %v2823_v33 }
 0xdb4   :  { %2827 = vmax.xlane.f32.xlu1 %v2826_v61 }
 0xdbc   :  { %2818 = vmax.xlane.f32.xlu1 %v2817_v55 }
 0xdf8   :  { %v2517_v49 = vpop.xlane.xlu0 %2516 }
 0xe00   :  { %v2520_v47 = vpop.xlane.xlu2 %2519  ;;  %v2526_v50 = vpop.xlane.xlu0 %2525 }
 0xe07   :  { %v2523_v4 = vpop.xlane.xlu1 %2522 }
 0xe08   :  { %v2529_v8 = vpop.xlane.xlu2 %2528  ;;  %v2511_v29 = vpop.xlane.xlu0 %2510 }
 0xe09   :  { %5902 = vrcp.f32 %v2529_v8 }
 0xe0f   :  { %v2532_v13 = vpop.xlane.xlu1 %2531  ;;  %v5903_v12 = vpop.eup %5902 }
 0xe10   :  { %5904 = vrcp.f32 %v2532_v13  ;;  %v2831_v48 = vpop.xlane.xlu0 %2830  ;;  %v2840_v2 = vpop.xlane.xlu2 %2839  ;;  %v2547_v58 = vmul.f32 %v5903_v12, %v7951_v31 }
 0xe11   :  { %v2848_v9 = vsub.f32 %v2815_v24, %v2840_v2  ;;  %5906 = vrcp.f32 %v2526_v50  ;;  %v2845_v37 = vsub.f32 %v2806_v43, %v2831_v48 }
 0xe12   :  { %5908 = vrcp.f32 %v2523_v4 }
 0xe13   :  { %v2863_v38 = vmul.f32 1.442695, %v2848_v9  ;;  %5910 = vrcp.f32 %v2520_v47  ;;  %v2857_v36 = vmul.f32 1.442695, %v2845_v37 }
 0xe15   :  { %5912 = vpow2.f32 %v2863_v38 }
 0xe16   :  { %v5905_v18 = vpop.eup %5904  ;;  %5914 = vrcp.f32 %v2517_v49 }
 0xe17   :  { %v2514_v41 = vpop.xlane.xlu1 %2513  ;;  %v2548_v5 = vmul.f32 %v5905_v18, %v5899_v25  ;;  %v5907_v0 = vpop.eup %5906 }
 0xe18   :  { %v2822_v40 = vpop.xlane.xlu0 %2821  ;;  %v2834_v52 = vpop.xlane.xlu2 %2833  ;;  %5916 = vrcp.f32 %v2514_v41  ;;  %v2546_v7 = vmul.f32 %v5907_v0, %v7943_v60  ;;  %v8054_v0 = vld [vmem:[%s9576_s8 + $0xd0] sm:$0xff] }
 0xe19   :  { %2581 = vmatpush.msra.mxu1 %v2548_v5  ;;  %v2846_v44 = vsub.f32 %v2809_v16, %v2834_v52  ;;  %v5909_v10 = vpop.eup %5908  ;;  %5918 = vrcp.f32 %v2511_v29  ;;  %v2842_v43 = vsub.f32 %v7972_v1, %v2822_v40  ;;  %v8062_v40 = vld [vmem:[%s9576_s8 + $0xd8] sm:$0xff]  ;;  %v8069_v52 = vld [vmem:[%s9576_s8 + $0xe0] sm:$0xff] }
 0xe1a   :  { %v5911_v24 = vpop.eup %5910  ;;  %5920 = vpow2.f32 %v2857_v36  ;;  %v2545_v16 = vmul.f32 %v5909_v10, %v7953_v11  ;;  %v8090_v10 = vld [vmem:[%s9576_s8 + $0xf8] sm:$0xff] }
 0xe1b   :  { %v2859_v54 = vmul.f32 1.442695, %v2846_v44  ;;  %2582 = vmatpush.msra.mxu1 %v2547_v58  ;;  %v8006_v25 = vpop.eup %5912  ;;  %v2851_v15 = vmul.f32 1.442695, %v2842_v43  ;;  %v2544_v1 = vmul.f32 %v5911_v24, %v7945_v17  ;;  %v8076_v44 = vld [vmem:[%s9576_s8 + $0xe8] sm:$0xff]  ;;  %v8083_v58 = vld [vmem:[%s9576_s8 + $0xf0] sm:$0xff] }
 0xe1c   :  { %v2886_v51 = vsel %vm819_vm15, %v8006_v25, 0.0  ;;  %v5915_v31 = vpop.eup %5914 }
 0xe1d   :  { %2583 = vmatpush.msra.mxu1 %v2546_v7  ;;  %5922 = vpow2.f32 %v2859_v54  ;;  %2887 = vadd.xlane.f32.xlu2 %v2886_v51  ;;  %v2543_v55 = vmul.f32 %v5915_v31, %v7939_v21  ;;  %v8098_v31 = vld [vmem:[%s9577_s9 + $0xc0] sm:$0xff] }
 0xe1e   :  { %v5917_v30 = vpop.eup %5916  ;;  %5924 = vpow2.f32 %v2851_v15 }
 0xe1f   :  { %v2837_v39 = vpop.xlane.xlu1 %2836  ;;  %2584 = vmatpush.msra.mxu1 %v2545_v16  ;;  %v5919_v33 = vpop.eup %5918  ;;  %v2542_v50 = vmul.f32 %v5917_v30, %v7968_v53 }
 0xe20   :  { %v2847_v60 = vsub.f32 %v7981_v56, %v2837_v39  ;;  %v2825_v46 = vpop.xlane.xlu2 %2824  ;;  %v8015_v49 = vpop.eup %5920  ;;  %v2541_v21 = vmul.f32 %v5919_v33, %v7955_v19 }
 0xe21   :  { %v2843_v61 = vsub.f32 %v7985_v62, %v2825_v46  ;;  %2585 = vmatpush.msra.mxu1 %v2544_v1  ;;  %v2877_v56 = vsel %vm819_vm15, %v8015_v49, 0.0  ;;  %v8028_v62 = vld [vmem:[%s9576_s8 + $0xc0] sm:$0xff] }
 0xe22   :  { %v2861_v11 = vmul.f32 1.442695, %v2847_v60 }
 0xe23   :  { %v2853_v47 = vmul.f32 1.442695, %v2843_v61  ;;  %2586 = vmatpush.msra.mxu1 %v2543_v55  ;;  %v8018_v4 = vpop.eup %5922 }
 0xe24   :  { %5926 = vpow2.f32 %v2861_v11  ;;  %v2880_v17 = vsel %vm819_vm15, %v8018_v4, 0.0  ;;  %v8033_v29 = vpop.eup %5924  ;;  %v8106_v11 = vld [vmem:[%s9577_s9 + $0xc8] sm:$0xff] }
 0xe25   :  { %5928 = vpow2.f32 %v2853_v47  ;;  %2587 = vmatpush.msra.mxu1 %v2542_v50  ;;  %2881 = vadd.xlane.f32.xlu1 %v2880_v17  ;;  %v2868_v38 = vsel %vm819_vm15, %v8033_v29, 0.0 }
 0xe26   :  { %2878 = vadd.xlane.f32.xlu2 %v2877_v56 }
 0xe27   :  { %v2828_v53 = vpop.xlane.xlu1 %2827  ;;  %2588 = vmatpush.msra.mxu1 %v2541_v21 }
 0xe28   :  { %v2844_v8 = vsub.f32 %v7993_v59, %v2828_v53  ;;  %5473 = vmatmul.msk.f32.vlgmr.msra.gmra.mxu1 %vm489_vm1, %v8028_v62  ;;  %v8045_v59 = vld [vmem:[%s9576_s8 + $0xc8] sm:$0xff] }
 0xe2a   :  { %v5927_v13 = vpop.eup %5926  ;;  %v2855_v48 = vmul.f32 1.442695, %v2844_v8 }
 0xe2b   :  { %v8035_v2 = vpop.eup %5928  ;;  %v2883_v19 = vsel %vm819_vm15, %v5927_v13, 0.0 }
 0xe2c   :  { %5930 = vpow2.f32 %v2855_v48  ;;  %2884 = vadd.xlane.f32.xlu0 %v2883_v19  ;;  %v2871_v9 = vsel %vm819_vm15, %v8035_v2, 0.0 }
 0xe2d   :  { %2872 = vadd.xlane.f32.xlu1 %v2871_v9 }
 0xe2e   :  { %2869 = vadd.xlane.f32.xlu2 %v2868_v38 }
 0xe2f   :  { %v2819_v37 = vpop.xlane.xlu1 %2818 }
 0xe30   :  { %v2841_v12 = vsub.f32 %v7999_v57, %v2819_v37  ;;  %5474 = vmatmul.msk.f32.gmra.mxu1 %vm489_vm1, %v8045_v59 }
 0xe32   :  { %v5931_v18 = vpop.eup %5930  ;;  %v2849_v41 = vmul.f32 1.442695, %v2841_v12 }
 0xe33   :  { %v2874_v5 = vsel %vm819_vm15, %v5931_v18, 0.0 }
 0xe34   :  { %5932 = vpow2.f32 %v2849_v41  ;;  %2875 = vadd.xlane.f32.xlu0 %v2874_v5 }
 0xe38   :  { %5475 = vmatmul.msk.f32.gmra.mxu1 %vm489_vm1, %v8054_v0 }
 0xe3a   :  { %v5933_v36 = vpop.eup %5932 }
 0xe3b   :  { %v2865_v57 = vsel %vm819_vm15, %v5933_v36, 0.0 }
 0xe3c   :  { %2866 = vadd.xlane.f32.xlu0 %v2865_v57 }
 0xe40   :  { %5476 = vmatmul.msk.f32.gmra.mxu1 %vm489_vm1, %v8062_v40 }
 0xe48   :  { %5477 = vmatmul.msk.f32.gmra.mxu1 %vm489_vm1, %v8069_v52 }
 0xe50   :  { %5478 = vmatmul.msk.f32.gmra.mxu1 %vm489_vm1, %v8076_v44 }
 0xe58   :  { %5479 = vmatmul.msk.f32.gmra.mxu1 %vm489_vm1, %v8083_v58 }
 0xe60   :  { %5480 = vmatmul.msk.f32.gmra.mxu1 %vm489_vm1, %v8090_v10 }
 0xe90   :  { %v2888_v24 = vpop.xlane.xlu2 %2887 }
 0xe91   :  { %5934 = vrcp.f32 %v2888_v24 }
 0xe97   :  { %v5935_v43 = vpop.eup %5934 }
 0xe98   :  { %v2904_v54 = vmul.f32 %v5935_v43, %v8006_v25  ;;  %v2882_v7 = vpop.xlane.xlu1 %2881  ;;  %v8155_v43 = vld [vmem:[%s9577_s9 + $0xf8] sm:$0xff] }
 0xe99   :  { %v2879_v51 = vpop.xlane.xlu2 %2878  ;;  %5936 = vrcp.f32 %v2882_v7  ;;  %v5363_v7 = vld [vmem:[%s9572_s4 + $0x78] sm:$0xff] }
 0xe9a   :  { %2913 = vmatpush.msrb.mxu1 %v2904_v54  ;;  %3046 = vmatpush.msra.mxu3 %v5363_v7 }
 0xe9f   :  { %v2885_v16 = vpop.xlane.xlu0 %2884  ;;  %v5937_v39 = vpop.eup %5936 }
 0xea0   :  { %5938 = vrcp.f32 %v2885_v16  ;;  %v2873_v15 = vpop.xlane.xlu1 %2872  ;;  %v2902_v55 = vmul.f32 %v5937_v39, %v8018_v4  ;;  %v5362_v16 = vld [vmem:[%s9572_s4 + $0x70] sm:$0xff]  ;;  %v5359_v39 = vld [vmem:[%s9572_s4 + $0x58] sm:$0xff] }
 0xea1   :  { %5940 = vrcp.f32 %v2879_v51  ;;  %v2870_v25 = vpop.xlane.xlu2 %2869  ;;  %3047 = vmatpush.msra.mxu3 %v5362_v16  ;;  %v8216_v16 = vld [vmem:[%s9575_s7 + $0x20] sm:$0xff] }
 0xea2   :  { %5942 = vrcp.f32 %v2873_v15  ;;  %v5360_v15 = vld [vmem:[%s9572_s4 + $0x60] sm:$0xff] }
 0xea5   :  { %v2590_v1 = vpop.f32.mrf.mxu1 }
 0xea6   :  { %v5939_v30 = vpop.eup %5938  ;;  %v2591_v60 = vadd.f32 %v8098_v31, %v2590_v1 }
 0xea7   :  { %v2876_v46 = vpop.xlane.xlu0 %2875  ;;  %v2903_v33 = vmul.f32 %v5939_v30, %v5927_v13  ;;  %v5941_v61 = vpop.eup %5940  ;;  %v5358_v30 = vld [vmem:[%s9572_s4 + $0x50] sm:$0xff] }
 0xea8   :  { %5944 = vrcp.f32 %v2876_v46  ;;  %5481 = vmatmul.msk.f32.vlgmr.msrb.gmra.mxu2 %vm819_vm15, %v2591_v60  ;;  %v2901_v47 = vmul.f32 %v5941_v61, %v8015_v49  ;;  %v5943_v50 = vpop.eup %5942  ;;  %v8115_v49 = vld [vmem:[%s9577_s9 + $0xd0] sm:$0xff]  ;;  %v5356_v46 = vld [vmem:[%s9572_s4 + $0x40] sm:$0xff] }
 0xea9   :  { %2914 = vmatpush.msrb.mxu1 %v2903_v33  ;;  %5946 = vrcp.f32 %v2870_v25  ;;  %v2899_v4 = vmul.f32 %v5943_v50, %v8035_v2  ;;  %v5442_v2 = vld [vmem:[%s9577_s9 + $0xd8] sm:$0xff] }
 0xeab   :  { %2915 = vmatpush.msrb.mxu1 %v2902_v55 }
 0xead   :  { %v2593_v17 = vpop.f32.mrf.mxu1  ;;  %2916 = vmatpush.msrb.mxu1 %v2901_v47 }
 0xeae   :  { %v5945_v56 = vpop.eup %5944  ;;  %v2594_v21 = vadd.f32 %v8106_v11, %v2593_v17 }
 0xeaf   :  { %v2867_v53 = vpop.xlane.xlu0 %2866  ;;  %v2900_v8 = vmul.f32 %v5945_v56, %v5931_v18  ;;  %v5947_v13 = vpop.eup %5946 }
 0xeb0   :  { %5948 = vrcp.f32 %v2867_v53  ;;  %5482 = vmatmul.msk.f32.gmra.mxu2 %vm819_vm15, %v2594_v21  ;;  %v2898_v48 = vmul.f32 %v5947_v13, %v8033_v29  ;;  %v5443_v29 = vld [vmem:[%s9577_s9 + $0xe0] sm:$0xff] }
 0xeb1   :  { %2917 = vmatpush.msrb.mxu1 %v2900_v8 }
 0xeb3   :  { %2918 = vmatpush.msrb.mxu1 %v2899_v4 }
 0xeb5   :  { %v2596_v19 = vpop.f32.mrf.mxu1  ;;  %2919 = vmatpush.msrb.mxu1 %v2898_v48 }
 0xeb6   :  { %v5949_v9 = vpop.eup %5948  ;;  %v2597_v38 = vadd.f32 %v8115_v49, %v2596_v19 }
 0xeb7   :  { %v2897_v37 = vmul.f32 %v5949_v9, %v5933_v36 }
 0xeb8   :  { %5483 = vmatmul.msk.f32.gmra.mxu2 %vm819_vm15, %v2597_v38 }
 0xeb9   :  { %2920 = vmatpush.msrb.mxu1 %v2897_v37 }
 0xeba   :  { %5507 = vmatmul.msk.f32.vlgmr.msrb.gmra.mxu1 %vm489_vm1, %v8028_v62  ;;  %v8137_v62 = vld [vmem:[%s9577_s9 + $0xe8] sm:$0xff] }
 0xebd   :  { %v2599_v12 = vpop.f32.mrf.mxu1 }
 0xebe   :  { %v2600_v18 = vadd.f32 %v5442_v2, %v2599_v12 }
 0xec0   :  { %5484 = vmatmul.msk.f32.gmra.mxu2 %vm819_vm15, %v2600_v18 }
 0xec2   :  { %5508 = vmatmul.msk.f32.gmra.mxu1 %vm489_vm1, %v8045_v59  ;;  %v8146_v59 = vld [vmem:[%s9577_s9 + $0xf0] sm:$0xff] }
 0xec5   :  { %v2602_v41 = vpop.f32.mrf.mxu1 }
 0xec6   :  { %v2603_v5 = vadd.f32 %v5443_v29, %v2602_v41 }
 0xec8   :  { %5485 = vmatmul.msk.f32.gmra.mxu2 %vm819_vm15, %v2603_v5 }
 0xeca   :  { %5509 = vmatmul.msk.f32.gmra.mxu1 %vm489_vm1, %v8054_v0 }
 0xecd   :  { %v2605_v36 = vpop.f32.mrf.mxu1 }
 0xece   :  { %v2606_v57 = vadd.f32 %v8137_v62, %v2605_v36 }
 0xed0   :  { %5486 = vmatmul.msk.f32.gmra.mxu2 %vm819_vm15, %v2606_v57 }
 0xed2   :  { %5510 = vmatmul.msk.f32.gmra.mxu1 %vm489_vm1, %v8062_v40 }
 0xed5   :  { %v2608_v24 = vpop.f32.mrf.mxu1 }
 0xed6   :  { %v2609_v0 = vadd.f32 %v8146_v59, %v2608_v24 }
 0xed8   :  { %5487 = vmatmul.msk.f32.gmra.mxu2 %vm819_vm15, %v2609_v0 }
 0xeda   :  { %5511 = vmatmul.msk.f32.gmra.mxu1 %vm489_vm1, %v8069_v52 }
 0xedd   :  { %v2611_v54 = vpop.f32.mrf.mxu1 }
 0xede   :  { %v2612_v40 = vadd.f32 %v8155_v43, %v2611_v54 }
 0xee0   :  { %5488 = vmatmul.msk.f32.gmra.mxu2 %vm819_vm15, %v2612_v40 }
 0xee2   :  { %5512 = vmatmul.msk.f32.gmra.mxu1 %vm489_vm1, %v8076_v44  ;;  %v5361_v44 = vld [vmem:[%s9572_s4 + $0x68] sm:$0xff] }
 0xee3   :  { %3048 = vmatpush.msra.mxu3 %v5361_v44  ;;  %v3067_v44 = vperm.slane %v8216_v16, 4 }
 0xee5   :  { %3049 = vmatpush.msra.mxu3 %v5360_v15 }
 0xee7   :  { %3050 = vmatpush.msra.mxu3 %v5359_v39 }
 0xee9   :  { %3051 = vmatpush.msra.mxu3 %v5358_v30 }
 0xeea   :  { %5513 = vmatmul.msk.f32.gmra.mxu1 %vm489_vm1, %v8083_v58 }
 0xef2   :  { %5514 = vmatmul.msk.f32.gmra.mxu1 %vm489_vm1, %v8090_v10 }
 0xf2b   :  { %v2655_v52 = vpop.f32.mrf.mxu2 }
 0xf2c   :  { %v2679_v56 = vmul.f32 %v7756_v45, %v2655_v52 }
 0xf33   :  { %v2658_v51 = vpop.f32.mrf.mxu2 }
 0xf34   :  { %v2680_v48 = vmul.f32 %v7764_v6, %v2658_v51 }
 0xf37   :  { %v2922_v58 = vpop.f32.mrf.mxu1 }
 0xf38   :  { %v2923_v10 = vadd.f32 %v8098_v31, %v2922_v58  ;;  %v5357_v31 = vld [vmem:[%s9572_s4 + $0x48] sm:$0xff] }
 0xf39   :  { %3052 = vmatpush.msra.mxu3 %v5357_v31 }
 0xf3a   :  { %5515 = vmatmul.msk.f32.vlgmr.msra.gmra.mxu2 %vm819_vm15, %v2923_v10 }
 0xf3b   :  { %v2661_v1 = vpop.f32.mrf.mxu2  ;;  %3053 = vmatpush.msra.mxu3 %v5356_v46 }
 0xf3f   :  { %v2925_v60 = vpop.f32.mrf.mxu1 }
 0xf40   :  { %v2926_v25 = vadd.f32 %v8106_v11, %v2925_v60  ;;  %v2681_v11 = vmul.f32 %v7772_v14, %v2661_v1 }
 0xf42   :  { %5516 = vmatmul.msk.f32.gmra.mxu2 %vm819_vm15, %v2926_v25  ;;  %v2687_v53 = vadd.f32 %v2681_v11, %v2679_v56 }
 0xf43   :  { %v2664_v33 = vpop.f32.mrf.mxu2 }
 0xf47   :  { %v2928_v61 = vpop.f32.mrf.mxu1 }
 0xf48   :  { %v2929_v55 = vadd.f32 %v8115_v49, %v2928_v61  ;;  %v2682_v49 = vmul.f32 %v7781_v42, %v2664_v33 }
 0xf4a   :  { %5517 = vmatmul.msk.f32.gmra.mxu2 %vm819_vm15, %v2929_v55  ;;  %v2688_v37 = vadd.f32 %v2682_v49, %v2680_v48 }
 0xf4b   :  { %v2667_v47 = vpop.f32.mrf.mxu2 }
 0xf4c   :  { %v2683_v8 = vmul.f32 %v7788_v28, %v2667_v47 }
 0xf4e   :  { %v2689_v19 = vadd.f32 %v2687_v53, %v2683_v8 }
 0xf4f   :  { %v2931_v50 = vpop.f32.mrf.mxu1 }
 0xf50   :  { %v2932_v17 = vadd.f32 %v5442_v2, %v2931_v50 }
 0xf52   :  { %5518 = vmatmul.msk.f32.gmra.mxu2 %vm819_vm15, %v2932_v17 }
 0xf53   :  { %v2670_v21 = vpop.f32.mrf.mxu2 }
 0xf54   :  { %v2684_v2 = vmul.f32 %v7795_v34, %v2670_v21 }
 0xf57   :  { %v2934_v13 = vpop.f32.mrf.mxu1 }
 0xf58   :  { %v2935_v4 = vadd.f32 %v5443_v29, %v2934_v13  ;;  %v2690_v29 = vadd.f32 %v2688_v37, %v2684_v2 }
 0xf5a   :  { %5519 = vmatmul.msk.f32.gmra.mxu2 %vm819_vm15, %v2935_v4 }
 0xf5b   :  { %v2673_v9 = vpop.f32.mrf.mxu2 }
 0xf5c   :  { %v2685_v38 = vmul.f32 %v7802_v35, %v2673_v9 }
 0xf5e   :  { %v2691_v12 = vadd.f32 %v2689_v19, %v2685_v38 }
 0xf5f   :  { %v2937_v18 = vpop.f32.mrf.mxu1 }
 0xf60   :  { %v2938_v41 = vadd.f32 %v8137_v62, %v2937_v18  ;;  %5523 = vmatmul.msk.f32.vlgmr.msra.gmra.mxu3 %vm489_vm1, %v2691_v12 }
 0xf62   :  { %5520 = vmatmul.msk.f32.gmra.mxu2 %vm819_vm15, %v2938_v41 }
 0xf63   :  { %v2676_v6 = vpop.f32.mrf.mxu2 }
 0xf64   :  { %v2686_v5 = vmul.f32 %v7809_v3, %v2676_v6 }
 0xf66   :  { %v2692_v36 = vadd.f32 %v2690_v29, %v2686_v5 }
 0xf67   :  { %v2940_v57 = vpop.f32.mrf.mxu1 }
 0xf68   :  { %v2941_v24 = vadd.f32 %v8146_v59, %v2940_v57  ;;  %5524 = vmatmul.msk.f32.gmra.mxu3 %vm489_vm1, %v2692_v36  ;;  %v3025_v59 = vperm.slane %v8216_v16, 3  ;;  %v5378_v57 = vld [vmem:[%s9573_s5 + $0xf0] sm:$0xff] }
 0xf69   :  { %3196 = vmatpush.msra.mxu0 %v5378_v57  ;;  %v5395_v57 = vld [vmem:[%s9574_s6 + $0x178] sm:$0xff] }
 0xf6a   :  { %5521 = vmatmul.msk.f32.gmra.mxu2 %vm819_vm15, %v2941_v24  ;;  %v5379_v24 = vld [vmem:[%s9573_s5 + $0xf8] sm:$0xff] }
 0xf6b   :  { %3225 = vmatpush.msra.mxu1 %v5379_v24  ;;  %v5411_v24 = vld [vmem:[%s9574_s6 + $0x1f8] sm:$0xff]  ;;  %3599 = vmatpush.msrb.mxu2 %v5395_v57 }
 0xf6c   :  { %3628 = vmatpush.msrb.mxu3 %v5411_v24 }
 0xf6f   :  { %v2943_v0 = vpop.f32.mrf.mxu1 }
 0xf70   :  { %v2944_v54 = vadd.f32 %v8155_v43, %v2943_v0  ;;  %v5377_v0 = vld [vmem:[%s9573_s5 + $0xe8] sm:$0xff] }
 0xf71   :  { %3226 = vmatpush.msra.mxu1 %v5377_v0  ;;  %v5410_v0 = vld [vmem:[%s9574_s6 + $0x1f0] sm:$0xff] }
 0xf72   :  { %5522 = vmatmul.msk.f32.gmra.mxu2 %vm819_vm15, %v2944_v54  ;;  %v5374_v54 = vld [vmem:[%s9573_s5 + $0xd0] sm:$0xff]  ;;  %3629 = vmatpush.msrb.mxu3 %v5410_v0 }
 0xfbd   :  { %v2987_v62 = vpop.f32.mrf.mxu2 }
 0xfbe   :  { %v3011_v30 = vmul.f32 %v7756_v45, %v2987_v62  ;;  %v5375_v62 = vld [vmem:[%s9573_s5 + $0xd8] sm:$0xff] }
 0xfbf   :  { %3227 = vmatpush.msra.mxu1 %v5375_v62  ;;  %v5393_v62 = vld [vmem:[%s9574_s6 + $0x168] sm:$0xff] }
 0xfc5   :  { %v2990_v40 = vpop.f32.mrf.mxu2 }
 0xfcd   :  { %v2993_v52 = vpop.f32.mrf.mxu2 }
 0xfce   :  { %v3013_v39 = vmul.f32 %v7772_v14, %v2993_v52  ;;  %v5373_v52 = vld [vmem:[%s9573_s5 + $0xc8] sm:$0xff] }
 0xfcf   :  { %3228 = vmatpush.msra.mxu1 %v5373_v52  ;;  %v8369_v52 = vperm.slane %v8216_v16, 7 }
 0xfd0   :  { %v3019_v46 = vadd.f32 %v3013_v39, %v3011_v30 }
 0xfd5   :  { %v2996_v7 = vpop.f32.mrf.mxu2 }
 0xfd6   :  { %v3014_v14 = vmul.f32 %v7781_v42, %v2996_v7  ;;  %v5370_v7 = vld [vmem:[%s9573_s5 + $0xb0] sm:$0xff] }
 0xfdd   :  { %v2999_v51 = vpop.f32.mrf.mxu2 }
 0xfde   :  { %v3015_v31 = vmul.f32 %v7788_v28, %v2999_v51  ;;  %v6037_v28 = vld [vmem:[%s9578_s10 + $0x8] sm:$0xff]  ;;  %v5371_v51 = vld [vmem:[%s9573_s5 + $0xb8] sm:$0xff] }
 0xfdf   :  { %v3012_v17 = vmul.f32 %v6037_v28, %v2990_v40  ;;  %v5372_v40 = vld [vmem:[%s9573_s5 + $0xc0] sm:$0xff]  ;;  %3229 = vmatpush.msra.mxu1 %v5371_v51 }
 0xfe0   :  { %v3021_v55 = vadd.f32 %v3019_v46, %v3015_v31 }
 0xfe3   :  { %v3055_v58 = vpop.f32.mrf.mxu3 }
 0xfe4   :  { %v3056_v10 = vadd.f32 %v3055_v58, %v3025_v59  ;;  %v5366_v58 = vld [vmem:[%s9573_s5 + $0x90] sm:$0xff] }
 0xfe5   :  { %v3002_v15 = vpop.f32.mrf.mxu2 }
 0xfe6   :  { %v3068_v43 = vmul.f32 %v3067_v44, %v3056_v10  ;;  %v3016_v56 = vmul.f32 %v7795_v34, %v3002_v15  ;;  %v5367_v10 = vld [vmem:[%s9573_s5 + $0x98] sm:$0xff]  ;;  %v5364_v15 = vld [vmem:[%s9573_s5 + $0x80] sm:$0xff] }
 0xfe8   :  { %v8222_v1 = vadd.f32 %v3068_v43, %v7600_v20  ;;  %v5365_v43 = vld [vmem:[%s9573_s5 + $0x88] sm:$0xff] }
 0xfea   :  { %v3076_v60 = vsel %vm489_vm1, %v8222_v1, 0.0 }
 0xfeb   :  { %3077 = vadd.xlane.f32.xlu1 %v3076_v60  ;;  %v3058_v25 = vpop.f32.mrf.mxu3 }
 0xfec   :  { %v3059_v33 = vadd.f32 %v3058_v25, %v3025_v59 }
 0xfed   :  { %v3005_v61 = vpop.f32.mrf.mxu2 }
 0xfee   :  { %v3069_v47 = vmul.f32 %v3067_v44, %v3059_v33  ;;  %v3017_v50 = vmul.f32 %v7802_v35, %v3005_v61  ;;  %v3020_v35 = vadd.f32 %v3014_v14, %v3012_v17  ;;  %v8319_v14 = vperm.slane %v8216_v16, 6 }
 0xff0   :  { %v8231_v20 = vadd.f32 %v3069_v47, %v7626_v32  ;;  %v3023_v45 = vadd.f32 %v3021_v55, %v3017_v50  ;;  %v3022_v42 = vadd.f32 %v3020_v35, %v3016_v56  ;;  %v8316_v47 = vperm.slane %v8216_v16, 5 }
 0xff2   :  { %5525 = vmatmul.msk.f32.gmra.mxu3 %vm489_vm1, %v3023_v45  ;;  %v3079_v11 = vsel %vm489_vm1, %v8231_v20, 0.0 }
 0xff3   :  { %3080 = vadd.xlane.f32.xlu2 %v3079_v11 }
 0xff5   :  { %v3008_v21 = vpop.f32.mrf.mxu2 }
 0xff6   :  { %v3018_v32 = vmul.f32 %v7809_v3, %v3008_v21 }
 0xff8   :  { %v3024_v53 = vadd.f32 %v3022_v42, %v3018_v32 }
 0xffa   :  { %5526 = vmatmul.msk.f32.gmra.mxu3 %vm489_vm1, %v3024_v53 }
0x105e   :  { %v3078_v8 = vpop.xlane.xlu1 %3077 }
0x105f   :  { %v3088_v13 = vmul.f32 %v3078_v8, %v6586_v63 }
0x1061   :  { %v8244_v4 = vsub.f32 %v8222_v1, %v3088_v13 }
0x1063   :  { %v3096_v34 = vmul.f32 %v8244_v4, %v8244_v4 }
0x1065   :  { %v3100_v48 = vsel %vm489_vm1, %v3096_v34, 0.0 }
0x1066   :  { %3101 = vadd.xlane.f32.xlu2 %v3100_v48  ;;  %v3081_v49 = vpop.xlane.xlu2 %3080 }
0x1067   :  { %v3089_v3 = vmul.f32 %v3081_v49, %v6586_v63 }
0x1069   :  { %v8254_v2 = vsub.f32 %v8231_v20, %v3089_v3 }
0x106b   :  { %v3097_v6 = vmul.f32 %v8254_v2, %v8254_v2 }
0x106d   :  { %v3103_v36 = vsel %vm489_vm1, %v3097_v6, 0.0 }
0x1075   :  { %v3061_v19 = vpop.f32.mrf.mxu3 }
0x1076   :  { %v3062_v9 = vadd.f32 %v3061_v19, %v3025_v59 }
0x1078   :  { %v3070_v38 = vmul.f32 %v3067_v44, %v3062_v9 }
0x107a   :  { %v8251_v37 = vadd.f32 %v3070_v38, %v7648_v23 }
0x107c   :  { %v3082_v12 = vsel %vm489_vm1, %v8251_v37, 0.0 }
0x107d   :  { %3083 = vadd.xlane.f32.xlu0 %v3082_v12  ;;  %v3064_v18 = vpop.f32.mrf.mxu3 }
0x107e   :  { %v3065_v41 = vadd.f32 %v3064_v18, %v3025_v59  ;;  %v5368_v59 = vld [vmem:[%s9573_s5 + $0xa0] sm:$0xff] }
0x1080   :  { %v3071_v29 = vmul.f32 %v3067_v44, %v3065_v41  ;;  %v5369_v44 = vld [vmem:[%s9573_s5 + $0xa8] sm:$0xff] }
0x1081   :  { %3230 = vmatpush.msra.mxu1 %v5369_v44 }
0x1082   :  { %v8261_v5 = vadd.f32 %v3071_v29, %v7655_v27  ;;  %v5376_v27 = vld [vmem:[%s9573_s5 + $0xe0] sm:$0xff] }
0x1083   :  { %3197 = vmatpush.msra.mxu0 %v5376_v27  ;;  %3231 = vmatpush.msra.mxu1 %v5367_v10  ;;  %v5408_v10 = vld [vmem:[%s9574_s6 + $0x1e0] sm:$0xff] }
0x1084   :  { %v3085_v23 = vsel %vm489_vm1, %v8261_v5, 0.0 }
0x1085   :  { %3104 = vadd.xlane.f32.xlu0 %v3103_v36  ;;  %3086 = vadd.xlane.f32.xlu1 %v3085_v23 }
0x1086   :  { %3198 = vmatpush.msra.mxu0 %v5374_v54  ;;  %3232 = vmatpush.msra.mxu1 %v5365_v43 }
0x1088   :  { %3199 = vmatpush.msra.mxu0 %v5372_v40  ;;  %v5409_v40 = vld [vmem:[%s9574_s6 + $0x1e8] sm:$0xff] }
0x1089   :  { %3630 = vmatpush.msrb.mxu3 %v5409_v40  ;;  %v5401_v40 = vld [vmem:[%s9574_s6 + $0x1a8] sm:$0xff] }
0x108a   :  { %3200 = vmatpush.msra.mxu0 %v5370_v7  ;;  %v6038_v7 = vld [vmem:[%s9575_s7 + $0x28] sm:$0xff] }
0x108b   :  { %v8374_v51 = vperm.slane %v6038_v7, 7  ;;  %3631 = vmatpush.msrb.mxu3 %v5408_v10 }
0x108c   :  { %3201 = vmatpush.msra.mxu0 %v5368_v59 }
0x108e   :  { %3202 = vmatpush.msra.mxu0 %v5366_v58  ;;  %v5392_v58 = vld [vmem:[%s9574_s6 + $0x160] sm:$0xff] }
0x1090   :  { %3203 = vmatpush.msra.mxu0 %v5364_v15 }
0x10d9   :  { %v3102_v39 = vpop.xlane.xlu2 %3101 }
0x10da   :  { %v3112_v30 = vmul.f32 %v3102_v39, %v6586_v63 }
0x10dc   :  { %v3116_v31 = vadd.f32 1e-06, %v3112_v30  ;;  %v5391_v30 = vld [vmem:[%s9574_s6 + $0x158] sm:$0xff] }
0x10de   :  { %5950 = vrsqrt.f32 %v3116_v31  ;;  %vm3126_vm2 = vweird.f32 %v3116_v31 }
0x10e4   :  { %v5951_v60 = vpop.eup %5950 }
0x10e5   :  { %v3121_v25 = vmul.f32 %v5951_v60, %v3116_v31  ;;  %vm3127_vm0 = vweird.f32 %v5951_v60  ;;  %v5407_v31 = vld [vmem:[%s9574_s6 + $0x1d8] sm:$0xff] }
0x10e6   :  { %vm3128_vm3 = vmor %vm3126_vm2, %vm3127_vm0  ;;  %3632 = vmatpush.msrb.mxu3 %v5407_v31 }
0x10e7   :  { %v3122_v46 = vmul.f32 %v5951_v60, %v3121_v25 }
0x10e9   :  { %v3123_v33 = vmul.f32 0.5, %v3122_v46 }
0x10eb   :  { %v3124_v61 = vsub.f32 1.5, %v3123_v33 }
0x10ed   :  { %v3125_v55 = vmul.f32 %v5951_v60, %v3124_v61 }
0x10ef   :  { %v3129_v50 = vsel %vm3128_vm3, %v5951_v60, %v3125_v55  ;;  %v5390_v55 = vld [vmem:[%s9574_s6 + $0x150] sm:$0xff] }
0x10f0   :  { %v3160_v45 = vmul.f32 %v3129_v50, %v8244_v4  ;;  %v3084_v28 = vpop.xlane.xlu0 %3083  ;;  %v5406_v50 = vld [vmem:[%s9574_s6 + $0x1d0] sm:$0xff] }
0x10f1   :  { %v3090_v17 = vmul.f32 %v3084_v28, %v6586_v63  ;;  %3633 = vmatpush.msrb.mxu3 %v5406_v50 }
0x10f2   :  { %v3165_v56 = vmul.f32 %v8316_v47, %v3160_v45 }
0x10f3   :  { %v8325_v11 = vsub.f32 %v8251_v37, %v3090_v17 }
0x10f4   :  { %v3170_v35 = vadd.f32 %v8319_v14, %v3165_v56  ;;  %v5389_v56 = vld [vmem:[%s9574_s6 + $0x148] sm:$0xff] }
0x10f5   :  { %v3098_v21 = vmul.f32 %v8325_v11, %v8325_v11 }
0x10f6   :  { %5527 = vmatmul.msk.f32.vlgmr.msra.gmra.mxu0 %vm489_vm1, %v3170_v35  ;;  %5531 = vmatmul.msk.f32.vlgmr.msra.gmra.mxu1 %vm489_vm1, %v3170_v35  ;;  %v5405_v35 = vld [vmem:[%s9574_s6 + $0x1c8] sm:$0xff] }
0x10f7   :  { %v3106_v42 = vsel %vm489_vm1, %v3098_v21, 0.0  ;;  %3634 = vmatpush.msrb.mxu3 %v5405_v35 }
0x10f8   :  { %v3105_v32 = vpop.xlane.xlu0 %3104  ;;  %3107 = vadd.xlane.f32.xlu1 %v3106_v42  ;;  %v3087_v53 = vpop.xlane.xlu1 %3086 }
0x10f9   :  { %v3113_v8 = vmul.f32 %v3105_v32, %v6586_v63  ;;  %v3091_v13 = vmul.f32 %v3087_v53, %v6586_v63  ;;  %v5388_v53 = vld [vmem:[%s9574_s6 + $0x140] sm:$0xff] }
0x10fb   :  { %v3117_v4 = vadd.f32 1e-06, %v3113_v8  ;;  %v8336_v34 = vsub.f32 %v8261_v5, %v3091_v13  ;;  %v5404_v8 = vld [vmem:[%s9574_s6 + $0x1c0] sm:$0xff] }
0x10fc   :  { %3635 = vmatpush.msrb.mxu3 %v5404_v8 }
0x10fd   :  { %5952 = vrsqrt.f32 %v3117_v4  ;;  %v3099_v48 = vmul.f32 %v8336_v34, %v8336_v34  ;;  %vm3136_vm5 = vweird.f32 %v3117_v4 }
0x10ff   :  { %v3109_v49 = vsel %vm489_vm1, %v3099_v48, 0.0 }
0x1100   :  { %3110 = vadd.xlane.f32.xlu2 %v3109_v49 }
0x1103   :  { %v5953_v19 = vpop.eup %5952 }
0x1104   :  { %v3131_v9 = vmul.f32 %v5953_v19, %v3117_v4  ;;  %vm3137_vm4 = vweird.f32 %v5953_v19 }
0x1105   :  { %vm3138_vm6 = vmor %vm3136_vm5, %vm3137_vm4 }
0x1106   :  { %v3132_v3 = vmul.f32 %v5953_v19, %v3131_v9  ;;  %v5387_v9 = vld [vmem:[%s9574_s6 + $0x138] sm:$0xff] }
0x1108   :  { %v3133_v38 = vmul.f32 0.5, %v3132_v3  ;;  %v5403_v3 = vld [vmem:[%s9574_s6 + $0x1b8] sm:$0xff] }
0x1109   :  { %3636 = vmatpush.msrb.mxu3 %v5403_v3 }
0x110a   :  { %v3134_v12 = vsub.f32 1.5, %v3133_v38 }
0x110c   :  { %v3135_v18 = vmul.f32 %v5953_v19, %v3134_v12 }
0x110e   :  { %v3139_v41 = vsel %vm3138_vm6, %v5953_v19, %v3135_v18 }
0x110f   :  { %v3161_v29 = vmul.f32 %v3139_v41, %v8254_v2  ;;  %v5394_v2 = vld [vmem:[%s9574_s6 + $0x170] sm:$0xff] }
0x1110   :  { %3600 = vmatpush.msrb.mxu2 %v5394_v2 }
0x1111   :  { %v3166_v6 = vmul.f32 %v8316_v47, %v3161_v29 }
0x1112   :  { %3601 = vmatpush.msrb.mxu2 %v5393_v62  ;;  %v5385_v62 = vld [vmem:[%s9574_s6 + $0x128] sm:$0xff] }
0x1113   :  { %v3171_v36 = vadd.f32 %v8319_v14, %v3166_v6 }
0x1114   :  { %3602 = vmatpush.msrb.mxu2 %v5392_v58 }
0x1115   :  { %5528 = vmatmul.msk.f32.gmra.mxu0 %vm489_vm1, %v3171_v36  ;;  %5532 = vmatmul.msk.f32.gmra.mxu1 %vm489_vm1, %v3171_v36  ;;  %v5386_v36 = vld [vmem:[%s9574_s6 + $0x130] sm:$0xff] }
0x1116   :  { %3603 = vmatpush.msrb.mxu2 %v5391_v30  ;;  %v5400_v30 = vld [vmem:[%s9574_s6 + $0x1a0] sm:$0xff] }
0x1118   :  { %3604 = vmatpush.msrb.mxu2 %v5390_v55 }
0x111a   :  { %3605 = vmatpush.msrb.mxu2 %v5389_v56 }
0x111c   :  { %3606 = vmatpush.msrb.mxu2 %v5388_v53 }
0x111e   :  { %3607 = vmatpush.msrb.mxu2 %v5387_v9 }
0x1120   :  { %3608 = vmatpush.msrb.mxu2 %v5386_v36 }
0x1122   :  { %3609 = vmatpush.msrb.mxu2 %v5385_v62 }
0x116b   :  { %v3108_v23 = vpop.xlane.xlu1 %3107 }
0x116c   :  { %v3114_v27 = vmul.f32 %v3108_v23, %v6586_v63  ;;  %v5402_v23 = vld [vmem:[%s9574_s6 + $0x1b0] sm:$0xff] }
0x116d   :  { %3637 = vmatpush.msrb.mxu3 %v5402_v23  ;;  %v5396_v23 = vld [vmem:[%s9574_s6 + $0x180] sm:$0xff] }
0x116e   :  { %v8359_v54 = vadd.f32 1e-06, %v3114_v27 }
0x116f   :  { %3638 = vmatpush.msrb.mxu3 %v5401_v40 }
0x1170   :  { %5954 = vrsqrt.f32 %v8359_v54  ;;  %vm3146_vm8 = vweird.f32 %v8359_v54 }
0x1171   :  { %3639 = vmatpush.msrb.mxu3 %v5400_v30 }
0x1173   :  { %v3205_v59 = vpop.f32.mrf.mxu0  ;;  %v3234_v44 = vpop.f32.mrf.mxu1 }
0x1174   :  { %v8383_v16 = vadd.f32 %v3205_v59, %v8369_v52  ;;  %v8386_v15 = vadd.f32 %v3234_v44, %v8374_v51  ;;  %v3111_v43 = vpop.xlane.xlu2 %3110 }
0x1175   :  { %v3115_v39 = vmul.f32 %v3111_v43, %v6586_v63 }
0x1176   :  { %v5955_v60 = vpop.eup %5954  ;;  %v8396_v25 = vmul.f32 0.70710677, %v8383_v16  ;;  %v8399_v46 = vmul.f32 0.70710677, %v8386_v15 }
0x1177   :  { %v3141_v33 = vmul.f32 %v5955_v60, %v8359_v54  ;;  %v8402_v61 = vadd.f32 1e-06, %v3115_v39  ;;  %vm3147_vm7 = vweird.f32 %v5955_v60  ;;  %v5384_v39 = vld [vmem:[%s9574_s6 + $0x120] sm:$0xff] }
0x1178   :  { %v3262_v45 = vmul.f32 %v8396_v25, %v8396_v25  ;;  %v3302_v28 = vmul.f32 %v8399_v46, %v8399_v46  ;;  %vm3148_vm9 = vmor %vm3146_vm8, %vm3147_vm7  ;;  %3610 = vmatpush.msrb.mxu2 %v5384_v39  ;;  %vm3667_vm7 = vcmask 1040384   ;;  %vm3957_vm8 = vcmask 517120  }
0x1179   :  { %v3142_v17 = vmul.f32 %v5955_v60, %v3141_v33  ;;  %5956 = vrsqrt.f32 %v8402_v61  ;;  %vm3156_vm11 = vweird.f32 %v8402_v61 }
0x117a   :  { %v8421_v21 = vmin.f32 %v3262_v45, 16.0  ;;  %v8423_v42 = vmin.f32 %v3302_v28, 16.0  ;;  %v5383_v45 = vld [vmem:[%s9574_s6 + $0x118] sm:$0xff] }
0x117b   :  { %v3143_v32 = vmul.f32 0.5, %v3142_v17  ;;  %v5399_v28 = vld [vmem:[%s9574_s6 + $0x198] sm:$0xff]  ;;  %3611 = vmatpush.msrb.mxu2 %v5383_v45 }
0x117c   :  { %v3264_v13 = vmul.f32 2.1237322e-06, %v8421_v21  ;;  %v3275_v4 = vmul.f32 3.8918573e-05, %v8421_v21  ;;  %v3304_v48 = vmul.f32 2.1237322e-06, %v8423_v42  ;;  %3640 = vmatpush.msrb.mxu3 %v5399_v28 }
0x117d   :  { %v3144_v49 = vsub.f32 1.5, %v3143_v32  ;;  %v3315_v19 = vmul.f32 3.8918573e-05, %v8423_v42 }
0x117e   :  { %v3265_v38 = vadd.f32 0.00028619796, %v3264_v13  ;;  %v3276_v12 = vadd.f32 0.001143296, %v3275_v4  ;;  %v3305_v18 = vadd.f32 0.00028619796, %v3304_v48 }
0x117f   :  { %v8441_v41 = vpop.eup %5956  ;;  %v3145_v29 = vmul.f32 %v5955_v60, %v3144_v49  ;;  %v3316_v6 = vadd.f32 0.001143296, %v3315_v19  ;;  %v5382_v13 = vld [vmem:[%s9574_s6 + $0x110] sm:$0xff] }
0x1180   :  { %v3266_v57 = vmul.f32 %v3265_v38, %v8421_v21  ;;  %v3277_v24 = vmul.f32 %v3276_v12, %v8421_v21  ;;  %v3306_v27 = vmul.f32 %v3305_v18, %v8423_v42  ;;  %v3151_v2 = vmul.f32 %v8441_v41, %v8402_v61  ;;  %v5398_v4 = vld [vmem:[%s9574_s6 + $0x190] sm:$0xff]  ;;  %3612 = vmatpush.msrb.mxu2 %v5382_v13  ;;  %v5381_v38 = vld [vmem:[%s9574_s6 + $0x108] sm:$0xff]  ;;  %v5380_v61 = vld [vmem:[%s9574_s6 + $0x100] sm:$0xff] }
0x1181   :  { %v3149_v0 = vsel %vm3148_vm9, %v5955_v60, %v3145_v29  ;;  %v3317_v54 = vmul.f32 %v3316_v6, %v8423_v42  ;;  %vm3157_vm10 = vweird.f32 %v8441_v41  ;;  %3641 = vmatpush.msrb.mxu3 %v5398_v4  ;;  %v5397_v12 = vld [vmem:[%s9574_s6 + $0x188] sm:$0xff]  ;;  %s5216_s6 = sshll.u32 %s9585_s17, 4  ;;  %s6098_s17 = smov [#allocation4]   ;;  %s5217_s6 = int_to_ptr.hbm [resolvable:$true] %s5216_s6 }
0x1182   :  { %v3162_v7 = vmul.f32 %v3149_v0, %v8325_v11  ;;  %v3267_v59 = vadd.f32 0.0036580483, %v3266_v57  ;;  %v3278_v44 = vadd.f32 0.014752088, %v3277_v24  ;;  %v3307_v58 = vadd.f32 0.0036580483, %v3306_v27  ;;  %vm3158_vm12 = vmor %vm3156_vm11, %vm3157_vm10  ;;  %3613 = vmatpush.msrb.mxu2 %v5381_v38 }
0x1183   :  { %v3318_v10 = vadd.f32 0.014752088, %v3317_v54  ;;  %v3152_v43 = vmul.f32 %v8441_v41, %v3151_v2  ;;  %3642 = vmatpush.msrb.mxu3 %v5397_v12  ;;  %s5228_s29 = sshll.u32 %s6098_s17, 4  ;;  %s5229_s29 = int_to_ptr.vmem [resolvable:$true] %s5228_s29 }
0x1184   :  { %v3268_v31 = vmul.f32 %v3267_v59, %v8421_v21  ;;  %v3279_v11 = vmul.f32 %v3278_v44, %v8421_v21  ;;  %v3308_v60 = vmul.f32 %v3307_v58, %v8423_v42  ;;  %v3167_v33 = vmul.f32 %v8316_v47, %v3162_v7  ;;  %3614 = vmatpush.msrb.mxu2 %v5380_v61 }
0x1185   :  { %v3319_v55 = vmul.f32 %v3318_v10, %v8423_v42  ;;  %v3153_v50 = vmul.f32 0.5, %v3152_v43  ;;  %3643 = vmatpush.msrb.mxu3 %v5396_v23 }
0x1186   :  { %v3269_v17 = vadd.f32 0.05243302, %v3268_v31  ;;  %v3280_v56 = vadd.f32 0.112945676, %v3279_v11  ;;  %v3309_v35 = vadd.f32 0.05243302, %v3308_v60  ;;  %v3172_v32 = vadd.f32 %v8319_v14, %v3167_v33 }
0x1187   :  { %v3320_v53 = vadd.f32 0.112945676, %v3319_v55  ;;  %v3154_v8 = vsub.f32 1.5, %v3153_v50 }
0x1188   :  { %v3270_v48 = vmul.f32 %v3269_v17, %v8421_v21  ;;  %v3281_v49 = vmul.f32 %v3280_v56, %v8421_v21  ;;  %v3310_v19 = vmul.f32 %v3309_v35, %v8423_v42  ;;  %5529 = vmatmul.msk.f32.gmra.mxu0 %vm489_vm1, %v3172_v32  ;;  %5533 = vmatmul.msk.f32.gmra.mxu1 %vm489_vm1, %v3172_v32 }
0x1189   :  { %v3321_v9 = vmul.f32 %v3320_v53, %v8423_v42  ;;  %v3155_v3 = vmul.f32 %v8441_v41, %v3154_v8 }
0x118a   :  { %v3282_v18 = vadd.f32 0.4994258, %v3281_v49  ;;  %v3271_v29 = vadd.f32 0.18741608, %v3270_v48  ;;  %v3311_v24 = vadd.f32 0.18741608, %v3310_v19 }
0x118b   :  { %v3322_v6 = vadd.f32 0.4994258, %v3321_v9  ;;  %v3159_v36 = vsel %vm3158_vm12, %v8441_v41, %v3155_v3 }
0x118c   :  { %v3283_v57 = vmul.f32 %v3282_v18, %v8421_v21  ;;  %v3163_v27 = vmul.f32 %v3159_v36, %v8336_v34  ;;  %v3272_v54 = vmul.f32 %v3271_v29, %v8421_v21  ;;  %v3312_v40 = vmul.f32 %v3311_v24, %v8423_v42 }
0x118d   :  { %v3323_v2 = vmul.f32 %v3322_v6, %v8423_v42 }
0x118e   :  { %v3284_v41 = vadd.f32 1.0, %v3283_v57  ;;  %v3168_v0 = vmul.f32 %v8316_v47, %v3163_v27  ;;  %v3273_v58 = vadd.f32 1.1283791, %v3272_v54  ;;  %v3313_v43 = vadd.f32 1.1283791, %v3312_v40 }
0x118f   :  { %v3324_v62 = vadd.f32 1.0, %v3323_v2 }
0x1190   :  { %5958 = vrcp.f32 %v3284_v41  ;;  %v3173_v7 = vadd.f32 %v8319_v14, %v3168_v0  ;;  %v3294_v42 = vand.u32 2147483647, %v3284_v41  ;;  %v3274_v30 = vmul.f32 %v3273_v58, %v8396_v25 }
0x1191   :  { %5960 = vrcp.f32 %v3324_v62  ;;  %vm3290_vm13 = vweird.f32 %v3284_v41  ;;  %v3296_v33 = vand.u32 2147483648, %v3284_v41  ;;  %v3314_v55 = vmul.f32 %v3313_v43, %v8399_v46 }
0x1192   :  { %v3208_v59 = vpop.f32.mrf.mxu0  ;;  %v3237_v44 = vpop.f32.mrf.mxu1  ;;  %5530 = vmatmul.msk.f32.gmra.mxu0 %vm489_vm1, %v3173_v7  ;;  %5534 = vmatmul.msk.f32.gmra.mxu1 %vm489_vm1, %v3173_v7  ;;  %vm3330_vm14 = vweird.f32 %v3324_v62  ;;  %vm8544_vm2 = vcmp.eq.f32.partialorder %v3294_v42, 8.507059e+37  ;;  %v3336_v35 = vand.u32 2147483648, %v3324_v62  ;;  %v3334_v4 = vand.u32 2147483647, %v3324_v62 }
0x1193   :  { %v8521_v34 = vadd.f32 %v3208_v59, %v8369_v52  ;;  %v8524_v10 = vadd.f32 %v3237_v44, %v8374_v51  ;;  %v3297_v38 = vor.u32 1.1754944e-38, %v3296_v33 }
0x1194   :  { %v3337_v18 = vor.u32 1.1754944e-38, %v3336_v35  ;;  %vm3335_vm6 = vcmp.eq.f32.partialorder %v3334_v4, 8.507059e+37 }
0x1195   :  { %v8529_v47 = vmul.f32 0.70710677, %v8521_v34  ;;  %v8532_v21 = vmul.f32 0.70710677, %v8524_v10 }
0x1196   :  { %v5959_v14 = vpop.eup %5958 }
0x1197   :  { %v5961_v39 = vpop.eup %5960  ;;  %v3286_v31 = vmul.f32 %v5959_v14, %v3284_v41  ;;  %v3342_v11 = vmul.f32 %v8529_v47, %v8529_v47  ;;  %v3382_v60 = vmul.f32 %v8532_v21, %v8532_v21  ;;  %vm3291_vm0 = vweird.f32 %v5959_v14 }
0x1198   :  { %v3326_v50 = vmul.f32 %v5961_v39, %v3324_v62  ;;  %vm3331_vm3 = vweird.f32 %v5961_v39  ;;  %vm3292_vm4 = vmor %vm3290_vm13, %vm3291_vm0 }
0x1199   :  { %v3287_v45 = vsub.f32 1.0, %v3286_v31  ;;  %v8540_v28 = vmin.f32 %v3342_v11, 16.0  ;;  %v8542_v17 = vmin.f32 %v3382_v60, 16.0  ;;  %vm3332_vm5 = vmor %vm3330_vm14, %vm3331_vm3 }
0x119a   :  { %v3327_v56 = vsub.f32 1.0, %v3326_v50 }
0x119b   :  { %v3288_v32 = vmul.f32 %v5959_v14, %v3287_v45  ;;  %v3344_v53 = vmul.f32 2.1237322e-06, %v8540_v28  ;;  %v3355_v8 = vmul.f32 3.8918573e-05, %v8540_v28  ;;  %v3384_v46 = vmul.f32 2.1237322e-06, %v8542_v17 }
0x119c   :  { %v3328_v13 = vmul.f32 %v5961_v39, %v3327_v56  ;;  %v3395_v48 = vmul.f32 3.8918573e-05, %v8542_v17 }
0x119d   :  { %v3289_v49 = vadd.f32 %v5959_v14, %v3288_v32  ;;  %v3345_v19 = vadd.f32 0.00028619796, %v3344_v53  ;;  %v3356_v9 = vadd.f32 0.001143296, %v3355_v8  ;;  %v3385_v3 = vadd.f32 0.00028619796, %v3384_v46 }
0x119e   :  { %v3329_v12 = vadd.f32 %v5961_v39, %v3328_v13  ;;  %v3396_v29 = vadd.f32 0.001143296, %v3395_v48 }
0x119f   :  { %v3293_v6 = vsel %vm3292_vm4, %v5959_v14, %v3289_v49  ;;  %v3346_v36 = vmul.f32 %v3345_v19, %v8540_v28  ;;  %v3357_v61 = vmul.f32 %v3356_v9, %v8540_v28  ;;  %v3386_v23 = vmul.f32 %v3385_v3, %v8542_v17 }
0x11a0   :  { %v3298_v57 = vsel %vm8544_vm2, %v3297_v38, %v3293_v6  ;;  %v3333_v24 = vsel %vm3332_vm5, %v5961_v39, %v3329_v12  ;;  %v3397_v27 = vmul.f32 %v3396_v29, %v8542_v17  ;;  %v3246_v14 = vmul.f32 0.5, %v8383_v16 }
0x11a1   :  { %v3299_v2 = vmul.f32 %v3298_v57, %v3274_v30  ;;  %v3338_v41 = vsel %vm3335_vm6, %v3337_v18, %v3333_v24  ;;  %v3347_v0 = vadd.f32 0.0036580483, %v3346_v36  ;;  %v3358_v54 = vadd.f32 0.014752088, %v3357_v61 }
0x11a2   :  { %v3339_v40 = vmul.f32 %v3338_v41, %v3314_v55  ;;  %v3398_v62 = vadd.f32 0.014752088, %v3397_v27  ;;  %v3387_v44 = vadd.f32 0.0036580483, %v3386_v23  ;;  %v3247_v30 = vmul.f32 0.5, %v8386_v15 }
0x11a3   :  { %v5535_v7 = vclamps-f32 %v3299_v2, 1.0  ;;  %v3359_v59 = vmul.f32 %v3358_v54, %v8540_v28  ;;  %v3348_v39 = vmul.f32 %v3347_v0, %v8540_v28  ;;  %v8572_v15 = vld [vmem:[%s9595_s25 + $0x10] sm:$0xf]  ;;  %s5214_s25 = sshll.u32 %s6095_s26, 4  ;;  %s5215_s25 = int_to_ptr.vmem [resolvable:$true] %s5214_s25 }
0x11a4   :  { %v5536_v58 = vclamps-f32 %v3339_v40, 1.0  ;;  %v3399_v43 = vmul.f32 %v3398_v62, %v8542_v17  ;;  %v3388_v50 = vmul.f32 %v3387_v44, %v8542_v17  ;;  %v8578_v32 = vsel %vm3667_vm7, %v374_v26, %v8572_v15 }
0x11a5   :  { %v3582_v42 = vadd.f32 1.0, %v5535_v7  ;;  %v3360_v31 = vadd.f32 0.112945676, %v3359_v59  ;;  %v3349_v56 = vadd.f32 0.05243302, %v3348_v39  ;;  %v3958_v46 = vsel %vm3957_vm8, %v8578_v32, 0.0 }
0x11a6   :  { %v3583_v11 = vadd.f32 1.0, %v5536_v58  ;;  %v3400_v60 = vadd.f32 0.112945676, %v3399_v43  ;;  %v3389_v8 = vadd.f32 0.05243302, %v3388_v50  ;;  %3959 = vadd.xlane.f32.xlu0 %v3958_v46  ;;  %v8600_v50 = vld [vmem:[%s9580_s12 + $0x58] sm:$0xff] }
0x11a7   :  { %v3590_v33 = vmul.f32 %v3582_v42, %v3246_v14  ;;  %v3361_v55 = vmul.f32 %v3360_v31, %v8540_v28  ;;  %v3350_v4 = vmul.f32 %v3349_v56, %v8540_v28 }
0x11a8   :  { %v3591_v45 = vmul.f32 %v3583_v11, %v3247_v30  ;;  %v3401_v25 = vmul.f32 %v3400_v60, %v8542_v17  ;;  %v3390_v19 = vmul.f32 %v3389_v8, %v8542_v17  ;;  %v3248_v30 = vmul.f32 0.5, %v8521_v34 }
0x11a9   :  { %v3362_v35 = vadd.f32 0.4994258, %v3361_v55  ;;  %3615 = vmatmul.f32.vlgmr.msrb.gmra.mxu2 %v3590_v33  ;;  %v3351_v22 = vadd.f32 0.18741608, %v3350_v4  ;;  %v3249_v60 = vmul.f32 0.5, %v8524_v10 }
0x11aa   :  { %v3402_v16 = vadd.f32 0.4994258, %v3401_v25  ;;  %3644 = vmatmul.f32.vlgmr.msrb.gmra.mxu3 %v3591_v45  ;;  %v3391_v26 = vadd.f32 0.18741608, %v3390_v19 }
0x11ab   :  { %v3363_v53 = vmul.f32 %v3362_v35, %v8540_v28  ;;  %v3352_v3 = vmul.f32 %v3351_v22, %v8540_v28 }
0x11ac   :  { %v3403_v13 = vmul.f32 %v3402_v16, %v8542_v17  ;;  %v3392_v18 = vmul.f32 %v3391_v26, %v8542_v17 }
0x11ad   :  { %v3364_v48 = vadd.f32 1.0, %v3363_v53  ;;  %v3353_v36 = vadd.f32 1.1283791, %v3352_v3 }
0x11ae   :  { %v3404_v49 = vadd.f32 1.0, %v3403_v13  ;;  %v3393_v2 = vadd.f32 1.1283791, %v3392_v18 }
0x11af   :  { %5962 = vrcp.f32 %v3364_v48  ;;  %v3376_v61 = vand.u32 2147483648, %v3364_v48  ;;  %v3374_v24 = vand.u32 2147483647, %v3364_v48  ;;  %vm3370_vm11 = vweird.f32 %v3364_v48 }
0x11b0   :  { %5964 = vrcp.f32 %v3404_v49  ;;  %v3416_v27 = vand.u32 2147483648, %v3404_v49  ;;  %v3414_v0 = vand.u32 2147483647, %v3404_v49  ;;  %vm3410_vm13 = vweird.f32 %v3404_v49 }
0x11b1   :  { %v3377_v28 = vor.u32 1.1754944e-38, %v3376_v61  ;;  %v3354_v17 = vmul.f32 %v3353_v36, %v8529_v47  ;;  %vm3375_vm14 = vcmp.eq.f32.partialorder %v3374_v24, 8.507059e+37  ;;  %v3394_v44 = vmul.f32 %v3393_v2, %v8532_v21  ;;  %v8595_v21 = vld [vmem:[%s9580_s12 + $0x50] sm:$0xff] }
0x11b2   :  { %v3417_v7 = vor.u32 1.1754944e-38, %v3416_v27  ;;  %vm3415_vm2 = vcmp.eq.f32.partialorder %v3414_v0, 8.507059e+37  ;;  %v5690_v34 = vpack.i.bf16 %v8600_v50, %v8595_v21 }
0x11b5   :  { %v5963_v9 = vpop.eup %5962 }
0x11b6   :  { %v5965_v38 = vpop.eup %5964  ;;  %v3366_v12 = vmul.f32 %v5963_v9, %v3364_v48  ;;  %vm3371_vm9 = vweird.f32 %v5963_v9 }
0x11b7   :  { %v3406_v29 = vmul.f32 %v5965_v38, %v3404_v49  ;;  %vm3411_vm10 = vweird.f32 %v5965_v38  ;;  %vm3372_vm12 = vmor %vm3370_vm11, %vm3371_vm9 }
0x11b8   :  { %v3367_v6 = vsub.f32 1.0, %v3366_v12  ;;  %vm3412_vm0 = vmor %vm3410_vm13, %vm3411_vm10 }
0x11b9   :  { %v3407_v23 = vsub.f32 1.0, %v3406_v29 }
0x11ba   :  { %v3368_v57 = vmul.f32 %v5963_v9, %v3367_v6  ;;  %5691 = vrot.lane.b32.xlu0 %v5690_v34, %s6094_s22 }
0x11bb   :  { %v3408_v41 = vmul.f32 %v5965_v38, %v3407_v23 }
0x11bc   :  { %v3369_v54 = vadd.f32 %v5963_v9, %v3368_v57 }
0x11bd   :  { %v3409_v40 = vadd.f32 %v5965_v38, %v3408_v41 }
0x11be   :  { %v3373_v62 = vsel %vm3372_vm12, %v5963_v9, %v3369_v54 }
0x11bf   :  { %v3378_v59 = vsel %vm3375_vm14, %v3377_v28, %v3373_v62  ;;  %v3413_v58 = vsel %vm3412_vm0, %v5965_v38, %v3409_v40  ;;  %v3684_v62 = vld [vmem:[%s9580_s12 + $0x78] sm:$0xff] }
0x11c0   :  { %v3379_v43 = vmul.f32 %v3378_v59, %v3354_v17  ;;  %v3418_v14 = vsel %vm3415_vm2, %v3417_v7, %v3413_v58  ;;  %v3683_v17 = vld [vmem:[%s9580_s12 + $0x70] sm:$0xff]  ;;  %4013 = vmatpush.msra.mxu2 %v3684_v62 }
0x11c1   :  { %v3419_v42 = vmul.f32 %v3418_v14, %v3394_v44  ;;  %3993 = vmatpush.msrb.mxu1 %v3683_v17 }
0x11c2   :  { %v5537_v39 = vclamps-f32 %v3379_v43, 1.0 }
0x11c3   :  { %v5538_v31 = vclamps-f32 %v3419_v42, 1.0  ;;  %v5680_v42 = vpack.i.bf16 %v3684_v62, %v3683_v17 }
0x11c4   :  { %v3584_v11 = vadd.f32 1.0, %v5537_v39 }
0x11c5   :  { %v3585_v47 = vadd.f32 1.0, %v5538_v31  ;;  %5681 = vrot.lane.b32.xlu1 %v5680_v42, %s6094_s22 }
0x11c6   :  { %v3592_v33 = vmul.f32 %v3584_v11, %v3248_v30 }
0x11c7   :  { %v3593_v55 = vmul.f32 %v3585_v47, %v3249_v60 }
0x11c8   :  { %3618 = vmatmul.f32.gmra.mxu2 %v3592_v33 }
0x11c9   :  { %3647 = vmatmul.f32.gmra.mxu3 %v3593_v55 }
0x1205   :  { %v3211_v10 = vpop.f32.mrf.mxu0  ;;  %v3240_v45 = vpop.f32.mrf.mxu1 }
0x1206   :  { %v8606_v25 = vadd.f32 %v3211_v10, %v8369_v52  ;;  %v8609_v56 = vadd.f32 %v3240_v45, %v8374_v51 }
0x1208   :  { %v8612_v35 = vmul.f32 0.70710677, %v8606_v25  ;;  %v8615_v16 = vmul.f32 0.70710677, %v8609_v56 }
0x120a   :  { %v3422_v53 = vmul.f32 %v8612_v35, %v8612_v35  ;;  %v3462_v8 = vmul.f32 %v8615_v16, %v8615_v16 }
0x120c   :  { %v3423_v46 = vmin.f32 %v3422_v53, 16.0  ;;  %v8621_v13 = vmin.f32 %v3462_v8, 16.0 }
0x120e   :  { %v3424_v4 = vmul.f32 2.1237322e-06, %v3423_v46  ;;  %v3435_v48 = vmul.f32 3.8918573e-05, %v3423_v46  ;;  %v3464_v49 = vmul.f32 2.1237322e-06, %v8621_v13 }
0x120f   :  { %v3475_v19 = vmul.f32 3.8918573e-05, %v8621_v13  ;;  %v3214_v38 = vpop.f32.mrf.mxu0  ;;  %v3243_v12 = vpop.f32.mrf.mxu1 }
0x1210   :  { %v3425_v22 = vadd.f32 0.00028619796, %v3424_v4  ;;  %v3436_v26 = vadd.f32 0.001143296, %v3435_v48  ;;  %v3465_v9 = vadd.f32 0.00028619796, %v3464_v49  ;;  %v8627_v36 = vadd.f32 %v3214_v38, %v8369_v52 }
0x1211   :  { %v3476_v3 = vadd.f32 0.001143296, %v3475_v19  ;;  %v8631_v23 = vadd.f32 %v3243_v12, %v8374_v51 }
0x1212   :  { %v3426_v18 = vmul.f32 %v3425_v22, %v3423_v46  ;;  %v3437_v29 = vmul.f32 %v3436_v26, %v3423_v46  ;;  %v3466_v6 = vmul.f32 %v3465_v9, %v8621_v13  ;;  %v8634_v41 = vmul.f32 0.70710677, %v8627_v36 }
0x1213   :  { %v3477_v61 = vmul.f32 %v3476_v3, %v8621_v13  ;;  %v8638_v40 = vmul.f32 0.70710677, %v8631_v23 }
0x1214   :  { %v3427_v57 = vadd.f32 0.0036580483, %v3426_v18  ;;  %v3438_v24 = vadd.f32 0.014752088, %v3437_v29  ;;  %v3467_v27 = vadd.f32 0.0036580483, %v3466_v6  ;;  %v3502_v51 = vmul.f32 %v8634_v41, %v8634_v41 }
0x1215   :  { %v3478_v2 = vadd.f32 0.014752088, %v3477_v61  ;;  %v3542_v58 = vmul.f32 %v8638_v40, %v8638_v40 }
0x1216   :  { %v3428_v0 = vmul.f32 %v3427_v57, %v3423_v46  ;;  %v3439_v54 = vmul.f32 %v3438_v24, %v3423_v46  ;;  %v3468_v28 = vmul.f32 %v3467_v27, %v8621_v13  ;;  %v8651_v14 = vmin.f32 %v3502_v51, 16.0 }
0x1217   :  { %v3479_v52 = vmul.f32 %v3478_v2, %v8621_v13  ;;  %v8658_v34 = vmin.f32 %v3542_v58, 16.0 }
0x1218   :  { %v3429_v7 = vadd.f32 0.05243302, %v3428_v0  ;;  %v3440_v59 = vadd.f32 0.112945676, %v3439_v54  ;;  %v3469_v44 = vadd.f32 0.05243302, %v3468_v28 }
0x1219   :  { %v3480_v43 = vadd.f32 0.112945676, %v3479_v52  ;;  %v3504_v60 = vmul.f32 2.1237322e-06, %v8651_v14  ;;  %v3515_v47 = vmul.f32 3.8918573e-05, %v8651_v14 }
0x121a   :  { %v3430_v39 = vmul.f32 %v3429_v7, %v3423_v46  ;;  %v3441_v31 = vmul.f32 %v3440_v59, %v3423_v46  ;;  %v3470_v30 = vmul.f32 %v3469_v44, %v8621_v13  ;;  %v3544_v9 = vmul.f32 2.1237322e-06, %v8658_v34 }
0x121b   :  { %v3481_v11 = vmul.f32 %v3480_v43, %v8621_v13  ;;  %v3505_v45 = vadd.f32 0.00028619796, %v3504_v60  ;;  %v3516_v53 = vadd.f32 0.001143296, %v3515_v47  ;;  %v3555_v12 = vmul.f32 3.8918573e-05, %v8658_v34 }
0x121c   :  { %v3431_v33 = vadd.f32 0.18741608, %v3430_v39  ;;  %v3442_v55 = vadd.f32 0.4994258, %v3441_v31  ;;  %v3471_v4 = vadd.f32 0.18741608, %v3470_v30 }
0x121d   :  { %v3482_v10 = vadd.f32 0.4994258, %v3481_v11  ;;  %v3506_v49 = vmul.f32 %v3505_v45, %v8651_v14  ;;  %v3517_v19 = vmul.f32 %v3516_v53, %v8651_v14  ;;  %v3545_v57 = vadd.f32 0.00028619796, %v3544_v9 }
0x121e   :  { %v3443_v8 = vmul.f32 %v3442_v55, %v3423_v46  ;;  %v3432_v22 = vmul.f32 %v3431_v33, %v3423_v46  ;;  %v3472_v29 = vmul.f32 %v3471_v4, %v8621_v13  ;;  %v3556_v24 = vadd.f32 0.001143296, %v3555_v12  ;;  %v5414_v46 = vld [vmem:[%s9575_s7 + $0x30] sm:$0x3] }
0x121f   :  { %v3483_v48 = vmul.f32 %v3482_v10, %v8621_v13  ;;  %v3518_v38 = vadd.f32 0.014752088, %v3517_v19  ;;  %v3507_v18 = vadd.f32 0.0036580483, %v3506_v49  ;;  %v3546_v54 = vmul.f32 %v3545_v57, %v8658_v34 }
0x1220   :  { %v3444_v26 = vadd.f32 1.0, %v3443_v8  ;;  %v3433_v6 = vadd.f32 1.1283791, %v3432_v22  ;;  %v3473_v2 = vadd.f32 1.1283791, %v3472_v29  ;;  %v3557_v28 = vmul.f32 %v3556_v24, %v8658_v34 }
0x1221   :  { %v8664_v3 = vadd.f32 1.0, %v3483_v48  ;;  %v3519_v61 = vmul.f32 %v3518_v38, %v8651_v14  ;;  %v3508_v27 = vmul.f32 %v3507_v18, %v8651_v14  ;;  %v8677_v51 = vperm.slane %v5414_v46, 0 }
0x1222   :  { %5966 = vrcp.f32 %v3444_v26  ;;  %v3434_v52 = vmul.f32 %v3433_v6, %v8612_v35  ;;  %v8679_v17 = vperm.slane %v5414_v46, 1  ;;  %vm3450_vm3 = vweird.f32 %v3444_v26 }
0x1223   :  { %5968 = vrcp.f32 %v8664_v3  ;;  %v3520_v0 = vadd.f32 0.112945676, %v3519_v61  ;;  %v3454_v59 = vand.u32 2147483647, %v3444_v26  ;;  %v3456_v58 = vand.u32 2147483648, %v3444_v26 }
0x1224   :  { %v3509_v42 = vadd.f32 0.05243302, %v3508_v27  ;;  %v3558_v39 = vadd.f32 0.014752088, %v3557_v28  ;;  %v3474_v30 = vmul.f32 %v3473_v2, %v8615_v16  ;;  %v3547_v35 = vadd.f32 0.0036580483, %v3546_v54 }
0x1225   :  { %v3521_v44 = vmul.f32 %v3520_v0, %v8651_v14  ;;  %v3494_v47 = vand.u32 2147483647, %v8664_v3  ;;  %v3496_v33 = vand.u32 2147483648, %v8664_v3  ;;  %vm3490_vm6 = vweird.f32 %v8664_v3 }
0x1226   :  { %v3559_v55 = vmul.f32 %v3558_v39, %v8658_v34  ;;  %v3510_v16 = vmul.f32 %v3509_v42, %v8651_v14  ;;  %v3548_v22 = vmul.f32 %v3547_v35, %v8658_v34  ;;  %v3457_v38 = vor.u32 1.1754944e-38, %v3456_v58 }
0x1227   :  { %v3522_v11 = vadd.f32 0.4994258, %v3521_v44  ;;  %vm3455_vm10 = vcmp.eq.f32.partialorder %v3454_v59, 8.507059e+37  ;;  %v3497_v61 = vor.u32 1.1754944e-38, %v3496_v33  ;;  %vm3495_vm12 = vcmp.eq.f32.partialorder %v3494_v47, 8.507059e+37 }
0x1228   :  { %v5967_v13 = vpop.eup %5966  ;;  %v3560_v48 = vadd.f32 0.112945676, %v3559_v55  ;;  %v3511_v24 = vadd.f32 0.18741608, %v3510_v16 }
0x1229   :  { %v5969_v62 = vpop.eup %5968  ;;  %v3446_v7 = vmul.f32 %v5967_v13, %v3444_v26  ;;  %vm3451_vm4 = vweird.f32 %v5967_v13  ;;  %v3523_v53 = vmul.f32 %v3522_v11, %v8651_v14  ;;  %v3549_v26 = vadd.f32 0.05243302, %v3548_v22 }
0x122a   :  { %v3486_v43 = vmul.f32 %v5969_v62, %v8664_v3  ;;  %vm3491_vm5 = vweird.f32 %v5969_v62  ;;  %vm3452_vm9 = vmor %vm3450_vm3, %vm3451_vm4  ;;  %v3561_v18 = vmul.f32 %v3560_v48, %v8658_v34  ;;  %v3512_v59 = vmul.f32 %v3511_v24, %v8651_v14 }
0x122b   :  { %v3447_v31 = vsub.f32 1.0, %v3446_v7  ;;  %v8691_v19 = vadd.f32 1.0, %v3523_v53  ;;  %vm3492_vm11 = vmor %vm3490_vm6, %vm3491_vm5  ;;  %v3681_v7 = vld [vmem:[%s9580_s12 + $0x60] sm:$0xff] }
0x122c   :  { %v3487_v60 = vsub.f32 1.0, %v3486_v43  ;;  %v3616_v10 = vpop.f32.mrf.mxu2  ;;  %v3562_v2 = vadd.f32 0.4994258, %v3561_v18  ;;  %3994 = vmatpush.msrb.mxu1 %v3681_v7  ;;  %v3550_v43 = vmul.f32 %v3549_v26, %v8658_v34  ;;  %v3513_v33 = vadd.f32 1.1283791, %v3512_v59 }
0x122d   :  { %v3448_v45 = vmul.f32 %v5967_v13, %v3447_v31  ;;  %v3617_v8 = vadd.f32 %v3616_v10, %v8677_v51  ;;  %v3645_v9 = vpop.f32.mrf.mxu3  ;;  %5970 = vrcp.f32 %v8691_v19  ;;  %vm3530_vm14 = vweird.f32 %v8691_v19 }
0x122e   :  { %v3488_v4 = vmul.f32 %v5969_v62, %v3487_v60  ;;  %v3563_v28 = vmul.f32 %v3562_v2, %v8658_v34  ;;  %3995 = vmatpush.msrb.mxu1 %v8595_v21  ;;  %v3551_v55 = vadd.f32 0.18741608, %v3550_v43 }
0x122f   :  { %v3449_v49 = vadd.f32 %v5967_v13, %v3448_v45  ;;  %v3646_v29 = vadd.f32 %v3645_v9, %v3617_v8  ;;  %v3534_v45 = vand.u32 2147483647, %v8691_v19 }
0x1230   :  { %v3489_v12 = vadd.f32 %v5969_v62, %v3488_v4  ;;  %v3564_v42 = vadd.f32 1.0, %v3563_v28  ;;  %v3552_v8 = vmul.f32 %v3551_v55, %v8658_v34  ;;  %v3514_v4 = vmul.f32 %v3513_v33, %v8634_v41  ;;  %v8728_v41 = vld [vmem:[%s9580_s12 + $0x20] sm:$0xff]  ;;  %v8733_v34 = vld [vmem:[%s9580_s12 + $0x28] sm:$0xff] }
0x1231   :  { %v3453_v6 = vsel %vm3452_vm9, %v5967_v13, %v3449_v49  ;;  %v3658_v54 = vmul.f32 %v8679_v17, %v3646_v29  ;;  %vm3535_vm2 = vcmp.eq.f32.partialorder %v3534_v45, 8.507059e+37  ;;  %v5705_v26 = vpack.i.bf16 %v8733_v34, %v8728_v41 }
0x1232   :  { %v3458_v3 = vsel %vm3455_vm10, %v3457_v38, %v3453_v6  ;;  %v3493_v57 = vsel %vm3492_vm11, %v5969_v62, %v3489_v12  ;;  %v3682_v62 = vld [vmem:[%s9580_s12 + $0x68] sm:$0xff]  ;;  %5972 = vrcp.f32 %v3564_v42  ;;  %v3553_v38 = vadd.f32 1.1283791, %v3552_v8 }
0x1233   :  { %v3459_v46 = vmul.f32 %v3458_v3, %v3434_v52  ;;  %v3498_v27 = vsel %vm3495_vm12, %v3497_v61, %v3493_v57  ;;  %v8708_v52 = vadd.f32 %v3658_v54, %v8222_v1  ;;  %4014 = vmatpush.msra.mxu2 %v3682_v62  ;;  %v5971_v58 = vpop.eup %5970  ;;  %v5685_v31 = vpack.i.bf16 %v3682_v62, %v3681_v7 }
0x1234   :  { %v3499_v0 = vmul.f32 %v3498_v27, %v3474_v30  ;;  %v3250_v30 = vmul.f32 0.5, %v8606_v25  ;;  %v3526_v11 = vmul.f32 %v5971_v58, %v8691_v19  ;;  %v3251_v1 = vmul.f32 0.5, %v8609_v56 }
0x1235   :  { %v5539_v13 = vclamps-f32 %v3459_v46, 1.0  ;;  %v3744_v35 = vsel %vm489_vm1, %v8708_v52, 0.0  ;;  %4015 = vmatpush.msra.mxu2 %v8600_v50  ;;  %5686 = vrot.lane.b32.xlu2 %v5685_v31, %s6094_s22  ;;  %v3536_v25 = vand.u32 2147483648, %v8691_v19  ;;  %vm3531_vm13 = vweird.f32 %v5971_v58  ;;  %v3677_v31 = vld [vmem:[%s9580_s12 + $0x40] sm:$0xff] }
0x1236   :  { %v5540_v44 = vclamps-f32 %v3499_v0, 1.0  ;;  %3745 = vadd.xlane.f32.xlu0 %v3744_v35  ;;  %v3527_v14 = vsub.f32 1.0, %v3526_v11  ;;  %vm3532_vm0 = vmor %vm3530_vm14, %vm3531_vm13  ;;  %v3576_v12 = vand.u32 2147483648, %v3564_v42  ;;  %v3574_v29 = vand.u32 2147483647, %v3564_v42  ;;  %3996 = vmatpush.msrb.mxu1 %v3677_v31 }
0x1237   :  { %v3586_v39 = vadd.f32 1.0, %v5539_v13  ;;  %v3537_v56 = vor.u32 1.1754944e-38, %v3536_v25  ;;  %v3252_v6 = vmul.f32 0.5, %v8627_v36  ;;  %vm3570_vm4 = vweird.f32 %v3564_v42 }
0x1238   :  { %v3587_v47 = vadd.f32 1.0, %v5540_v44  ;;  %v3528_v10 = vmul.f32 %v5971_v58, %v3527_v14  ;;  %v5973_v53 = vpop.eup %5972  ;;  %v3577_v57 = vor.u32 1.1754944e-38, %v3576_v12  ;;  %v3554_v24 = vmul.f32 %v3553_v38, %v8638_v40 }
0x1239   :  { %v3594_v60 = vmul.f32 %v3586_v39, %v3250_v30  ;;  %v3566_v48 = vmul.f32 %v5973_v53, %v3564_v42  ;;  %vm3571_vm3 = vweird.f32 %v5973_v53  ;;  %vm3575_vm6 = vcmp.eq.f32.partialorder %v3574_v29, 8.507059e+37  ;;  %v3960_v42 = vpop.xlane.xlu0 %3959  ;;  %v5682_v30 = vpop.permute.xlu1 %5681 }
0x123a   :  { %v3595_v21 = vmul.f32 %v3587_v47, %v3251_v1  ;;  %v3529_v50 = vadd.f32 %v5971_v58, %v3528_v10  ;;  %vm3572_vm5 = vmor %vm3570_vm4, %vm3571_vm3  ;;  %v3253_v7 = vmul.f32 0.5, %v8631_v23  ;;  %v3678_v23 = vld [vmem:[%s9580_s12 + $0x48] sm:$0xff] }
0x123b   :  { %3621 = vmatmul.f32.gmra.mxu2 %v3594_v60  ;;  %v3567_v9 = vsub.f32 1.0, %v3566_v48 }
0x123c   :  { %3650 = vmatmul.f32.gmra.mxu3 %v3595_v21  ;;  %v3533_v16 = vsel %vm3532_vm0, %v5971_v58, %v3529_v50  ;;  %4016 = vmatpush.msra.mxu2 %v3678_v23 }
0x123d   :  { %v3538_v49 = vsel %vm3535_vm2, %v3537_v56, %v3533_v16  ;;  %v3568_v18 = vmul.f32 %v5973_v53, %v3567_v9  ;;  %v5683_v16 = vunpack.i.l.bf16 %v5682_v30 }
0x123e   :  { %v3539_v22 = vmul.f32 %v3538_v49, %v3514_v4  ;;  %v5684_v4 = vunpack.i.h.bf16 %v5682_v30 }
0x123f   :  { %v3569_v61 = vadd.f32 %v5973_v53, %v3568_v18 }
0x1240   :  { %v5541_v19 = vclamps-f32 %v3539_v22, 1.0 }
0x1241   :  { %v3573_v46 = vsel %vm3572_vm5, %v5973_v53, %v3569_v61  ;;  %v5692_v39 = vpop.permute.xlu0 %5691 }
0x1242   :  { %v3588_v3 = vadd.f32 1.0, %v5541_v19  ;;  %v3578_v27 = vsel %vm3575_vm6, %v3577_v57, %v3573_v46  ;;  %v5694_v22 = vunpack.i.h.bf16 %v5692_v39  ;;  %v5693_v9 = vunpack.i.l.bf16 %v5692_v39 }
0x1243   :  { %v3579_v2 = vmul.f32 %v3578_v27, %v3554_v24  ;;  %v3899_v19 = vsel %vm489_vm1, %v5683_v16, %v5684_v4  ;;  %v5695_v57 = vpack.i.bf16 %v3678_v23, %v3677_v31  ;;  %v3961_v46 = vmul.f32 %v3960_v42, %v6586_v63 }
0x1244   :  { %v3596_v36 = vmul.f32 %v3588_v3, %v3252_v6  ;;  %3936 = vmatpush.msrb.mxu0 %v3899_v19  ;;  %v3897_v3 = vsel %vm489_vm1, %v5693_v9, %v5694_v22  ;;  %v8824_v4 = vperm.slane %v8572_v15, 3 }
0x1245   :  { %v5542_v54 = vclamps-f32 %v3579_v2, 1.0 }
0x1246   :  { %3624 = vmatmul.f32.gmra.mxu2 %v3596_v36  ;;  %v8786_v36 = vsub.f32 %v8578_v32, %v3961_v46 }
0x1247   :  { %v3589_v62 = vadd.f32 1.0, %v5542_v54 }
0x1248   :  { %v3963_v27 = vmul.f32 %v8786_v36, %v8786_v36 }
0x1249   :  { %v3597_v59 = vmul.f32 %v3589_v62, %v3253_v7 }
0x124a   :  { %5706 = vrot.lane.b32.xlu0 %v5705_v26, %s6094_s22  ;;  %v3964_v26 = vsel %vm3957_vm8, %v3963_v27, 0.0 }
0x124b   :  { %v3619_v0 = vpop.f32.mrf.mxu2  ;;  %3653 = vmatmul.f32.gmra.mxu3 %v3597_v59 }
0x124c   :  { %v3620_v28 = vadd.f32 %v3619_v0, %v8677_v51  ;;  %v3648_v13 = vpop.f32.mrf.mxu3 }
0x124e   :  { %v3649_v40 = vadd.f32 %v3648_v13, %v3620_v28  ;;  %v3672_v13 = vld [vmem:[%s9580_s12 + $0x18] sm:$0xff] }
0x1250   :  { %v3659_v44 = vmul.f32 %v8679_v17, %v3649_v40  ;;  %v3669_v40 = vld [vmem:[%s9580_s12] sm:$0xff] }
0x1252   :  { %v3663_v58 = vadd.f32 %v3659_v44, %v8231_v20 }
0x1254   :  { %v3747_v43 = vsel %vm489_vm1, %v3663_v58, 0.0 }
0x1255   :  { %3748 = vadd.xlane.f32.xlu1 %v3747_v43 }
0x128f   :  { %v5687_v38 = vpop.permute.xlu2 %5686 }
0x1290   :  { %v5689_v18 = vunpack.i.h.bf16 %v5687_v38  ;;  %v5688_v29 = vunpack.i.l.bf16 %v5687_v38 }
0x1292   :  { %v3898_v61 = vsel %vm489_vm1, %v5688_v29, %v5689_v18 }
0x1293   :  { %3937 = vmatpush.msrb.mxu0 %v3898_v61 }
0x1295   :  { %3938 = vmatpush.msrb.mxu0 %v3897_v3 }
0x12a9   :  { %v3746_v20 = vpop.xlane.xlu0 %3745 }
0x12aa   :  { %v3756_v60 = vmul.f32 %v3746_v20, %v6586_v63 }
0x12ac   :  { %v8755_v25 = vsub.f32 %v8708_v52, %v3756_v60 }
0x12ae   :  { %v3764_v50 = vmul.f32 %v8755_v25, %v8755_v25 }
0x12b0   :  { %v3768_v52 = vsel %vm489_vm1, %v3764_v50, 0.0 }
0x12bc   :  { %v8791_v2 = vpop.permute.xlu0 %5706 }
0x12bd   :  { %v5709_v29 = vunpack.i.h.bf16 %v8791_v2 }
0x12be   :  { %v3622_v11 = vpop.f32.mrf.mxu2 }
0x12bf   :  { %v3623_v35 = vadd.f32 %v3622_v11, %v8677_v51  ;;  %v3651_v1 = vpop.f32.mrf.mxu3 }
0x12c1   :  { %v3652_v14 = vadd.f32 %v3651_v1, %v3623_v35 }
0x12c3   :  { %v3660_v47 = vmul.f32 %v8679_v17, %v3652_v14 }
0x12c5   :  { %v3664_v33 = vadd.f32 %v3660_v47, %v8251_v37 }
0x12c7   :  { %v3750_v55 = vsel %vm489_vm1, %v3664_v33, 0.0 }
0x12c8   :  { %v3749_v10 = vpop.xlane.xlu1 %3748  ;;  %3751 = vadd.xlane.f32.xlu2 %v3750_v55 }
0x12c9   :  { %v3757_v45 = vmul.f32 %v3749_v10, %v6586_v63  ;;  %v3625_v56 = vpop.f32.mrf.mxu2 }
0x12ca   :  { %v3626_v8 = vadd.f32 %v3625_v56, %v8677_v51 }
0x12cb   :  { %v8759_v21 = vsub.f32 %v3663_v58, %v3757_v45  ;;  %v3670_v58 = vld [vmem:[%s9580_s12 + $0x8] sm:$0xff] }
0x12cc   :  { %v5715_v9 = vpack.i.bf16 %v3670_v58, %v3669_v40 }
0x12cd   :  { %v3765_v53 = vmul.f32 %v8759_v21, %v8759_v21 }
0x12ce   :  { %v3654_v48 = vpop.f32.mrf.mxu3 }
0x12cf   :  { %v3771_v37 = vsel %vm489_vm1, %v3765_v53, 0.0  ;;  %v3655_v49 = vadd.f32 %v3654_v48, %v3626_v8 }
0x12d0   :  { %3772 = vadd.xlane.f32.xlu0 %v3771_v37  ;;  %3769 = vadd.xlane.f32.xlu2 %v3768_v52  ;;  %v8820_v37 = vperm.slane %v8572_v15, 2 }
0x12d1   :  { %v3661_v12 = vmul.f32 %v8679_v17, %v3655_v49  ;;  %v3675_v17 = vld [vmem:[%s9580_s12 + $0x30] sm:$0xff] }
0x12d2   :  { %3997 = vmatpush.msrb.mxu1 %v3675_v17 }
0x12d3   :  { %v3665_v6 = vadd.f32 %v3661_v12, %v8261_v5  ;;  %v3676_v5 = vld [vmem:[%s9580_s12 + $0x38] sm:$0xff] }
0x12d4   :  { %v5700_v24 = vpack.i.bf16 %v3676_v5, %v3675_v17  ;;  %4017 = vmatpush.msra.mxu2 %v3676_v5  ;;  %3998 = vmatpush.msrb.mxu1 %v8728_v41 }
0x12d5   :  { %v3753_v51 = vsel %vm489_vm1, %v3665_v6, 0.0 }
0x12d6   :  { %3754 = vadd.xlane.f32.xlu1 %v3753_v51  ;;  %4018 = vmatpush.msra.mxu2 %v8733_v34  ;;  %v3671_v34 = vld [vmem:[%s9580_s12 + $0x10] sm:$0xff] }
0x12d7   :  { %3999 = vmatpush.msrb.mxu1 %v3671_v34  ;;  %v5710_v55 = vpack.i.bf16 %v3672_v13, %v3671_v34 }
0x12d8   :  { %4019 = vmatpush.msra.mxu2 %v3672_v13 }
0x12d9   :  { %4000 = vmatpush.msrb.mxu1 %v3669_v40 }
0x12da   :  { %4020 = vmatpush.msra.mxu2 %v3670_v58 }
0x12e8   :  { %5701 = vrot.lane.b32.xlu2 %v5700_v24, %s6094_s22 }
0x12ef   :  { %5696 = vrot.lane.b32.xlu1 %v5695_v57, %s6094_s22 }
0x1319   :  { %3965 = vadd.xlane.f32.xlu1 %v3964_v26 }
0x133b   :  { %v3752_v0 = vpop.xlane.xlu2 %3751 }
0x133c   :  { %v3758_v54 = vmul.f32 %v3752_v0, %v6586_v63 }
0x133e   :  { %v8794_v28 = vsub.f32 %v3664_v33, %v3758_v54 }
0x1340   :  { %v3766_v41 = vmul.f32 %v8794_v28, %v8794_v28 }
0x1342   :  { %v3774_v7 = vsel %vm489_vm1, %v3766_v41, 0.0  ;;  %v8850_v41 = vld [vmem:[%s9584_s16] sm:$0xff] }
0x1343   :  { %v3773_v62 = vpop.xlane.xlu0 %3772  ;;  %v3770_v59 = vpop.xlane.xlu2 %3769  ;;  %3775 = vadd.xlane.f32.xlu0 %v3774_v7  ;;  %v8853_v7 = vperm.slane %v8850_v41, 0  ;;  %v8857_v40 = vperm.slane %v8850_v41, 1 }
0x1344   :  { %v3781_v44 = vmul.f32 %v3773_v62, %v6586_v63  ;;  %v3780_v43 = vmul.f32 %v3770_v59, %v6586_v63 }
0x1346   :  { %v3785_v42 = vadd.f32 1e-06, %v3781_v44  ;;  %v3784_v39 = vadd.f32 1e-06, %v3780_v43 }
0x1348   :  { %5974 = vrsqrt.f32 %v3785_v42  ;;  %vm3804_vm11 = vweird.f32 %v3785_v42  ;;  %vm3794_vm12 = vweird.f32 %v3784_v39 }
0x1349   :  { %5976 = vrsqrt.f32 %v3784_v39  ;;  %v3755_v35 = vpop.xlane.xlu1 %3754 }
0x134a   :  { %v3759_v1 = vmul.f32 %v3755_v35, %v6586_v63 }
0x134b   :  { %v5702_v19 = vpop.permute.xlu2 %5701 }
0x134c   :  { %v8814_v47 = vsub.f32 %v3665_v6, %v3759_v1  ;;  %v5708_v6 = vunpack.i.l.bf16 %v8791_v2  ;;  %v5704_v61 = vunpack.i.h.bf16 %v5702_v19  ;;  %v5703_v51 = vunpack.i.l.bf16 %v5702_v19 }
0x134e   :  { %v5975_v31 = vpop.eup %5974  ;;  %v3767_v45 = vmul.f32 %v8814_v47, %v8814_v47  ;;  %v3895_v57 = vsel %vm489_vm1, %v5703_v51, %v5704_v61  ;;  %v3894_v17 = vsel %vm489_vm1, %v5708_v6, %v5709_v29 }
0x134f   :  { %v5977_v23 = vpop.eup %5976  ;;  %v3799_v30 = vmul.f32 %v5975_v31, %v3785_v42  ;;  %vm3805_vm9 = vweird.f32 %v5975_v31 }
0x1350   :  { %v3789_v11 = vmul.f32 %v5977_v23, %v3784_v39  ;;  %vm3795_vm10 = vweird.f32 %v5977_v23  ;;  %v3777_v56 = vsel %vm489_vm1, %v3767_v45, 0.0  ;;  %vm3806_vm13 = vmor %vm3804_vm11, %vm3805_vm9 }
0x1351   :  { %v3800_v20 = vmul.f32 %v5975_v31, %v3799_v30  ;;  %3778 = vadd.xlane.f32.xlu2 %v3777_v56  ;;  %vm3796_vm14 = vmor %vm3794_vm12, %vm3795_vm10  ;;  %vm4034_vm12 = vcmask 1041408  }
0x1352   :  { %v3790_v14 = vmul.f32 %v5977_v23, %v3789_v11  ;;  %v8869_v11 = vld [vmem:[%s9584_s16 + $0x8] sm:$0xff] }
0x1353   :  { %v3801_v60 = vmul.f32 0.5, %v3800_v20 }
0x1354   :  { %v3791_v33 = vmul.f32 0.5, %v3790_v14 }
0x1355   :  { %v3802_v10 = vsub.f32 1.5, %v3801_v60 }
0x1356   :  { %v3792_v50 = vsub.f32 1.5, %v3791_v33 }
0x1357   :  { %v3803_v53 = vmul.f32 %v5975_v31, %v3802_v10  ;;  %5711 = vrot.lane.b32.xlu0 %v5710_v55, %s6094_s22  ;;  %v3843_v55 = vperm.slane %v8869_v11, 2 }
0x1358   :  { %v3793_v52 = vmul.f32 %v5977_v23, %v3792_v50 }
0x1359   :  { %v3807_v8 = vsel %vm3806_vm13, %v5975_v31, %v3803_v53  ;;  %vm4036_vm13 = vcmask 1042432  }
0x135a   :  { %v3797_v16 = vsel %vm3796_vm14, %v5977_v23, %v3793_v52  ;;  %v8827_v48 = vmul.f32 %v3807_v8, %v8759_v21  ;;  %vm4074_vm14 = vcmask 519168  }
0x135b   :  { %v8830_v49 = vmul.f32 %v3797_v16, %v8755_v25 }
0x135c   :  { %v5173_v22 = vmul.f32 %v8820_v37, %v8827_v48 }
0x135d   :  { %v5172_v38 = vmul.f32 %v8820_v37, %v8830_v49  ;;  %v3833_v8 = vmul.f32 %v8853_v7, %v8830_v49 }
0x135e   :  { %v5178_v12 = vadd.f32 %v8824_v4, %v5173_v22 }
0x135f   :  { %v5177_v18 = vadd.f32 %v8824_v4, %v5172_v38  ;;  %5716 = vrot.lane.b32.xlu0 %v5715_v9, %s6094_s22 }
0x1360   :  { %5182 = vst.msk [vmem:[#allocation2 + $0x8] sm:$0xff] %vm489_vm1, %v5178_v12 }
0x1361   :  { %5181 = vst.msk [vmem:[#allocation2] sm:$0xff] %vm489_vm1, %v5177_v18  ;;  %v5697_v15 = vpop.permute.xlu1 %5696 }
0x1362   :  { %v5699_v25 = vunpack.i.h.bf16 %v5697_v15  ;;  %v5698_v21 = vunpack.i.l.bf16 %v5697_v15 }
0x1364   :  { %v3896_v3 = vsel %vm489_vm1, %v5698_v21, %v5699_v25  ;;  %v3834_v21 = vmul.f32 %v8853_v7, %v8827_v48 }
0x1365   :  { %3939 = vmatpush.msrb.mxu0 %v3896_v3 }
0x1366   :  { %v3839_v6 = vadd.f32 %v8857_v40, %v3834_v21 }
0x1367   :  { %3940 = vmatpush.msrb.mxu0 %v3895_v57 }
0x1369   :  { %3941 = vmatpush.msrb.mxu0 %v3894_v17 }
0x138c   :  { %v3966_v5 = vpop.xlane.xlu1 %3965 }
0x138d   :  { %v3967_v24 = vmul.f32 %v3966_v5, %v6586_v63 }
0x138f   :  { %v3968_v46 = vadd.f32 1e-06, %v3967_v24 }
0x1391   :  { %5978 = vrsqrt.f32 %v3968_v46  ;;  %vm3975_vm2 = vweird.f32 %v3968_v46 }
0x1397   :  { %v5979_v27 = vpop.eup %5978 }
0x1398   :  { %v3970_v26 = vmul.f32 %v5979_v27, %v3968_v46  ;;  %vm3976_vm0 = vweird.f32 %v5979_v27 }
0x1399   :  { %vm3977_vm3 = vmor %vm3975_vm2, %vm3976_vm0  ;;  %vm4078_vm0 = vcmask 125952  }
0x139a   :  { %v3971_v0 = vmul.f32 %v5979_v27, %v3970_v26 }
0x139c   :  { %v3972_v2 = vmul.f32 0.5, %v3971_v0 }
0x139e   :  { %v3973_v54 = vsub.f32 1.5, %v3972_v2 }
0x13a0   :  { %v3974_v34 = vmul.f32 %v5979_v27, %v3973_v54 }
0x13a2   :  { %v3978_v13 = vsel %vm3977_vm3, %v5979_v27, %v3974_v34 }
0x13a3   :  { %v3979_v62 = vmul.f32 %v3978_v13, %v8786_v36  ;;  %v3842_v36 = vperm.slane %v8850_v41, 2 }
0x13a5   :  { %v3980_v59 = vmul.f32 %v3979_v62, %v8853_v7  ;;  %3910 = vrot.lane.b32.xlu0 %v3842_v36, %s6094_s22 }
0x13a7   :  { %v3981_v44 = vadd.f32 %v3980_v59, %v8857_v40 }
0x13a9   :  { %5547 = vmatmul.msk.f32.vlgmr.msrb.gmra.mxu1 %vm489_vm1, %v3981_v44  ;;  %5548 = vmatmul.msk.f32.vlgmr.msra.gmra.mxu2 %vm489_vm1, %v3981_v44 }
0x13ad   :  { %3912 = vrot.lane.b32.xlu0 %v3843_v55, %s6094_s22 }
0x13b6   :  { %v3776_v58 = vpop.xlane.xlu0 %3775 }
0x13b7   :  { %v3782_v43 = vmul.f32 %v3776_v58, %v6586_v63 }
0x13b9   :  { %v3786_v42 = vadd.f32 1e-06, %v3782_v43 }
0x13bb   :  { %5980 = vrsqrt.f32 %v3786_v42  ;;  %vm3814_vm5 = vweird.f32 %v3786_v42 }
0x13c1   :  { %v5981_v39 = vpop.eup %5980 }
0x13c2   :  { %v3809_v31 = vmul.f32 %v5981_v39, %v3786_v42  ;;  %vm3815_vm4 = vweird.f32 %v5981_v39 }
0x13c3   :  { %vm3816_vm6 = vmor %vm3814_vm5, %vm3815_vm4 }
0x13c4   :  { %v3810_v23 = vmul.f32 %v5981_v39, %v3809_v31  ;;  %v3779_v14 = vpop.xlane.xlu2 %3778 }
0x13c5   :  { %v3783_v10 = vmul.f32 %v3779_v14, %v6586_v63 }
0x13c6   :  { %v3811_v30 = vmul.f32 0.5, %v3810_v23 }
0x13c7   :  { %v3787_v56 = vadd.f32 1e-06, %v3783_v10 }
0x13c8   :  { %v3812_v35 = vsub.f32 1.5, %v3811_v30 }
0x13c9   :  { %v5712_v20 = vpop.permute.xlu0 %5711  ;;  %5982 = vrsqrt.f32 %v3787_v56  ;;  %vm3824_vm10 = vweird.f32 %v3787_v56 }
0x13ca   :  { %v3813_v1 = vmul.f32 %v5981_v39, %v3812_v35  ;;  %v5714_v60 = vunpack.i.h.bf16 %v5712_v20  ;;  %v5713_v33 = vunpack.i.l.bf16 %v5712_v20 }
0x13cc   :  { %v3817_v45 = vsel %vm3816_vm6, %v5981_v39, %v3813_v1  ;;  %v3893_v50 = vsel %vm489_vm1, %v5713_v33, %v5714_v60 }
0x13cd   :  { %v8875_v53 = vmul.f32 %v3817_v45, %v8794_v28  ;;  %3942 = vmatpush.msrb.mxu0 %v3893_v50  ;;  %v3838_v28 = vadd.f32 %v8857_v40, %v3833_v8 }
0x13cf   :  { %v5174_v52 = vmul.f32 %v8820_v37, %v8875_v53  ;;  %v5983_v18 = vpop.eup %5982  ;;  %v3835_v3 = vmul.f32 %v8853_v7, %v8875_v53 }
0x13d0   :  { %v3819_v15 = vmul.f32 %v5983_v18, %v3787_v56  ;;  %vm3825_vm9 = vweird.f32 %v5983_v18 }
0x13d1   :  { %v5179_v16 = vadd.f32 %v8824_v4, %v5174_v52  ;;  %v5717_v22 = vpop.permute.xlu0 %5716  ;;  %vm3826_vm11 = vmor %vm3824_vm10, %vm3825_vm9  ;;  %v3840_v24 = vadd.f32 %v8857_v40, %v3835_v3 }
0x13d2   :  { %v5719_v9 = vunpack.i.h.bf16 %v5717_v22  ;;  %v5718_v38 = vunpack.i.l.bf16 %v5717_v22  ;;  %v3820_v25 = vmul.f32 %v5983_v18, %v3819_v15 }
0x13d3   :  { %5183 = vst.msk [vmem:[#allocation2 + $0x10] sm:$0xff] %vm489_vm1, %v5179_v16 }
0x13d4   :  { %v3892_v12 = vsel %vm489_vm1, %v5718_v38, %v5719_v9  ;;  %v3821_v29 = vmul.f32 0.5, %v3820_v25 }
0x13d5   :  { %3943 = vmatpush.msrb.mxu0 %v3892_v12 }
0x13d6   :  { %5543 = vmatmul.msk.f32.vlgmr.msrb.gmra.mxu0 %vm489_vm1, %v3838_v28  ;;  %v3822_v19 = vsub.f32 1.5, %v3821_v29 }
0x13d8   :  { %v3823_v61 = vmul.f32 %v5983_v18, %v3822_v19 }
0x13da   :  { %v3827_v51 = vsel %vm3826_vm11, %v5983_v18, %v3823_v61 }
0x13db   :  { %v8896_v57 = vmul.f32 %v3827_v51, %v8814_v47 }
0x13dd   :  { %v5175_v17 = vmul.f32 %v8820_v37, %v8896_v57  ;;  %v3836_v5 = vmul.f32 %v8853_v7, %v8896_v57 }
0x13de   :  { %5544 = vmatmul.msk.f32.gmra.mxu0 %vm489_vm1, %v3839_v6 }
0x13df   :  { %v5180_v46 = vadd.f32 %v8824_v4, %v5175_v17  ;;  %v3841_v27 = vadd.f32 %v8857_v40, %v3836_v5 }
0x13e1   :  { %5184 = vst.msk [vmem:[#allocation2 + $0x18] sm:$0xff] %vm489_vm1, %v5180_v46 }
0x13e2   :  { %5222 = dma.vmem_to_hbm [thread:$0]  %s5215_s25, 512, %s5217_s6, [#allocation3], %s6096_s28, %s6096_s28, %s6097_s30  }
0x13e6   :  { %5545 = vmatmul.msk.f32.gmra.mxu0 %vm489_vm1, %v3840_v24 }
0x13ee   :  { %5546 = vmatmul.msk.f32.gmra.mxu0 %vm489_vm1, %v3841_v27 }
0x1417   :  { %v3911_v54 = vpop.permute.xlu0 %3910 }
0x141f   :  { %v3913_v62 = vpop.permute.xlu0 %3912 }
0x1420   :  { %v3914_v59 = vsel %vm489_vm1, %v3911_v54, %v3913_v62 }
0x1426   :  { %v4002_v47 = vpop.f32.mrf.mxu1 }
0x1427   :  { %v4003_v26 = vadd.f32 %v4002_v47, %v3842_v36  ;;  %v8917_v36 = vld [vmem:[%s9579_s11] sm:$0xf] }
0x1429   :  { %v4169_v0 = vperm.slane %v4003_v26, 1  ;;  %v4068_v2 = vperm.slane %v4003_v26, 0  ;;  %v4025_v34 = vmul.f32 0.25, %v4003_v26 }
0x142b   :  { %4171 = vrot.lane.b32.xlu0 %v4169_v0, %s6094_s22  ;;  %4070 = vrot.lane.b32.xlu1 %v4068_v2, %s6094_s22  ;;  %v4027_v7 = vrot.slane %v4025_v34, 7  ;;  %v4029_v40 = vrot.slane %v4025_v34, 6  ;;  %v4031_v23 = vrot.slane %v4025_v34, 5  ;;  %v4134_v1 = vrot.slane %v4025_v34, 1 }
0x142c   :  { %v4022_v29 = vpop.f32.mrf.mxu2 }
0x142d   :  { %v4033_v44 = vsel %vm3667_vm7, %v4025_v34, %v4027_v7  ;;  %v4136_v14 = vsel %vm3667_vm7, %v4134_v1, %v4025_v34 }
0x142e   :  { %v4035_v39 = vsel %vm4034_vm12, %v4033_v44, %v4029_v40  ;;  %v4137_v45 = vsel %vm4034_vm12, %v4136_v14, %v4027_v7  ;;  %v3692_v14 = vld [vmem:[%s9581_s13 + $0x38] sm:$0xff] }
0x142f   :  { %v4037_v30 = vsel %vm4036_vm13, %v4035_v39, %v4031_v23  ;;  %v4138_v56 = vsel %vm4036_vm13, %v4137_v45, %v4029_v40  ;;  %v3689_v45 = vld [vmem:[%s9581_s13 + $0x20] sm:$0xff] }
0x1430   :  { %v4038_v20 = vmul.f32 %v4037_v30, %v8917_v36  ;;  %v4139_v52 = vmul.f32 %v4138_v56, %v8917_v36 }
0x1453   :  { %v3945_v13 = vpop.f32.mrf.mxu0 }
0x1454   :  { %v3946_v43 = vadd.f32 %v3945_v13, %v3914_v59 }
0x145b   :  { %v3948_v58 = vpop.f32.mrf.mxu0 }
0x145c   :  { %v3949_v42 = vadd.f32 %v3948_v58, %v3914_v59 }
0x145e   :  { %v5725_v31 = vpack.i.bf16 %v3946_v43, %v3949_v42  ;;  %5549 = vmatpush.xpose.msk.msra.mxu3 %vm489_vm1, %v3949_v42 }
0x1462   :  { %5550 = vmatpush.xpose.msk.msra.mxu3 %vm489_vm1, %v3946_v43  ;;  %v4023_v43 = vadd.f32 %v4022_v29, %v3843_v55  ;;  %v3690_v55 = vld [vmem:[%s9581_s13 + $0x28] sm:$0xff] }
0x1463   :  { %v3951_v35 = vpop.f32.mrf.mxu0 }
0x1464   :  { %v3952_v33 = vadd.f32 %v3951_v35, %v3914_v59 }
0x1465   :  { %5551 = vmatmul.msk.f32.vlgmr.msra.gmra.mxu3 %vm489_vm1, %v4038_v20 }
0x146b   :  { %v3954_v60 = vpop.f32.mrf.mxu0 }
0x146c   :  { %v3955_v10 = vadd.f32 %v3954_v60, %v3914_v59  ;;  %v3691_v60 = vld [vmem:[%s9581_s13 + $0x30] sm:$0xff] }
0x146e   :  { %v5720_v50 = vpack.i.bf16 %v3952_v33, %v3955_v10  ;;  %5553 = vmatpush.xpose.msk.msrb.mxu2 %vm489_vm1, %v3955_v10 }
0x1470   :  { %5721 = vrot.lane.b32.xlu1 %v5720_v50, %s6094_s22 }
0x1472   :  { %5554 = vmatpush.xpose.msk.msrb.mxu2 %vm489_vm1, %v3952_v33 }
0x1475   :  { %5555 = vmatmul.msk.f32.vlgmr.msrb.gmra.mxu2 %vm489_vm1, %v4139_v52 }
0x149d   :  { %v4172_v8 = vpop.permute.xlu0 %4171  ;;  %v4071_v9 = vpop.permute.xlu1 %4070 }
0x149e   :  { %v4174_v16 = vmul.f32 %v4172_v8, %v4139_v52  ;;  %v4073_v38 = vmul.f32 %v4071_v9, %v4038_v20  ;;  %v3688_v8 = vld [vmem:[%s9581_s13 + $0x18] sm:$0xff]  ;;  %v3686_v9 = vld [vmem:[%s9581_s13 + $0x8] sm:$0xff] }
0x14a0   :  { %v4175_v22 = vsel %vm4074_vm14, %v4174_v16, 0.0  ;;  %v4075_v28 = vsel %vm4074_vm14, %v4073_v38, 0.0  ;;  %v3687_v16 = vld [vmem:[%s9581_s13 + $0x10] sm:$0xff]  ;;  %v4192_v38 = vperm.slane %v4023_v43, 1 }
0x14a1   :  { %4176 = vadd.xlane.f32.xlu2 %v4175_v22 }
0x14a9   :  { %4076 = vadd.xlane.f32.xlu2 %v4075_v28 }
0x14e2   :  { %v5722_v12 = vpop.permute.xlu1 %5721 }
0x14e3   :  { %v5723_v18 = vunpack.i.l.bf16 %v5722_v12  ;;  %v5724_v15 = vunpack.i.h.bf16 %v5722_v12  ;;  %v3685_v12 = vld [vmem:[%s9581_s13] sm:$0xff] }
0x14e5   :  { %4217 = vmatpush.msrb.mxu3 %v5723_v18 }
0x14e7   :  { %4218 = vmatpush.msrb.mxu3 %v5724_v15 }
0x14e8   :  { %v4065_v25 = vpop.f32.mrf.mxu3 }
0x14e9   :  { %v4079_v21 = vsel %vm4078_vm0, %v4065_v25, -inf }
0x14ea   :  { %4080 = vmax.xlane.f32.xlu2 %v4079_v21 }
0x14f8   :  { %v4166_v19 = vpop.f32.mrf.mxu2 }
0x14f9   :  { %v4178_v6 = vsel %vm4078_vm0, %v4166_v19, -inf }
0x14fa   :  { %4179 = vmax.xlane.f32.xlu0 %v4178_v6 }
0x1502   :  { %5726 = vrot.lane.b32.xlu2 %v5725_v31, %s6094_s22  ;;  %v4093_v31 = vperm.slane %v4023_v43, 0 }
0x1514   :  { %v4177_v61 = vpop.xlane.xlu2 %4176 }
0x151c   :  { %v4077_v51 = vpop.xlane.xlu2 %4076 }
0x155d   :  { %v4081_v3 = vpop.xlane.xlu2 %4080 }
0x155e   :  { %v4082_v17 = vmax.f32 %v4081_v3, %v4077_v51 }
0x1560   :  { %v4083_v5 = vsub.f32 %v4065_v25, %v4082_v17  ;;  %v4086_v24 = vsub.f32 %v4077_v51, %v4082_v17 }
0x1562   :  { %v4084_v46 = vmul.f32 1.442695, %v4083_v5  ;;  %v4087_v59 = vmul.f32 1.442695, %v4086_v24 }
0x1564   :  { %5984 = vpow2.f32 %v4084_v46 }
0x1565   :  { %v5727_v27 = vpop.permute.xlu2 %5726 }
0x1566   :  { %v5728_v47 = vunpack.i.l.bf16 %v5727_v27  ;;  %v5729_v26 = vunpack.i.h.bf16 %v5727_v27 }
0x1568   :  { %4118 = vmatpush.msra.mxu1 %v5728_v47 }
0x156a   :  { %v5985_v0 = vpop.eup %5984  ;;  %4119 = vmatpush.msra.mxu1 %v5729_v26 }
0x156b   :  { %5552 = vmatmul.msk.f32.vlgmr.msra.gmra.mxu1 %vm819_vm15, %v5985_v0  ;;  %v4089_v2 = vsel %vm4078_vm0, %v5985_v0, 0.0 }
0x156c   :  { %4090 = vadd.xlane.f32.xlu1 %v4089_v2  ;;  %4246 = vmatpush.msrb.mxu1 %v3692_v14 }
0x156d   :  { %v4180_v54 = vpop.xlane.xlu0 %4179 }
0x156e   :  { %v4181_v34 = vmax.f32 %v4180_v54, %v4177_v61  ;;  %4247 = vmatpush.msrb.mxu1 %v3691_v60  ;;  %v4234_v54 = vperm.slane %v8850_v41, 3 }
0x1570   :  { %v4182_v13 = vsub.f32 %v4166_v19, %v4181_v34  ;;  %v4185_v39 = vsub.f32 %v4177_v61, %v4181_v34  ;;  %4248 = vmatpush.msrb.mxu1 %v3690_v55  ;;  %v3700_v55 = vld [vmem:[%s9582_s14 + $0x38] sm:$0xff] }
0x1572   :  { %v4183_v7 = vmul.f32 1.442695, %v4182_v13  ;;  %v4186_v30 = vmul.f32 1.442695, %v4185_v39  ;;  %4249 = vmatpush.msrb.mxu1 %v3689_v45  ;;  %v3707_v39 = vld [vmem:[%s9582_s14 + $0x70] sm:$0xff]  ;;  %v3697_v45 = vld [vmem:[%s9582_s14 + $0x20] sm:$0xff] }
0x1573   :  { %4300 = vmatpush.msra.mxu2 %v3707_v39 }
0x1574   :  { %5986 = vpow2.f32 %v4183_v7  ;;  %4250 = vmatpush.msrb.mxu1 %v3688_v8  ;;  %v3693_v8 = vld [vmem:[%s9582_s14] sm:$0xff] }
0x1575   :  { %5988 = vpow2.f32 %v4087_v59 }
0x1576   :  { %4251 = vmatpush.msrb.mxu1 %v3687_v16  ;;  %v3694_v16 = vld [vmem:[%s9582_s14 + $0x8] sm:$0xff] }
0x1578   :  { %4252 = vmatpush.msrb.mxu1 %v3686_v9 }
0x157a   :  { %v5987_v62 = vpop.eup %5986  ;;  %4253 = vmatpush.msrb.mxu1 %v3685_v12 }
0x157b   :  { %5556 = vmatmul.msk.f32.vlgmr.msrb.gmra.mxu3 %vm819_vm15, %v5987_v62  ;;  %v4188_v40 = vsel %vm4078_vm0, %v5987_v62, 0.0  ;;  %v5989_v58 = vpop.eup %5988 }
0x157c   :  { %4189 = vadd.xlane.f32.xlu0 %v4188_v40  ;;  %v4094_v35 = vmul.f32 %v5989_v58, %v4093_v31  ;;  %v3705_v31 = vld [vmem:[%s9582_s14 + $0x60] sm:$0xff] }
0x157d   :  { %4301 = vmatpush.msra.mxu2 %v3705_v31 }
0x15df   :  { %v4091_v44 = vpop.xlane.xlu1 %4090 }
0x15e0   :  { %v4092_v42 = vadd.f32 %v5989_v58, %v4091_v44 }
0x15e2   :  { %5990 = vrcp.f32 %v4092_v42 }
0x15e3   :  { %5992 = vpow2.f32 %v4186_v30  ;;  %v3703_v30 = vld [vmem:[%s9582_s14 + $0x50] sm:$0xff] }
0x15e4   :  { %4302 = vmatpush.msra.mxu2 %v3703_v30  ;;  %v3736_v30 = vld [vmem:[%s9583_s15 + $0xd8] sm:$0xff] }
0x15e8   :  { %v4121_v23 = vpop.f32.mrf.mxu1  ;;  %v5991_v1 = vpop.eup %5990 }
0x15e9   :  { %v4122_v20 = vadd.f32 %v4121_v23, %v4094_v35  ;;  %v5993_v50 = vpop.eup %5992  ;;  %v3706_v23 = vld [vmem:[%s9582_s14 + $0x68] sm:$0xff]  ;;  %v3704_v35 = vld [vmem:[%s9582_s14 + $0x58] sm:$0xff] }
0x15ea   :  { %v4193_v18 = vmul.f32 %v5993_v50, %v4192_v38 }
0x15eb   :  { %v4125_v33 = vmul.f32 %v5991_v1, %v4122_v20  ;;  %v3701_v20 = vld [vmem:[%s9582_s14 + $0x40] sm:$0xff]  ;;  %v3702_v1 = vld [vmem:[%s9582_s14 + $0x48] sm:$0xff] }
0x15ec   :  { %4303 = vmatpush.msra.mxu2 %v3701_v20 }
0x15ed   :  { %v4126_v56 = vmul.f32 %v4125_v33, %v8917_v36  ;;  %v3699_v33 = vld [vmem:[%s9582_s14 + $0x30] sm:$0xff] }
0x15ee   :  { %4304 = vmatpush.msra.mxu2 %v3699_v33  ;;  %v3735_v33 = vld [vmem:[%s9583_s15 + $0xd0] sm:$0xff] }
0x15ef   :  { %v4190_v10 = vpop.xlane.xlu0 %4189  ;;  %v4127_v22 = vsel %vm4074_vm14, %v4126_v56, 0.0  ;;  %v3695_v56 = vld [vmem:[%s9582_s14 + $0x10] sm:$0xff] }
0x15f0   :  { %v4191_v52 = vadd.f32 %v5993_v50, %v4190_v10  ;;  %v4128_v28 = vrot.slane %v4127_v22, 4  ;;  %v3698_v50 = vld [vmem:[%s9582_s14 + $0x28] sm:$0xff]  ;;  %4305 = vmatpush.msra.mxu2 %v3697_v45 }
0x15f2   :  { %5994 = vrcp.f32 %v4191_v52  ;;  %v4129_v29 = vadd.f32 %v4128_v28, %v4127_v22  ;;  %v3696_v52 = vld [vmem:[%s9582_s14 + $0x18] sm:$0xff]  ;;  %4306 = vmatpush.msra.mxu2 %v3695_v56  ;;  %v3734_v56 = vld [vmem:[%s9583_s15 + $0xc8] sm:$0xff] }
0x15f4   :  { %v4130_v61 = vrot.slane %v4129_v29, 2  ;;  %4307 = vmatpush.msra.mxu2 %v3693_v8 }
0x15f6   :  { %v4131_v17 = vadd.f32 %v4130_v61, %v4129_v29  ;;  %v4287_v61 = vperm.slane %v8850_v41, 7 }
0x15f8   :  { %v5995_v21 = vpop.eup %5994  ;;  %v4132_v46 = vrot.slane %v4131_v17, 1 }
0x15fa   :  { %v4133_v26 = vadd.f32 %v4132_v46, %v4131_v17 }
0x15fe   :  { %v4220_v15 = vpop.f32.mrf.mxu3 }
0x15ff   :  { %v4221_v25 = vadd.f32 %v4220_v15, %v4193_v18  ;;  %v4283_v15 = vperm.slane %v8850_v41, 5 }
0x1601   :  { %v4224_v19 = vmul.f32 %v5995_v21, %v4221_v25  ;;  %v4285_v21 = vperm.slane %v8850_v41, 6 }
0x1603   :  { %v4225_v6 = vmul.f32 %v4224_v19, %v8917_v36  ;;  %v4258_v36 = vperm.slane %v8850_v41, 4  ;;  %v3740_v41 = vld [vmem:[%s9583_s15 + $0xf8] sm:$0xff] }
0x1604   :  { %4441 = vmatpush.msra.mxu1 %v3740_v41  ;;  %v3713_v41 = vld [vmem:[%s9583_s15 + $0x20] sm:$0xff] }
0x1605   :  { %v4226_v51 = vsel %vm4074_vm14, %v4225_v6, 0.0 }
0x1606   :  { %v4227_v3 = vrot.slane %v4226_v51, 4 }
0x1608   :  { %v4228_v5 = vadd.f32 %v4227_v3, %v4226_v51  ;;  %v4288_v51 = vperm.slane %v8869_v11, 7 }
0x160a   :  { %v4229_v24 = vrot.slane %v4228_v5, 2 }
0x160c   :  { %v4230_v27 = vadd.f32 %v4229_v24, %v4228_v5 }
0x160e   :  { %v4231_v47 = vrot.slane %v4230_v27, 1 }
0x1610   :  { %v4232_v0 = vadd.f32 %v4231_v47, %v4230_v27  ;;  %v3724_v47 = vld [vmem:[%s9583_s15 + $0x78] sm:$0xff] }
0x1611   :  { %4421 = vmatpush.msra.mxu0 %v3724_v47 }
0x1612   :  { %v4233_v2 = vsel %vm3667_vm7, %v4133_v26, %v4232_v0  ;;  %v3723_v0 = vld [vmem:[%s9583_s15 + $0x70] sm:$0xff] }
0x1613   :  { %5557 = vmatmul.msk.f32.vlgmr.msrb.gmra.mxu1 %vm489_vm1, %v4233_v2  ;;  %v3739_v2 = vld [vmem:[%s9583_s15 + $0xf0] sm:$0xff]  ;;  %4422 = vmatpush.msra.mxu0 %v3723_v0 }
0x1614   :  { %4442 = vmatpush.msra.mxu1 %v3739_v2 }
0x1690   :  { %v4255_v34 = vpop.f32.mrf.mxu1 }
0x1691   :  { %v4256_v13 = vadd.f32 %v4255_v34, %v4234_v54  ;;  %v3722_v34 = vld [vmem:[%s9583_s15 + $0x68] sm:$0xff] }
0x1692   :  { %4423 = vmatpush.msra.mxu0 %v3722_v34  ;;  %v3712_v34 = vld [vmem:[%s9583_s15 + $0x18] sm:$0xff] }
0x1693   :  { %v4259_v7 = vmul.f32 %v4258_v36, %v4256_v13  ;;  %v3738_v13 = vld [vmem:[%s9583_s15 + $0xe8] sm:$0xff] }
0x1694   :  { %4443 = vmatpush.msra.mxu1 %v3738_v13  ;;  %v3728_v13 = vld [vmem:[%s9583_s15 + $0x98] sm:$0xff] }
0x1695   :  { %v8975_v62 = vadd.f32 %v4259_v7, %v8578_v32  ;;  %v3708_v32 = vld [vmem:[%s9582_s14 + $0x78] sm:$0xff] }
0x1696   :  { %4320 = vmatpush.msra.mxu3 %v3708_v32 }
0x1697   :  { %v4261_v40 = vsel %vm3957_vm8, %v8975_v62, 0.0 }
0x1698   :  { %4262 = vadd.xlane.f32.xlu2 %v4261_v40  ;;  %4321 = vmatpush.msra.mxu3 %v3706_v23  ;;  %v3720_v23 = vld [vmem:[%s9583_s15 + $0x58] sm:$0xff] }
0x169a   :  { %4322 = vmatpush.msra.mxu3 %v3704_v35 }
0x169c   :  { %4323 = vmatpush.msra.mxu3 %v3702_v1 }
0x169e   :  { %4324 = vmatpush.msra.mxu3 %v3700_v55 }
0x16a0   :  { %4325 = vmatpush.msra.mxu3 %v3698_v50  ;;  %v3718_v50 = vld [vmem:[%s9583_s15 + $0x48] sm:$0xff] }
0x16a2   :  { %4326 = vmatpush.msra.mxu3 %v3696_v52 }
0x16a4   :  { %4327 = vmatpush.msra.mxu3 %v3694_v16 }
0x170b   :  { %v4263_v59 = vpop.xlane.xlu2 %4262 }
0x170c   :  { %v4264_v44 = vmul.f32 %v4263_v59, %v6586_v63 }
0x170e   :  { %v4265_v58 = vsub.f32 %v8975_v62, %v4264_v44 }
0x1710   :  { %v4266_v43 = vmul.f32 %v4265_v58, %v4265_v58 }
0x1712   :  { %v4267_v42 = vsel %vm3957_vm8, %v4266_v43, 0.0  ;;  %v3737_v43 = vld [vmem:[%s9583_s15 + $0xe0] sm:$0xff] }
0x1713   :  { %4268 = vadd.xlane.f32.xlu0 %v4267_v42  ;;  %4444 = vmatpush.msra.mxu1 %v3737_v43  ;;  %v3711_v43 = vld [vmem:[%s9583_s15 + $0x10] sm:$0xff] }
0x1715   :  { %4445 = vmatpush.msra.mxu1 %v3736_v30 }
0x1717   :  { %4446 = vmatpush.msra.mxu1 %v3735_v33 }
0x1719   :  { %4447 = vmatpush.msra.mxu1 %v3734_v56 }
0x1786   :  { %v4269_v14 = vpop.xlane.xlu0 %4268 }
0x1787   :  { %v4270_v60 = vmul.f32 %v4269_v14, %v6586_v63 }
0x1789   :  { %v4271_v10 = vadd.f32 1e-06, %v4270_v60  ;;  %v3719_v60 = vld [vmem:[%s9583_s15 + $0x50] sm:$0xff] }
0x178b   :  { %5996 = vrsqrt.f32 %v4271_v10  ;;  %vm4278_vm3 = vweird.f32 %v4271_v10 }
0x1791   :  { %v5997_v22 = vpop.eup %5996 }
0x1792   :  { %v4273_v9 = vmul.f32 %v5997_v22, %v4271_v10  ;;  %vm4279_vm2 = vweird.f32 %v5997_v22 }
0x1793   :  { %vm4280_vm4 = vmor %vm4278_vm3, %vm4279_vm2 }
0x1794   :  { %v4274_v38 = vmul.f32 %v5997_v22, %v4273_v9  ;;  %v3733_v9 = vld [vmem:[%s9583_s15 + $0xc0] sm:$0xff] }
0x1795   :  { %4448 = vmatpush.msra.mxu1 %v3733_v9 }
0x1796   :  { %v4275_v28 = vmul.f32 0.5, %v4274_v38 }
0x1798   :  { %v4276_v12 = vsub.f32 1.5, %v4275_v28 }
0x179a   :  { %v4277_v18 = vmul.f32 %v5997_v22, %v4276_v12 }
0x179c   :  { %v4281_v25 = vsel %vm4280_vm4, %v5997_v22, %v4277_v18  ;;  %v3717_v22 = vld [vmem:[%s9583_s15 + $0x40] sm:$0xff]  ;;  %v3716_v18 = vld [vmem:[%s9583_s15 + $0x38] sm:$0xff] }
0x179d   :  { %v4282_v29 = vmul.f32 %v4281_v25, %v4265_v58  ;;  %v3721_v58 = vld [vmem:[%s9583_s15 + $0x60] sm:$0xff] }
0x179e   :  { %4424 = vmatpush.msra.mxu0 %v3721_v58 }
0x179f   :  { %v4284_v19 = vmul.f32 %v4283_v15, %v4282_v29  ;;  %v3732_v15 = vld [vmem:[%s9583_s15 + $0xb8] sm:$0xff]  ;;  %v3715_v29 = vld [vmem:[%s9583_s15 + $0x30] sm:$0xff] }
0x17a0   :  { %4425 = vmatpush.msra.mxu0 %v3720_v23  ;;  %4449 = vmatpush.msra.mxu1 %v3732_v15  ;;  %v3726_v23 = vld [vmem:[%s9583_s15 + $0x88] sm:$0xff] }
0x17a1   :  { %v4286_v6 = vadd.f32 %v4285_v21, %v4284_v19  ;;  %v3731_v19 = vld [vmem:[%s9583_s15 + $0xb0] sm:$0xff] }
0x17a2   :  { %4426 = vmatpush.msra.mxu0 %v3719_v60  ;;  %4450 = vmatpush.msra.mxu1 %v3731_v19 }
0x17a3   :  { %5558 = vmatmul.msk.f32.vlgmr.msra.gmra.mxu2 %vm489_vm1, %v4286_v6  ;;  %5559 = vmatmul.msk.f32.vlgmr.msra.gmra.mxu3 %vm489_vm1, %v4286_v6 }
0x17a4   :  { %4427 = vmatpush.msra.mxu0 %v3718_v50 }
0x17a6   :  { %4428 = vmatpush.msra.mxu0 %v3717_v22 }
0x17a8   :  { %4429 = vmatpush.msra.mxu0 %v3716_v18 }
0x17aa   :  { %4430 = vmatpush.msra.mxu0 %v3715_v29 }
0x1826   :  { %v4309_v3 = vpop.f32.mrf.mxu2  ;;  %v4329_v17 = vpop.f32.mrf.mxu3 }
0x1827   :  { %v9037_v5 = vadd.f32 %v4309_v3, %v4287_v61  ;;  %v9039_v24 = vadd.f32 %v4329_v17, %v4288_v51  ;;  %v3714_v61 = vld [vmem:[%s9583_s15 + $0x28] sm:$0xff] }
0x1828   :  { %v3730_v51 = vld [vmem:[%s9583_s15 + $0xa8] sm:$0xff]  ;;  %4431 = vmatpush.msra.mxu0 %v3714_v61 }
0x1829   :  { %v9042_v46 = vmul.f32 0.70710677, %v9037_v5  ;;  %v9045_v27 = vmul.f32 0.70710677, %v9039_v24  ;;  %4451 = vmatpush.msra.mxu1 %v3730_v51 }
0x182a   :  { %4432 = vmatpush.msra.mxu0 %v3713_v41  ;;  %v4332_v41 = vmul.f32 0.5, %v9037_v5  ;;  %v3743_v5 = vld [vmem:[%s9584_s16 + $0x10] sm:$0x3] }
0x182b   :  { %v4336_v11 = vmul.f32 %v9042_v46, %v9042_v46  ;;  %v4376_v26 = vmul.f32 %v9045_v27, %v9045_v27 }
0x182c   :  { %4433 = vmatpush.msra.mxu0 %v3712_v34  ;;  %v5575_v34 = vld [vmem:[%s9580_s12 + $0xe8] sm:$0xff] }
0x182d   :  { %v9063_v54 = vmin.f32 %v4336_v11, 16.0  ;;  %v9065_v36 = vmin.f32 %v4376_v26, 16.0  ;;  %v3729_v11 = vld [vmem:[%s9583_s15 + $0xa0] sm:$0xff] }
0x182e   :  { %4452 = vmatpush.msra.mxu1 %v3729_v11  ;;  %4434 = vmatpush.msra.mxu0 %v3711_v43 }
0x182f   :  { %v4338_v7 = vmul.f32 2.1237322e-06, %v9063_v54  ;;  %v4349_v40 = vmul.f32 3.8918573e-05, %v9063_v54  ;;  %v4378_v59 = vmul.f32 2.1237322e-06, %v9065_v36 }
0x1830   :  { %v4389_v44 = vmul.f32 3.8918573e-05, %v9065_v36  ;;  %4453 = vmatpush.msra.mxu1 %v3728_v13 }
0x1831   :  { %v4339_v42 = vadd.f32 0.00028619796, %v4338_v7  ;;  %v4350_v39 = vadd.f32 0.001143296, %v4349_v40  ;;  %v4379_v32 = vadd.f32 0.00028619796, %v4378_v59 }
0x1832   :  { %v4390_v31 = vadd.f32 0.001143296, %v4389_v44  ;;  %v5576_v7 = vld [vmem:[%s9580_s12 + $0xf0] sm:$0xff]  ;;  %v5577_v44 = vld [vmem:[%s9580_s12 + $0xf8] sm:$0xff] }
0x1833   :  { %v4340_v35 = vmul.f32 %v4339_v42, %v9063_v54  ;;  %v4351_v20 = vmul.f32 %v4350_v39, %v9063_v54  ;;  %v4380_v1 = vmul.f32 %v4379_v32, %v9065_v36  ;;  %v3727_v42 = vld [vmem:[%s9583_s15 + $0x90] sm:$0xff]  ;;  %v5730_v39 = vpack.i.bf16 %v5577_v44, %v5576_v7  ;;  %4704 = vmatpush.msrb.mxu3 %v5576_v7 }
0x1834   :  { %v4391_v14 = vmul.f32 %v4390_v31, %v9065_v36  ;;  %v3710_v31 = vld [vmem:[%s9583_s15 + $0x8] sm:$0xff]  ;;  %4454 = vmatpush.msra.mxu1 %v3727_v42 }
0x1835   :  { %v4341_v55 = vadd.f32 0.0036580483, %v4340_v35  ;;  %v4352_v10 = vadd.f32 0.014752088, %v4351_v20  ;;  %v4381_v8 = vadd.f32 0.0036580483, %v4380_v1  ;;  %5731 = vrot.lane.b32.xlu0 %v5730_v39, %s6094_s22  ;;  %4435 = vmatpush.msra.mxu0 %v3710_v31 }
0x1836   :  { %v4392_v45 = vadd.f32 0.014752088, %v4391_v14  ;;  %v3709_v35 = vld [vmem:[%s9583_s15] sm:$0xff]  ;;  %4455 = vmatpush.msra.mxu1 %v3726_v23 }
0x1837   :  { %v4353_v52 = vmul.f32 %v4352_v10, %v9063_v54  ;;  %v4342_v38 = vmul.f32 %v4341_v55, %v9063_v54  ;;  %v4382_v21 = vmul.f32 %v4381_v8, %v9065_v36  ;;  %v3725_v20 = vld [vmem:[%s9583_s15 + $0x80] sm:$0xff]  ;;  %4436 = vmatpush.msra.mxu0 %v3709_v35 }
0x1838   :  { %v4393_v16 = vmul.f32 %v4392_v45, %v9065_v36  ;;  %4456 = vmatpush.msra.mxu1 %v3725_v20  ;;  %v5570_v35 = vld [vmem:[%s9580_s12 + $0xc0] sm:$0xff]  ;;  %v5571_v20 = vld [vmem:[%s9580_s12 + $0xc8] sm:$0xff] }
0x1839   :  { %v4354_v28 = vadd.f32 0.112945676, %v4353_v52  ;;  %v4343_v3 = vadd.f32 0.05243302, %v4342_v38  ;;  %v4383_v0 = vadd.f32 0.05243302, %v4382_v21  ;;  %4724 = vmatpush.msrb.mxu0 %v5577_v44 }
0x183a   :  { %v4394_v12 = vadd.f32 0.112945676, %v4393_v16 }
0x183b   :  { %v4355_v25 = vmul.f32 %v4354_v28, %v9063_v54  ;;  %v4344_v40 = vmul.f32 %v4343_v3, %v9063_v54  ;;  %v4384_v32 = vmul.f32 %v4383_v0, %v9065_v36  ;;  %4725 = vmatpush.msrb.mxu0 %v5575_v34 }
0x183c   :  { %v4395_v6 = vmul.f32 %v4394_v12, %v9065_v36 }
0x183d   :  { %v4356_v17 = vadd.f32 0.4994258, %v4355_v25  ;;  %v4345_v30 = vadd.f32 0.18741608, %v4344_v40  ;;  %v4385_v1 = vadd.f32 0.18741608, %v4384_v32 }
0x183e   :  { %v4396_v47 = vadd.f32 0.4994258, %v4395_v6 }
0x183f   :  { %v4357_v26 = vmul.f32 %v4356_v17, %v9063_v54  ;;  %v4346_v60 = vmul.f32 %v4345_v30, %v9063_v54  ;;  %v4386_v10 = vmul.f32 %v4385_v1, %v9065_v36  ;;  %v5568_v1 = vld [vmem:[%s9580_s12 + $0xb0] sm:$0xff] }
0x1840   :  { %v4397_v2 = vmul.f32 %v4396_v47, %v9065_v36 }
0x1841   :  { %v4358_v59 = vadd.f32 1.0, %v4357_v26  ;;  %v4347_v56 = vadd.f32 1.1283791, %v4346_v60  ;;  %v4387_v38 = vadd.f32 1.1283791, %v4386_v10  ;;  %v4333_v26 = vmul.f32 0.5, %v9039_v24 }
0x1842   :  { %v4398_v58 = vadd.f32 1.0, %v4397_v2  ;;  %v4420_v24 = vperm.slane %v3743_v5, 0  ;;  %v5564_v10 = vld [vmem:[%s9580_s12 + $0x90] sm:$0xff] }
0x1843   :  { %5998 = vrcp.f32 %v4358_v59  ;;  %v4370_v52 = vand.u32 2147483648, %v4358_v59  ;;  %v4368_v22 = vand.u32 2147483647, %v4358_v59  ;;  %vm4364_vm9 = vweird.f32 %v4358_v59 }
0x1844   :  { %6000 = vrcp.f32 %v4398_v58  ;;  %v4410_v9 = vand.u32 2147483648, %v4398_v58  ;;  %v4408_v54 = vand.u32 2147483647, %v4398_v58  ;;  %vm4404_vm11 = vweird.f32 %v4398_v58 }
0x1845   :  { %v4371_v18 = vor.u32 1.1754944e-38, %v4370_v52  ;;  %v4348_v36 = vmul.f32 %v4347_v56, %v9042_v46  ;;  %vm4369_vm2 = vcmp.eq.f32.partialorder %v4368_v22, 8.507059e+37  ;;  %v4388_v19 = vmul.f32 %v4387_v38, %v9045_v27  ;;  %v5574_v27 = vld [vmem:[%s9580_s12 + $0xe0] sm:$0xff]  ;;  %v5573_v52 = vld [vmem:[%s9580_s12 + $0xd8] sm:$0xff]  ;;  %v5563_v38 = vld [vmem:[%s9580_s12 + $0x88] sm:$0xff] }
0x1846   :  { %v4411_v21 = vor.u32 1.1754944e-38, %v4410_v9  ;;  %vm4409_vm4 = vcmp.eq.f32.partialorder %v4408_v54, 8.507059e+37  ;;  %v5735_v13 = vpack.i.bf16 %v5575_v34, %v5574_v27  ;;  %4705 = vmatpush.msrb.mxu3 %v5574_v27  ;;  %4726 = vmatpush.msrb.mxu0 %v5573_v52  ;;  %v5562_v9 = vld [vmem:[%s9580_s12 + $0x80] sm:$0xff] }
0x1847   :  { %v5566_v54 = vld [vmem:[%s9580_s12 + $0xa0] sm:$0xff] }
0x1848   :  { %5736 = vrot.lane.b32.xlu1 %v5735_v13, %s6094_s22  ;;  %4727 = vmatpush.msrb.mxu0 %v5571_v20  ;;  %v9255_v13 = vld [vmem:[%s9584_s16 + $0x20] sm:$0xff] }
0x1849   :  { %v5999_v14 = vpop.eup %5998 }
0x184a   :  { %v6001_v33 = vpop.eup %6000  ;;  %v4360_v55 = vmul.f32 %v5999_v14, %v4358_v59  ;;  %vm4365_vm5 = vweird.f32 %v5999_v14  ;;  %v4461_v59 = vperm.slane %v3743_v5, 1  ;;  %v9260_v5 = vld [vmem:[%s9584_s16 + $0x28] sm:$0xff] }
0x184b   :  { %v4400_v45 = vmul.f32 %v6001_v33, %v4398_v58  ;;  %vm4405_vm6 = vweird.f32 %v6001_v33  ;;  %vm4366_vm10 = vmor %vm4364_vm9, %vm4365_vm5 }
0x184c   :  { %v4361_v50 = vsub.f32 1.0, %v4360_v55  ;;  %vm4406_vm3 = vmor %vm4404_vm11, %vm4405_vm6 }
0x184d   :  { %v4401_v8 = vsub.f32 1.0, %v4400_v45  ;;  %v5565_v45 = vld [vmem:[%s9580_s12 + $0x98] sm:$0xff] }
0x184e   :  { %v4362_v16 = vmul.f32 %v5999_v14, %v4361_v50  ;;  %v5572_v50 = vld [vmem:[%s9580_s12 + $0xd0] sm:$0xff]  ;;  %v5760_v56 = vpack.i.bf16 %v5565_v45, %v5564_v10 }
0x184f   :  { %v4402_v28 = vmul.f32 %v6001_v33, %v4401_v8  ;;  %4706 = vmatpush.msrb.mxu3 %v5572_v50 }
0x1850   :  { %v4363_v12 = vadd.f32 %v5999_v14, %v4362_v16  ;;  %v5740_v16 = vpack.i.bf16 %v5573_v52, %v5572_v50 }
0x1851   :  { %v4403_v15 = vadd.f32 %v6001_v33, %v4402_v28  ;;  %4707 = vmatpush.msrb.mxu3 %v5570_v35 }
0x1852   :  { %v4367_v25 = vsel %vm4366_vm10, %v5999_v14, %v4363_v12  ;;  %v5569_v14 = vld [vmem:[%s9580_s12 + $0xb8] sm:$0xff]  ;;  %5741 = vrot.lane.b32.xlu2 %v5740_v16, %s6094_s22  ;;  %v5567_v12 = vld [vmem:[%s9580_s12 + $0xa8] sm:$0xff] }
0x1853   :  { %v4372_v29 = vsel %vm4369_vm2, %v4371_v18, %v4367_v25  ;;  %v4407_v6 = vsel %vm4406_vm3, %v6001_v33, %v4403_v15  ;;  %v5750_v60 = vpack.i.bf16 %v5569_v14, %v5568_v1  ;;  %4708 = vmatpush.msrb.mxu3 %v5568_v1  ;;  %4728 = vmatpush.msrb.mxu0 %v5569_v14  ;;  %v4549_v1 = vperm.slane %v9255_v13, 1 }
0x1854   :  { %v4373_v61 = vmul.f32 %v4372_v29, %v4348_v36  ;;  %v4412_v51 = vsel %vm4409_vm4, %v4411_v21, %v4407_v6  ;;  %v5765_v18 = vpack.i.bf16 %v5563_v38, %v5562_v9  ;;  %v5755_v15 = vpack.i.bf16 %v5567_v12, %v5566_v54 }
0x1855   :  { %v4413_v3 = vmul.f32 %v4412_v51, %v4388_v19  ;;  %4709 = vmatpush.msrb.mxu3 %v5566_v54  ;;  %4729 = vmatpush.msrb.mxu0 %v5567_v12 }
0x1856   :  { %v5560_v17 = vclamps-f32 %v4373_v61, 1.0 }
0x1857   :  { %v5561_v47 = vclamps-f32 %v4413_v3, 1.0  ;;  %4710 = vmatpush.msrb.mxu3 %v5564_v10  ;;  %4730 = vmatpush.msrb.mxu0 %v5565_v45 }
0x1858   :  { %v4416_v11 = vadd.f32 1.0, %v5560_v17 }
0x1859   :  { %v4417_v46 = vadd.f32 1.0, %v5561_v47  ;;  %4711 = vmatpush.msrb.mxu3 %v5562_v9  ;;  %4731 = vmatpush.msrb.mxu0 %v5563_v38 }
0x185a   :  { %v4418_v0 = vmul.f32 %v4416_v11, %v4332_v41  ;;  %5766 = vrot.lane.b32.xlu2 %v5765_v18, %s6094_s22 }
0x185b   :  { %v4419_v2 = vmul.f32 %v4417_v46, %v4333_v26 }
0x185c   :  { %4437 = vmatmul.f32.vlgmr.msra.gmra.mxu0 %v4418_v0 }
0x185d   :  { %4457 = vmatmul.f32.vlgmr.msra.gmra.mxu1 %v4419_v2 }
0x18a7   :  { %v5732_v32 = vpop.permute.xlu0 %5731 }
0x18a8   :  { %v5734_v31 = vunpack.i.h.bf16 %v5732_v32  ;;  %v5733_v23 = vunpack.i.l.bf16 %v5732_v32 }
0x18aa   :  { %v4611_v30 = vsel %vm489_vm1, %v5733_v23, %v5734_v31 }
0x18ab   :  { %4648 = vmatpush.msrb.mxu2 %v4611_v30  ;;  %v4544_v30 = vperm.slane %v9255_v13, 0 }
0x18ac   :  { %v5742_v19 = vpop.permute.xlu2 %5741 }
0x18ad   :  { %v5744_v6 = vunpack.i.h.bf16 %v5742_v19  ;;  %v5743_v61 = vunpack.i.l.bf16 %v5742_v19  ;;  %v4545_v50 = vmul.f32 %v4544_v30, %v8830_v49  ;;  %v4546_v9 = vmul.f32 %v4544_v30, %v8827_v48 }
0x18ae   :  { %v4547_v38 = vmul.f32 %v4544_v30, %v8875_v53  ;;  %v4548_v54 = vmul.f32 %v4544_v30, %v8896_v57 }
0x18af   :  { %v4609_v47 = vsel %vm489_vm1, %v5743_v61, %v5744_v6  ;;  %v4551_v49 = vadd.f32 %v4549_v1, %v4546_v9 }
0x18b0   :  { %v4553_v12 = vadd.f32 %v4549_v1, %v4548_v54 }
0x18b4   :  { %v5767_v31 = vpop.permute.xlu2 %5766 }
0x18b5   :  { %v5768_v45 = vunpack.i.l.bf16 %v5767_v31 }
0x18ba   :  { %v5737_v36 = vpop.permute.xlu1 %5736 }
0x18bb   :  { %v5739_v25 = vunpack.i.h.bf16 %v5737_v36  ;;  %v5738_v21 = vunpack.i.l.bf16 %v5737_v36 }
0x18bd   :  { %v4610_v29 = vsel %vm489_vm1, %v5738_v21, %v5739_v25 }
0x18be   :  { %4649 = vmatpush.msrb.mxu2 %v4610_v29 }
0x18c0   :  { %4650 = vmatpush.msrb.mxu2 %v4609_v47 }
0x18d9   :  { %v4438_v7 = vpop.f32.mrf.mxu0 }
0x18da   :  { %v4439_v40 = vadd.f32 %v4438_v7, %v4420_v24  ;;  %v4458_v44 = vpop.f32.mrf.mxu1  ;;  %v4554_v24 = vperm.slane %v9255_v13, 2  ;;  %v4555_v7 = vperm.slane %v9260_v5, 2 }
0x18dc   :  { %v4459_v58 = vadd.f32 %v4458_v44, %v4439_v40 }
0x18de   :  { %v4462_v43 = vmul.f32 %v4461_v59, %v4459_v58 }
0x18e0   :  { %v9193_v42 = vadd.f32 %v4462_v43, %v8975_v62  ;;  %v5745_v62 = vpack.i.bf16 %v5571_v20, %v5570_v35 }
0x18e2   :  { %v4669_v39 = vsel %vm3957_vm8, %v9193_v42, 0.0 }
0x18e3   :  { %4670 = vadd.xlane.f32.xlu0 %v4669_v39 }
0x18f7   :  { %5746 = vrot.lane.b32.xlu0 %v5745_v62, %s6094_s22 }
0x18ff   :  { %5751 = vrot.lane.b32.xlu0 %v5750_v60, %s6094_s22  ;;  %v5769_v60 = vunpack.i.h.bf16 %v5767_v31 }
0x1907   :  { %5761 = vrot.lane.b32.xlu0 %v5760_v56, %s6094_s22 }
0x190f   :  { %4624 = vrot.lane.b32.xlu0 %v4555_v7, %s6094_s22 }
0x1956   :  { %v4671_v33 = vpop.xlane.xlu0 %4670 }
0x1957   :  { %v4672_v55 = vmul.f32 %v4671_v33, %v6586_v63 }
0x1959   :  { %v9226_v8 = vsub.f32 %v9193_v42, %v4672_v55 }
0x195b   :  { %v4674_v22 = vmul.f32 %v9226_v8, %v9226_v8 }
0x195d   :  { %v4675_v28 = vsel %vm3957_vm8, %v4674_v22, 0.0  ;;  %v4550_v22 = vadd.f32 %v4549_v1, %v4545_v50 }
0x195e   :  { %4676 = vadd.xlane.f32.xlu1 %v4675_v28  ;;  %v4552_v28 = vadd.f32 %v4549_v1, %v4547_v38 }
0x1969   :  { %v5747_v51 = vpop.permute.xlu0 %5746 }
0x196a   :  { %v5749_v3 = vunpack.i.h.bf16 %v5747_v51  ;;  %v5748_v17 = vunpack.i.l.bf16 %v5747_v51 }
0x196c   :  { %v4608_v41 = vsel %vm489_vm1, %v5748_v17, %v5749_v3 }
0x196d   :  { %4651 = vmatpush.msrb.mxu2 %v4608_v41 }
0x1971   :  { %v5752_v26 = vpop.permute.xlu0 %5751 }
0x1972   :  { %v5754_v0 = vunpack.i.h.bf16 %v5752_v26  ;;  %v5753_v2 = vunpack.i.l.bf16 %v5752_v26 }
0x1974   :  { %v4607_v34 = vsel %vm489_vm1, %v5753_v2, %v5754_v0  ;;  %v9295_v0 = vld [vmem:[%s9579_s11] sm:$0xf] }
0x1975   :  { %4652 = vmatpush.msrb.mxu2 %v4607_v34 }
0x1977   :  { %5756 = vrot.lane.b32.xlu1 %v5755_v15, %s6094_s22 }
0x1979   :  { %v5762_v32 = vpop.permute.xlu0 %5761 }
0x197a   :  { %v5764_v20 = vunpack.i.h.bf16 %v5762_v32  ;;  %v5763_v62 = vunpack.i.l.bf16 %v5762_v32 }
0x197c   :  { %v4605_v16 = vsel %vm489_vm1, %v5763_v62, %v5764_v20 }
0x197f   :  { %4622 = vrot.lane.b32.xlu1 %v4554_v24, %s6094_s22 }
0x1981   :  { %v4625_v19 = vpop.permute.xlu0 %4624 }
0x19d1   :  { %v4677_v11 = vpop.xlane.xlu1 %4676 }
0x19d2   :  { %v4678_v46 = vmul.f32 %v4677_v11, %v6586_v63 }
0x19d4   :  { %v4679_v27 = vadd.f32 1e-06, %v4678_v46 }
0x19d6   :  { %6002 = vrsqrt.f32 %v4679_v27  ;;  %vm4686_vm6 = vweird.f32 %v4679_v27 }
0x19dc   :  { %v6003_v40 = vpop.eup %6002 }
0x19dd   :  { %v4681_v59 = vmul.f32 %v6003_v40, %v4679_v27  ;;  %vm4687_vm5 = vweird.f32 %v6003_v40 }
0x19de   :  { %vm4688_vm9 = vmor %vm4686_vm6, %vm4687_vm5 }
0x19df   :  { %v4682_v44 = vmul.f32 %v6003_v40, %v4681_v59 }
0x19e1   :  { %v4683_v58 = vmul.f32 0.5, %v4682_v44 }
0x19e3   :  { %v4684_v43 = vsub.f32 1.5, %v4683_v58 }
0x19e5   :  { %v4685_v39 = vmul.f32 %v6003_v40, %v4684_v43 }
0x19e7   :  { %v4689_v23 = vsel %vm4688_vm9, %v6003_v40, %v4685_v39 }
0x19e8   :  { %v4690_v35 = vmul.f32 %v4689_v23, %v9226_v8  ;;  %v4604_v8 = vsel %vm489_vm1, %v5768_v45, %v5769_v60 }
0x19e9   :  { %v5757_v14 = vpop.permute.xlu1 %5756 }
0x19ea   :  { %v4691_v33 = vmul.f32 %v4690_v35, %v4544_v30  ;;  %v5759_v55 = vunpack.i.h.bf16 %v5757_v14  ;;  %v5758_v10 = vunpack.i.l.bf16 %v5757_v14 }
0x19ec   :  { %v4692_v56 = vadd.f32 %v4691_v33, %v4549_v1  ;;  %v4606_v52 = vsel %vm489_vm1, %v5758_v10, %v5759_v55 }
0x19ed   :  { %4653 = vmatpush.msrb.mxu2 %v4606_v52 }
0x19ee   :  { %5641 = vmatmul.msk.f32.vlgmr.msrb.gmra.mxu3 %vm489_vm1, %v4692_v56  ;;  %5642 = vmatmul.msk.f32.vlgmr.msrb.gmra.mxu0 %vm489_vm1, %v4692_v56 }
0x19ef   :  { %4654 = vmatpush.msrb.mxu2 %v4605_v16 }
0x19f1   :  { %4655 = vmatpush.msrb.mxu2 %v4604_v8  ;;  %v4623_v53 = vpop.permute.xlu1 %4622 }
0x19f2   :  { %5637 = vmatmul.msk.f32.vlgmr.msrb.gmra.mxu2 %vm489_vm1, %v4550_v22  ;;  %v4626_v61 = vsel %vm489_vm1, %v4623_v53, %v4625_v19 }
0x19fa   :  { %5638 = vmatmul.msk.f32.gmra.mxu2 %vm489_vm1, %v4551_v49 }
0x1a02   :  { %5639 = vmatmul.msk.f32.gmra.mxu2 %vm489_vm1, %v4552_v28 }
0x1a0a   :  { %5640 = vmatmul.msk.f32.gmra.mxu2 %vm489_vm1, %v4553_v12 }
0x1a6b   :  { %v4733_v53 = vpop.f32.mrf.mxu0 }
0x1a71   :  { %v4713_v18 = vpop.f32.mrf.mxu3 }
0x1a72   :  { %v4714_v15 = vadd.f32 %v4713_v18, %v4554_v24 }
0x1a74   :  { %v4736_v36 = vmul.f32 0.25, %v4714_v15  ;;  %v4876_v25 = vperm.slane %v4714_v15, 1  ;;  %v4777_v21 = vperm.slane %v4714_v15, 0 }
0x1a75   :  { %v4657_v29 = vpop.f32.mrf.mxu2 }
0x1a76   :  { %4878 = vrot.lane.b32.xlu1 %v4876_v25, %s6094_s22  ;;  %4779 = vrot.lane.b32.xlu2 %v4777_v21, %s6094_s22  ;;  %v4738_v48 = vrot.slane %v4736_v36, 7  ;;  %v4740_v6 = vrot.slane %v4736_v36, 6  ;;  %v4658_v3 = vadd.f32 %v4657_v29, %v4626_v61  ;;  %v4742_v11 = vrot.slane %v4736_v36, 5 }
0x1a77   :  { %v4841_v27 = vrot.slane %v4736_v36, 1 }
0x1a78   :  { %v4744_v57 = vsel %vm3667_vm7, %v4736_v36, %v4738_v48 }
0x1a79   :  { %v4745_v47 = vsel %vm4034_vm12, %v4744_v57, %v4740_v6  ;;  %v4843_v34 = vsel %vm3667_vm7, %v4841_v27, %v4736_v36  ;;  %v4734_v57 = vadd.f32 %v4733_v53, %v4555_v7  ;;  %v5583_v7 = vld [vmem:[%s9581_s13 + $0x68] sm:$0xff]  ;;  %v5582_v27 = vld [vmem:[%s9581_s13 + $0x60] sm:$0xff]  ;;  %v5600_v53 = vld [vmem:[%s9582_s14 + $0xf0] sm:$0xff] }
0x1a7a   :  { %v4746_v26 = vsel %vm4036_vm13, %v4745_v47, %v4742_v11  ;;  %v4844_v44 = vsel %vm4034_vm12, %v4843_v34, %v4738_v48  ;;  %5007 = vmatpush.msra.mxu2 %v5600_v53  ;;  %v5629_v53 = vld [vmem:[%s9583_s15 + $0x1d8] sm:$0xff] }
0x1a7b   :  { %v4747_v2 = vmul.f32 %v9295_v0, %v4746_v26  ;;  %v4845_v43 = vsel %vm4036_vm13, %v4844_v44, %v4740_v6  ;;  %v5585_v26 = vld [vmem:[%s9581_s13 + $0x78] sm:$0xff] }
0x1a7c   :  { %v4846_v39 = vmul.f32 %v9295_v0, %v4845_v43  ;;  %4953 = vmatpush.msrb.mxu1 %v5585_v26  ;;  %v5581_v44 = vld [vmem:[%s9581_s13 + $0x58] sm:$0xff] }
0x1a7d   :  { %v4660_v51 = vpop.f32.mrf.mxu2 }
0x1a7e   :  { %v4661_v17 = vadd.f32 %v4660_v51, %v4626_v61  ;;  %v4800_v51 = vperm.slane %v4734_v57, 0 }
0x1a80   :  { %v5770_v41 = vpack.i.bf16 %v4658_v3, %v4661_v17  ;;  %5643 = vmatpush.xpose.msk.msra.mxu3 %vm489_vm1, %v4661_v17 }
0x1a84   :  { %5644 = vmatpush.xpose.msk.msra.mxu3 %vm489_vm1, %v4658_v3 }
0x1a85   :  { %v4663_v46 = vpop.f32.mrf.mxu2 }
0x1a86   :  { %v4664_v40 = vadd.f32 %v4663_v46, %v4626_v61  ;;  %v5584_v46 = vld [vmem:[%s9581_s13 + $0x70] sm:$0xff] }
0x1a87   :  { %5645 = vmatmul.msk.f32.vlgmr.msra.gmra.mxu3 %vm489_vm1, %v4747_v2  ;;  %4954 = vmatpush.msrb.mxu1 %v5584_v46  ;;  %v5590_v46 = vld [vmem:[%s9582_s14 + $0xa0] sm:$0xff] }
0x1a89   :  { %4955 = vmatpush.msrb.mxu1 %v5583_v7  ;;  %v5588_v7 = vld [vmem:[%s9582_s14 + $0x90] sm:$0xff] }
0x1a8b   :  { %4956 = vmatpush.msrb.mxu1 %v5582_v27  ;;  %v5589_v27 = vld [vmem:[%s9582_s14 + $0x98] sm:$0xff] }
0x1a8d   :  { %v4666_v24 = vpop.f32.mrf.mxu2  ;;  %4957 = vmatpush.msrb.mxu1 %v5581_v44 }
0x1a8e   :  { %v4667_v59 = vadd.f32 %v4666_v24, %v4626_v61 }
0x1a90   :  { %v5775_v58 = vpack.i.bf16 %v4664_v40, %v4667_v59  ;;  %5647 = vmatpush.xpose.msk.msrb.mxu3 %vm489_vm1, %v4667_v59 }
0x1a94   :  { %5648 = vmatpush.xpose.msk.msrb.mxu3 %vm489_vm1, %v4664_v40 }
0x1a97   :  { %5649 = vmatmul.msk.f32.vlgmr.msrb.gmra.mxu3 %vm489_vm1, %v4846_v39 }
0x1ad0   :  { %v4780_v32 = vpop.permute.xlu2 %4779 }
0x1ad1   :  { %v4782_v31 = vmul.f32 %v4780_v32, %v4747_v2  ;;  %v4899_v32 = vperm.slane %v4734_v57, 1  ;;  %v5597_v57 = vld [vmem:[%s9582_s14 + $0xd8] sm:$0xff] }
0x1ad3   :  { %v4783_v23 = vsel %vm4074_vm14, %v4782_v31, 0.0 }
0x1ad4   :  { %4784 = vadd.xlane.f32.xlu0 %v4783_v23  ;;  %v5578_v23 = vld [vmem:[%s9581_s13 + $0x40] sm:$0xff] }
0x1ae8   :  { %v4879_v30 = vpop.permute.xlu1 %4878 }
0x1ae9   :  { %v4881_v35 = vmul.f32 %v4879_v30, %v4846_v39  ;;  %v5579_v39 = vld [vmem:[%s9581_s13 + $0x48] sm:$0xff] }
0x1aeb   :  { %v4882_v20 = vsel %vm4074_vm14, %v4881_v35, 0.0 }
0x1aec   :  { %4883 = vadd.xlane.f32.xlu1 %v4882_v20 }
0x1b05   :  { %5776 = vrot.lane.b32.xlu1 %v5775_v58, %s6094_s22  ;;  %v5580_v58 = vld [vmem:[%s9581_s13 + $0x50] sm:$0xff] }
0x1b06   :  { %4958 = vmatpush.msrb.mxu1 %v5580_v58 }
0x1b08   :  { %4959 = vmatpush.msrb.mxu1 %v5579_v39 }
0x1b0a   :  { %v4774_v62 = vpop.f32.mrf.mxu3  ;;  %4960 = vmatpush.msrb.mxu1 %v5578_v23  ;;  %v4992_v23 = vperm.slane %v9255_v13, 6 }
0x1b0b   :  { %v4786_v1 = vsel %vm4078_vm0, %v4774_v62, -inf }
0x1b0c   :  { %4787 = vmax.xlane.f32.xlu2 %v4786_v1 }
0x1b1a   :  { %v4873_v14 = vpop.f32.mrf.mxu3 }
0x1b1b   :  { %v4885_v60 = vsel %vm4078_vm0, %v4873_v14, -inf }
0x1b1c   :  { %4886 = vmax.xlane.f32.xlu0 %v4885_v60 }
0x1b24   :  { %5771 = vrot.lane.b32.xlu2 %v5770_v41, %s6094_s22 }
0x1b47   :  { %v4785_v33 = vpop.xlane.xlu0 %4784 }
0x1b5f   :  { %v4884_v45 = vpop.xlane.xlu1 %4883 }
0x1b77   :  { %v5777_v22 = vpop.permute.xlu1 %5776 }
0x1b78   :  { %v5778_v38 = vunpack.i.l.bf16 %v5777_v22  ;;  %v5779_v54 = vunpack.i.h.bf16 %v5777_v22 }
0x1b7f   :  { %v4788_v55 = vpop.xlane.xlu2 %4787 }
0x1b80   :  { %v4789_v10 = vmax.f32 %v4788_v55, %v4785_v33 }
0x1b82   :  { %v4790_v50 = vsub.f32 %v4774_v62, %v4789_v10  ;;  %v4793_v56 = vsub.f32 %v4785_v33, %v4789_v10 }
0x1b84   :  { %v4791_v52 = vmul.f32 1.442695, %v4790_v50  ;;  %v4794_v48 = vmul.f32 1.442695, %v4793_v56 }
0x1b86   :  { %6004 = vpow2.f32 %v4791_v52 }
0x1b87   :  { %v5772_v16 = vpop.permute.xlu2 %5771 }
0x1b88   :  { %v5773_v8 = vunpack.i.l.bf16 %v5772_v16  ;;  %v5774_v9 = vunpack.i.h.bf16 %v5772_v16 }
0x1b8a   :  { %4825 = vmatpush.msra.mxu0 %v5773_v8 }
0x1b8c   :  { %v6005_v49 = vpop.eup %6004  ;;  %4826 = vmatpush.msra.mxu0 %v5774_v9 }
0x1b8d   :  { %5646 = vmatmul.msk.f32.vlgmr.msra.gmra.mxu0 %vm819_vm15, %v6005_v49  ;;  %v4796_v28 = vsel %vm4078_vm0, %v6005_v49, 0.0 }
0x1b8e   :  { %4924 = vmatpush.msrb.mxu0 %v5778_v38  ;;  %4797 = vadd.xlane.f32.xlu0 %v4796_v28  ;;  %v4941_v38 = vperm.slane %v9255_v13, 3 }
0x1b8f   :  { %v4887_v12 = vpop.xlane.xlu0 %4886 }
0x1b90   :  { %v4888_v18 = vmax.f32 %v4887_v12, %v4884_v45  ;;  %4925 = vmatpush.msrb.mxu0 %v5779_v54 }
0x1b92   :  { %v4889_v15 = vsub.f32 %v4873_v14, %v4888_v18  ;;  %v4892_v36 = vsub.f32 %v4884_v45, %v4888_v18 }
0x1b94   :  { %v4890_v25 = vmul.f32 1.442695, %v4889_v15  ;;  %v4893_v3 = vmul.f32 1.442695, %v4892_v36 }
0x1b96   :  { %6006 = vpow2.f32 %v4890_v25 }
0x1b97   :  { %6008 = vpow2.f32 %v4794_v48 }
0x1b9c   :  { %v6007_v21 = vpop.eup %6006 }
0x1b9d   :  { %5650 = vmatmul.msk.f32.vlgmr.msrb.gmra.mxu0 %vm819_vm15, %v6007_v21  ;;  %v4895_v29 = vsel %vm4078_vm0, %v6007_v21, 0.0  ;;  %v6009_v19 = vpop.eup %6008 }
0x1b9e   :  { %4896 = vadd.xlane.f32.xlu0 %v4895_v29  ;;  %v4801_v17 = vmul.f32 %v6009_v19, %v4800_v51  ;;  %v5594_v51 = vld [vmem:[%s9582_s14 + $0xc0] sm:$0xff] }
0x1c01   :  { %v4798_v6 = vpop.xlane.xlu0 %4797 }
0x1c02   :  { %v4799_v61 = vadd.f32 %v6009_v19, %v4798_v6  ;;  %v5598_v19 = vld [vmem:[%s9582_s14 + $0xe0] sm:$0xff]  ;;  %v5599_v6 = vld [vmem:[%s9582_s14 + $0xe8] sm:$0xff] }
0x1c03   :  { %5008 = vmatpush.msra.mxu2 %v5598_v19 }
0x1c04   :  { %6010 = vrcp.f32 %v4799_v61  ;;  %v5596_v61 = vld [vmem:[%s9582_s14 + $0xd0] sm:$0xff] }
0x1c05   :  { %6012 = vpow2.f32 %v4893_v3  ;;  %v5595_v3 = vld [vmem:[%s9582_s14 + $0xc8] sm:$0xff]  ;;  %5009 = vmatpush.msra.mxu2 %v5596_v61 }
0x1c07   :  { %5010 = vmatpush.msra.mxu2 %v5594_v51  ;;  %v5628_v51 = vld [vmem:[%s9583_s15 + $0x1d0] sm:$0xff] }
0x1c0a   :  { %v4828_v47 = vpop.f32.mrf.mxu0  ;;  %v6011_v11 = vpop.eup %6010 }
0x1c0b   :  { %v4829_v41 = vadd.f32 %v4828_v47, %v4801_v17  ;;  %v6013_v34 = vpop.eup %6012 }
0x1c0c   :  { %v4900_v30 = vmul.f32 %v6013_v34, %v4899_v32  ;;  %v4990_v32 = vperm.slane %v9255_v13, 5 }
0x1c0d   :  { %v4832_v2 = vmul.f32 %v6011_v11, %v4829_v41  ;;  %v5592_v41 = vld [vmem:[%s9582_s14 + $0xb0] sm:$0xff]  ;;  %v5593_v11 = vld [vmem:[%s9582_s14 + $0xb8] sm:$0xff] }
0x1c0e   :  { %5011 = vmatpush.msra.mxu2 %v5592_v41  ;;  %v5611_v41 = vld [vmem:[%s9583_s15 + $0x148] sm:$0xff] }
0x1c0f   :  { %v4833_v24 = vmul.f32 %v9295_v0, %v4832_v2  ;;  %v5591_v2 = vld [vmem:[%s9582_s14 + $0xa8] sm:$0xff] }
0x1c10   :  { %5012 = vmatpush.msra.mxu2 %v5590_v46 }
0x1c11   :  { %v4897_v40 = vpop.xlane.xlu0 %4896  ;;  %v4834_v43 = vsel %vm4074_vm14, %v4833_v24, 0.0  ;;  %v5587_v24 = vld [vmem:[%s9582_s14 + $0x88] sm:$0xff] }
0x1c12   :  { %v4898_v59 = vadd.f32 %v6013_v34, %v4897_v40  ;;  %v4835_v31 = vrot.slane %v4834_v43, 4  ;;  %v5586_v34 = vld [vmem:[%s9582_s14 + $0x80] sm:$0xff]  ;;  %5013 = vmatpush.msra.mxu2 %v5588_v7 }
0x1c13   :  { %v5610_v7 = vld [vmem:[%s9583_s15 + $0x140] sm:$0xff] }
0x1c14   :  { %6014 = vrcp.f32 %v4898_v59  ;;  %v4836_v1 = vadd.f32 %v4835_v31, %v4834_v43  ;;  %5014 = vmatpush.msra.mxu2 %v5586_v34 }
0x1c16   :  { %v4837_v33 = vrot.slane %v4836_v1, 2 }
0x1c18   :  { %v4838_v45 = vadd.f32 %v4837_v33, %v4836_v1  ;;  %v4995_v1 = vperm.slane %v9260_v5, 7 }
0x1c1a   :  { %v4927_v35 = vpop.f32.mrf.mxu0  ;;  %v6015_v62 = vpop.eup %6014  ;;  %v4839_v52 = vrot.slane %v4838_v45, 1 }
0x1c1b   :  { %v4928_v20 = vadd.f32 %v4927_v35, %v4900_v30 }
0x1c1c   :  { %v4840_v22 = vadd.f32 %v4839_v52, %v4838_v45  ;;  %v5616_v52 = vld [vmem:[%s9583_s15 + $0x170] sm:$0xff] }
0x1c1d   :  { %v4931_v14 = vmul.f32 %v6015_v62, %v4928_v20  ;;  %v4994_v62 = vperm.slane %v9255_v13, 7 }
0x1c1f   :  { %v4932_v60 = vmul.f32 %v9295_v0, %v4931_v14  ;;  %v4965_v0 = vperm.slane %v9255_v13, 4  ;;  %v5633_v13 = vld [vmem:[%s9583_s15 + $0x1f8] sm:$0xff] }
0x1c20   :  { %5148 = vmatpush.msra.mxu1 %v5633_v13 }
0x1c21   :  { %v4933_v55 = vsel %vm4074_vm14, %v4932_v60, 0.0 }
0x1c22   :  { %v4934_v10 = vrot.slane %v4933_v55, 4 }
0x1c24   :  { %v4935_v50 = vadd.f32 %v4934_v10, %v4933_v55 }
0x1c26   :  { %v4936_v56 = vrot.slane %v4935_v50, 2 }
0x1c28   :  { %v4937_v16 = vadd.f32 %v4936_v56, %v4935_v50  ;;  %v5617_v50 = vld [vmem:[%s9583_s15 + $0x178] sm:$0xff] }
0x1c29   :  { %5128 = vmatpush.msra.mxu0 %v5617_v50 }
0x1c2a   :  { %v4938_v8 = vrot.slane %v4937_v16, 1 }
0x1c2b   :  { %5129 = vmatpush.msra.mxu0 %v5616_v52 }
0x1c2c   :  { %v4939_v9 = vadd.f32 %v4938_v8, %v4937_v16  ;;  %v5632_v16 = vld [vmem:[%s9583_s15 + $0x1f0] sm:$0xff] }
0x1c2d   :  { %5149 = vmatpush.msra.mxu1 %v5632_v16 }
0x1c2e   :  { %v4940_v49 = vsel %vm3667_vm7, %v4840_v22, %v4939_v9  ;;  %v5615_v9 = vld [vmem:[%s9583_s15 + $0x168] sm:$0xff] }
0x1c2f   :  { %5651 = vmatmul.msk.f32.vlgmr.msrb.gmra.mxu1 %vm489_vm1, %v4940_v49  ;;  %v5631_v49 = vld [vmem:[%s9583_s15 + $0x1e8] sm:$0xff]  ;;  %5130 = vmatpush.msra.mxu0 %v5615_v9 }
0x1c30   :  { %5150 = vmatpush.msra.mxu1 %v5631_v49  ;;  %v5604_v49 = vld [vmem:[%s9583_s15 + $0x110] sm:$0xff] }
0x1cac   :  { %v4962_v28 = vpop.f32.mrf.mxu1 }
0x1cad   :  { %v4963_v54 = vadd.f32 %v4962_v28, %v4941_v38 }
0x1caf   :  { %v4966_v12 = vmul.f32 %v4965_v0, %v4963_v54 }
0x1cb1   :  { %v9351_v18 = vadd.f32 %v4966_v12, %v9193_v42  ;;  %v5601_v42 = vld [vmem:[%s9582_s14 + $0xf8] sm:$0xff]  ;;  %v5614_v12 = vld [vmem:[%s9583_s15 + $0x160] sm:$0xff] }
0x1cb2   :  { %5027 = vmatpush.msra.mxu3 %v5601_v42  ;;  %5131 = vmatpush.msra.mxu0 %v5614_v12 }
0x1cb3   :  { %v4968_v15 = vsel %vm3957_vm8, %v9351_v18, 0.0 }
0x1cb4   :  { %4969 = vadd.xlane.f32.xlu0 %v4968_v15  ;;  %5028 = vmatpush.msra.mxu3 %v5599_v6  ;;  %v5630_v15 = vld [vmem:[%s9583_s15 + $0x1e0] sm:$0xff] }
0x1cb5   :  { %5151 = vmatpush.msra.mxu1 %v5630_v15  ;;  %v5602_v15 = vld [vmem:[%s9583_s15 + $0x100] sm:$0xff] }
0x1cb6   :  { %5029 = vmatpush.msra.mxu3 %v5597_v57  ;;  %v5612_v57 = vld [vmem:[%s9583_s15 + $0x150] sm:$0xff] }
0x1cb7   :  { %5152 = vmatpush.msra.mxu1 %v5629_v53 }
0x1cb8   :  { %5030 = vmatpush.msra.mxu3 %v5595_v3 }
0x1cb9   :  { %5153 = vmatpush.msra.mxu1 %v5628_v51 }
0x1cba   :  { %5031 = vmatpush.msra.mxu3 %v5593_v11  ;;  %v5627_v11 = vld [vmem:[%s9583_s15 + $0x1c8] sm:$0xff] }
0x1cbb   :  { %5154 = vmatpush.msra.mxu1 %v5627_v11 }
0x1cbc   :  { %5032 = vmatpush.msra.mxu3 %v5591_v2 }
0x1cbe   :  { %5033 = vmatpush.msra.mxu3 %v5589_v27  ;;  %v5626_v27 = vld [vmem:[%s9583_s15 + $0x1c0] sm:$0xff] }
0x1cbf   :  { %5155 = vmatpush.msra.mxu1 %v5626_v27 }
0x1cc0   :  { %5034 = vmatpush.msra.mxu3 %v5587_v24 }
0x1d27   :  { %v4970_v36 = vpop.xlane.xlu0 %4969 }
0x1d28   :  { %v4971_v25 = vmul.f32 %v4970_v36, %v6586_v63 }
0x1d2a   :  { %v4972_v21 = vsub.f32 %v9351_v18, %v4971_v25 }
0x1d2c   :  { %v4973_v29 = vmul.f32 %v4972_v21, %v4972_v21 }
0x1d2e   :  { %v4974_v48 = vsel %vm3957_vm8, %v4973_v29, 0.0 }
0x1d2f   :  { %4975 = vadd.xlane.f32.xlu2 %v4974_v48  ;;  %v5613_v48 = vld [vmem:[%s9583_s15 + $0x158] sm:$0xff] }
0x1d30   :  { %5132 = vmatpush.msra.mxu0 %v5613_v48 }
0x1d32   :  { %5133 = vmatpush.msra.mxu0 %v5612_v57 }
0x1d34   :  { %5134 = vmatpush.msra.mxu0 %v5611_v41 }
0x1d36   :  { %5135 = vmatpush.msra.mxu0 %v5610_v7 }
0x1da2   :  { %v4976_v17 = vpop.xlane.xlu2 %4975 }
0x1da3   :  { %v4977_v47 = vmul.f32 %v4976_v17, %v6586_v63 }
0x1da5   :  { %v4978_v26 = vadd.f32 1e-06, %v4977_v47 }
0x1da7   :  { %6016 = vrsqrt.f32 %v4978_v26  ;;  %vm4985_vm7 = vweird.f32 %v4978_v26 }
0x1dad   :  { %v6017_v40 = vpop.eup %6016 }
0x1dae   :  { %v4980_v59 = vmul.f32 %v6017_v40, %v4978_v26  ;;  %vm4986_vm15 = vweird.f32 %v6017_v40 }
0x1daf   :  { %vm4987_vm12 = vmor %vm4985_vm7, %vm4986_vm15 }
0x1db0   :  { %v4981_v44 = vmul.f32 %v6017_v40, %v4980_v59  ;;  %v5609_v59 = vld [vmem:[%s9583_s15 + $0x138] sm:$0xff] }
0x1db1   :  { %5136 = vmatpush.msra.mxu0 %v5609_v59 }
0x1db2   :  { %v4982_v58 = vmul.f32 0.5, %v4981_v44  ;;  %v5625_v44 = vld [vmem:[%s9583_s15 + $0x1b8] sm:$0xff] }
0x1db3   :  { %5156 = vmatpush.msra.mxu1 %v5625_v44 }
0x1db4   :  { %v4983_v43 = vsub.f32 1.5, %v4982_v58 }
0x1db6   :  { %v4984_v39 = vmul.f32 %v6017_v40, %v4983_v43 }
0x1db8   :  { %v4988_v31 = vsel %vm4987_vm12, %v6017_v40, %v4984_v39  ;;  %v5608_v39 = vld [vmem:[%s9583_s15 + $0x130] sm:$0xff] }
0x1db9   :  { %v4989_v30 = vmul.f32 %v4988_v31, %v4972_v21  ;;  %5137 = vmatpush.msra.mxu0 %v5608_v39 }
0x1dbb   :  { %v4991_v35 = vmul.f32 %v4990_v32, %v4989_v30  ;;  %v5624_v32 = vld [vmem:[%s9583_s15 + $0x1b0] sm:$0xff]  ;;  %v5623_v30 = vld [vmem:[%s9583_s15 + $0x1a8] sm:$0xff] }
0x1dbc   :  { %5157 = vmatpush.msra.mxu1 %v5624_v32 }
0x1dbd   :  { %v4993_v20 = vadd.f32 %v4992_v23, %v4991_v35  ;;  %v5607_v23 = vld [vmem:[%s9583_s15 + $0x128] sm:$0xff] }
0x1dbe   :  { %5138 = vmatpush.msra.mxu0 %v5607_v23  ;;  %5158 = vmatpush.msra.mxu1 %v5623_v30 }
0x1dbf   :  { %5652 = vmatmul.msk.f32.vlgmr.msra.gmra.mxu2 %vm489_vm1, %v4993_v20  ;;  %5653 = vmatmul.msk.f32.vlgmr.msra.gmra.mxu3 %vm489_vm1, %v4993_v20 }
0x1e42   :  { %v5016_v14 = vpop.f32.mrf.mxu2  ;;  %v5036_v60 = vpop.f32.mrf.mxu3 }
0x1e43   :  { %v9413_v33 = vadd.f32 %v5016_v14, %v4994_v62  ;;  %v9415_v55 = vadd.f32 %v5036_v60, %v4995_v1  ;;  %v5606_v1 = vld [vmem:[%s9583_s15 + $0x120] sm:$0xff] }
0x1e44   :  { %v5622_v14 = vld [vmem:[%s9583_s15 + $0x1a0] sm:$0xff]  ;;  %5139 = vmatpush.msra.mxu0 %v5606_v1 }
0x1e45   :  { %v9418_v10 = vmul.f32 0.70710677, %v9413_v33  ;;  %v9421_v45 = vmul.f32 0.70710677, %v9415_v55  ;;  %5159 = vmatpush.msra.mxu1 %v5622_v14  ;;  %v5039_v32 = vmul.f32 0.5, %v9413_v33  ;;  %v5040_v23 = vmul.f32 0.5, %v9415_v55 }
0x1e47   :  { %v5043_v5 = vmul.f32 %v9418_v10, %v9418_v10  ;;  %v5083_v56 = vmul.f32 %v9421_v45, %v9421_v45 }
0x1e49   :  { %v9439_v8 = vmin.f32 %v5043_v5, 16.0  ;;  %v9441_v22 = vmin.f32 %v5083_v56, 16.0  ;;  %v5605_v5 = vld [vmem:[%s9583_s15 + $0x118] sm:$0xff] }
0x1e4a   :  { %v5621_v56 = vld [vmem:[%s9583_s15 + $0x198] sm:$0xff]  ;;  %5140 = vmatpush.msra.mxu0 %v5605_v5 }
0x1e4b   :  { %v5045_v38 = vmul.f32 2.1237322e-06, %v9439_v8  ;;  %v5056_v0 = vmul.f32 3.8918573e-05, %v9439_v8  ;;  %v5085_v28 = vmul.f32 2.1237322e-06, %v9441_v22  ;;  %5160 = vmatpush.msra.mxu1 %v5621_v56 }
0x1e4c   :  { %v5096_v54 = vmul.f32 3.8918573e-05, %v9441_v22  ;;  %5141 = vmatpush.msra.mxu0 %v5604_v49 }
0x1e4d   :  { %v5046_v36 = vadd.f32 0.00028619796, %v5045_v38  ;;  %v5057_v25 = vadd.f32 0.001143296, %v5056_v0  ;;  %v5086_v21 = vadd.f32 0.00028619796, %v5085_v28 }
0x1e4e   :  { %v5097_v29 = vadd.f32 0.001143296, %v5096_v54  ;;  %v5620_v38 = vld [vmem:[%s9583_s15 + $0x190] sm:$0xff]  ;;  %v5603_v28 = vld [vmem:[%s9583_s15 + $0x108] sm:$0xff] }
0x1e4f   :  { %v5047_v42 = vmul.f32 %v5046_v36, %v9439_v8  ;;  %v5058_v19 = vmul.f32 %v5057_v25, %v9439_v8  ;;  %v5087_v6 = vmul.f32 %v5086_v21, %v9441_v22  ;;  %v5619_v54 = vld [vmem:[%s9583_s15 + $0x188] sm:$0xff]  ;;  %5161 = vmatpush.msra.mxu1 %v5620_v38  ;;  %v5618_v36 = vld [vmem:[%s9583_s15 + $0x180] sm:$0xff]  ;;  %5142 = vmatpush.msra.mxu0 %v5603_v28 }
0x1e50   :  { %v5098_v61 = vmul.f32 %v5097_v29, %v9441_v22 }
0x1e51   :  { %v5048_v3 = vadd.f32 0.0036580483, %v5047_v42  ;;  %v5059_v17 = vadd.f32 0.014752088, %v5058_v19  ;;  %v5088_v46 = vadd.f32 0.0036580483, %v5087_v6  ;;  %5162 = vmatpush.msra.mxu1 %v5619_v54  ;;  %5143 = vmatpush.msra.mxu0 %v5602_v15 }
0x1e52   :  { %v5099_v47 = vadd.f32 0.014752088, %v5098_v61 }
0x1e53   :  { %v5060_v26 = vmul.f32 %v5059_v17, %v9439_v8  ;;  %v5049_v34 = vmul.f32 %v5048_v3, %v9439_v8  ;;  %v5089_v43 = vmul.f32 %v5088_v46, %v9441_v22  ;;  %5163 = vmatpush.msra.mxu1 %v5618_v36 }
0x1e54   :  { %v5100_v2 = vmul.f32 %v5099_v47, %v9441_v22 }
0x1e55   :  { %v5061_v24 = vadd.f32 0.112945676, %v5060_v26  ;;  %v5050_v35 = vadd.f32 0.05243302, %v5049_v34  ;;  %v5090_v50 = vadd.f32 0.05243302, %v5089_v43 }
0x1e56   :  { %v5101_v40 = vadd.f32 0.112945676, %v5100_v2 }
0x1e57   :  { %v5062_v58 = vmul.f32 %v5061_v24, %v9439_v8  ;;  %v5051_v52 = vmul.f32 %v5050_v35, %v9439_v8  ;;  %v5091_v0 = vmul.f32 %v5090_v50, %v9441_v22 }
0x1e58   :  { %v5102_v31 = vmul.f32 %v5101_v40, %v9441_v22 }
0x1e59   :  { %v5063_v20 = vadd.f32 0.4994258, %v5062_v58  ;;  %v5052_v12 = vadd.f32 0.18741608, %v5051_v52  ;;  %v5092_v25 = vadd.f32 0.18741608, %v5091_v0 }
0x1e5a   :  { %v5103_v62 = vadd.f32 0.4994258, %v5102_v31 }
0x1e5b   :  { %v5064_v60 = vmul.f32 %v5063_v20, %v9439_v8  ;;  %v5053_v29 = vmul.f32 %v5052_v12, %v9439_v8  ;;  %v5093_v42 = vmul.f32 %v5092_v25, %v9441_v22 }
0x1e5c   :  { %v5104_v13 = vmul.f32 %v5103_v62, %v9441_v22 }
0x1e5d   :  { %v5065_v16 = vadd.f32 1.0, %v5064_v60  ;;  %v5054_v61 = vadd.f32 1.1283791, %v5053_v29  ;;  %v5094_v41 = vadd.f32 1.1283791, %v5093_v42 }
0x1e5e   :  { %v5105_v9 = vadd.f32 1.0, %v5104_v13 }
0x1e5f   :  { %6018 = vrcp.f32 %v5065_v16  ;;  %v5077_v57 = vand.u32 2147483648, %v5065_v16  ;;  %v5075_v17 = vand.u32 2147483647, %v5065_v16  ;;  %vm5071_vm14 = vweird.f32 %v5065_v16 }
0x1e60   :  { %6020 = vrcp.f32 %v5105_v9  ;;  %v5117_v47 = vand.u32 2147483648, %v5105_v9  ;;  %v5115_v26 = vand.u32 2147483647, %v5105_v9  ;;  %vm5111_vm10 = vweird.f32 %v5105_v9 }
0x1e61   :  { %v5078_v46 = vor.u32 1.1754944e-38, %v5077_v57  ;;  %v5055_v22 = vmul.f32 %v5054_v61, %v9418_v10  ;;  %vm5076_vm11 = vcmp.eq.f32.partialorder %v5075_v17, 8.507059e+37  ;;  %v5095_v24 = vmul.f32 %v5094_v41, %v9421_v45  ;;  %v5636_v45 = vld [vmem:[%s9584_s16 + $0x30] sm:$0x3] }
0x1e62   :  { %v5118_v27 = vor.u32 1.1754944e-38, %v5117_v47  ;;  %vm5116_vm3 = vcmp.eq.f32.partialorder %v5115_v26, 8.507059e+37  ;;  %v5127_v20 = vperm.slane %v5636_v45, 0  ;;  %v5168_v14 = vperm.slane %v5636_v45, 1 }
0x1e65   :  { %v6019_v21 = vpop.eup %6018 }
0x1e66   :  { %v6021_v48 = vpop.eup %6020  ;;  %v5067_v53 = vmul.f32 %v6019_v21, %v5065_v16  ;;  %vm5072_vm1 = vweird.f32 %v6019_v21 }
0x1e67   :  { %v5107_v19 = vmul.f32 %v6021_v48, %v5105_v9  ;;  %vm5112_vm13 = vweird.f32 %v6021_v48  ;;  %vm5073_vm0 = vmor %vm5071_vm14, %vm5072_vm1 }
0x1e68   :  { %v5068_v6 = vsub.f32 1.0, %v5067_v53  ;;  %vm5113_vm2 = vmor %vm5111_vm10, %vm5112_vm13 }
0x1e69   :  { %v5108_v51 = vsub.f32 1.0, %v5107_v19 }
0x1e6a   :  { %v5069_v3 = vmul.f32 %v6019_v21, %v5068_v6 }
0x1e6b   :  { %v5109_v11 = vmul.f32 %v6021_v48, %v5108_v51 }
0x1e6c   :  { %v5070_v8 = vadd.f32 %v6019_v21, %v5069_v3 }
0x1e6d   :  { %v5110_v2 = vadd.f32 %v6021_v48, %v5109_v11 }
0x1e6e   :  { %v5074_v7 = vsel %vm5073_vm0, %v6019_v21, %v5070_v8 }
0x1e6f   :  { %v5079_v34 = vsel %vm5076_vm11, %v5078_v46, %v5074_v7  ;;  %v5114_v40 = vsel %vm5113_vm2, %v6021_v48, %v5110_v2 }
0x1e70   :  { %v5080_v59 = vmul.f32 %v5079_v34, %v5055_v22  ;;  %v5119_v44 = vsel %vm5116_vm3, %v5118_v27, %v5114_v40 }
0x1e71   :  { %v5120_v58 = vmul.f32 %v5119_v44, %v5095_v24 }
0x1e72   :  { %v5654_v43 = vclamps-f32 %v5080_v59, 1.0 }
0x1e73   :  { %v5655_v39 = vclamps-f32 %v5120_v58, 1.0 }
0x1e74   :  { %v5123_v31 = vadd.f32 1.0, %v5654_v43 }
0x1e75   :  { %v5124_v10 = vadd.f32 1.0, %v5655_v39 }
0x1e76   :  { %v5125_v30 = vmul.f32 %v5123_v31, %v5039_v32 }
0x1e77   :  { %v5126_v35 = vmul.f32 %v5124_v10, %v5040_v23 }
0x1e78   :  { %5144 = vmatmul.f32.vlgmr.msra.gmra.mxu0 %v5125_v30 }
0x1e79   :  { %5164 = vmatmul.f32.vlgmr.msra.gmra.mxu1 %v5126_v35 }
0x1ef5   :  { %v5145_v62 = vpop.f32.mrf.mxu0 }
0x1ef6   :  { %v5146_v1 = vadd.f32 %v5145_v62, %v5127_v20  ;;  %v5165_v60 = vpop.f32.mrf.mxu1 }
0x1ef8   :  { %v5166_v50 = vadd.f32 %v5165_v60, %v5146_v1 }
0x1efa   :  { %v5169_v13 = vmul.f32 %v5168_v14, %v5166_v50 }
0x1efc   :  { %v5170_v33 = vadd.f32 %v5169_v13, %v9351_v18 }
0x1efe   :  { %v5185_v55 = vsel %vm3957_vm8, %v5170_v33, 0.0 }
0x1eff   :  { %5186 = vadd.xlane.f32.xlu0 %v5185_v55 }
0x1f72   :  { %v5187_v5 = vpop.xlane.xlu0 %5186 }
0x1f73   :  { %v5188_v56 = vmul.f32 %v5187_v5, %v6586_v63 }
0x1f75   :  { %v5189_v52 = vsub.f32 %v5170_v33, %v5188_v56 }
0x1f77   :  { %v5190_v16 = vmul.f32 %v5189_v52, %v5189_v52 }
0x1f79   :  { %v5191_v9 = vsel %vm3957_vm8, %v5190_v16, 0.0 }
0x1f7a   :  { %5192 = vadd.xlane.f32.xlu1 %v5191_v9 }
0x1fed   :  { %v5193_v18 = vpop.xlane.xlu1 %5192 }
0x1fee   :  { %v5194_v49 = vmul.f32 %v5193_v18, %v6586_v63 }
0x1ff0   :  { %v5195_v38 = vadd.f32 1e-06, %v5194_v49 }
0x1ff2   :  { %6022 = vrsqrt.f32 %v5195_v38  ;;  %vm5202_vm5 = vweird.f32 %v5195_v38 }
0x1ff8   :  { %v6023_v0 = vpop.eup %6022 }
0x1ff9   :  { %v5197_v28 = vmul.f32 %v6023_v0, %v5195_v38  ;;  %vm5203_vm4 = vweird.f32 %v6023_v0 }
0x1ffa   :  { %vm5204_vm6 = vmor %vm5202_vm5, %vm5203_vm4 }
0x1ffb   :  { %v5198_v54 = vmul.f32 %v6023_v0, %v5197_v28 }
0x1ffd   :  { %v5199_v12 = vmul.f32 0.5, %v5198_v54 }
0x1fff   :  { %v5200_v15 = vsub.f32 1.5, %v5199_v12 }
0x2001   :  { %v5201_v36 = vmul.f32 %v6023_v0, %v5200_v15 }
0x2003   :  { %v5205_v25 = vsel %vm5204_vm6, %v6023_v0, %v5201_v36 }
0x2004   :  { %v5206_v21 = vmul.f32 %v5205_v25, %v5189_v52 }
0x2006   :  { %v5207_v63 = vmul.f32 %v5206_v21, %v8820_v37 }
0x2008   :  { %v5208_v29 = vadd.f32 %v5207_v63, %v8824_v4 }
0x200a   :  { %5209 = vst.msk [vmem:[#allocation4] sm:$0x3] %vm3957_vm8, %v5208_v29 }
0x200b   :  { %5233 = dma.vmem_to_hbm [thread:$0]  %s5229_s29, 32, %s5231_s1, [#allocation5]  }
0x200c   :  { %6089 = dma.done.wait [#allocation3], 512  }
0x200d   :  { %6090 = vsyncadd [#allocation3], 4294966784 }
0x200e   :  { %6091 = dma.done.wait [#allocation5], 32  }
0x200f   :  { %6092 = vsyncadd [#allocation5], 4294967264 }
0x2010   :  { %5242 = vsyncpa [#allocation3], 1 }
0x2011   :  { %5243 = vsyncpa [#allocation5], 1 }

</bundles_post_ra>
